<compile_context>
chip_gen: v7x
topology: tpu7x:2x2x1
jax: 0.10.0
libtpu: 0.0.40
codegen_flags: <defaults>
</compile_context>

<pallas_src>
import numpy as np

import jax
import jax.numpy as jnp
from jax.experimental import pallas as pl
from jax.experimental.pallas import tpu as pltpu


def _round_up(x, m):
    return (x + m - 1) // m * m


# -----------------------------------------------------------------------------
# Fused LeNet kernel: one grid step == BT images.
# -----------------------------------------------------------------------------
def _lenet_kernel(x_ref, m1_ref, b1_ref, n2_ref, b2_ref,
                  w1_ref, c1_ref, w2_ref, c2_ref, w3_ref, c3_ref,
                  o_ref, p1_scr, p2_scr):
    f32 = jnp.float32
    bf16 = jnp.bfloat16

    # ---- conv1(1->16, k=5) + ReLU + 2x2 maxpool, one pooled row at a time ----
    # x_ref[oh]  : (BT, 140) = concat_dh X[n, oh+dh, :]   (pre-assembled K=140)
    # m1_ref     : (140, 512) banded weights, col = b*256 + pw*16 + co (ow=2pw+b)
    # pooled row ph -> (BT, 256) [n, pw*16+co], stored at lane offset ph*256
    for ph in range(12):
        ca = jnp.dot(x_ref[2 * ph], m1_ref[...], preferred_element_type=f32)
        cb = jnp.dot(x_ref[2 * ph + 1], m1_ref[...], preferred_element_type=f32)
        c = jnp.maximum(ca, cb)                      # max over pool row offset
        c = jnp.maximum(c[:, :256], c[:, 256:])      # max over pool col offset
        p1_scr[:, ph * 256:(ph + 1) * 256] = (
            jnp.maximum(c + b1_ref[...], 0.0).astype(bf16))

    # ---- conv2(16->32, k=5) + ReLU + 2x2 maxpool ----
    # LHS for conv2 output row oh2 = lanes [oh2*256, oh2*256+1280) of p1 scratch
    # n2_ref : (1280, 256) banded weights, col = bb*128 + pw2*32 + co (ow2=2pw2+bb)
    for ph2 in range(4):
        s0 = (2 * ph2) * 256
        s1 = (2 * ph2 + 1) * 256
        e0 = jnp.dot(p1_scr[:, s0:s0 + 1280], n2_ref[...],
                     preferred_element_type=f32)
        e1 = jnp.dot(p1_scr[:, s1:s1 + 1280], n2_ref[...],
                     preferred_element_type=f32)
        f = jnp.maximum(e0, e1)                      # max over pool row offset
        f = jnp.maximum(f[:, :128], f[:, 128:])      # max over pool col offset
        p2_scr[:, ph2 * 128:(ph2 + 1) * 128] = (
            jnp.maximum(f + b2_ref[...], 0.0).astype(bf16))

    # ---- fully connected stack: three full-tile matmuls ----
    h = jnp.dot(p2_scr[...], w1_ref[...], preferred_element_type=f32) + c1_ref[...]
    h = jnp.maximum(h, 0.0).astype(bf16)
    h = jnp.dot(h, w2_ref[...], preferred_element_type=f32) + c2_ref[...]
    h = jnp.maximum(h, 0.0).astype(bf16)
    o_ref[...] = jnp.dot(h, w3_ref[...], preferred_element_type=f32) + c3_ref[...]


# -----------------------------------------------------------------------------
# One-time host-side parameter packing (banded conv matrices, FC perm/padding)
# -----------------------------------------------------------------------------
def prepare_params(params):
    w1 = np.asarray(params["conv1_w"], np.float32)    # (16, 1, 5, 5)  (Cout,Cin,KH,KW)
    b1 = np.asarray(params["conv1_b"], np.float32)
    w2 = np.asarray(params["conv2_w"], np.float32)    # (32, 16, 5, 5)
    b2 = np.asarray(params["conv2_b"], np.float32)

    # conv1 banded matrix, kernel-row blocks stacked along K:
    #   m1[dh*28 + j, b*256 + pw*16 + co] = w1[co, 0, dh, j - (2*pw + b)]
    m1 = np.zeros((5, 28, 2, 16, 16), np.float32)     # [dh, j, b, pw, co]
    for dh in range(5):
        for dw in range(5):
            for b in range(2):
                for pw in range(12):
                    m1[dh, 2 * pw + b + dw, b, pw, :] = w1[:, 0, dh, dw]
    m1 = m1.reshape(140, 512)
    b1t = np.zeros((16, 16), np.float32)              # [pw, co]; pw >= 12 stays 0
    b1t[:12, :] = b1[None, :]
    b1t = b1t.reshape(1, 256)

    # conv2 banded matrix, kernel-row blocks stacked along K:
    #   n2[dh*256 + pw*16 + ci, bb*128 + pw2*32 + co] = w2[co, ci, dh, pw - (2*pw2 + bb)]
    n2 = np.zeros((5, 16, 16, 2, 4, 32), np.float32)  # [dh, pw, ci, bb, pw2, co]
    for dh in range(5):
        for dw in range(5):
            for bb in range(2):
                for pw2 in range(4):
                    n2[dh, 2 * pw2 + bb + dw, :, bb, pw2, :] = w2[:, :, dh, dw].T
    n2 = n2.reshape(1280, 256)
    b2t = np.tile(b2[None, :], (4, 1)).reshape(1, 128)

    # fc1: permute rows from the PyTorch (C,H,W) flatten order (c*16 + h*4 + w)
    # to the kernel's pooled layout (h*128 + w*32 + c); pad 120 -> 128 columns.
    f1 = np.asarray(params["fc1_w"], np.float32)      # (512, 120)
    w1p = f1.reshape(32, 4, 4, 120).transpose(1, 2, 0, 3).reshape(512, 120)
    w1p = np.pad(w1p, ((0, 0), (0, 8)))
    c1 = np.pad(np.asarray(params["fc1_b"], np.float32), (0, 8)).reshape(1, 128)

    w2p = np.zeros((128, 128), np.float32)
    w2p[:120, :84] = np.asarray(params["fc2_w"], np.float32)
    c2 = np.zeros((1, 128), np.float32)
    c2[0, :84] = np.asarray(params["fc2_b"], np.float32)

    w3p = np.zeros((128, 128), np.float32)
    w3p[:84, :10] = np.asarray(params["fc3_w"], np.float32)
    c3 = np.zeros((1, 128), np.float32)
    c3[0, :10] = np.asarray(params["fc3_b"], np.float32)

    mats = {"m1": m1, "n2": n2, "w1": w1p, "w2": w2p, "w3": w3p}       # bf16 (MXU)
    vecs = {"b1": b1t, "b2": b2t, "c1": c1, "c2": c2, "c3": c3}        # f32 biases
    prep = {k: jnp.asarray(v, jnp.bfloat16) for k, v in mats.items()}
    prep.update({k: jnp.asarray(v, jnp.float32) for k, v in vecs.items()})
    return prep


# -----------------------------------------------------------------------------
# Forward pass: one pallas_call, grid over batch tiles of BT images
# -----------------------------------------------------------------------------
@jax.jit
def lenet_forward(x_nchw, prep):
    """x_nchw: (B, 1, 28, 28) float32 -> logits (B, 10)."""
    B = x_nchw.shape[0]
    # Batch tile: M dimension of every matmul.  Capped at 128 so large batches
    # keep >= 2 grid steps (lets v7x's two TensorCores split the work).
    BT = min(128, _round_up(B, 16))
    B_pad = _round_up(B, BT)
    grid = (B_pad // BT,)

    x = x_nchw.reshape(B, 28, 28).astype(jnp.float32)
    if B_pad != B:
        x = jnp.pad(x, ((0, B_pad - B), (0, 0), (0, 0)))
    # Pre-assembled conv1 LHS (layout plumbing only, done in XLA):
    #   lhs[oh, n, dh*28 + j] = X[n, oh+dh, j]   -> one K=140 dot per conv row.
    lhs = jnp.stack([x[:, oh:oh + 5, :].reshape(B_pad, 140) for oh in range(24)],
                    axis=0).astype(jnp.bfloat16)

    flops_per_img = 2 * (24 * 140 * 512 + 8 * 1280 * 256 + 512 * 128 + 2 * 128 * 128)
    weight_bytes = (2 * (140 * 512 + 1280 * 256 + 512 * 128 + 2 * 128 * 128)
                    + 4 * (256 + 3 * 128))

    out = pl.pallas_call(
        _lenet_kernel,
        out_shape=jax.ShapeDtypeStruct((B_pad, 128), jnp.float32),
        grid=grid,
        in_specs=[
            pl.BlockSpec((24, BT, 140), lambda g: (0, g, 0)),   # conv1 LHS windows
            pl.BlockSpec((140, 512), lambda g: (0, 0)),         # conv1 banded W (bf16)
            pl.BlockSpec((1, 256), lambda g: (0, 0)),           # conv1 bias tile
            pl.BlockSpec((1280, 256), lambda g: (0, 0)),        # conv2 banded W (bf16)
            pl.BlockSpec((1, 128), lambda g: (0, 0)),           # conv2 bias tile
            pl.BlockSpec((512, 128), lambda g: (0, 0)),         # fc1 W (permuted, bf16)
            pl.BlockSpec((1, 128), lambda g: (0, 0)),           # fc1 b
            pl.BlockSpec((128, 128), lambda g: (0, 0)),         # fc2 W (bf16)
            pl.BlockSpec((1, 128), lambda g: (0, 0)),           # fc2 b
            pl.BlockSpec((128, 128), lambda g: (0, 0)),         # fc3 W (bf16)
            pl.BlockSpec((1, 128), lambda g: (0, 0)),           # fc3 b
        ],
        out_specs=pl.BlockSpec((BT, 128), lambda g: (g, 0)),
        scratch_shapes=[
            pltpu.VMEM((BT, 12 * 256), jnp.bfloat16),   # pooled conv1 activations
            pltpu.VMEM((BT, 4 * 128), jnp.bfloat16),    # pooled conv2 activations
        ],
        compiler_params=pltpu.CompilerParams(dimension_semantics=("parallel",)),
        cost_estimate=pl.CostEstimate(
            flops=B_pad * flops_per_img,
            transcendentals=0,
            bytes_accessed=grid[0] * weight_bytes + B_pad * (24 * 140 * 2 + 128 * 4)),
    )(lhs, prep["m1"], prep["b1"], prep["n2"], prep["b2"],
      prep["w1"], prep["c1"], prep["w2"], prep["c2"], prep["w3"], prep["c3"])
    return out[:B, :10]


# -----------------------------------------------------------------------------
# Deterministic synthetic parameters (shapes from LeNet.__init__)
# -----------------------------------------------------------------------------
def init_params(key):
    ks = jax.random.split(key, 10)
    scale = 0.05
    p = {}
    p["conv1_w"] = scale * jax.random.normal(ks[0], (16, 1, 5, 5), jnp.float32)
    p["conv1_b"] = scale * jax.random.normal(ks[1], (16,), jnp.float32)
    p["conv2_w"] = scale * jax.random.normal(ks[2], (32, 16, 5, 5), jnp.float32)
    p["conv2_b"] = scale * jax.random.normal(ks[3], (32,), jnp.float32)
    p["fc1_w"] = scale * jax.random.normal(ks[4], (512, 120), jnp.float32)
    p["fc1_b"] = scale * jax.random.normal(ks[5], (120,), jnp.float32)
    p["fc2_w"] = scale * jax.random.normal(ks[6], (120, 84), jnp.float32)
    p["fc2_b"] = scale * jax.random.normal(ks[7], (84,), jnp.float32)
    p["fc3_w"] = scale * jax.random.normal(ks[8], (84, 10), jnp.float32)
    p["fc3_b"] = scale * jax.random.normal(ks[9], (10,), jnp.float32)
    return p


# -----------------------------------------------------------------------------
# Pure-JAX reference (same semantics as the PyTorch module)
# -----------------------------------------------------------------------------
def lenet_reference(x_nchw, params):
    x = jnp.transpose(x_nchw, (0, 2, 3, 1))
    B = x.shape[0]

    def conv(x, w_oihw, b):
        w_hwio = jnp.transpose(w_oihw, (2, 3, 1, 0))
        y = jax.lax.conv_general_dilated(
            x, w_hwio, (1, 1), "VALID",
            dimension_numbers=("NHWC", "HWIO", "NHWC"))
        return jnp.maximum(y + b, 0.0)

    def pool(x):
        B_, H, W, C = x.shape
        return x.reshape(B_, H // 2, 2, W // 2, 2, C).max(axis=(2, 4))

    h = pool(conv(x, params["conv1_w"], params["conv1_b"]))
    h = pool(conv(h, params["conv2_w"], params["conv2_b"]))
    flat = jnp.transpose(h, (0, 3, 1, 2)).reshape(B, 512)    # PyTorch (C,H,W) flatten
    h = jnp.maximum(flat @ params["fc1_w"] + params["fc1_b"], 0.0)
    h = jnp.maximum(h @ params["fc2_w"] + params["fc2_b"], 0.0)
    return h @ params["fc3_w"] + params["fc3_b"]


if __name__ == "__main__":
    key = jax.random.PRNGKey(0)
    k_x, k_p = jax.random.split(key)

    params = init_params(k_p)
    prep = prepare_params(params)          # one-time host-side weight packing

    # Small demo batch (single grid step).  Linear(512) after two conv5+pool2
    # stages implies 28x28 inputs.
    batch = 2
    x = jax.random.normal(k_x, (batch, 1, 28, 28), jnp.float32)
    out = jax.block_until_ready(lenet_forward(x, prep))
    assert out.shape == (batch, 10), out.shape
    ref = lenet_reference(x, params)
    assert jnp.allclose(out, ref, rtol=2e-2, atol=2e-2), \
        float(jnp.max(jnp.abs(out - ref)))

    # Larger batch exercising batch padding and a multi-step "parallel" grid.
    x2 = jax.random.normal(k_x, (160, 1, 28, 28), jnp.float32)
    out2 = jax.block_until_ready(lenet_forward(x2, prep))
    ref2 = lenet_reference(x2, params)
    assert out2.shape == (160, 10), out2.shape
    assert jnp.allclose(out2, ref2, rtol=2e-2, atol=2e-2), \
        float(jnp.max(jnp.abs(out2 - ref2)))

    print("KERNEL_OK")
</pallas_src>

<mosaic_0001>
module attributes {stable_mosaic.version = 11 : i64} {
  func.func @_lenet_kernel(%arg0: i32, %arg1: memref<24x16x140xbf16, #tpu.memory_space<vmem>>, %arg2: memref<140x512xbf16, #tpu.memory_space<vmem>>, %arg3: memref<1x256xf32, #tpu.memory_space<vmem>>, %arg4: memref<1280x256xbf16, #tpu.memory_space<vmem>>, %arg5: memref<1x128xf32, #tpu.memory_space<vmem>>, %arg6: memref<512x128xbf16, #tpu.memory_space<vmem>>, %arg7: memref<1x128xf32, #tpu.memory_space<vmem>>, %arg8: memref<128x128xbf16, #tpu.memory_space<vmem>>, %arg9: memref<1x128xf32, #tpu.memory_space<vmem>>, %arg10: memref<128x128xbf16, #tpu.memory_space<vmem>>, %arg11: memref<1x128xf32, #tpu.memory_space<vmem>>, %arg12: memref<16x128xf32, #tpu.memory_space<vmem>>, %arg13: memref<16x3072xbf16, #tpu.memory_space<vmem>>, %arg14: memref<16x512xbf16, #tpu.memory_space<vmem>>) attributes {dimension_semantics = [#tpu.dimension_semantics<parallel>], iteration_bounds = array<i64: 1>, scalar_prefetch = 0 : i64, scratch_operands = 2 : i64, tpu.core_type = #tpu.core_type<tc>, window_params = [{transform_indices = @transform_0, window_bounds = array<i64: 24, 16, 140>}, {pipeline_mode = #tpu.pipeline_mode<synchronous>, transform_indices = @transform_1, window_bounds = array<i64: 140, 512>}, {pipeline_mode = #tpu.pipeline_mode<synchronous>, transform_indices = @transform_2, window_bounds = array<i64: 1, 256>}, {pipeline_mode = #tpu.pipeline_mode<synchronous>, transform_indices = @transform_3, window_bounds = array<i64: 1280, 256>}, {pipeline_mode = #tpu.pipeline_mode<synchronous>, transform_indices = @transform_4, window_bounds = array<i64: 1, 128>}, {pipeline_mode = #tpu.pipeline_mode<synchronous>, transform_indices = @transform_5, window_bounds = array<i64: 512, 128>}, {pipeline_mode = #tpu.pipeline_mode<synchronous>, transform_indices = @transform_6, window_bounds = array<i64: 1, 128>}, {pipeline_mode = #tpu.pipeline_mode<synchronous>, transform_indices = @transform_7, window_bounds = array<i64: 128, 128>}, {pipeline_mode = #tpu.pipeline_mode<synchronous>, transform_indices = @transform_8, window_bounds = array<i64: 1, 128>}, {pipeline_mode = #tpu.pipeline_mode<synchronous>, transform_indices = @transform_9, window_bounds = array<i64: 128, 128>}, {pipeline_mode = #tpu.pipeline_mode<synchronous>, transform_indices = @transform_10, window_bounds = array<i64: 1, 128>}, {transform_indices = @transform_11, window_bounds = array<i64: 16, 128>}]} {
    %c0 = arith.constant 0 : index
    %c0_0 = arith.constant 0 : index
    %c0_1 = arith.constant 0 : index
    %0 = vector.load %arg1[%c0, %c0_0, %c0_1] : memref<24x16x140xbf16, #tpu.memory_space<vmem>>, vector<1x16x140xbf16>
    %1 = vector.shape_cast %0 : vector<1x16x140xbf16> to vector<16x140xbf16>
    %c0_2 = arith.constant 0 : index
    %c0_3 = arith.constant 0 : index
    %2 = vector.load %arg2[%c0_2, %c0_3] : memref<140x512xbf16, #tpu.memory_space<vmem>>, vector<140x512xbf16>
    %cst = arith.constant dense<0.000000e+00> : vector<16x512xf32>
    %3 = tpu.matmul %1, %2, %cst {dimension_numbers = #tpu.dot_dimension_numbers<[1], [0], [0], [1], [0, 0, 1, 1], [], []>} : vector<16x140xbf16>, vector<140x512xbf16>, vector<16x512xf32> -> vector<16x512xf32>
    %c1 = arith.constant 1 : index
    %c0_4 = arith.constant 0 : index
    %c0_5 = arith.constant 0 : index
    %4 = vector.load %arg1[%c1, %c0_4, %c0_5] : memref<24x16x140xbf16, #tpu.memory_space<vmem>>, vector<1x16x140xbf16>
    %5 = vector.shape_cast %4 : vector<1x16x140xbf16> to vector<16x140xbf16>
    %c0_6 = arith.constant 0 : index
    %c0_7 = arith.constant 0 : index
    %6 = vector.load %arg2[%c0_6, %c0_7] : memref<140x512xbf16, #tpu.memory_space<vmem>>, vector<140x512xbf16>
    %cst_8 = arith.constant dense<0.000000e+00> : vector<16x512xf32>
    %7 = tpu.matmul %5, %6, %cst_8 {dimension_numbers = #tpu.dot_dimension_numbers<[1], [0], [0], [1], [0, 0, 1, 1], [], []>} : vector<16x140xbf16>, vector<140x512xbf16>, vector<16x512xf32> -> vector<16x512xf32>
    %8 = arith.maximumf %3, %7 : vector<16x512xf32>
    %9 = vector.extract_strided_slice %8 {offsets = [0, 0], sizes = [16, 256], strides = [1, 1]} : vector<16x512xf32> to vector<16x256xf32>
    %10 = vector.extract_strided_slice %8 {offsets = [0, 256], sizes = [16, 256], strides = [1, 1]} : vector<16x512xf32> to vector<16x256xf32>
    %11 = arith.maximumf %9, %10 : vector<16x256xf32>
    %c0_9 = arith.constant 0 : index
    %c0_10 = arith.constant 0 : index
    %12 = vector.load %arg3[%c0_9, %c0_10] : memref<1x256xf32, #tpu.memory_space<vmem>>, vector<1x256xf32>
    %13 = vector.broadcast %12 : vector<1x256xf32> to vector<16x256xf32>
    %14 = arith.addf %11, %13 : vector<16x256xf32>
    %cst_11 = arith.constant 0.000000e+00 : f32
    %15 = vector.broadcast %cst_11 : f32 to vector<16x256xf32>
    %16 = arith.maximumf %14, %15 : vector<16x256xf32>
    %17 = arith.truncf %16 : vector<16x256xf32> to vector<16x256xbf16>
    %c0_12 = arith.constant 0 : index
    %c0_13 = arith.constant 0 : index
    %18 = vector.load %arg13[%c0_12, %c0_13] : memref<16x3072xbf16, #tpu.memory_space<vmem>>, vector<16x256xbf16>
    tpu.vector_store %arg13[%c0_12, %c0_13], %17 {strides = array<i32>} : memref<16x3072xbf16, #tpu.memory_space<vmem>>, vector<16x256xbf16>,
    %c2 = arith.constant 2 : index
    %c0_14 = arith.constant 0 : index
    %c0_15 = arith.constant 0 : index
    %19 = vector.load %arg1[%c2, %c0_14, %c0_15] : memref<24x16x140xbf16, #tpu.memory_space<vmem>>, vector<1x16x140xbf16>
    %20 = vector.shape_cast %19 : vector<1x16x140xbf16> to vector<16x140xbf16>
    %c0_16 = arith.constant 0 : index
    %c0_17 = arith.constant 0 : index
    %21 = vector.load %arg2[%c0_16, %c0_17] : memref<140x512xbf16, #tpu.memory_space<vmem>>, vector<140x512xbf16>
    %cst_18 = arith.constant dense<0.000000e+00> : vector<16x512xf32>
    %22 = tpu.matmul %20, %21, %cst_18 {dimension_numbers = #tpu.dot_dimension_numbers<[1], [0], [0], [1], [0, 0, 1, 1], [], []>} : vector<16x140xbf16>, vector<140x512xbf16>, vector<16x512xf32> -> vector<16x512xf32>
    %c3 = arith.constant 3 : index
    %c0_19 = arith.constant 0 : index
    %c0_20 = arith.constant 0 : index
    %23 = vector.load %arg1[%c3, %c0_19, %c0_20] : memref<24x16x140xbf16, #tpu.memory_space<vmem>>, vector<1x16x140xbf16>
    %24 = vector.shape_cast %23 : vector<1x16x140xbf16> to vector<16x140xbf16>
    %c0_21 = arith.constant 0 : index
    %c0_22 = arith.constant 0 : index
    %25 = vector.load %arg2[%c0_21, %c0_22] : memref<140x512xbf16, #tpu.memory_space<vmem>>, vector<140x512xbf16>
    %cst_23 = arith.constant dense<0.000000e+00> : vector<16x512xf32>
    %26 = tpu.matmul %24, %25, %cst_23 {dimension_numbers = #tpu.dot_dimension_numbers<[1], [0], [0], [1], [0, 0, 1, 1], [], []>} : vector<16x140xbf16>, vector<140x512xbf16>, vector<16x512xf32> -> vector<16x512xf32>
    %27 = arith.maximumf %22, %26 : vector<16x512xf32>
    %28 = vector.extract_strided_slice %27 {offsets = [0, 0], sizes = [16, 256], strides = [1, 1]} : vector<16x512xf32> to vector<16x256xf32>
    %29 = vector.extract_strided_slice %27 {offsets = [0, 256], sizes = [16, 256], strides = [1, 1]} : vector<16x512xf32> to vector<16x256xf32>
    %30 = arith.maximumf %28, %29 : vector<16x256xf32>
    %c0_24 = arith.constant 0 : index
    %c0_25 = arith.constant 0 : index
    %31 = vector.load %arg3[%c0_24, %c0_25] : memref<1x256xf32, #tpu.memory_space<vmem>>, vector<1x256xf32>
    %32 = vector.broadcast %31 : vector<1x256xf32> to vector<16x256xf32>
    %33 = arith.addf %30, %32 : vector<16x256xf32>
    %cst_26 = arith.constant 0.000000e+00 : f32
    %34 = vector.broadcast %cst_26 : f32 to vector<16x256xf32>
    %35 = arith.maximumf %33, %34 : vector<16x256xf32>
    %36 = arith.truncf %35 : vector<16x256xf32> to vector<16x256xbf16>
    %c0_27 = arith.constant 0 : index
    %c256 = arith.constant 256 : index
    %37 = vector.load %arg13[%c0_27, %c256] : memref<16x3072xbf16, #tpu.memory_space<vmem>>, vector<16x256xbf16>
    tpu.vector_store %arg13[%c0_27, %c256], %36 {strides = array<i32>} : memref<16x3072xbf16, #tpu.memory_space<vmem>>, vector<16x256xbf16>,
    %c4 = arith.constant 4 : index
    %c0_28 = arith.constant 0 : index
    %c0_29 = arith.constant 0 : index
    %38 = vector.load %arg1[%c4, %c0_28, %c0_29] : memref<24x16x140xbf16, #tpu.memory_space<vmem>>, vector<1x16x140xbf16>
    %39 = vector.shape_cast %38 : vector<1x16x140xbf16> to vector<16x140xbf16>
    %c0_30 = arith.constant 0 : index
    %c0_31 = arith.constant 0 : index
    %40 = vector.load %arg2[%c0_30, %c0_31] : memref<140x512xbf16, #tpu.memory_space<vmem>>, vector<140x512xbf16>
    %cst_32 = arith.constant dense<0.000000e+00> : vector<16x512xf32>
    %41 = tpu.matmul %39, %40, %cst_32 {dimension_numbers = #tpu.dot_dimension_numbers<[1], [0], [0], [1], [0, 0, 1, 1], [], []>} : vector<16x140xbf16>, vector<140x512xbf16>, vector<16x512xf32> -> vector<16x512xf32>
    %c5 = arith.constant 5 : index
    %c0_33 = arith.constant 0 : index
    %c0_34 = arith.constant 0 : index
    %42 = vector.load %arg1[%c5, %c0_33, %c0_34] : memref<24x16x140xbf16, #tpu.memory_space<vmem>>, vector<1x16x140xbf16>
    %43 = vector.shape_cast %42 : vector<1x16x140xbf16> to vector<16x140xbf16>
    %c0_35 = arith.constant 0 : index
    %c0_36 = arith.constant 0 : index
    %44 = vector.load %arg2[%c0_35, %c0_36] : memref<140x512xbf16, #tpu.memory_space<vmem>>, vector<140x512xbf16>
    %cst_37 = arith.constant dense<0.000000e+00> : vector<16x512xf32>
    %45 = tpu.matmul %43, %44, %cst_37 {dimension_numbers = #tpu.dot_dimension_numbers<[1], [0], [0], [1], [0, 0, 1, 1], [], []>} : vector<16x140xbf16>, vector<140x512xbf16>, vector<16x512xf32> -> vector<16x512xf32>
    %46 = arith.maximumf %41, %45 : vector<16x512xf32>
    %47 = vector.extract_strided_slice %46 {offsets = [0, 0], sizes = [16, 256], strides = [1, 1]} : vector<16x512xf32> to vector<16x256xf32>
    %48 = vector.extract_strided_slice %46 {offsets = [0, 256], sizes = [16, 256], strides = [1, 1]} : vector<16x512xf32> to vector<16x256xf32>
    %49 = arith.maximumf %47, %48 : vector<16x256xf32>
    %c0_38 = arith.constant 0 : index
    %c0_39 = arith.constant 0 : index
    %50 = vector.load %arg3[%c0_38, %c0_39] : memref<1x256xf32, #tpu.memory_space<vmem>>, vector<1x256xf32>
    %51 = vector.broadcast %50 : vector<1x256xf32> to vector<16x256xf32>
    %52 = arith.addf %49, %51 : vector<16x256xf32>
    %cst_40 = arith.constant 0.000000e+00 : f32
    %53 = vector.broadcast %cst_40 : f32 to vector<16x256xf32>
    %54 = arith.maximumf %52, %53 : vector<16x256xf32>
    %55 = arith.truncf %54 : vector<16x256xf32> to vector<16x256xbf16>
    %c0_41 = arith.constant 0 : index
    %c512 = arith.constant 512 : index
    %56 = vector.load %arg13[%c0_41, %c512] : memref<16x3072xbf16, #tpu.memory_space<vmem>>, vector<16x256xbf16>
    tpu.vector_store %arg13[%c0_41, %c512], %55 {strides = array<i32>} : memref<16x3072xbf16, #tpu.memory_space<vmem>>, vector<16x256xbf16>,
    %c6 = arith.constant 6 : index
    %c0_42 = arith.constant 0 : index
    %c0_43 = arith.constant 0 : index
    %57 = vector.load %arg1[%c6, %c0_42, %c0_43] : memref<24x16x140xbf16, #tpu.memory_space<vmem>>, vector<1x16x140xbf16>
    %58 = vector.shape_cast %57 : vector<1x16x140xbf16> to vector<16x140xbf16>
    %c0_44 = arith.constant 0 : index
    %c0_45 = arith.constant 0 : index
    %59 = vector.load %arg2[%c0_44, %c0_45] : memref<140x512xbf16, #tpu.memory_space<vmem>>, vector<140x512xbf16>
    %cst_46 = arith.constant dense<0.000000e+00> : vector<16x512xf32>
    %60 = tpu.matmul %58, %59, %cst_46 {dimension_numbers = #tpu.dot_dimension_numbers<[1], [0], [0], [1], [0, 0, 1, 1], [], []>} : vector<16x140xbf16>, vector<140x512xbf16>, vector<16x512xf32> -> vector<16x512xf32>
    %c7 = arith.constant 7 : index
    %c0_47 = arith.constant 0 : index
    %c0_48 = arith.constant 0 : index
    %61 = vector.load %arg1[%c7, %c0_47, %c0_48] : memref<24x16x140xbf16, #tpu.memory_space<vmem>>, vector<1x16x140xbf16>
    %62 = vector.shape_cast %61 : vector<1x16x140xbf16> to vector<16x140xbf16>
    %c0_49 = arith.constant 0 : index
    %c0_50 = arith.constant 0 : index
    %63 = vector.load %arg2[%c0_49, %c0_50] : memref<140x512xbf16, #tpu.memory_space<vmem>>, vector<140x512xbf16>
    %cst_51 = arith.constant dense<0.000000e+00> : vector<16x512xf32>
    %64 = tpu.matmul %62, %63, %cst_51 {dimension_numbers = #tpu.dot_dimension_numbers<[1], [0], [0], [1], [0, 0, 1, 1], [], []>} : vector<16x140xbf16>, vector<140x512xbf16>, vector<16x512xf32> -> vector<16x512xf32>
    %65 = arith.maximumf %60, %64 : vector<16x512xf32>
    %66 = vector.extract_strided_slice %65 {offsets = [0, 0], sizes = [16, 256], strides = [1, 1]} : vector<16x512xf32> to vector<16x256xf32>
    %67 = vector.extract_strided_slice %65 {offsets = [0, 256], sizes = [16, 256], strides = [1, 1]} : vector<16x512xf32> to vector<16x256xf32>
    %68 = arith.maximumf %66, %67 : vector<16x256xf32>
    %c0_52 = arith.constant 0 : index
    %c0_53 = arith.constant 0 : index
    %69 = vector.load %arg3[%c0_52, %c0_53] : memref<1x256xf32, #tpu.memory_space<vmem>>, vector<1x256xf32>
    %70 = vector.broadcast %69 : vector<1x256xf32> to vector<16x256xf32>
    %71 = arith.addf %68, %70 : vector<16x256xf32>
    %cst_54 = arith.constant 0.000000e+00 : f32
    %72 = vector.broadcast %cst_54 : f32 to vector<16x256xf32>
    %73 = arith.maximumf %71, %72 : vector<16x256xf32>
    %74 = arith.truncf %73 : vector<16x256xf32> to vector<16x256xbf16>
    %c0_55 = arith.constant 0 : index
    %c768 = arith.constant 768 : index
    %75 = vector.load %arg13[%c0_55, %c768] : memref<16x3072xbf16, #tpu.memory_space<vmem>>, vector<16x256xbf16>
    tpu.vector_store %arg13[%c0_55, %c768], %74 {strides = array<i32>} : memref<16x3072xbf16, #tpu.memory_space<vmem>>, vector<16x256xbf16>,
    %c8 = arith.constant 8 : index
    %c0_56 = arith.constant 0 : index
    %c0_57 = arith.constant 0 : index
    %76 = vector.load %arg1[%c8, %c0_56, %c0_57] : memref<24x16x140xbf16, #tpu.memory_space<vmem>>, vector<1x16x140xbf16>
    %77 = vector.shape_cast %76 : vector<1x16x140xbf16> to vector<16x140xbf16>
    %c0_58 = arith.constant 0 : index
    %c0_59 = arith.constant 0 : index
    %78 = vector.load %arg2[%c0_58, %c0_59] : memref<140x512xbf16, #tpu.memory_space<vmem>>, vector<140x512xbf16>
    %cst_60 = arith.constant dense<0.000000e+00> : vector<16x512xf32>
    %79 = tpu.matmul %77, %78, %cst_60 {dimension_numbers = #tpu.dot_dimension_numbers<[1], [0], [0], [1], [0, 0, 1, 1], [], []>} : vector<16x140xbf16>, vector<140x512xbf16>, vector<16x512xf32> -> vector<16x512xf32>
    %c9 = arith.constant 9 : index
    %c0_61 = arith.constant 0 : index
    %c0_62 = arith.constant 0 : index
    %80 = vector.load %arg1[%c9, %c0_61, %c0_62] : memref<24x16x140xbf16, #tpu.memory_space<vmem>>, vector<1x16x140xbf16>
    %81 = vector.shape_cast %80 : vector<1x16x140xbf16> to vector<16x140xbf16>
    %c0_63 = arith.constant 0 : index
    %c0_64 = arith.constant 0 : index
    %82 = vector.load %arg2[%c0_63, %c0_64] : memref<140x512xbf16, #tpu.memory_space<vmem>>, vector<140x512xbf16>
    %cst_65 = arith.constant dense<0.000000e+00> : vector<16x512xf32>
    %83 = tpu.matmul %81, %82, %cst_65 {dimension_numbers = #tpu.dot_dimension_numbers<[1], [0], [0], [1], [0, 0, 1, 1], [], []>} : vector<16x140xbf16>, vector<140x512xbf16>, vector<16x512xf32> -> vector<16x512xf32>
    %84 = arith.maximumf %79, %83 : vector<16x512xf32>
    %85 = vector.extract_strided_slice %84 {offsets = [0, 0], sizes = [16, 256], strides = [1, 1]} : vector<16x512xf32> to vector<16x256xf32>
    %86 = vector.extract_strided_slice %84 {offsets = [0, 256], sizes = [16, 256], strides = [1, 1]} : vector<16x512xf32> to vector<16x256xf32>
    %87 = arith.maximumf %85, %86 : vector<16x256xf32>
    %c0_66 = arith.constant 0 : index
    %c0_67 = arith.constant 0 : index
    %88 = vector.load %arg3[%c0_66, %c0_67] : memref<1x256xf32, #tpu.memory_space<vmem>>, vector<1x256xf32>
    %89 = vector.broadcast %88 : vector<1x256xf32> to vector<16x256xf32>
    %90 = arith.addf %87, %89 : vector<16x256xf32>
    %cst_68 = arith.constant 0.000000e+00 : f32
    %91 = vector.broadcast %cst_68 : f32 to vector<16x256xf32>
    %92 = arith.maximumf %90, %91 : vector<16x256xf32>
    %93 = arith.truncf %92 : vector<16x256xf32> to vector<16x256xbf16>
    %c0_69 = arith.constant 0 : index
    %c1024 = arith.constant 1024 : index
    %94 = vector.load %arg13[%c0_69, %c1024] : memref<16x3072xbf16, #tpu.memory_space<vmem>>, vector<16x256xbf16>
    tpu.vector_store %arg13[%c0_69, %c1024], %93 {strides = array<i32>} : memref<16x3072xbf16, #tpu.memory_space<vmem>>, vector<16x256xbf16>,
    %c10 = arith.constant 10 : index
    %c0_70 = arith.constant 0 : index
    %c0_71 = arith.constant 0 : index
    %95 = vector.load %arg1[%c10, %c0_70, %c0_71] : memref<24x16x140xbf16, #tpu.memory_space<vmem>>, vector<1x16x140xbf16>
    %96 = vector.shape_cast %95 : vector<1x16x140xbf16> to vector<16x140xbf16>
    %c0_72 = arith.constant 0 : index
    %c0_73 = arith.constant 0 : index
    %97 = vector.load %arg2[%c0_72, %c0_73] : memref<140x512xbf16, #tpu.memory_space<vmem>>, vector<140x512xbf16>
    %cst_74 = arith.constant dense<0.000000e+00> : vector<16x512xf32>
    %98 = tpu.matmul %96, %97, %cst_74 {dimension_numbers = #tpu.dot_dimension_numbers<[1], [0], [0], [1], [0, 0, 1, 1], [], []>} : vector<16x140xbf16>, vector<140x512xbf16>, vector<16x512xf32> -> vector<16x512xf32>
    %c11 = arith.constant 11 : index
    %c0_75 = arith.constant 0 : index
    %c0_76 = arith.constant 0 : index
    %99 = vector.load %arg1[%c11, %c0_75, %c0_76] : memref<24x16x140xbf16, #tpu.memory_space<vmem>>, vector<1x16x140xbf16>
    %100 = vector.shape_cast %99 : vector<1x16x140xbf16> to vector<16x140xbf16>
    %c0_77 = arith.constant 0 : index
    %c0_78 = arith.constant 0 : index
    %101 = vector.load %arg2[%c0_77, %c0_78] : memref<140x512xbf16, #tpu.memory_space<vmem>>, vector<140x512xbf16>
    %cst_79 = arith.constant dense<0.000000e+00> : vector<16x512xf32>
    %102 = tpu.matmul %100, %101, %cst_79 {dimension_numbers = #tpu.dot_dimension_numbers<[1], [0], [0], [1], [0, 0, 1, 1], [], []>} : vector<16x140xbf16>, vector<140x512xbf16>, vector<16x512xf32> -> vector<16x512xf32>
    %103 = arith.maximumf %98, %102 : vector<16x512xf32>
    %104 = vector.extract_strided_slice %103 {offsets = [0, 0], sizes = [16, 256], strides = [1, 1]} : vector<16x512xf32> to vector<16x256xf32>
    %105 = vector.extract_strided_slice %103 {offsets = [0, 256], sizes = [16, 256], strides = [1, 1]} : vector<16x512xf32> to vector<16x256xf32>
    %106 = arith.maximumf %104, %105 : vector<16x256xf32>
    %c0_80 = arith.constant 0 : index
    %c0_81 = arith.constant 0 : index
    %107 = vector.load %arg3[%c0_80, %c0_81] : memref<1x256xf32, #tpu.memory_space<vmem>>, vector<1x256xf32>
    %108 = vector.broadcast %107 : vector<1x256xf32> to vector<16x256xf32>
    %109 = arith.addf %106, %108 : vector<16x256xf32>
    %cst_82 = arith.constant 0.000000e+00 : f32
    %110 = vector.broadcast %cst_82 : f32 to vector<16x256xf32>
    %111 = arith.maximumf %109, %110 : vector<16x256xf32>
    %112 = arith.truncf %111 : vector<16x256xf32> to vector<16x256xbf16>
    %c0_83 = arith.constant 0 : index
    %c1280 = arith.constant 1280 : index
    %113 = vector.load %arg13[%c0_83, %c1280] : memref<16x3072xbf16, #tpu.memory_space<vmem>>, vector<16x256xbf16>
    tpu.vector_store %arg13[%c0_83, %c1280], %112 {strides = array<i32>} : memref<16x3072xbf16, #tpu.memory_space<vmem>>, vector<16x256xbf16>,
    %c12 = arith.constant 12 : index
    %c0_84 = arith.constant 0 : index
    %c0_85 = arith.constant 0 : index
    %114 = vector.load %arg1[%c12, %c0_84, %c0_85] : memref<24x16x140xbf16, #tpu.memory_space<vmem>>, vector<1x16x140xbf16>
    %115 = vector.shape_cast %114 : vector<1x16x140xbf16> to vector<16x140xbf16>
    %c0_86 = arith.constant 0 : index
    %c0_87 = arith.constant 0 : index
    %116 = vector.load %arg2[%c0_86, %c0_87] : memref<140x512xbf16, #tpu.memory_space<vmem>>, vector<140x512xbf16>
    %cst_88 = arith.constant dense<0.000000e+00> : vector<16x512xf32>
    %117 = tpu.matmul %115, %116, %cst_88 {dimension_numbers = #tpu.dot_dimension_numbers<[1], [0], [0], [1], [0, 0, 1, 1], [], []>} : vector<16x140xbf16>, vector<140x512xbf16>, vector<16x512xf32> -> vector<16x512xf32>
    %c13 = arith.constant 13 : index
    %c0_89 = arith.constant 0 : index
    %c0_90 = arith.constant 0 : index
    %118 = vector.load %arg1[%c13, %c0_89, %c0_90] : memref<24x16x140xbf16, #tpu.memory_space<vmem>>, vector<1x16x140xbf16>
    %119 = vector.shape_cast %118 : vector<1x16x140xbf16> to vector<16x140xbf16>
    %c0_91 = arith.constant 0 : index
    %c0_92 = arith.constant 0 : index
    %120 = vector.load %arg2[%c0_91, %c0_92] : memref<140x512xbf16, #tpu.memory_space<vmem>>, vector<140x512xbf16>
    %cst_93 = arith.constant dense<0.000000e+00> : vector<16x512xf32>
    %121 = tpu.matmul %119, %120, %cst_93 {dimension_numbers = #tpu.dot_dimension_numbers<[1], [0], [0], [1], [0, 0, 1, 1], [], []>} : vector<16x140xbf16>, vector<140x512xbf16>, vector<16x512xf32> -> vector<16x512xf32>
    %122 = arith.maximumf %117, %121 : vector<16x512xf32>
    %123 = vector.extract_strided_slice %122 {offsets = [0, 0], sizes = [16, 256], strides = [1, 1]} : vector<16x512xf32> to vector<16x256xf32>
    %124 = vector.extract_strided_slice %122 {offsets = [0, 256], sizes = [16, 256], strides = [1, 1]} : vector<16x512xf32> to vector<16x256xf32>
    %125 = arith.maximumf %123, %124 : vector<16x256xf32>
    %c0_94 = arith.constant 0 : index
    %c0_95 = arith.constant 0 : index
    %126 = vector.load %arg3[%c0_94, %c0_95] : memref<1x256xf32, #tpu.memory_space<vmem>>, vector<1x256xf32>
    %127 = vector.broadcast %126 : vector<1x256xf32> to vector<16x256xf32>
    %128 = arith.addf %125, %127 : vector<16x256xf32>
    %cst_96 = arith.constant 0.000000e+00 : f32
    %129 = vector.broadcast %cst_96 : f32 to vector<16x256xf32>
    %130 = arith.maximumf %128, %129 : vector<16x256xf32>
    %131 = arith.truncf %130 : vector<16x256xf32> to vector<16x256xbf16>
    %c0_97 = arith.constant 0 : index
    %c1536 = arith.constant 1536 : index
    %132 = vector.load %arg13[%c0_97, %c1536] : memref<16x3072xbf16, #tpu.memory_space<vmem>>, vector<16x256xbf16>
    tpu.vector_store %arg13[%c0_97, %c1536], %131 {strides = array<i32>} : memref<16x3072xbf16, #tpu.memory_space<vmem>>, vector<16x256xbf16>,
    %c14 = arith.constant 14 : index
    %c0_98 = arith.constant 0 : index
    %c0_99 = arith.constant 0 : index
    %133 = vector.load %arg1[%c14, %c0_98, %c0_99] : memref<24x16x140xbf16, #tpu.memory_space<vmem>>, vector<1x16x140xbf16>
    %134 = vector.shape_cast %133 : vector<1x16x140xbf16> to vector<16x140xbf16>
    %c0_100 = arith.constant 0 : index
    %c0_101 = arith.constant 0 : index
    %135 = vector.load %arg2[%c0_100, %c0_101] : memref<140x512xbf16, #tpu.memory_space<vmem>>, vector<140x512xbf16>
    %cst_102 = arith.constant dense<0.000000e+00> : vector<16x512xf32>
    %136 = tpu.matmul %134, %135, %cst_102 {dimension_numbers = #tpu.dot_dimension_numbers<[1], [0], [0], [1], [0, 0, 1, 1], [], []>} : vector<16x140xbf16>, vector<140x512xbf16>, vector<16x512xf32> -> vector<16x512xf32>
    %c15 = arith.constant 15 : index
    %c0_103 = arith.constant 0 : index
    %c0_104 = arith.constant 0 : index
    %137 = vector.load %arg1[%c15, %c0_103, %c0_104] : memref<24x16x140xbf16, #tpu.memory_space<vmem>>, vector<1x16x140xbf16>
    %138 = vector.shape_cast %137 : vector<1x16x140xbf16> to vector<16x140xbf16>
    %c0_105 = arith.constant 0 : index
    %c0_106 = arith.constant 0 : index
    %139 = vector.load %arg2[%c0_105, %c0_106] : memref<140x512xbf16, #tpu.memory_space<vmem>>, vector<140x512xbf16>
    %cst_107 = arith.constant dense<0.000000e+00> : vector<16x512xf32>
    %140 = tpu.matmul %138, %139, %cst_107 {dimension_numbers = #tpu.dot_dimension_numbers<[1], [0], [0], [1], [0, 0, 1, 1], [], []>} : vector<16x140xbf16>, vector<140x512xbf16>, vector<16x512xf32> -> vector<16x512xf32>
    %141 = arith.maximumf %136, %140 : vector<16x512xf32>
    %142 = vector.extract_strided_slice %141 {offsets = [0, 0], sizes = [16, 256], strides = [1, 1]} : vector<16x512xf32> to vector<16x256xf32>
    %143 = vector.extract_strided_slice %141 {offsets = [0, 256], sizes = [16, 256], strides = [1, 1]} : vector<16x512xf32> to vector<16x256xf32>
    %144 = arith.maximumf %142, %143 : vector<16x256xf32>
    %c0_108 = arith.constant 0 : index
    %c0_109 = arith.constant 0 : index
    %145 = vector.load %arg3[%c0_108, %c0_109] : memref<1x256xf32, #tpu.memory_space<vmem>>, vector<1x256xf32>
    %146 = vector.broadcast %145 : vector<1x256xf32> to vector<16x256xf32>
    %147 = arith.addf %144, %146 : vector<16x256xf32>
    %cst_110 = arith.constant 0.000000e+00 : f32
    %148 = vector.broadcast %cst_110 : f32 to vector<16x256xf32>
    %149 = arith.maximumf %147, %148 : vector<16x256xf32>
    %150 = arith.truncf %149 : vector<16x256xf32> to vector<16x256xbf16>
    %c0_111 = arith.constant 0 : index
    %c1792 = arith.constant 1792 : index
    %151 = vector.load %arg13[%c0_111, %c1792] : memref<16x3072xbf16, #tpu.memory_space<vmem>>, vector<16x256xbf16>
    tpu.vector_store %arg13[%c0_111, %c1792], %150 {strides = array<i32>} : memref<16x3072xbf16, #tpu.memory_space<vmem>>, vector<16x256xbf16>,
    %c16 = arith.constant 16 : index
    %c0_112 = arith.constant 0 : index
    %c0_113 = arith.constant 0 : index
    %152 = vector.load %arg1[%c16, %c0_112, %c0_113] : memref<24x16x140xbf16, #tpu.memory_space<vmem>>, vector<1x16x140xbf16>
    %153 = vector.shape_cast %152 : vector<1x16x140xbf16> to vector<16x140xbf16>
    %c0_114 = arith.constant 0 : index
    %c0_115 = arith.constant 0 : index
    %154 = vector.load %arg2[%c0_114, %c0_115] : memref<140x512xbf16, #tpu.memory_space<vmem>>, vector<140x512xbf16>
    %cst_116 = arith.constant dense<0.000000e+00> : vector<16x512xf32>
    %155 = tpu.matmul %153, %154, %cst_116 {dimension_numbers = #tpu.dot_dimension_numbers<[1], [0], [0], [1], [0, 0, 1, 1], [], []>} : vector<16x140xbf16>, vector<140x512xbf16>, vector<16x512xf32> -> vector<16x512xf32>
    %c17 = arith.constant 17 : index
    %c0_117 = arith.constant 0 : index
    %c0_118 = arith.constant 0 : index
    %156 = vector.load %arg1[%c17, %c0_117, %c0_118] : memref<24x16x140xbf16, #tpu.memory_space<vmem>>, vector<1x16x140xbf16>
    %157 = vector.shape_cast %156 : vector<1x16x140xbf16> to vector<16x140xbf16>
    %c0_119 = arith.constant 0 : index
    %c0_120 = arith.constant 0 : index
    %158 = vector.load %arg2[%c0_119, %c0_120] : memref<140x512xbf16, #tpu.memory_space<vmem>>, vector<140x512xbf16>
    %cst_121 = arith.constant dense<0.000000e+00> : vector<16x512xf32>
    %159 = tpu.matmul %157, %158, %cst_121 {dimension_numbers = #tpu.dot_dimension_numbers<[1], [0], [0], [1], [0, 0, 1, 1], [], []>} : vector<16x140xbf16>, vector<140x512xbf16>, vector<16x512xf32> -> vector<16x512xf32>
    %160 = arith.maximumf %155, %159 : vector<16x512xf32>
    %161 = vector.extract_strided_slice %160 {offsets = [0, 0], sizes = [16, 256], strides = [1, 1]} : vector<16x512xf32> to vector<16x256xf32>
    %162 = vector.extract_strided_slice %160 {offsets = [0, 256], sizes = [16, 256], strides = [1, 1]} : vector<16x512xf32> to vector<16x256xf32>
    %163 = arith.maximumf %161, %162 : vector<16x256xf32>
    %c0_122 = arith.constant 0 : index
    %c0_123 = arith.constant 0 : index
    %164 = vector.load %arg3[%c0_122, %c0_123] : memref<1x256xf32, #tpu.memory_space<vmem>>, vector<1x256xf32>
    %165 = vector.broadcast %164 : vector<1x256xf32> to vector<16x256xf32>
    %166 = arith.addf %163, %165 : vector<16x256xf32>
    %cst_124 = arith.constant 0.000000e+00 : f32
    %167 = vector.broadcast %cst_124 : f32 to vector<16x256xf32>
    %168 = arith.maximumf %166, %167 : vector<16x256xf32>
    %169 = arith.truncf %168 : vector<16x256xf32> to vector<16x256xbf16>
    %c0_125 = arith.constant 0 : index
    %c2048 = arith.constant 2048 : index
    %170 = vector.load %arg13[%c0_125, %c2048] : memref<16x3072xbf16, #tpu.memory_space<vmem>>, vector<16x256xbf16>
    tpu.vector_store %arg13[%c0_125, %c2048], %169 {strides = array<i32>} : memref<16x3072xbf16, #tpu.memory_space<vmem>>, vector<16x256xbf16>,
    %c18 = arith.constant 18 : index
    %c0_126 = arith.constant 0 : index
    %c0_127 = arith.constant 0 : index
    %171 = vector.load %arg1[%c18, %c0_126, %c0_127] : memref<24x16x140xbf16, #tpu.memory_space<vmem>>, vector<1x16x140xbf16>
    %172 = vector.shape_cast %171 : vector<1x16x140xbf16> to vector<16x140xbf16>
    %c0_128 = arith.constant 0 : index
    %c0_129 = arith.constant 0 : index
    %173 = vector.load %arg2[%c0_128, %c0_129] : memref<140x512xbf16, #tpu.memory_space<vmem>>, vector<140x512xbf16>
    %cst_130 = arith.constant dense<0.000000e+00> : vector<16x512xf32>
    %174 = tpu.matmul %172, %173, %cst_130 {dimension_numbers = #tpu.dot_dimension_numbers<[1], [0], [0], [1], [0, 0, 1, 1], [], []>} : vector<16x140xbf16>, vector<140x512xbf16>, vector<16x512xf32> -> vector<16x512xf32>
    %c19 = arith.constant 19 : index
    %c0_131 = arith.constant 0 : index
    %c0_132 = arith.constant 0 : index
    %175 = vector.load %arg1[%c19, %c0_131, %c0_132] : memref<24x16x140xbf16, #tpu.memory_space<vmem>>, vector<1x16x140xbf16>
    %176 = vector.shape_cast %175 : vector<1x16x140xbf16> to vector<16x140xbf16>
    %c0_133 = arith.constant 0 : index
    %c0_134 = arith.constant 0 : index
    %177 = vector.load %arg2[%c0_133, %c0_134] : memref<140x512xbf16, #tpu.memory_space<vmem>>, vector<140x512xbf16>
    %cst_135 = arith.constant dense<0.000000e+00> : vector<16x512xf32>
    %178 = tpu.matmul %176, %177, %cst_135 {dimension_numbers = #tpu.dot_dimension_numbers<[1], [0], [0], [1], [0, 0, 1, 1], [], []>} : vector<16x140xbf16>, vector<140x512xbf16>, vector<16x512xf32> -> vector<16x512xf32>
    %179 = arith.maximumf %174, %178 : vector<16x512xf32>
    %180 = vector.extract_strided_slice %179 {offsets = [0, 0], sizes = [16, 256], strides = [1, 1]} : vector<16x512xf32> to vector<16x256xf32>
    %181 = vector.extract_strided_slice %179 {offsets = [0, 256], sizes = [16, 256], strides = [1, 1]} : vector<16x512xf32> to vector<16x256xf32>
    %182 = arith.maximumf %180, %181 : vector<16x256xf32>
    %c0_136 = arith.constant 0 : index
    %c0_137 = arith.constant 0 : index
    %183 = vector.load %arg3[%c0_136, %c0_137] : memref<1x256xf32, #tpu.memory_space<vmem>>, vector<1x256xf32>
    %184 = vector.broadcast %183 : vector<1x256xf32> to vector<16x256xf32>
    %185 = arith.addf %182, %184 : vector<16x256xf32>
    %cst_138 = arith.constant 0.000000e+00 : f32
    %186 = vector.broadcast %cst_138 : f32 to vector<16x256xf32>
    %187 = arith.maximumf %185, %186 : vector<16x256xf32>
    %188 = arith.truncf %187 : vector<16x256xf32> to vector<16x256xbf16>
    %c0_139 = arith.constant 0 : index
    %c2304 = arith.constant 2304 : index
    %189 = vector.load %arg13[%c0_139, %c2304] : memref<16x3072xbf16, #tpu.memory_space<vmem>>, vector<16x256xbf16>
    tpu.vector_store %arg13[%c0_139, %c2304], %188 {strides = array<i32>} : memref<16x3072xbf16, #tpu.memory_space<vmem>>, vector<16x256xbf16>,
    %c20 = arith.constant 20 : index
    %c0_140 = arith.constant 0 : index
    %c0_141 = arith.constant 0 : index
    %190 = vector.load %arg1[%c20, %c0_140, %c0_141] : memref<24x16x140xbf16, #tpu.memory_space<vmem>>, vector<1x16x140xbf16>
    %191 = vector.shape_cast %190 : vector<1x16x140xbf16> to vector<16x140xbf16>
    %c0_142 = arith.constant 0 : index
    %c0_143 = arith.constant 0 : index
    %192 = vector.load %arg2[%c0_142, %c0_143] : memref<140x512xbf16, #tpu.memory_space<vmem>>, vector<140x512xbf16>
    %cst_144 = arith.constant dense<0.000000e+00> : vector<16x512xf32>
    %193 = tpu.matmul %191, %192, %cst_144 {dimension_numbers = #tpu.dot_dimension_numbers<[1], [0], [0], [1], [0, 0, 1, 1], [], []>} : vector<16x140xbf16>, vector<140x512xbf16>, vector<16x512xf32> -> vector<16x512xf32>
    %c21 = arith.constant 21 : index
    %c0_145 = arith.constant 0 : index
    %c0_146 = arith.constant 0 : index
    %194 = vector.load %arg1[%c21, %c0_145, %c0_146] : memref<24x16x140xbf16, #tpu.memory_space<vmem>>, vector<1x16x140xbf16>
    %195 = vector.shape_cast %194 : vector<1x16x140xbf16> to vector<16x140xbf16>
    %c0_147 = arith.constant 0 : index
    %c0_148 = arith.constant 0 : index
    %196 = vector.load %arg2[%c0_147, %c0_148] : memref<140x512xbf16, #tpu.memory_space<vmem>>, vector<140x512xbf16>
    %cst_149 = arith.constant dense<0.000000e+00> : vector<16x512xf32>
    %197 = tpu.matmul %195, %196, %cst_149 {dimension_numbers = #tpu.dot_dimension_numbers<[1], [0], [0], [1], [0, 0, 1, 1], [], []>} : vector<16x140xbf16>, vector<140x512xbf16>, vector<16x512xf32> -> vector<16x512xf32>
    %198 = arith.maximumf %193, %197 : vector<16x512xf32>
    %199 = vector.extract_strided_slice %198 {offsets = [0, 0], sizes = [16, 256], strides = [1, 1]} : vector<16x512xf32> to vector<16x256xf32>
    %200 = vector.extract_strided_slice %198 {offsets = [0, 256], sizes = [16, 256], strides = [1, 1]} : vector<16x512xf32> to vector<16x256xf32>
    %201 = arith.maximumf %199, %200 : vector<16x256xf32>
    %c0_150 = arith.constant 0 : index
    %c0_151 = arith.constant 0 : index
    %202 = vector.load %arg3[%c0_150, %c0_151] : memref<1x256xf32, #tpu.memory_space<vmem>>, vector<1x256xf32>
    %203 = vector.broadcast %202 : vector<1x256xf32> to vector<16x256xf32>
    %204 = arith.addf %201, %203 : vector<16x256xf32>
    %cst_152 = arith.constant 0.000000e+00 : f32
    %205 = vector.broadcast %cst_152 : f32 to vector<16x256xf32>
    %206 = arith.maximumf %204, %205 : vector<16x256xf32>
    %207 = arith.truncf %206 : vector<16x256xf32> to vector<16x256xbf16>
    %c0_153 = arith.constant 0 : index
    %c2560 = arith.constant 2560 : index
    %208 = vector.load %arg13[%c0_153, %c2560] : memref<16x3072xbf16, #tpu.memory_space<vmem>>, vector<16x256xbf16>
    tpu.vector_store %arg13[%c0_153, %c2560], %207 {strides = array<i32>} : memref<16x3072xbf16, #tpu.memory_space<vmem>>, vector<16x256xbf16>,
    %c22 = arith.constant 22 : index
    %c0_154 = arith.constant 0 : index
    %c0_155 = arith.constant 0 : index
    %209 = vector.load %arg1[%c22, %c0_154, %c0_155] : memref<24x16x140xbf16, #tpu.memory_space<vmem>>, vector<1x16x140xbf16>
    %210 = vector.shape_cast %209 : vector<1x16x140xbf16> to vector<16x140xbf16>
    %c0_156 = arith.constant 0 : index
    %c0_157 = arith.constant 0 : index
    %211 = vector.load %arg2[%c0_156, %c0_157] : memref<140x512xbf16, #tpu.memory_space<vmem>>, vector<140x512xbf16>
    %cst_158 = arith.constant dense<0.000000e+00> : vector<16x512xf32>
    %212 = tpu.matmul %210, %211, %cst_158 {dimension_numbers = #tpu.dot_dimension_numbers<[1], [0], [0], [1], [0, 0, 1, 1], [], []>} : vector<16x140xbf16>, vector<140x512xbf16>, vector<16x512xf32> -> vector<16x512xf32>
    %c23 = arith.constant 23 : index
    %c0_159 = arith.constant 0 : index
    %c0_160 = arith.constant 0 : index
    %213 = vector.load %arg1[%c23, %c0_159, %c0_160] : memref<24x16x140xbf16, #tpu.memory_space<vmem>>, vector<1x16x140xbf16>
    %214 = vector.shape_cast %213 : vector<1x16x140xbf16> to vector<16x140xbf16>
    %c0_161 = arith.constant 0 : index
    %c0_162 = arith.constant 0 : index
    %215 = vector.load %arg2[%c0_161, %c0_162] : memref<140x512xbf16, #tpu.memory_space<vmem>>, vector<140x512xbf16>
    %cst_163 = arith.constant dense<0.000000e+00> : vector<16x512xf32>
    %216 = tpu.matmul %214, %215, %cst_163 {dimension_numbers = #tpu.dot_dimension_numbers<[1], [0], [0], [1], [0, 0, 1, 1], [], []>} : vector<16x140xbf16>, vector<140x512xbf16>, vector<16x512xf32> -> vector<16x512xf32>
    %217 = arith.maximumf %212, %216 : vector<16x512xf32>
    %218 = vector.extract_strided_slice %217 {offsets = [0, 0], sizes = [16, 256], strides = [1, 1]} : vector<16x512xf32> to vector<16x256xf32>
    %219 = vector.extract_strided_slice %217 {offsets = [0, 256], sizes = [16, 256], strides = [1, 1]} : vector<16x512xf32> to vector<16x256xf32>
    %220 = arith.maximumf %218, %219 : vector<16x256xf32>
    %c0_164 = arith.constant 0 : index
    %c0_165 = arith.constant 0 : index
    %221 = vector.load %arg3[%c0_164, %c0_165] : memref<1x256xf32, #tpu.memory_space<vmem>>, vector<1x256xf32>
    %222 = vector.broadcast %221 : vector<1x256xf32> to vector<16x256xf32>
    %223 = arith.addf %220, %222 : vector<16x256xf32>
    %cst_166 = arith.constant 0.000000e+00 : f32
    %224 = vector.broadcast %cst_166 : f32 to vector<16x256xf32>
    %225 = arith.maximumf %223, %224 : vector<16x256xf32>
    %226 = arith.truncf %225 : vector<16x256xf32> to vector<16x256xbf16>
    %c0_167 = arith.constant 0 : index
    %c2816 = arith.constant 2816 : index
    %227 = vector.load %arg13[%c0_167, %c2816] : memref<16x3072xbf16, #tpu.memory_space<vmem>>, vector<16x256xbf16>
    tpu.vector_store %arg13[%c0_167, %c2816], %226 {strides = array<i32>} : memref<16x3072xbf16, #tpu.memory_space<vmem>>, vector<16x256xbf16>,
    %c0_168 = arith.constant 0 : index
    %c0_169 = arith.constant 0 : index
    %228 = vector.load %arg13[%c0_168, %c0_169] : memref<16x3072xbf16, #tpu.memory_space<vmem>>, vector<16x1280xbf16>
    %c0_170 = arith.constant 0 : index
    %c0_171 = arith.constant 0 : index
    %229 = vector.load %arg4[%c0_170, %c0_171] : memref<1280x256xbf16, #tpu.memory_space<vmem>>, vector<1280x256xbf16>
    %cst_172 = arith.constant dense<0.000000e+00> : vector<16x256xf32>
    %230 = tpu.matmul %228, %229, %cst_172 {dimension_numbers = #tpu.dot_dimension_numbers<[1], [0], [0], [1], [0, 0, 1, 1], [], []>} : vector<16x1280xbf16>, vector<1280x256xbf16>, vector<16x256xf32> -> vector<16x256xf32>
    %c0_173 = arith.constant 0 : index
    %c256_174 = arith.constant 256 : index
    %231 = vector.load %arg13[%c0_173, %c256_174] : memref<16x3072xbf16, #tpu.memory_space<vmem>>, vector<16x1280xbf16>
    %c0_175 = arith.constant 0 : index
    %c0_176 = arith.constant 0 : index
    %232 = vector.load %arg4[%c0_175, %c0_176] : memref<1280x256xbf16, #tpu.memory_space<vmem>>, vector<1280x256xbf16>
    %cst_177 = arith.constant dense<0.000000e+00> : vector<16x256xf32>
    %233 = tpu.matmul %231, %232, %cst_177 {dimension_numbers = #tpu.dot_dimension_numbers<[1], [0], [0], [1], [0, 0, 1, 1], [], []>} : vector<16x1280xbf16>, vector<1280x256xbf16>, vector<16x256xf32> -> vector<16x256xf32>
    %234 = arith.maximumf %230, %233 : vector<16x256xf32>
    %235 = vector.extract_strided_slice %234 {offsets = [0, 0], sizes = [16, 128], strides = [1, 1]} : vector<16x256xf32> to vector<16x128xf32>
    %236 = vector.extract_strided_slice %234 {offsets = [0, 128], sizes = [16, 128], strides = [1, 1]} : vector<16x256xf32> to vector<16x128xf32>
    %237 = arith.maximumf %235, %236 : vector<16x128xf32>
    %c0_178 = arith.constant 0 : index
    %c0_179 = arith.constant 0 : index
    %238 = vector.load %arg5[%c0_178, %c0_179] : memref<1x128xf32, #tpu.memory_space<vmem>>, vector<1x128xf32>
    %239 = vector.broadcast %238 : vector<1x128xf32> to vector<16x128xf32>
    %240 = arith.addf %237, %239 : vector<16x128xf32>
    %cst_180 = arith.constant 0.000000e+00 : f32
    %241 = vector.broadcast %cst_180 : f32 to vector<16x128xf32>
    %242 = arith.maximumf %240, %241 : vector<16x128xf32>
    %243 = arith.truncf %242 : vector<16x128xf32> to vector<16x128xbf16>
    %c0_181 = arith.constant 0 : index
    %c0_182 = arith.constant 0 : index
    %244 = vector.load %arg14[%c0_181, %c0_182] : memref<16x512xbf16, #tpu.memory_space<vmem>>, vector<16x128xbf16>
    tpu.vector_store %arg14[%c0_181, %c0_182], %243 {strides = array<i32>} : memref<16x512xbf16, #tpu.memory_space<vmem>>, vector<16x128xbf16>,
    %c0_183 = arith.constant 0 : index
    %c512_184 = arith.constant 512 : index
    %245 = vector.load %arg13[%c0_183, %c512_184] : memref<16x3072xbf16, #tpu.memory_space<vmem>>, vector<16x1280xbf16>
    %c0_185 = arith.constant 0 : index
    %c0_186 = arith.constant 0 : index
    %246 = vector.load %arg4[%c0_185, %c0_186] : memref<1280x256xbf16, #tpu.memory_space<vmem>>, vector<1280x256xbf16>
    %cst_187 = arith.constant dense<0.000000e+00> : vector<16x256xf32>
    %247 = tpu.matmul %245, %246, %cst_187 {dimension_numbers = #tpu.dot_dimension_numbers<[1], [0], [0], [1], [0, 0, 1, 1], [], []>} : vector<16x1280xbf16>, vector<1280x256xbf16>, vector<16x256xf32> -> vector<16x256xf32>
    %c0_188 = arith.constant 0 : index
    %c768_189 = arith.constant 768 : index
    %248 = vector.load %arg13[%c0_188, %c768_189] : memref<16x3072xbf16, #tpu.memory_space<vmem>>, vector<16x1280xbf16>
    %c0_190 = arith.constant 0 : index
    %c0_191 = arith.constant 0 : index
    %249 = vector.load %arg4[%c0_190, %c0_191] : memref<1280x256xbf16, #tpu.memory_space<vmem>>, vector<1280x256xbf16>
    %cst_192 = arith.constant dense<0.000000e+00> : vector<16x256xf32>
    %250 = tpu.matmul %248, %249, %cst_192 {dimension_numbers = #tpu.dot_dimension_numbers<[1], [0], [0], [1], [0, 0, 1, 1], [], []>} : vector<16x1280xbf16>, vector<1280x256xbf16>, vector<16x256xf32> -> vector<16x256xf32>
    %251 = arith.maximumf %247, %250 : vector<16x256xf32>
    %252 = vector.extract_strided_slice %251 {offsets = [0, 0], sizes = [16, 128], strides = [1, 1]} : vector<16x256xf32> to vector<16x128xf32>
    %253 = vector.extract_strided_slice %251 {offsets = [0, 128], sizes = [16, 128], strides = [1, 1]} : vector<16x256xf32> to vector<16x128xf32>
    %254 = arith.maximumf %252, %253 : vector<16x128xf32>
    %c0_193 = arith.constant 0 : index
    %c0_194 = arith.constant 0 : index
    %255 = vector.load %arg5[%c0_193, %c0_194] : memref<1x128xf32, #tpu.memory_space<vmem>>, vector<1x128xf32>
    %256 = vector.broadcast %255 : vector<1x128xf32> to vector<16x128xf32>
    %257 = arith.addf %254, %256 : vector<16x128xf32>
    %cst_195 = arith.constant 0.000000e+00 : f32
    %258 = vector.broadcast %cst_195 : f32 to vector<16x128xf32>
    %259 = arith.maximumf %257, %258 : vector<16x128xf32>
    %260 = arith.truncf %259 : vector<16x128xf32> to vector<16x128xbf16>
    %c0_196 = arith.constant 0 : index
    %c128 = arith.constant 128 : index
    %261 = vector.load %arg14[%c0_196, %c128] : memref<16x512xbf16, #tpu.memory_space<vmem>>, vector<16x128xbf16>
    tpu.vector_store %arg14[%c0_196, %c128], %260 {strides = array<i32>} : memref<16x512xbf16, #tpu.memory_space<vmem>>, vector<16x128xbf16>,
    %c0_197 = arith.constant 0 : index
    %c1024_198 = arith.constant 1024 : index
    %262 = vector.load %arg13[%c0_197, %c1024_198] : memref<16x3072xbf16, #tpu.memory_space<vmem>>, vector<16x1280xbf16>
    %c0_199 = arith.constant 0 : index
    %c0_200 = arith.constant 0 : index
    %263 = vector.load %arg4[%c0_199, %c0_200] : memref<1280x256xbf16, #tpu.memory_space<vmem>>, vector<1280x256xbf16>
    %cst_201 = arith.constant dense<0.000000e+00> : vector<16x256xf32>
    %264 = tpu.matmul %262, %263, %cst_201 {dimension_numbers = #tpu.dot_dimension_numbers<[1], [0], [0], [1], [0, 0, 1, 1], [], []>} : vector<16x1280xbf16>, vector<1280x256xbf16>, vector<16x256xf32> -> vector<16x256xf32>
    %c0_202 = arith.constant 0 : index
    %c1280_203 = arith.constant 1280 : index
    %265 = vector.load %arg13[%c0_202, %c1280_203] : memref<16x3072xbf16, #tpu.memory_space<vmem>>, vector<16x1280xbf16>
    %c0_204 = arith.constant 0 : index
    %c0_205 = arith.constant 0 : index
    %266 = vector.load %arg4[%c0_204, %c0_205] : memref<1280x256xbf16, #tpu.memory_space<vmem>>, vector<1280x256xbf16>
    %cst_206 = arith.constant dense<0.000000e+00> : vector<16x256xf32>
    %267 = tpu.matmul %265, %266, %cst_206 {dimension_numbers = #tpu.dot_dimension_numbers<[1], [0], [0], [1], [0, 0, 1, 1], [], []>} : vector<16x1280xbf16>, vector<1280x256xbf16>, vector<16x256xf32> -> vector<16x256xf32>
    %268 = arith.maximumf %264, %267 : vector<16x256xf32>
    %269 = vector.extract_strided_slice %268 {offsets = [0, 0], sizes = [16, 128], strides = [1, 1]} : vector<16x256xf32> to vector<16x128xf32>
    %270 = vector.extract_strided_slice %268 {offsets = [0, 128], sizes = [16, 128], strides = [1, 1]} : vector<16x256xf32> to vector<16x128xf32>
    %271 = arith.maximumf %269, %270 : vector<16x128xf32>
    %c0_207 = arith.constant 0 : index
    %c0_208 = arith.constant 0 : index
    %272 = vector.load %arg5[%c0_207, %c0_208] : memref<1x128xf32, #tpu.memory_space<vmem>>, vector<1x128xf32>
    %273 = vector.broadcast %272 : vector<1x128xf32> to vector<16x128xf32>
    %274 = arith.addf %271, %273 : vector<16x128xf32>
    %cst_209 = arith.constant 0.000000e+00 : f32
    %275 = vector.broadcast %cst_209 : f32 to vector<16x128xf32>
    %276 = arith.maximumf %274, %275 : vector<16x128xf32>
    %277 = arith.truncf %276 : vector<16x128xf32> to vector<16x128xbf16>
    %c0_210 = arith.constant 0 : index
    %c256_211 = arith.constant 256 : index
    %278 = vector.load %arg14[%c0_210, %c256_211] : memref<16x512xbf16, #tpu.memory_space<vmem>>, vector<16x128xbf16>
    tpu.vector_store %arg14[%c0_210, %c256_211], %277 {strides = array<i32>} : memref<16x512xbf16, #tpu.memory_space<vmem>>, vector<16x128xbf16>,
    %c0_212 = arith.constant 0 : index
    %c1536_213 = arith.constant 1536 : index
    %279 = vector.load %arg13[%c0_212, %c1536_213] : memref<16x3072xbf16, #tpu.memory_space<vmem>>, vector<16x1280xbf16>
    %c0_214 = arith.constant 0 : index
    %c0_215 = arith.constant 0 : index
    %280 = vector.load %arg4[%c0_214, %c0_215] : memref<1280x256xbf16, #tpu.memory_space<vmem>>, vector<1280x256xbf16>
    %cst_216 = arith.constant dense<0.000000e+00> : vector<16x256xf32>
    %281 = tpu.matmul %279, %280, %cst_216 {dimension_numbers = #tpu.dot_dimension_numbers<[1], [0], [0], [1], [0, 0, 1, 1], [], []>} : vector<16x1280xbf16>, vector<1280x256xbf16>, vector<16x256xf32> -> vector<16x256xf32>
    %c0_217 = arith.constant 0 : index
    %c1792_218 = arith.constant 1792 : index
    %282 = vector.load %arg13[%c0_217, %c1792_218] : memref<16x3072xbf16, #tpu.memory_space<vmem>>, vector<16x1280xbf16>
    %c0_219 = arith.constant 0 : index
    %c0_220 = arith.constant 0 : index
    %283 = vector.load %arg4[%c0_219, %c0_220] : memref<1280x256xbf16, #tpu.memory_space<vmem>>, vector<1280x256xbf16>
    %cst_221 = arith.constant dense<0.000000e+00> : vector<16x256xf32>
    %284 = tpu.matmul %282, %283, %cst_221 {dimension_numbers = #tpu.dot_dimension_numbers<[1], [0], [0], [1], [0, 0, 1, 1], [], []>} : vector<16x1280xbf16>, vector<1280x256xbf16>, vector<16x256xf32> -> vector<16x256xf32>
    %285 = arith.maximumf %281, %284 : vector<16x256xf32>
    %286 = vector.extract_strided_slice %285 {offsets = [0, 0], sizes = [16, 128], strides = [1, 1]} : vector<16x256xf32> to vector<16x128xf32>
    %287 = vector.extract_strided_slice %285 {offsets = [0, 128], sizes = [16, 128], strides = [1, 1]} : vector<16x256xf32> to vector<16x128xf32>
    %288 = arith.maximumf %286, %287 : vector<16x128xf32>
    %c0_222 = arith.constant 0 : index
    %c0_223 = arith.constant 0 : index
    %289 = vector.load %arg5[%c0_222, %c0_223] : memref<1x128xf32, #tpu.memory_space<vmem>>, vector<1x128xf32>
    %290 = vector.broadcast %289 : vector<1x128xf32> to vector<16x128xf32>
    %291 = arith.addf %288, %290 : vector<16x128xf32>
    %cst_224 = arith.constant 0.000000e+00 : f32
    %292 = vector.broadcast %cst_224 : f32 to vector<16x128xf32>
    %293 = arith.maximumf %291, %292 : vector<16x128xf32>
    %294 = arith.truncf %293 : vector<16x128xf32> to vector<16x128xbf16>
    %c0_225 = arith.constant 0 : index
    %c384 = arith.constant 384 : index
    %295 = vector.load %arg14[%c0_225, %c384] : memref<16x512xbf16, #tpu.memory_space<vmem>>, vector<16x128xbf16>
    tpu.vector_store %arg14[%c0_225, %c384], %294 {strides = array<i32>} : memref<16x512xbf16, #tpu.memory_space<vmem>>, vector<16x128xbf16>,
    %c0_226 = arith.constant 0 : index
    %c0_227 = arith.constant 0 : index
    %296 = vector.load %arg14[%c0_226, %c0_227] : memref<16x512xbf16, #tpu.memory_space<vmem>>, vector<16x512xbf16>
    %c0_228 = arith.constant 0 : index
    %c0_229 = arith.constant 0 : index
    %297 = vector.load %arg6[%c0_228, %c0_229] : memref<512x128xbf16, #tpu.memory_space<vmem>>, vector<512x128xbf16>
    %cst_230 = arith.constant dense<0.000000e+00> : vector<16x128xf32>
    %298 = tpu.matmul %296, %297, %cst_230 {dimension_numbers = #tpu.dot_dimension_numbers<[1], [0], [0], [1], [0, 0, 1, 1], [], []>} : vector<16x512xbf16>, vector<512x128xbf16>, vector<16x128xf32> -> vector<16x128xf32>
    %c0_231 = arith.constant 0 : index
    %c0_232 = arith.constant 0 : index
    %299 = vector.load %arg7[%c0_231, %c0_232] : memref<1x128xf32, #tpu.memory_space<vmem>>, vector<1x128xf32>
    %300 = vector.broadcast %299 : vector<1x128xf32> to vector<16x128xf32>
    %301 = arith.addf %298, %300 : vector<16x128xf32>
    %cst_233 = arith.constant 0.000000e+00 : f32
    %302 = vector.broadcast %cst_233 : f32 to vector<16x128xf32>
    %303 = arith.maximumf %301, %302 : vector<16x128xf32>
    %304 = arith.truncf %303 : vector<16x128xf32> to vector<16x128xbf16>
    %c0_234 = arith.constant 0 : index
    %c0_235 = arith.constant 0 : index
    %305 = vector.load %arg8[%c0_234, %c0_235] : memref<128x128xbf16, #tpu.memory_space<vmem>>, vector<128x128xbf16>
    %cst_236 = arith.constant dense<0.000000e+00> : vector<16x128xf32>
    %306 = tpu.matmul %304, %305, %cst_236 {dimension_numbers = #tpu.dot_dimension_numbers<[1], [0], [0], [1], [0, 0, 1, 1], [], []>} : vector<16x128xbf16>, vector<128x128xbf16>, vector<16x128xf32> -> vector<16x128xf32>
    %c0_237 = arith.constant 0 : index
    %c0_238 = arith.constant 0 : index
    %307 = vector.load %arg9[%c0_237, %c0_238] : memref<1x128xf32, #tpu.memory_space<vmem>>, vector<1x128xf32>
    %308 = vector.broadcast %307 : vector<1x128xf32> to vector<16x128xf32>
    %309 = arith.addf %306, %308 : vector<16x128xf32>
    %cst_239 = arith.constant 0.000000e+00 : f32
    %310 = vector.broadcast %cst_239 : f32 to vector<16x128xf32>
    %311 = arith.maximumf %309, %310 : vector<16x128xf32>
    %312 = arith.truncf %311 : vector<16x128xf32> to vector<16x128xbf16>
    %c0_240 = arith.constant 0 : index
    %c0_241 = arith.constant 0 : index
    %313 = vector.load %arg10[%c0_240, %c0_241] : memref<128x128xbf16, #tpu.memory_space<vmem>>, vector<128x128xbf16>
    %cst_242 = arith.constant dense<0.000000e+00> : vector<16x128xf32>
    %314 = tpu.matmul %312, %313, %cst_242 {dimension_numbers = #tpu.dot_dimension_numbers<[1], [0], [0], [1], [0, 0, 1, 1], [], []>} : vector<16x128xbf16>, vector<128x128xbf16>, vector<16x128xf32> -> vector<16x128xf32>
    %c0_243 = arith.constant 0 : index
    %c0_244 = arith.constant 0 : index
    %315 = vector.load %arg11[%c0_243, %c0_244] : memref<1x128xf32, #tpu.memory_space<vmem>>, vector<1x128xf32>
    %316 = vector.broadcast %315 : vector<1x128xf32> to vector<16x128xf32>
    %317 = arith.addf %314, %316 : vector<16x128xf32>
    %c0_245 = arith.constant 0 : index
    %c0_246 = arith.constant 0 : index
    %318 = vector.load %arg12[%c0_245, %c0_246] : memref<16x128xf32, #tpu.memory_space<vmem>>, vector<16x128xf32>
    tpu.vector_store %arg12[%c0_245, %c0_246], %317 {strides = array<i32>} : memref<16x128xf32, #tpu.memory_space<vmem>>, vector<16x128xf32>,
    return
  }
  func.func @transform_0(%arg0: i32) -> (i32, i32, i32) {
    %c0_i32 = arith.constant 0 : i32
    %c0_i32_0 = arith.constant 0 : i32
    %c0_i32_1 = arith.constant 0 : i32
    return %c0_i32, %arg0, %c0_i32_0 : i32, i32, i32
  }
  func.func @transform_1(%arg0: i32) -> (i32, i32) {
    %c0_i32 = arith.constant 0 : i32
    %c0_i32_0 = arith.constant 0 : i32
    %c0_i32_1 = arith.constant 0 : i32
    return %c0_i32, %c0_i32_0 : i32, i32
  }
  func.func @transform_2(%arg0: i32) -> (i32, i32) {
    %c0_i32 = arith.constant 0 : i32
    %c0_i32_0 = arith.constant 0 : i32
    %c0_i32_1 = arith.constant 0 : i32
    return %c0_i32, %c0_i32_0 : i32, i32
  }
  func.func @transform_3(%arg0: i32) -> (i32, i32) {
    %c0_i32 = arith.constant 0 : i32
    %c0_i32_0 = arith.constant 0 : i32
    %c0_i32_1 = arith.constant 0 : i32
    return %c0_i32, %c0_i32_0 : i32, i32
  }
  func.func @transform_4(%arg0: i32) -> (i32, i32) {
    %c0_i32 = arith.constant 0 : i32
    %c0_i32_0 = arith.constant 0 : i32
    %c0_i32_1 = arith.constant 0 : i32
    return %c0_i32, %c0_i32_0 : i32, i32
  }
  func.func @transform_5(%arg0: i32) -> (i32, i32) {
    %c0_i32 = arith.constant 0 : i32
    %c0_i32_0 = arith.constant 0 : i32
    %c0_i32_1 = arith.constant 0 : i32
    return %c0_i32, %c0_i32_0 : i32, i32
  }
  func.func @transform_6(%arg0: i32) -> (i32, i32) {
    %c0_i32 = arith.constant 0 : i32
    %c0_i32_0 = arith.constant 0 : i32
    %c0_i32_1 = arith.constant 0 : i32
    return %c0_i32, %c0_i32_0 : i32, i32
  }
  func.func @transform_7(%arg0: i32) -> (i32, i32) {
    %c0_i32 = arith.constant 0 : i32
    %c0_i32_0 = arith.constant 0 : i32
    %c0_i32_1 = arith.constant 0 : i32
    return %c0_i32, %c0_i32_0 : i32, i32
  }
  func.func @transform_8(%arg0: i32) -> (i32, i32) {
    %c0_i32 = arith.constant 0 : i32
    %c0_i32_0 = arith.constant 0 : i32
    %c0_i32_1 = arith.constant 0 : i32
    return %c0_i32, %c0_i32_0 : i32, i32
  }
  func.func @transform_9(%arg0: i32) -> (i32, i32) {
    %c0_i32 = arith.constant 0 : i32
    %c0_i32_0 = arith.constant 0 : i32
    %c0_i32_1 = arith.constant 0 : i32
    return %c0_i32, %c0_i32_0 : i32, i32
  }
  func.func @transform_10(%arg0: i32) -> (i32, i32) {
    %c0_i32 = arith.constant 0 : i32
    %c0_i32_0 = arith.constant 0 : i32
    %c0_i32_1 = arith.constant 0 : i32
    return %c0_i32, %c0_i32_0 : i32, i32
  }
  func.func @transform_11(%arg0: i32) -> (i32, i32) {
    %c0_i32 = arith.constant 0 : i32
    %c0_i32_0 = arith.constant 0 : i32
    return %arg0, %c0_i32 : i32, i32
  }
}

</mosaic_0001>

<bundles_post_ra>
// kernel: lenet_forward.1
= control target key start
LH: loop header
LB: loop body
LE: loop exit
PB: predicated region body
PF: predicated region fallthrough
CT: control target
= control target key end

     0   :  { %vm262_vm0 = vcmask 97280   ;;  %vm266_vm1 = vcmask 1045504   ;;  %vm14775_vm2 = vmmov 0   ;;  %s19389_s1 = inlined_call_operand.vmem [shape: bf16[140,512], index: 1, kind: input, shape index: {}]   ;;  %s19390_s0 = inlined_call_operand.vmem [shape: bf16[24,16,140], index: 0, kind: input, shape index: {}]   ;;  %s19391_s2 = inlined_call_operand.vmem [shape: f32[1,256], index: 2, kind: input, shape index: {}]   ;;  %s19392_s3 = inlined_call_operand.vmem [shape: bf16[1280,256], index: 3, kind: input, shape index: {}]   ;;  %s19393_s4 = inlined_call_operand.vmem [shape: f32[1,128], index: 4, kind: input, shape index: {}]   ;;  %s19394_s5 = inlined_call_operand.vmem [shape: bf16[512,128], index: 5, kind: input, shape index: {}]   ;;  %s19395_s7 = inlined_call_operand.vmem [shape: bf16[128,128], index: 7, kind: input, shape index: {}]   ;;  %s19396_s9 = inlined_call_operand.vmem [shape: bf16[128,128], index: 9, kind: input, shape index: {}]   ;;  %s19397_s6 = inlined_call_operand.vmem [shape: f32[1,128], index: 6, kind: input, shape index: {}]   ;;  %s19398_s8 = inlined_call_operand.vmem [shape: f32[1,128], index: 8, kind: input, shape index: {}]   ;;  %s19399_s10 = inlined_call_operand.vmem [shape: f32[1,128], index: 10, kind: input, shape index: {}]   ;;  %s19400_s11 = inlined_call_operand.vmem [shape: f32[16,128], index: 11, kind: output, shape index: {}]  }
   0x1   :  { %v14839_v0 = vld [vmem:[%s19389_s1 + $0x4] ss:$16 sps:$4 sm:$0xff]   ;;  %v14844_v1 = vld [vmem:[%s19389_s1 + $0xc] ss:$16 sps:$4 sm:$0xff]   ;;  %v14850_v2 = vld [vmem:[%s19389_s1] ss:$16 sps:$4 sm:$0xff]  }
   0x2   :  { %279 = vmatprep.subr.bf16.mxu0 %v14839_v0  ;;  %v14855_v3 = vld [vmem:[%s19389_s1 + $0x8] ss:$16 sps:$4 sm:$0xff]   ;;  %322 = vmatprep.subr.bf16.mxu1 %v14844_v1  ;;  %v14861_v4 = vld [vmem:[%s19389_s1 + $0x24] ss:$16 sps:$4 sm:$0xff]   ;;  %v14868_v5 = vld [vmem:[%s19389_s1 + $0x2c] ss:$16 sps:$4 sm:$0xff]  }
   0x3   :  { %280 = vmatpush1.bf16.msra.mxu0 %v14850_v2  ;;  %323 = vmatpush1.bf16.msra.mxu1 %v14855_v3  ;;  %v14873_v6 = vld [vmem:[%s19389_s1 + $0x20] ss:$16 sps:$4 sm:$0xff]   ;;  %v14879_v7 = vld [vmem:[%s19389_s1 + $0x28] ss:$16 sps:$4 sm:$0xff]   ;;  %v14885_v8 = vld [vmem:[%s19389_s1 + $0x44] ss:$16 sps:$4 sm:$0xff]  }
   0x4   :  { %281 = vmatprep.subr.bf16.mxu0 %v14861_v4  ;;  %324 = vmatprep.subr.bf16.mxu1 %v14868_v5  ;;  %v14890_v9 = vld [vmem:[%s19389_s1 + $0x4c] ss:$16 sps:$4 sm:$0xff]   ;;  %v14895_v10 = vld [vmem:[%s19389_s1 + $0x40] ss:$16 sps:$4 sm:$0xff]   ;;  %v14900_v11 = vld [vmem:[%s19389_s1 + $0x48] ss:$16 sps:$4 sm:$0xff]  }
   0x5   :  { %v14907_v12 = vld [vmem:[%s19389_s1 + $0x64] ss:$16 sps:$4 sm:$0xff]   ;;  %v14914_v13 = vld [vmem:[%s19389_s1 + $0x6c] ss:$16 sps:$4 sm:$0xff]   ;;  %v14919_v14 = vld [vmem:[%s19389_s1 + $0x60] ss:$16 sps:$4 sm:$0xff]  }
   0x6   :  { %v14926_v15 = vld [vmem:[%s19389_s1 + $0x68] ss:$16 sps:$4 sm:$0xff]   ;;  %v14931_v16 = vld [vmem:[%s19389_s1 + $0x84] ss:$16 sps:$4 sm:$0xff]   ;;  %v14938_v17 = vld [vmem:[%s19389_s1 + $0x8c] ss:$16 sps:$4 sm:$0xff]  }
   0x7   :  { %282 = vmatpush1.bf16.msra.mxu0 %v14873_v6  ;;  %325 = vmatpush1.bf16.msra.mxu1 %v14879_v7  ;;  %v14943_v18 = vld [vmem:[%s19389_s1 + $0x80] ss:$16 sps:$4 sm:$0xff]   ;;  %v14948_v19 = vld [vmem:[%s19389_s1 + $0x88] ss:$16 sps:$4 sm:$0xff]   ;;  %v14955_v20 = vld [vmem:[%s19389_s1 + $0xa4] ss:$16 sps:$4 sm:$0xff]  }
   0x8   :  { %283 = vmatprep.subr.bf16.mxu0 %v14885_v8  ;;  %326 = vmatprep.subr.bf16.mxu1 %v14890_v9  ;;  %v14962_v21 = vld [vmem:[%s19389_s1 + $0xac] ss:$16 sps:$4 sm:$0xff]   ;;  %v14969_v22 = vld [vmem:[%s19389_s1 + $0xa0] ss:$16 sps:$4 sm:$0xff]   ;;  %v14974_v23 = vld [vmem:[%s19389_s1 + $0xa8] ss:$16 sps:$4 sm:$0xff]  }
   0x9   :  { %v14981_v24 = vld [vmem:[%s19389_s1 + $0xc4] ss:$16 sps:$4 sm:$0xff]   ;;  %v14986_v25 = vld [vmem:[%s19389_s1 + $0xcc] ss:$16 sps:$4 sm:$0xff]   ;;  %v14991_v26 = vld [vmem:[%s19389_s1 + $0xc0] ss:$16 sps:$4 sm:$0xff]  }
   0xa   :  { %v14996_v27 = vld [vmem:[%s19389_s1 + $0xc8] ss:$16 sps:$4 sm:$0xff]   ;;  %v15001_v28 = vld [vmem:[%s19389_s1 + $0xe4] ss:$16 sps:$4 sm:$0xff]   ;;  %v15011_v30 = vld [vmem:[%s19389_s1 + $0xec] ss:$16 sps:$4 sm:$0xff]  }
   0xb   :  { %284 = vmatpush1.bf16.msra.mxu0 %v14895_v10  ;;  %327 = vmatpush1.bf16.msra.mxu1 %v14900_v11  ;;  %v13488_v29 = vld [vmem:[%s19390_s0 + $0x4] ss:$8 sps:$4 sm:$0xff]   ;;  %v75_v32 = vld [vmem:[%s19389_s1 + $0x110] sm:$0x33]  ;;  %v76_v34 = vld [vmem:[%s19389_s1 + $0x118] sm:$0x33] }
   0xc   :  { %285 = vmatprep.subr.bf16.mxu0 %v14907_v12  ;;  %328 = vmatprep.subr.bf16.mxu1 %v14914_v13  ;;  %v15018_v31 = vld [vmem:[%s19389_s1 + $0x100] sm:$0xff]  ;;  %v15026_v33 = vld [vmem:[%s19389_s1 + $0x108] sm:$0xff]  ;;  %v13489_v44 = vld [vmem:[%s19390_s0 + $0x14] ss:$8 sps:$4 sm:$0xff]  }
   0xd   :  { %11924 = vmatprep.mubr.msk.bf16.mxu0 %vm262_vm0, %v13488_v29  ;;  %11926 = vmatprep.mubr.msk.bf16.mxu1 %vm262_vm0, %v13488_v29  ;;  %v15038_v35 = vld [vmem:[%s19389_s1 + $0xe0] ss:$16 sps:$4 sm:$0xff]   ;;  %v15043_v36 = vld [vmem:[%s19389_s1 + $0xe8] ss:$16 sps:$4 sm:$0xff]   ;;  %v11920_v37 = vcombine.high %v15018_v31, %v75_v32  ;;  %v11922_v38 = vcombine.high %v15026_v33, %v76_v34  ;;  %v11919_v39 = vcombine.low %v15018_v31, %v75_v32  ;;  %v13496_v46 = vld [vmem:[%s19390_s0 + $0x24] ss:$8 sps:$4 sm:$0xff]  }
   0xe   :  { %v11921_v40 = vcombine.low %v15026_v33, %v76_v34  ;;  %v13486_v43 = vld [vmem:[%s19390_s0] ss:$8 sps:$4 sm:$0xff]   ;;  %v13491_v45 = vld [vmem:[%s19390_s0 + $0x10] ss:$8 sps:$4 sm:$0xff]   ;;  %v13499_v56 = vld [vmem:[%s19390_s0 + $0x34] ss:$8 sps:$4 sm:$0xff]  }
   0xf   :  { %286 = vmatpush1.bf16.msra.mxu0 %v14919_v14  ;;  %329 = vmatpush1.bf16.msra.mxu1 %v14926_v15  ;;  %v268_v41 = vsel %vm266_vm1, %v11919_v39, 0  ;;  %v539_v47 = vld [vmem:[%s19389_s1 + $0x110] sm:$0x33]  ;;  %v540_v48 = vld [vmem:[%s19389_s1 + $0x118] sm:$0x33] }
  0x10   :  { %287 = vmatprep.subr.bf16.mxu0 %v14931_v16  ;;  %330 = vmatprep.subr.bf16.mxu1 %v14938_v17  ;;  %v274_v42 = vsel %vm266_vm1, %v11921_v40, 0  ;;  %v11972_v49 = vcombine.high %v15018_v31, %v539_v47  ;;  %v11974_v50 = vcombine.high %v15026_v33, %v540_v48  ;;  %v11971_v51 = vcombine.low %v15018_v31, %v539_v47  ;;  %v13498_v55 = vld [vmem:[%s19390_s0 + $0x20] ss:$8 sps:$4 sm:$0xff]   ;;  %v13501_v57 = vld [vmem:[%s19390_s0 + $0x30] ss:$8 sps:$4 sm:$0xff]  }
  0x11   :  { %v11973_v52 = vcombine.low %v15026_v33, %v540_v48  ;;  %v13506_v58 = vld [vmem:[%s19390_s0 + $0x44] ss:$8 sps:$4 sm:$0xff]   ;;  %v1001_v59 = vld [vmem:[%s19389_s1 + $0x110] sm:$0x33]  ;;  %v1002_v60 = vld [vmem:[%s19389_s1 + $0x118] sm:$0x33] }
  0x12   :  { %v730_v53 = vsel %vm266_vm1, %v11971_v51, 0  ;;  %v12024_v61 = vcombine.high %v15018_v31, %v1001_v59  ;;  %v12026_v62 = vcombine.high %v15026_v33, %v1002_v60  ;;  %v12023_v63 = vcombine.low %v15018_v31, %v1001_v59  ;;  %v13511_v39 = vld [vmem:[%s19390_s0 + $0x50] ss:$8 sps:$4 sm:$0xff]   ;;  %v13516_v40 = vld [vmem:[%s19390_s0 + $0x64] ss:$8 sps:$4 sm:$0xff]  }
  0x13   :  { %288 = vmatpush1.bf16.msra.mxu0 %v14943_v18  ;;  %331 = vmatpush1.bf16.msra.mxu1 %v14948_v19  ;;  %v736_v54 = vsel %vm266_vm1, %v11973_v52, 0  ;;  %v12025_v29 = vcombine.low %v15026_v33, %v1002_v60  ;;  %v14764_v47 = vld [vmem:[%s19389_s1 + $0x40] ss:$16 sps:$4 sm:$0xff]   ;;  %v14765_v48 = vld [vmem:[%s19389_s1 + $0x48] ss:$16 sps:$4 sm:$0xff]  }
  0x14   :  { %289 = vmatprep.subr.bf16.mxu0 %v14955_v20  ;;  %332 = vmatprep.subr.bf16.mxu1 %v14962_v21  ;;  %v1192_v32 = vsel %vm266_vm1, %v12023_v63, 0  ;;  %v14768_v51 = vld [vmem:[%s19389_s1 + $0x60] ss:$16 sps:$4 sm:$0xff]   ;;  %v14769_v52 = vld [vmem:[%s19389_s1 + $0x68] ss:$16 sps:$4 sm:$0xff]  }
  0x15   :  { %v1198_v34 = vsel %vm266_vm1, %v12025_v29, 0  ;;  %v13521_v59 = vld [vmem:[%s19390_s0 + $0x70] ss:$8 sps:$4 sm:$0xff]  }
  0x17   :  { %290 = vmatpush1.bf16.msra.mxu0 %v14969_v22  ;;  %333 = vmatpush1.bf16.msra.mxu1 %v14974_v23 }
  0x18   :  { %291 = vmatprep.subr.bf16.mxu0 %v14981_v24  ;;  %334 = vmatprep.subr.bf16.mxu1 %v14986_v25 }
  0x1b   :  { %292 = vmatpush1.bf16.msra.mxu0 %v14991_v26  ;;  %335 = vmatpush1.bf16.msra.mxu1 %v14996_v27 }
  0x1c   :  { %293 = vmatprep.subr.bf16.mxu0 %v15001_v28  ;;  %336 = vmatprep.subr.bf16.mxu1 %v15011_v30 }
  0x1f   :  { %294 = vmatpush1.bf16.msra.mxu0 %v15038_v35  ;;  %337 = vmatpush1.bf16.msra.mxu1 %v15043_v36 }
  0x20   :  { %11923 = vmatprep.subr.msk.bf16.mxu0 %vm266_vm1, %v11920_v37  ;;  %11925 = vmatprep.subr.msk.bf16.mxu1 %vm266_vm1, %v11922_v38 }
  0x23   :  { %296 = vmatpush1.bf16.msra.mxu0 %v268_v41  ;;  %339 = vmatpush1.bf16.msra.mxu1 %v274_v42 }
  0x24   :  { %380 = vmatprep.subr.bf16.mxu0 %v14839_v0  ;;  %423 = vmatprep.subr.bf16.mxu1 %v14844_v1 }
  0x26   :  { %312 = vmatmul.mubr.bf16.vlgmr.msra.gmra.mrb[0].mxu0 %v13486_v43  ;;  %355 = vmatmul.mubr.bf16.vlgmr.msra.gmra.mrb[0].mxu1 %v13486_v43  ;;  %v14760_v43 = vld [vmem:[%s19389_s1 + $0x20] ss:$16 sps:$4 sm:$0xff]  }
  0x27   :  { %381 = vmatpush1.bf16.msra.mxu0 %v14850_v2  ;;  %424 = vmatpush1.bf16.msra.mxu1 %v14855_v3 }
  0x28   :  { %382 = vmatprep.subr.bf16.mxu0 %v14861_v4  ;;  %425 = vmatprep.subr.bf16.mxu1 %v14868_v5 }
  0x29   :  { %11932 = vmatprep.mubr.msk.bf16.mxu0 %vm262_vm0, %v13489_v44  ;;  %11934 = vmatprep.mubr.msk.bf16.mxu1 %vm262_vm0, %v13489_v44  ;;  %v14761_v44 = vld [vmem:[%s19389_s1 + $0x28] ss:$16 sps:$4 sm:$0xff]  }
  0x2b   :  { %383 = vmatpush1.bf16.msra.mxu0 %v14873_v6  ;;  %426 = vmatpush1.bf16.msra.mxu1 %v14879_v7 }
  0x2c   :  { %384 = vmatprep.subr.bf16.mxu0 %v14885_v8  ;;  %427 = vmatprep.subr.bf16.mxu1 %v14890_v9 }
  0x2f   :  { %385 = vmatpush1.bf16.msra.mxu0 %v14895_v10  ;;  %428 = vmatpush1.bf16.msra.mxu1 %v14900_v11 }
  0x30   :  { %386 = vmatprep.subr.bf16.mxu0 %v14907_v12  ;;  %429 = vmatprep.subr.bf16.mxu1 %v14914_v13 }
  0x33   :  { %387 = vmatpush1.bf16.msra.mxu0 %v14919_v14  ;;  %430 = vmatpush1.bf16.msra.mxu1 %v14926_v15 }
  0x34   :  { %388 = vmatprep.subr.bf16.mxu0 %v14931_v16  ;;  %431 = vmatprep.subr.bf16.mxu1 %v14938_v17 }
  0x37   :  { %389 = vmatpush1.bf16.msra.mxu0 %v14943_v18  ;;  %432 = vmatpush1.bf16.msra.mxu1 %v14948_v19 }
  0x38   :  { %390 = vmatprep.subr.bf16.mxu0 %v14955_v20  ;;  %433 = vmatprep.subr.bf16.mxu1 %v14962_v21 }
  0x3b   :  { %391 = vmatpush1.bf16.msra.mxu0 %v14969_v22  ;;  %434 = vmatpush1.bf16.msra.mxu1 %v14974_v23 }
  0x3c   :  { %392 = vmatprep.subr.bf16.mxu0 %v14981_v24  ;;  %435 = vmatprep.subr.bf16.mxu1 %v14986_v25 }
  0x3f   :  { %393 = vmatpush1.bf16.msra.mxu0 %v14991_v26  ;;  %436 = vmatpush1.bf16.msra.mxu1 %v14996_v27 }
  0x40   :  { %394 = vmatprep.subr.bf16.mxu0 %v15001_v28  ;;  %437 = vmatprep.subr.bf16.mxu1 %v15011_v30 }
  0x43   :  { %395 = vmatpush1.bf16.msra.mxu0 %v15038_v35  ;;  %438 = vmatpush1.bf16.msra.mxu1 %v15043_v36 }
  0x44   :  { %11931 = vmatprep.subr.msk.bf16.mxu0 %vm266_vm1, %v11920_v37  ;;  %11933 = vmatprep.subr.msk.bf16.mxu1 %vm266_vm1, %v11922_v38  ;;  %v13508_v37 = vld [vmem:[%s19390_s0 + $0x40] ss:$8 sps:$4 sm:$0xff]   ;;  %v13509_v38 = vld [vmem:[%s19390_s0 + $0x54] ss:$8 sps:$4 sm:$0xff]  }
  0x47   :  { %397 = vmatpush1.bf16.msra.mxu0 %v268_v41  ;;  %440 = vmatpush1.bf16.msra.mxu1 %v274_v42  ;;  %v14758_v41 = vld [vmem:[%s19389_s1 + $0x24] ss:$16 sps:$4 sm:$0xff]   ;;  %v14759_v42 = vld [vmem:[%s19389_s1 + $0x2c] ss:$16 sps:$4 sm:$0xff]  }
  0x48   :  { %741 = vmatprep.subr.bf16.mxu0 %v14839_v0  ;;  %784 = vmatprep.subr.bf16.mxu1 %v14844_v1 }
  0x4a   :  { %413 = vmatmul.mubr.bf16.vlgmr.msra.gmra.mrb[4].mxu0 %v13491_v45  ;;  %456 = vmatmul.mubr.bf16.vlgmr.msra.gmra.mrb[4].mxu1 %v13491_v45  ;;  %v14762_v45 = vld [vmem:[%s19389_s1 + $0x44] ss:$16 sps:$4 sm:$0xff]  }
  0x4b   :  { %742 = vmatpush1.bf16.msra.mxu0 %v14850_v2  ;;  %785 = vmatpush1.bf16.msra.mxu1 %v14855_v3 }
  0x4c   :  { %743 = vmatprep.subr.bf16.mxu0 %v14861_v4  ;;  %786 = vmatprep.subr.bf16.mxu1 %v14868_v5 }
  0x4d   :  { %11976 = vmatprep.mubr.msk.bf16.mxu0 %vm262_vm0, %v13496_v46  ;;  %11978 = vmatprep.mubr.msk.bf16.mxu1 %vm262_vm0, %v13496_v46  ;;  %v14763_v46 = vld [vmem:[%s19389_s1 + $0x4c] ss:$16 sps:$4 sm:$0xff]  }
  0x4f   :  { %744 = vmatpush1.bf16.msra.mxu0 %v14873_v6  ;;  %787 = vmatpush1.bf16.msra.mxu1 %v14879_v7 }
  0x50   :  { %745 = vmatprep.subr.bf16.mxu0 %v14885_v8  ;;  %788 = vmatprep.subr.bf16.mxu1 %v14890_v9 }
  0x53   :  { %746 = vmatpush1.bf16.msra.mxu0 %v14895_v10  ;;  %789 = vmatpush1.bf16.msra.mxu1 %v14900_v11 }
  0x54   :  { %747 = vmatprep.subr.bf16.mxu0 %v14907_v12  ;;  %790 = vmatprep.subr.bf16.mxu1 %v14914_v13 }
  0x57   :  { %748 = vmatpush1.bf16.msra.mxu0 %v14919_v14  ;;  %791 = vmatpush1.bf16.msra.mxu1 %v14926_v15 }
  0x58   :  { %749 = vmatprep.subr.bf16.mxu0 %v14931_v16  ;;  %792 = vmatprep.subr.bf16.mxu1 %v14938_v17 }
  0x5b   :  { %750 = vmatpush1.bf16.msra.mxu0 %v14943_v18  ;;  %793 = vmatpush1.bf16.msra.mxu1 %v14948_v19 }
  0x5c   :  { %751 = vmatprep.subr.bf16.mxu0 %v14955_v20  ;;  %794 = vmatprep.subr.bf16.mxu1 %v14962_v21 }
  0x5f   :  { %752 = vmatpush1.bf16.msra.mxu0 %v14969_v22  ;;  %795 = vmatpush1.bf16.msra.mxu1 %v14974_v23 }
  0x60   :  { %753 = vmatprep.subr.bf16.mxu0 %v14981_v24  ;;  %796 = vmatprep.subr.bf16.mxu1 %v14986_v25 }
  0x63   :  { %754 = vmatpush1.bf16.msra.mxu0 %v14991_v26  ;;  %797 = vmatpush1.bf16.msra.mxu1 %v14996_v27 }
  0x64   :  { %755 = vmatprep.subr.bf16.mxu0 %v15001_v28  ;;  %798 = vmatprep.subr.bf16.mxu1 %v15011_v30 }
  0x67   :  { %756 = vmatpush1.bf16.msra.mxu0 %v15038_v35  ;;  %799 = vmatpush1.bf16.msra.mxu1 %v15043_v36 }
  0x68   :  { %11975 = vmatprep.subr.msk.bf16.mxu0 %vm266_vm1, %v11972_v49  ;;  %11977 = vmatprep.subr.msk.bf16.mxu1 %vm266_vm1, %v11974_v50 }
  0x6b   :  { %758 = vmatpush1.bf16.msra.mxu0 %v730_v53  ;;  %801 = vmatpush1.bf16.msra.mxu1 %v736_v54 }
  0x6c   :  { %842 = vmatprep.subr.bf16.mxu0 %v14839_v0  ;;  %885 = vmatprep.subr.bf16.mxu1 %v14844_v1 }
  0x6e   :  { %774 = vmatmul.mubr.bf16.vlgmr.msra.gmra.mrb[8].mxu0 %v13498_v55  ;;  %817 = vmatmul.mubr.bf16.vlgmr.msra.gmra.mrb[8].mxu1 %v13498_v55  ;;  %v14772_v55 = vld [vmem:[%s19389_s1 + $0x80] ss:$16 sps:$4 sm:$0xff]  }
  0x6f   :  { %843 = vmatpush1.bf16.msra.mxu0 %v14850_v2  ;;  %886 = vmatpush1.bf16.msra.mxu1 %v14855_v3 }
  0x70   :  { %844 = vmatprep.subr.bf16.mxu0 %v14861_v4  ;;  %887 = vmatprep.subr.bf16.mxu1 %v14868_v5 }
  0x71   :  { %11984 = vmatprep.mubr.msk.bf16.mxu0 %vm262_vm0, %v13499_v56  ;;  %11986 = vmatprep.mubr.msk.bf16.mxu1 %vm262_vm0, %v13499_v56  ;;  %v14773_v56 = vld [vmem:[%s19389_s1 + $0x88] ss:$16 sps:$4 sm:$0xff]  }
  0x73   :  { %845 = vmatpush1.bf16.msra.mxu0 %v14873_v6  ;;  %888 = vmatpush1.bf16.msra.mxu1 %v14879_v7 }
  0x74   :  { %846 = vmatprep.subr.bf16.mxu0 %v14885_v8  ;;  %889 = vmatprep.subr.bf16.mxu1 %v14890_v9 }
  0x77   :  { %847 = vmatpush1.bf16.msra.mxu0 %v14895_v10  ;;  %890 = vmatpush1.bf16.msra.mxu1 %v14900_v11 }
  0x78   :  { %848 = vmatprep.subr.bf16.mxu0 %v14907_v12  ;;  %891 = vmatprep.subr.bf16.mxu1 %v14914_v13 }
  0x7b   :  { %849 = vmatpush1.bf16.msra.mxu0 %v14919_v14  ;;  %892 = vmatpush1.bf16.msra.mxu1 %v14926_v15 }
  0x7c   :  { %850 = vmatprep.subr.bf16.mxu0 %v14931_v16  ;;  %893 = vmatprep.subr.bf16.mxu1 %v14938_v17 }
  0x7f   :  { %851 = vmatpush1.bf16.msra.mxu0 %v14943_v18  ;;  %894 = vmatpush1.bf16.msra.mxu1 %v14948_v19 }
  0x80   :  { %852 = vmatprep.subr.bf16.mxu0 %v14955_v20  ;;  %895 = vmatprep.subr.bf16.mxu1 %v14962_v21 }
  0x83   :  { %853 = vmatpush1.bf16.msra.mxu0 %v14969_v22  ;;  %896 = vmatpush1.bf16.msra.mxu1 %v14974_v23 }
  0x84   :  { %854 = vmatprep.subr.bf16.mxu0 %v14981_v24  ;;  %897 = vmatprep.subr.bf16.mxu1 %v14986_v25 }
  0x87   :  { %855 = vmatpush1.bf16.msra.mxu0 %v14991_v26  ;;  %898 = vmatpush1.bf16.msra.mxu1 %v14996_v27 }
  0x88   :  { %856 = vmatprep.subr.bf16.mxu0 %v15001_v28  ;;  %899 = vmatprep.subr.bf16.mxu1 %v15011_v30 }
  0x8b   :  { %857 = vmatpush1.bf16.msra.mxu0 %v15038_v35  ;;  %900 = vmatpush1.bf16.msra.mxu1 %v15043_v36 }
  0x8c   :  { %11983 = vmatprep.subr.msk.bf16.mxu0 %vm266_vm1, %v11972_v49  ;;  %11985 = vmatprep.subr.msk.bf16.mxu1 %vm266_vm1, %v11974_v50  ;;  %v14766_v49 = vld [vmem:[%s19389_s1 + $0x64] ss:$16 sps:$4 sm:$0xff]   ;;  %v14767_v50 = vld [vmem:[%s19389_s1 + $0x6c] ss:$16 sps:$4 sm:$0xff]  }
  0x8f   :  { %859 = vmatpush1.bf16.msra.mxu0 %v730_v53  ;;  %902 = vmatpush1.bf16.msra.mxu1 %v736_v54  ;;  %v14770_v53 = vld [vmem:[%s19389_s1 + $0x84] ss:$16 sps:$4 sm:$0xff]   ;;  %v14771_v54 = vld [vmem:[%s19389_s1 + $0x8c] ss:$16 sps:$4 sm:$0xff]  }
  0x90   :  { %1203 = vmatprep.subr.bf16.mxu0 %v14839_v0  ;;  %1246 = vmatprep.subr.bf16.mxu1 %v14844_v1 }
  0x92   :  { %875 = vmatmul.mubr.bf16.vlgmr.msra.gmra.mrb[12].mxu0 %v13501_v57  ;;  %918 = vmatmul.mubr.bf16.vlgmr.msra.gmra.mrb[12].mxu1 %v13501_v57  ;;  %v480_v57 = vlaneseq }
  0x93   :  { %1204 = vmatpush1.bf16.msra.mxu0 %v14850_v2  ;;  %1247 = vmatpush1.bf16.msra.mxu1 %v14855_v3 }
  0x94   :  { %1205 = vmatprep.subr.bf16.mxu0 %v14861_v4  ;;  %1248 = vmatprep.subr.bf16.mxu1 %v14868_v5 }
  0x95   :  { %12028 = vmatprep.mubr.msk.bf16.mxu0 %vm262_vm0, %v13506_v58  ;;  %12030 = vmatprep.mubr.msk.bf16.mxu1 %vm262_vm0, %v13506_v58  ;;  %v481_v58 = vshrl.u32 %v480_v57, 7  ;;  %v15638_v57 = vld [vmem:[%s19389_s1 + $0xcc] ss:$16 sps:$4 sm:$0xff]  }
  0x97   :  { %1206 = vmatpush1.bf16.msra.mxu0 %v14873_v6  ;;  %1249 = vmatpush1.bf16.msra.mxu1 %v14879_v7 }
  0x98   :  { %1207 = vmatprep.subr.bf16.mxu0 %v14885_v8  ;;  %1250 = vmatprep.subr.bf16.mxu1 %v14890_v9 }
  0x9b   :  { %1208 = vmatpush1.bf16.msra.mxu0 %v14895_v10  ;;  %1251 = vmatpush1.bf16.msra.mxu1 %v14900_v11 }
  0x9c   :  { %1209 = vmatprep.subr.bf16.mxu0 %v14907_v12  ;;  %1252 = vmatprep.subr.bf16.mxu1 %v14914_v13 }
  0x9f   :  { %1210 = vmatpush1.bf16.msra.mxu0 %v14919_v14  ;;  %1253 = vmatpush1.bf16.msra.mxu1 %v14926_v15 }
  0xa0   :  { %1211 = vmatprep.subr.bf16.mxu0 %v14931_v16  ;;  %1254 = vmatprep.subr.bf16.mxu1 %v14938_v17 }
  0xa3   :  { %1212 = vmatpush1.bf16.msra.mxu0 %v14943_v18  ;;  %1255 = vmatpush1.bf16.msra.mxu1 %v14948_v19 }
  0xa4   :  { %1213 = vmatprep.subr.bf16.mxu0 %v14955_v20  ;;  %1256 = vmatprep.subr.bf16.mxu1 %v14962_v21 }
  0xa7   :  { %1214 = vmatpush1.bf16.msra.mxu0 %v14969_v22  ;;  %1257 = vmatpush1.bf16.msra.mxu1 %v14974_v23 }
  0xa8   :  { %1215 = vmatprep.subr.bf16.mxu0 %v14981_v24  ;;  %1258 = vmatprep.subr.bf16.mxu1 %v14986_v25 }
  0xab   :  { %1216 = vmatpush1.bf16.msra.mxu0 %v14991_v26  ;;  %1259 = vmatpush1.bf16.msra.mxu1 %v14996_v27 }
  0xac   :  { %1217 = vmatprep.subr.bf16.mxu0 %v15001_v28  ;;  %1260 = vmatprep.subr.bf16.mxu1 %v15011_v30 }
  0xaf   :  { %1218 = vmatpush1.bf16.msra.mxu0 %v15038_v35  ;;  %1261 = vmatpush1.bf16.msra.mxu1 %v15043_v36 }
  0xb0   :  { %12027 = vmatprep.subr.msk.bf16.mxu0 %vm266_vm1, %v12024_v61  ;;  %12029 = vmatprep.subr.msk.bf16.mxu1 %vm266_vm1, %v12026_v62 }
  0xb3   :  { %1220 = vmatpush1.bf16.msra.mxu0 %v1192_v32  ;;  %1263 = vmatpush1.bf16.msra.mxu1 %v1198_v34 }
  0xb4   :  { %1304 = vmatprep.subr.bf16.mxu0 %v14839_v0  ;;  %1347 = vmatprep.subr.bf16.mxu1 %v14844_v1 }
  0xb6   :  { %1236 = vmatmul.mubr.bf16.vlgmr.msra.gmra.mrb[16].mxu0 %v13508_v37  ;;  %1279 = vmatmul.mubr.bf16.vlgmr.msra.gmra.mrb[16].mxu1 %v13508_v37 }
  0xb7   :  { %1305 = vmatpush1.bf16.msra.mxu0 %v14850_v2  ;;  %1348 = vmatpush1.bf16.msra.mxu1 %v14855_v3 }
  0xb8   :  { %1306 = vmatprep.subr.bf16.mxu0 %v14861_v4  ;;  %1349 = vmatprep.subr.bf16.mxu1 %v14868_v5 }
  0xb9   :  { %12036 = vmatprep.mubr.msk.bf16.mxu0 %vm262_vm0, %v13509_v38  ;;  %12038 = vmatprep.mubr.msk.bf16.mxu1 %vm262_vm0, %v13509_v38 }
  0xbb   :  { %1307 = vmatpush1.bf16.msra.mxu0 %v14873_v6  ;;  %1350 = vmatpush1.bf16.msra.mxu1 %v14879_v7 }
  0xbc   :  { %1308 = vmatprep.subr.bf16.mxu0 %v14885_v8  ;;  %1351 = vmatprep.subr.bf16.mxu1 %v14890_v9 }
  0xbf   :  { %1309 = vmatpush1.bf16.msra.mxu0 %v14895_v10  ;;  %1352 = vmatpush1.bf16.msra.mxu1 %v14900_v11 }
  0xc0   :  { %1310 = vmatprep.subr.bf16.mxu0 %v14907_v12  ;;  %1353 = vmatprep.subr.bf16.mxu1 %v14914_v13 }
  0xc3   :  { %1311 = vmatpush1.bf16.msra.mxu0 %v14919_v14  ;;  %1354 = vmatpush1.bf16.msra.mxu1 %v14926_v15 }
  0xc4   :  { %1312 = vmatprep.subr.bf16.mxu0 %v14931_v16  ;;  %1355 = vmatprep.subr.bf16.mxu1 %v14938_v17 }
  0xc7   :  { %1313 = vmatpush1.bf16.msra.mxu0 %v14943_v18  ;;  %1356 = vmatpush1.bf16.msra.mxu1 %v14948_v19 }
  0xc8   :  { %1314 = vmatprep.subr.bf16.mxu0 %v14955_v20  ;;  %1357 = vmatprep.subr.bf16.mxu1 %v14962_v21 }
  0xcb   :  { %1315 = vmatpush1.bf16.msra.mxu0 %v14969_v22  ;;  %1358 = vmatpush1.bf16.msra.mxu1 %v14974_v23 }
  0xcc   :  { %1316 = vmatprep.subr.bf16.mxu0 %v14981_v24  ;;  %1359 = vmatprep.subr.bf16.mxu1 %v14986_v25 }
  0xcf   :  { %1317 = vmatpush1.bf16.msra.mxu0 %v14991_v26  ;;  %1360 = vmatpush1.bf16.msra.mxu1 %v14996_v27 }
  0xd0   :  { %1318 = vmatprep.subr.bf16.mxu0 %v15001_v28  ;;  %1361 = vmatprep.subr.bf16.mxu1 %v15011_v30 }
  0xd3   :  { %1319 = vmatpush1.bf16.msra.mxu0 %v15038_v35  ;;  %1362 = vmatpush1.bf16.msra.mxu1 %v15043_v36 }
  0xd4   :  { %12035 = vmatprep.subr.msk.bf16.mxu0 %vm266_vm1, %v12024_v61  ;;  %12037 = vmatprep.subr.msk.bf16.mxu1 %vm266_vm1, %v12026_v62 }
  0xd7   :  { %1321 = vmatpush1.bf16.msra.mxu0 %v1192_v32  ;;  %1364 = vmatpush1.bf16.msra.mxu1 %v1198_v34  ;;  %v15488_v32 = vld [vmem:[%s19389_s1] ss:$16 sps:$4 sm:$0xff]   ;;  %v15493_v34 = vld [vmem:[%s19389_s1 + $0x8] ss:$16 sps:$4 sm:$0xff]  }
  0xd8   :  { %1665 = vmatprep.subr.bf16.mxu0 %v14839_v0  ;;  %1708 = vmatprep.subr.bf16.mxu1 %v14844_v1  ;;  %v1463_v0 = vld [vmem:[%s19389_s1 + $0x110] sm:$0x33]  ;;  %v1464_v1 = vld [vmem:[%s19389_s1 + $0x118] sm:$0x33] }
  0xda   :  { %1337 = vmatmul.mubr.bf16.vlgmr.msra.gmra.mrb[20].mxu0 %v13511_v39  ;;  %1380 = vmatmul.mubr.bf16.vlgmr.msra.gmra.mrb[20].mxu1 %v13511_v39 }
  0xdb   :  { %1666 = vmatpush1.bf16.msra.mxu0 %v14850_v2  ;;  %1709 = vmatpush1.bf16.msra.mxu1 %v14855_v3  ;;  %v15334_v2 = vcombine.high %v15018_v31, %v1463_v0  ;;  %v15339_v3 = vcombine.high %v15026_v33, %v1464_v1 }
  0xdc   :  { %1667 = vmatprep.subr.bf16.mxu0 %v14861_v4  ;;  %1710 = vmatprep.subr.bf16.mxu1 %v14868_v5  ;;  %v12075_v4 = vcombine.low %v15018_v31, %v1463_v0  ;;  %v12077_v5 = vcombine.low %v15026_v33, %v1464_v1  ;;  %v14756_v31 = vld [vmem:[%s19389_s1] ss:$16 sps:$4 sm:$0xff]   ;;  %v14757_v33 = vld [vmem:[%s19389_s1 + $0x8] ss:$16 sps:$4 sm:$0xff]   ;;  %v15502_v1 = vld [vmem:[%s19389_s1 + $0x24] ss:$16 sps:$4 sm:$0xff]  }
  0xdd   :  { %12080 = vmatprep.mubr.msk.bf16.mxu0 %vm262_vm0, %v13516_v40  ;;  %12082 = vmatprep.mubr.msk.bf16.mxu1 %vm262_vm0, %v13516_v40 }
  0xdf   :  { %1668 = vmatpush1.bf16.msra.mxu0 %v14873_v6  ;;  %1711 = vmatpush1.bf16.msra.mxu1 %v14879_v7  ;;  %v15350_v6 = vsel %vm266_vm1, %v12075_v4, 0  ;;  %v15353_v7 = vsel %vm266_vm1, %v12077_v5, 0 }
  0xe0   :  { %1669 = vmatprep.subr.bf16.mxu0 %v14885_v8  ;;  %1712 = vmatprep.subr.bf16.mxu1 %v14890_v9 }
  0xe3   :  { %1670 = vmatpush1.bf16.msra.mxu0 %v14895_v10  ;;  %1713 = vmatpush1.bf16.msra.mxu1 %v14900_v11 }
  0xe4   :  { %1671 = vmatprep.subr.bf16.mxu0 %v14907_v12  ;;  %1714 = vmatprep.subr.bf16.mxu1 %v14914_v13  ;;  %v13518_v12 = vld [vmem:[%s19390_s0 + $0x60] ss:$8 sps:$4 sm:$0xff]  }
  0xe7   :  { %1672 = vmatpush1.bf16.msra.mxu0 %v14919_v14  ;;  %1715 = vmatpush1.bf16.msra.mxu1 %v14926_v15 }
  0xe8   :  { %1673 = vmatprep.subr.bf16.mxu0 %v14931_v16  ;;  %1716 = vmatprep.subr.bf16.mxu1 %v14938_v17  ;;  %v14754_v17 = vld [vmem:[%s19389_s1 + $0x4] ss:$16 sps:$4 sm:$0xff]  }
  0xeb   :  { %1674 = vmatpush1.bf16.msra.mxu0 %v14943_v18  ;;  %1717 = vmatpush1.bf16.msra.mxu1 %v14948_v19  ;;  %v14755_v18 = vld [vmem:[%s19389_s1 + $0xc] ss:$16 sps:$4 sm:$0xff]  }
  0xec   :  { %1675 = vmatprep.subr.bf16.mxu0 %v14955_v20  ;;  %1718 = vmatprep.subr.bf16.mxu1 %v14962_v21  ;;  %v13519_v19 = vld [vmem:[%s19390_s0 + $0x74] ss:$8 sps:$4 sm:$0xff]  }
  0xef   :  { %1676 = vmatpush1.bf16.msra.mxu0 %v14969_v22  ;;  %1719 = vmatpush1.bf16.msra.mxu1 %v14974_v23 }
  0xf0   :  { %1677 = vmatprep.subr.bf16.mxu0 %v14981_v24  ;;  %1720 = vmatprep.subr.bf16.mxu1 %v14986_v25 }
  0xf3   :  { %1678 = vmatpush1.bf16.msra.mxu0 %v14991_v26  ;;  %1721 = vmatpush1.bf16.msra.mxu1 %v14996_v27 }
  0xf4   :  { %1679 = vmatprep.subr.bf16.mxu0 %v15001_v28  ;;  %1722 = vmatprep.subr.bf16.mxu1 %v15011_v30 }
  0xf7   :  { %1680 = vmatpush1.bf16.msra.mxu0 %v15038_v35  ;;  %1723 = vmatpush1.bf16.msra.mxu1 %v15043_v36 }
  0xf8   :  { %12079 = vmatprep.subr.msk.bf16.mxu0 %vm266_vm1, %v15334_v2  ;;  %12081 = vmatprep.subr.msk.bf16.mxu1 %vm266_vm1, %v15339_v3 }
  0xf9   :  { %v15355_v8 = vpop.f32.mrb[0].mxu0  ;;  %v15357_v9 = vpop.f32.mrb[0].mxu1 }
  0xfa   :  { %v15359_v10 = vpop.f32.mrb[1].mxu0  ;;  %v15361_v11 = vpop.f32.mrb[1].mxu1 }
  0xfb   :  { %v15366_v13 = vpop.f32.mrb[2].mxu0  ;;  %v15368_v14 = vpop.f32.mrb[2].mxu1  ;;  %1682 = vmatpush1.bf16.msra.mxu0 %v15350_v6  ;;  %1725 = vmatpush1.bf16.msra.mxu1 %v15353_v7 }
  0xfc   :  { %v15372_v15 = vpop.f32.mrb[3].mxu0  ;;  %v15374_v16 = vpop.f32.mrb[3].mxu1  ;;  %1766 = vmatprep.subr.bf16.mxu0 %v14754_v17  ;;  %1809 = vmatprep.subr.bf16.mxu1 %v14755_v18 }
  0xfe   :  { %1698 = vmatmul.mubr.bf16.vlgmr.msra.gmra.mrb[24].mxu0 %v13518_v12  ;;  %1741 = vmatmul.mubr.bf16.vlgmr.msra.gmra.mrb[24].mxu1 %v13518_v12  ;;  %v15524_v12 = vld [vmem:[%s19389_s1 + $0x28] ss:$16 sps:$4 sm:$0xff]  }
  0xff   :  { %1767 = vmatpush1.bf16.msra.mxu0 %v14756_v31  ;;  %1810 = vmatpush1.bf16.msra.mxu1 %v14757_v33  ;;  %v15545_v33 = vld [vmem:[%s19389_s1 + $0x40] ss:$16 sps:$4 sm:$0xff]  }
 0x100   :  { %1768 = vmatprep.subr.bf16.mxu0 %v14758_v41  ;;  %1811 = vmatprep.subr.bf16.mxu1 %v14759_v42  ;;  %v15550_v41 = vld [vmem:[%s19389_s1 + $0x48] ss:$16 sps:$4 sm:$0xff]  }
 0x101   :  { %12088 = vmatprep.mubr.msk.bf16.mxu0 %vm262_vm0, %v13519_v19  ;;  %12090 = vmatprep.mubr.msk.bf16.mxu1 %vm262_vm0, %v13519_v19 }
 0x103   :  { %1769 = vmatpush1.bf16.msra.mxu0 %v14760_v43  ;;  %1812 = vmatpush1.bf16.msra.mxu1 %v14761_v44  ;;  %v15559_v43 = vld [vmem:[%s19389_s1 + $0x64] ss:$16 sps:$4 sm:$0xff]   ;;  %v15564_v44 = vld [vmem:[%s19389_s1 + $0x6c] ss:$16 sps:$4 sm:$0xff]  }
 0x104   :  { %1770 = vmatprep.subr.bf16.mxu0 %v14762_v45  ;;  %1813 = vmatprep.subr.bf16.mxu1 %v14763_v46  ;;  %v15573_v46 = vld [vmem:[%s19389_s1 + $0x60] ss:$16 sps:$4 sm:$0xff]  }
 0x107   :  { %1771 = vmatpush1.bf16.msra.mxu0 %v14764_v47  ;;  %1814 = vmatpush1.bf16.msra.mxu1 %v14765_v48  ;;  %v15578_v47 = vld [vmem:[%s19389_s1 + $0x68] ss:$16 sps:$4 sm:$0xff]   ;;  %v15585_v48 = vld [vmem:[%s19389_s1 + $0x84] ss:$16 sps:$4 sm:$0xff]  }
 0x108   :  { %1772 = vmatprep.subr.bf16.mxu0 %v14766_v49  ;;  %1815 = vmatprep.subr.bf16.mxu1 %v14767_v50  ;;  %v15590_v49 = vld [vmem:[%s19389_s1 + $0x8c] ss:$16 sps:$4 sm:$0xff]   ;;  %v15597_v50 = vld [vmem:[%s19389_s1 + $0x80] ss:$16 sps:$4 sm:$0xff]  }
 0x10b   :  { %1773 = vmatpush1.bf16.msra.mxu0 %v14768_v51  ;;  %1816 = vmatpush1.bf16.msra.mxu1 %v14769_v52  ;;  %v15602_v51 = vld [vmem:[%s19389_s1 + $0x88] ss:$16 sps:$4 sm:$0xff]   ;;  %v15609_v52 = vld [vmem:[%s19389_s1 + $0xa4] ss:$16 sps:$4 sm:$0xff]  }
 0x10c   :  { %1774 = vmatprep.subr.bf16.mxu0 %v14770_v53  ;;  %1817 = vmatprep.subr.bf16.mxu1 %v14771_v54  ;;  %v15614_v53 = vld [vmem:[%s19389_s1 + $0xac] ss:$16 sps:$4 sm:$0xff]   ;;  %v15621_v54 = vld [vmem:[%s19389_s1 + $0xa0] ss:$16 sps:$4 sm:$0xff]  }
 0x10f   :  { %1775 = vmatpush1.bf16.msra.mxu0 %v14772_v55  ;;  %1818 = vmatpush1.bf16.msra.mxu1 %v14773_v56  ;;  %v15626_v55 = vld [vmem:[%s19389_s1 + $0xa8] ss:$16 sps:$4 sm:$0xff]   ;;  %v15633_v56 = vld [vmem:[%s19389_s1 + $0xc4] ss:$16 sps:$4 sm:$0xff]  }
 0x110   :  { %1776 = vmatprep.subr.bf16.mxu0 %v14955_v20  ;;  %1819 = vmatprep.subr.bf16.mxu1 %v14962_v21  ;;  %v15451_v20 = vsub.s32 0, %v481_v58  ;;  %v478_v21 = vld [vmem:[%s19391_s2] sm:$0x3] }
 0x113   :  { %1777 = vmatpush1.bf16.msra.mxu0 %v14969_v22  ;;  %1820 = vmatpush1.bf16.msra.mxu1 %v14974_v23  ;;  %v15458_v22 = vsub.s32 1, %v481_v58  ;;  %v15467_v23 = vld [vmem:[%s19389_s1 + $0x4] ss:$16 sps:$4 sm:$0xff]   ;;  %v15645_v58 = vld [vmem:[%s19389_s1 + $0xc0] ss:$16 sps:$4 sm:$0xff]  }
 0x114   :  { %1778 = vmatprep.subr.bf16.mxu0 %v14981_v24  ;;  %1821 = vmatprep.subr.bf16.mxu1 %v14986_v25  ;;  %v15472_v24 = vld [vmem:[%s19389_s1 + $0xc] ss:$16 sps:$4 sm:$0xff]  }
 0x115   :  { %v487_v62 = vrot.slane %v478_v21, %v15458_v22 }
 0x117   :  { %1779 = vmatpush1.bf16.msra.mxu0 %v14991_v26  ;;  %1822 = vmatpush1.bf16.msra.mxu1 %v14996_v27 }
 0x118   :  { %1780 = vmatprep.subr.bf16.mxu0 %v15001_v28  ;;  %1823 = vmatprep.subr.bf16.mxu1 %v15011_v30  ;;  %v483_v30 = vrot.slane %v478_v21, %v15451_v20  ;;  %v15650_v21 = vld [vmem:[%s19389_s1 + $0xc8] ss:$16 sps:$4 sm:$0xff]  }
 0x11b   :  { %1781 = vmatpush1.bf16.msra.mxu0 %v15038_v35  ;;  %1824 = vmatpush1.bf16.msra.mxu1 %v15043_v36 }
 0x11c   :  { %12087 = vmatprep.subr.msk.bf16.mxu0 %vm266_vm1, %v15334_v2  ;;  %12089 = vmatprep.subr.msk.bf16.mxu1 %vm266_vm1, %v15339_v3  ;;  %v15507_v2 = vld [vmem:[%s19389_s1 + $0x2c] ss:$16 sps:$4 sm:$0xff]  }
 0x11d   :  { %v414_v25 = vpop.f32.mrb[4].mxu0  ;;  %v457_v26 = vpop.f32.mrb[4].mxu1 }
 0x11e   :  { %v466_v27 = vmax.f32 %v15355_v8, %v414_v25  ;;  %v468_v28 = vmax.f32 %v15357_v9, %v457_v26  ;;  %v416_v35 = vpop.f32.mrb[5].mxu0  ;;  %v459_v36 = vpop.f32.mrb[5].mxu1  ;;  %v15655_v25 = vld [vmem:[%s19389_s1 + $0xe4] ss:$16 sps:$4 sm:$0xff]   ;;  %v15662_v26 = vld [vmem:[%s19389_s1 + $0xec] ss:$16 sps:$4 sm:$0xff]  }
 0x11f   :  { %v467_v60 = vmax.f32 %v15359_v10, %v416_v35  ;;  %v469_v61 = vmax.f32 %v15361_v11, %v459_v36  ;;  %v418_v63 = vpop.f32.mrb[6].mxu0  ;;  %v461_v29 = vpop.f32.mrb[6].mxu1  ;;  %1783 = vmatpush1.bf16.msra.mxu0 %v15350_v6  ;;  %1826 = vmatpush1.bf16.msra.mxu1 %v15353_v7  ;;  %v13574_v6 = vld [vmem:[%s19390_s0 + $0x84] ss:$8 sps:$4 sm:$0xff]   ;;  %v15519_v11 = vld [vmem:[%s19389_s1 + $0x20] ss:$16 sps:$4 sm:$0xff]  }
 0x120   :  { %v474_v37 = vmax.f32 %v466_v27, %v468_v28  ;;  %v470_v38 = vmax.f32 %v15366_v13, %v418_v63  ;;  %v472_v39 = vmax.f32 %v15368_v14, %v461_v29  ;;  %v420_v40 = vpop.f32.mrb[7].mxu0  ;;  %v463_v0 = vpop.f32.mrb[7].mxu1  ;;  %2127 = vmatprep.subr.bf16.mxu0 %v15467_v23  ;;  %2170 = vmatprep.subr.bf16.mxu1 %v15472_v24  ;;  %v15531_v14 = vld [vmem:[%s19389_s1 + $0x44] ss:$16 sps:$4 sm:$0xff]   ;;  %v1926_v35 = vld [vmem:[%s19389_s1 + $0x118] sm:$0x33] }
 0x121   :  { %v475_v3 = vmax.f32 %v467_v60, %v469_v61  ;;  %v471_v4 = vmax.f32 %v15372_v15, %v420_v40  ;;  %v473_v5 = vmax.f32 %v15374_v16, %v463_v0  ;;  %v15536_v15 = vld [vmem:[%s19389_s1 + $0x4c] ss:$16 sps:$4 sm:$0xff]   ;;  %v15667_v27 = vld [vmem:[%s19389_s1 + $0x100] sm:$0xff]  ;;  %v1925_v28 = vld [vmem:[%s19389_s1 + $0x110] sm:$0x33] }
 0x122   :  { %v490_v7 = vadd.f32 %v483_v30, %v474_v37  ;;  %v476_v8 = vmax.f32 %v470_v38, %v472_v39  ;;  %1799 = vmatmul.mubr.bf16.vlgmr.msra.gmra.mrb[28].mxu0 %v13521_v59  ;;  %1842 = vmatmul.mubr.bf16.vlgmr.msra.gmra.mrb[28].mxu1 %v13521_v59  ;;  %v15685_v36 = vld [vmem:[%s19389_s1 + $0xe0] ss:$16 sps:$4 sm:$0xff]   ;;  %v15690_v59 = vld [vmem:[%s19389_s1 + $0xe8] ss:$16 sps:$4 sm:$0xff]   ;;  %v12128_v60 = vcombine.high %v15667_v27, %v1925_v28 }
 0x123   :  { %v491_v9 = vadd.f32 %v487_v62, %v475_v3  ;;  %v477_v10 = vmax.f32 %v471_v4, %v473_v5  ;;  %2128 = vmatpush1.bf16.msra.mxu0 %v15488_v32  ;;  %2171 = vmatpush1.bf16.msra.mxu1 %v15493_v34  ;;  %v13576_v3 = vld [vmem:[%s19390_s0 + $0x80] ss:$8 sps:$4 sm:$0xff]  }
 0x124   :  { %v492_v13 = vadd.f32 %v483_v30, %v476_v8  ;;  %2129 = vmatprep.subr.bf16.mxu0 %v15502_v1  ;;  %2172 = vmatprep.subr.bf16.mxu1 %v15507_v2  ;;  %v494_v17 = vmax.f32 %v490_v7, 0.0  ;;  %v15675_v30 = vld [vmem:[%s19389_s1 + $0x108] sm:$0xff]  ;;  %v13577_v8 = vld [vmem:[%s19390_s0 + $0x94] ss:$8 sps:$4 sm:$0xff]  }
 0x125   :  { %v493_v16 = vadd.f32 %v487_v62, %v477_v10  ;;  %12132 = vmatprep.mubr.msk.bf16.mxu0 %vm262_vm0, %v13574_v6  ;;  %12134 = vmatprep.mubr.msk.bf16.mxu1 %vm262_vm0, %v13574_v6  ;;  %v495_v19 = vmax.f32 %v491_v9, 0.0  ;;  %v12130_v61 = vcombine.high %v15675_v30, %v1926_v35  ;;  %v12127_v62 = vcombine.low %v15667_v27, %v1925_v28  ;;  %v940_v9 = vld [vmem:[%s19391_s2] sm:$0x3]  ;;  %v13579_v28 = vld [vmem:[%s19390_s0 + $0x90] ss:$8 sps:$4 sm:$0xff]  }
 0x126   :  { %v496_v18 = vmax.f32 %v492_v13, 0.0  ;;  %v12129_v63 = vcombine.low %v15675_v30, %v1926_v35 }
 0x127   :  { %v497_v31 = vmax.f32 %v493_v16, 0.0  ;;  %2130 = vmatpush1.bf16.msra.mxu0 %v15519_v11  ;;  %2173 = vmatpush1.bf16.msra.mxu1 %v15524_v12  ;;  %v15703_v29 = vsel %vm266_vm1, %v12127_v62, 0 }
 0x128   :  { %v15552_v42 = vpack.c.bf16 %v496_v18, %v494_v17  ;;  %2131 = vmatprep.subr.bf16.mxu0 %v15531_v14  ;;  %2174 = vmatprep.subr.bf16.mxu1 %v15536_v15  ;;  %v15706_v37 = vsel %vm266_vm1, %v12129_v63, 0  ;;  %v945_v18 = vrot.slane %v940_v9, %v15451_v20 }
 0x129   :  { %v15566_v45 = vpack.c.bf16 %v497_v31, %v495_v19 }
 0x12b   :  { %2132 = vmatpush1.bf16.msra.mxu0 %v15545_v33  ;;  %2175 = vmatpush1.bf16.msra.mxu1 %v15550_v41 }
 0x12c   :  { %2133 = vmatprep.subr.bf16.mxu0 %v15559_v43  ;;  %2176 = vmatprep.subr.bf16.mxu1 %v15564_v44 }
 0x12f   :  { %2134 = vmatpush1.bf16.msra.mxu0 %v15573_v46  ;;  %2177 = vmatpush1.bf16.msra.mxu1 %v15578_v47 }
 0x130   :  { %2135 = vmatprep.subr.bf16.mxu0 %v15585_v48  ;;  %2178 = vmatprep.subr.bf16.mxu1 %v15590_v49 }
 0x133   :  { %2136 = vmatpush1.bf16.msra.mxu0 %v15597_v50  ;;  %2179 = vmatpush1.bf16.msra.mxu1 %v15602_v51 }
 0x134   :  { %2137 = vmatprep.subr.bf16.mxu0 %v15609_v52  ;;  %2180 = vmatprep.subr.bf16.mxu1 %v15614_v53 }
 0x137   :  { %2138 = vmatpush1.bf16.msra.mxu0 %v15621_v54  ;;  %2181 = vmatpush1.bf16.msra.mxu1 %v15626_v55 }
 0x138   :  { %2139 = vmatprep.subr.bf16.mxu0 %v15633_v56  ;;  %2182 = vmatprep.subr.bf16.mxu1 %v15638_v57 }
 0x13b   :  { %2140 = vmatpush1.bf16.msra.mxu0 %v15645_v58  ;;  %2183 = vmatpush1.bf16.msra.mxu1 %v15650_v21 }
 0x13c   :  { %2141 = vmatprep.subr.bf16.mxu0 %v15655_v25  ;;  %2184 = vmatprep.subr.bf16.mxu1 %v15662_v26 }
 0x13f   :  { %2142 = vmatpush1.bf16.msra.mxu0 %v15685_v36  ;;  %2185 = vmatpush1.bf16.msra.mxu1 %v15690_v59 }
 0x140   :  { %12131 = vmatprep.subr.msk.bf16.mxu0 %vm266_vm1, %v12128_v60  ;;  %12133 = vmatprep.subr.msk.bf16.mxu1 %vm266_vm1, %v12130_v61 }
 0x141   :  { %v15708_v38 = vpop.f32.mrb[8].mxu0  ;;  %v15710_v39 = vpop.f32.mrb[8].mxu1 }
 0x142   :  { %v15712_v40 = vpop.f32.mrb[9].mxu0  ;;  %v15714_v0 = vpop.f32.mrb[9].mxu1 }
 0x143   :  { %v15719_v4 = vpop.f32.mrb[10].mxu0  ;;  %v15721_v5 = vpop.f32.mrb[10].mxu1  ;;  %2144 = vmatpush1.bf16.msra.mxu0 %v15703_v29  ;;  %2187 = vmatpush1.bf16.msra.mxu1 %v15706_v37 }
 0x144   :  { %v15725_v6 = vpop.f32.mrb[11].mxu0  ;;  %v15727_v7 = vpop.f32.mrb[11].mxu1  ;;  %2228 = vmatprep.subr.bf16.mxu0 %v15467_v23  ;;  %2271 = vmatprep.subr.bf16.mxu1 %v15472_v24 }
 0x146   :  { %2160 = vmatmul.mubr.bf16.vlgmr.msra.gmra.mrb[32].mxu0 %v13576_v3  ;;  %2203 = vmatmul.mubr.bf16.vlgmr.msra.gmra.mrb[32].mxu1 %v13576_v3 }
 0x147   :  { %2229 = vmatpush1.bf16.msra.mxu0 %v15488_v32  ;;  %2272 = vmatpush1.bf16.msra.mxu1 %v15493_v34 }
 0x148   :  { %2230 = vmatprep.subr.bf16.mxu0 %v15502_v1  ;;  %2273 = vmatprep.subr.bf16.mxu1 %v15507_v2 }
 0x149   :  { %12140 = vmatprep.mubr.msk.bf16.mxu0 %vm262_vm0, %v13577_v8  ;;  %12142 = vmatprep.mubr.msk.bf16.mxu1 %vm262_vm0, %v13577_v8 }
 0x14b   :  { %2231 = vmatpush1.bf16.msra.mxu0 %v15519_v11  ;;  %2274 = vmatpush1.bf16.msra.mxu1 %v15524_v12 }
 0x14c   :  { %2232 = vmatprep.subr.bf16.mxu0 %v15531_v14  ;;  %2275 = vmatprep.subr.bf16.mxu1 %v15536_v15 }
 0x14f   :  { %2233 = vmatpush1.bf16.msra.mxu0 %v15545_v33  ;;  %2276 = vmatpush1.bf16.msra.mxu1 %v15550_v41 }
 0x150   :  { %2234 = vmatprep.subr.bf16.mxu0 %v15559_v43  ;;  %2277 = vmatprep.subr.bf16.mxu1 %v15564_v44 }
 0x153   :  { %2235 = vmatpush1.bf16.msra.mxu0 %v15573_v46  ;;  %2278 = vmatpush1.bf16.msra.mxu1 %v15578_v47 }
 0x154   :  { %2236 = vmatprep.subr.bf16.mxu0 %v15585_v48  ;;  %2279 = vmatprep.subr.bf16.mxu1 %v15590_v49 }
 0x157   :  { %2237 = vmatpush1.bf16.msra.mxu0 %v15597_v50  ;;  %2280 = vmatpush1.bf16.msra.mxu1 %v15602_v51 }
 0x158   :  { %2238 = vmatprep.subr.bf16.mxu0 %v15609_v52  ;;  %2281 = vmatprep.subr.bf16.mxu1 %v15614_v53 }
 0x15b   :  { %2239 = vmatpush1.bf16.msra.mxu0 %v15621_v54  ;;  %2282 = vmatpush1.bf16.msra.mxu1 %v15626_v55 }
 0x15c   :  { %2240 = vmatprep.subr.bf16.mxu0 %v15633_v56  ;;  %2283 = vmatprep.subr.bf16.mxu1 %v15638_v57 }
 0x15f   :  { %2241 = vmatpush1.bf16.msra.mxu0 %v15645_v58  ;;  %2284 = vmatpush1.bf16.msra.mxu1 %v15650_v21 }
 0x160   :  { %2242 = vmatprep.subr.bf16.mxu0 %v15655_v25  ;;  %2285 = vmatprep.subr.bf16.mxu1 %v15662_v26 }
 0x163   :  { %2243 = vmatpush1.bf16.msra.mxu0 %v15685_v36  ;;  %2286 = vmatpush1.bf16.msra.mxu1 %v15690_v59 }
 0x164   :  { %12139 = vmatprep.subr.msk.bf16.mxu0 %vm266_vm1, %v12128_v60  ;;  %12141 = vmatprep.subr.msk.bf16.mxu1 %vm266_vm1, %v12130_v61  ;;  %v949_v61 = vrot.slane %v940_v9, %v15458_v22 }
 0x165   :  { %v876_v10 = vpop.f32.mrb[12].mxu0  ;;  %v919_v13 = vpop.f32.mrb[12].mxu1 }
 0x166   :  { %v928_v16 = vmax.f32 %v15708_v38, %v876_v10  ;;  %v930_v17 = vmax.f32 %v15710_v39, %v919_v13  ;;  %v878_v19 = vpop.f32.mrb[13].mxu0  ;;  %v921_v31 = vpop.f32.mrb[13].mxu1 }
 0x167   :  { %v929_v35 = vmax.f32 %v15712_v40, %v878_v19  ;;  %v931_v60 = vmax.f32 %v15714_v0, %v921_v31  ;;  %v880_v62 = vpop.f32.mrb[14].mxu0  ;;  %v923_v63 = vpop.f32.mrb[14].mxu1  ;;  %2245 = vmatpush1.bf16.msra.mxu0 %v15703_v29  ;;  %2288 = vmatpush1.bf16.msra.mxu1 %v15706_v37  ;;  %v13584_v29 = vld [vmem:[%s19390_s0 + $0xa4] ss:$8 sps:$4 sm:$0xff]  }
 0x168   :  { %v936_v38 = vmax.f32 %v928_v16, %v930_v17  ;;  %v932_v39 = vmax.f32 %v15719_v4, %v880_v62  ;;  %v934_v3 = vmax.f32 %v15721_v5, %v923_v63  ;;  %v882_v8 = vpop.f32.mrb[15].mxu0  ;;  %v925_v10 = vpop.f32.mrb[15].mxu1  ;;  %2589 = vmatprep.subr.bf16.mxu0 %v15467_v23  ;;  %2632 = vmatprep.subr.bf16.mxu1 %v15472_v24 }
 0x169   :  { %v937_v40 = vmax.f32 %v929_v35, %v931_v60  ;;  %v933_v0 = vmax.f32 %v15725_v6, %v882_v8  ;;  %v935_v9 = vmax.f32 %v15727_v7, %v925_v10  ;;  %v2387_v35 = vld [vmem:[%s19389_s1 + $0x110] sm:$0x33]  ;;  %v2388_v60 = vld [vmem:[%s19389_s1 + $0x118] sm:$0x33] }
 0x16a   :  { %v952_v37 = vadd.f32 %v945_v18, %v936_v38  ;;  %v938_v13 = vmax.f32 %v932_v39, %v934_v3  ;;  %2261 = vmatmul.mubr.bf16.vlgmr.msra.gmra.mrb[36].mxu0 %v13579_v28  ;;  %2304 = vmatmul.mubr.bf16.vlgmr.msra.gmra.mrb[36].mxu1 %v13579_v28  ;;  %v12182_v62 = vcombine.high %v15675_v30, %v2388_v60 }
 0x16b   :  { %v953_v4 = vadd.f32 %v949_v61, %v937_v40  ;;  %v939_v5 = vmax.f32 %v933_v0, %v935_v9  ;;  %2590 = vmatpush1.bf16.msra.mxu0 %v15488_v32  ;;  %2633 = vmatpush1.bf16.msra.mxu1 %v15493_v34  ;;  %v12179_v63 = vcombine.low %v15667_v27, %v2387_v35  ;;  %v13586_v9 = vld [vmem:[%s19390_s0 + $0xa0] ss:$8 sps:$4 sm:$0xff]  }
 0x16c   :  { %v954_v16 = vadd.f32 %v945_v18, %v938_v13  ;;  %2591 = vmatprep.subr.bf16.mxu0 %v15502_v1  ;;  %2634 = vmatprep.subr.bf16.mxu1 %v15507_v2  ;;  %v956_v7 = vmax.f32 %v952_v37, 0.0  ;;  %v12181_v38 = vcombine.low %v15675_v30, %v2388_v60 }
 0x16d   :  { %v955_v6 = vadd.f32 %v949_v61, %v939_v5  ;;  %12184 = vmatprep.mubr.msk.bf16.mxu0 %vm262_vm0, %v13584_v29  ;;  %12186 = vmatprep.mubr.msk.bf16.mxu1 %vm262_vm0, %v13584_v29  ;;  %v957_v19 = vmax.f32 %v953_v4, 0.0  ;;  %v12180_v61 = vcombine.high %v15667_v27, %v2387_v35  ;;  %v15840_v39 = vsel %vm266_vm1, %v12179_v63, 0  ;;  %v13587_v5 = vld [vmem:[%s19390_s0 + $0xb4] ss:$8 sps:$4 sm:$0xff]   ;;  %v13589_v63 = vld [vmem:[%s19390_s0 + $0xb0] ss:$8 sps:$4 sm:$0xff]  }
 0x16e   :  { %v958_v17 = vmax.f32 %v954_v16, 0.0  ;;  %v15843_v3 = vsel %vm266_vm1, %v12181_v38, 0  ;;  %v1402_v16 = vld [vmem:[%s19391_s2] sm:$0x3] }
 0x16f   :  { %v959_v31 = vmax.f32 %v955_v6, 0.0  ;;  %2592 = vmatpush1.bf16.msra.mxu0 %v15519_v11  ;;  %2635 = vmatpush1.bf16.msra.mxu1 %v15524_v12 }
 0x170   :  { %v15799_v28 = vpack.c.bf16 %v958_v17, %v956_v7  ;;  %2593 = vmatprep.subr.bf16.mxu0 %v15531_v14  ;;  %2636 = vmatprep.subr.bf16.mxu1 %v15536_v15 }
 0x171   :  { %v15803_v18 = vpack.c.bf16 %v959_v31, %v957_v19  ;;  %v1407_v31 = vrot.slane %v1402_v16, %v15451_v20 }
 0x172   :  { %19412 = vst [vmem:[#allocation4_spill] sm:$0xff] %v15799_v28 }
 0x173   :  { %2594 = vmatpush1.bf16.msra.mxu0 %v15545_v33  ;;  %2637 = vmatpush1.bf16.msra.mxu1 %v15550_v41 }
 0x174   :  { %2595 = vmatprep.subr.bf16.mxu0 %v15559_v43  ;;  %2638 = vmatprep.subr.bf16.mxu1 %v15564_v44 }
 0x177   :  { %2596 = vmatpush1.bf16.msra.mxu0 %v15573_v46  ;;  %2639 = vmatpush1.bf16.msra.mxu1 %v15578_v47 }
 0x178   :  { %2597 = vmatprep.subr.bf16.mxu0 %v15585_v48  ;;  %2640 = vmatprep.subr.bf16.mxu1 %v15590_v49 }
 0x17b   :  { %2598 = vmatpush1.bf16.msra.mxu0 %v15597_v50  ;;  %2641 = vmatpush1.bf16.msra.mxu1 %v15602_v51 }
 0x17c   :  { %2599 = vmatprep.subr.bf16.mxu0 %v15609_v52  ;;  %2642 = vmatprep.subr.bf16.mxu1 %v15614_v53 }
 0x17f   :  { %2600 = vmatpush1.bf16.msra.mxu0 %v15621_v54  ;;  %2643 = vmatpush1.bf16.msra.mxu1 %v15626_v55 }
 0x180   :  { %2601 = vmatprep.subr.bf16.mxu0 %v15633_v56  ;;  %2644 = vmatprep.subr.bf16.mxu1 %v15638_v57 }
 0x183   :  { %2602 = vmatpush1.bf16.msra.mxu0 %v15645_v58  ;;  %2645 = vmatpush1.bf16.msra.mxu1 %v15650_v21 }
 0x184   :  { %2603 = vmatprep.subr.bf16.mxu0 %v15655_v25  ;;  %2646 = vmatprep.subr.bf16.mxu1 %v15662_v26 }
 0x187   :  { %2604 = vmatpush1.bf16.msra.mxu0 %v15685_v36  ;;  %2647 = vmatpush1.bf16.msra.mxu1 %v15690_v59 }
 0x188   :  { %12183 = vmatprep.subr.msk.bf16.mxu0 %vm266_vm1, %v12180_v61  ;;  %12185 = vmatprep.subr.msk.bf16.mxu1 %vm266_vm1, %v12182_v62 }
 0x189   :  { %v15845_v8 = vpop.f32.mrb[16].mxu0  ;;  %v15847_v10 = vpop.f32.mrb[16].mxu1 }
 0x18a   :  { %v15849_v40 = vpop.f32.mrb[17].mxu0  ;;  %v15851_v0 = vpop.f32.mrb[17].mxu1 }
 0x18b   :  { %v15856_v29 = vpop.f32.mrb[18].mxu0  ;;  %v15858_v37 = vpop.f32.mrb[18].mxu1  ;;  %2606 = vmatpush1.bf16.msra.mxu0 %v15840_v39  ;;  %2649 = vmatpush1.bf16.msra.mxu1 %v15843_v3 }
 0x18c   :  { %v15862_v13 = vpop.f32.mrb[19].mxu0  ;;  %v15864_v4 = vpop.f32.mrb[19].mxu1  ;;  %2690 = vmatprep.subr.bf16.mxu0 %v15467_v23  ;;  %2733 = vmatprep.subr.bf16.mxu1 %v15472_v24 }
 0x18e   :  { %2622 = vmatmul.mubr.bf16.vlgmr.msra.gmra.mrb[40].mxu0 %v13586_v9  ;;  %2665 = vmatmul.mubr.bf16.vlgmr.msra.gmra.mrb[40].mxu1 %v13586_v9 }
 0x18f   :  { %2691 = vmatpush1.bf16.msra.mxu0 %v15488_v32  ;;  %2734 = vmatpush1.bf16.msra.mxu1 %v15493_v34 }
 0x190   :  { %2692 = vmatprep.subr.bf16.mxu0 %v15502_v1  ;;  %2735 = vmatprep.subr.bf16.mxu1 %v15507_v2 }
 0x191   :  { %12192 = vmatprep.mubr.msk.bf16.mxu0 %vm262_vm0, %v13587_v5  ;;  %12194 = vmatprep.mubr.msk.bf16.mxu1 %vm262_vm0, %v13587_v5 }
 0x193   :  { %2693 = vmatpush1.bf16.msra.mxu0 %v15519_v11  ;;  %2736 = vmatpush1.bf16.msra.mxu1 %v15524_v12 }
 0x194   :  { %2694 = vmatprep.subr.bf16.mxu0 %v15531_v14  ;;  %2737 = vmatprep.subr.bf16.mxu1 %v15536_v15 }
 0x197   :  { %2695 = vmatpush1.bf16.msra.mxu0 %v15545_v33  ;;  %2738 = vmatpush1.bf16.msra.mxu1 %v15550_v41 }
 0x198   :  { %2696 = vmatprep.subr.bf16.mxu0 %v15559_v43  ;;  %2739 = vmatprep.subr.bf16.mxu1 %v15564_v44 }
 0x19b   :  { %2697 = vmatpush1.bf16.msra.mxu0 %v15573_v46  ;;  %2740 = vmatpush1.bf16.msra.mxu1 %v15578_v47 }
 0x19c   :  { %2698 = vmatprep.subr.bf16.mxu0 %v15585_v48  ;;  %2741 = vmatprep.subr.bf16.mxu1 %v15590_v49 }
 0x19f   :  { %2699 = vmatpush1.bf16.msra.mxu0 %v15597_v50  ;;  %2742 = vmatpush1.bf16.msra.mxu1 %v15602_v51 }
 0x1a0   :  { %2700 = vmatprep.subr.bf16.mxu0 %v15609_v52  ;;  %2743 = vmatprep.subr.bf16.mxu1 %v15614_v53 }
 0x1a3   :  { %2701 = vmatpush1.bf16.msra.mxu0 %v15621_v54  ;;  %2744 = vmatpush1.bf16.msra.mxu1 %v15626_v55 }
 0x1a4   :  { %2702 = vmatprep.subr.bf16.mxu0 %v15633_v56  ;;  %2745 = vmatprep.subr.bf16.mxu1 %v15638_v57 }
 0x1a7   :  { %2703 = vmatpush1.bf16.msra.mxu0 %v15645_v58  ;;  %2746 = vmatpush1.bf16.msra.mxu1 %v15650_v21 }
 0x1a8   :  { %2704 = vmatprep.subr.bf16.mxu0 %v15655_v25  ;;  %2747 = vmatprep.subr.bf16.mxu1 %v15662_v26 }
 0x1ab   :  { %2705 = vmatpush1.bf16.msra.mxu0 %v15685_v36  ;;  %2748 = vmatpush1.bf16.msra.mxu1 %v15690_v59 }
 0x1ac   :  { %12191 = vmatprep.subr.msk.bf16.mxu0 %vm266_vm1, %v12180_v61  ;;  %12193 = vmatprep.subr.msk.bf16.mxu1 %vm266_vm1, %v12182_v62  ;;  %v1411_v62 = vrot.slane %v1402_v16, %v15458_v22 }
 0x1ad   :  { %v1338_v6 = vpop.f32.mrb[20].mxu0  ;;  %v1381_v7 = vpop.f32.mrb[20].mxu1 }
 0x1ae   :  { %v1390_v17 = vmax.f32 %v15845_v8, %v1338_v6  ;;  %v1392_v19 = vmax.f32 %v15847_v10, %v1381_v7  ;;  %v1340_v35 = vpop.f32.mrb[21].mxu0  ;;  %v1383_v60 = vpop.f32.mrb[21].mxu1 }
 0x1af   :  { %v1391_v38 = vmax.f32 %v15849_v40, %v1340_v35  ;;  %v1393_v61 = vmax.f32 %v15851_v0, %v1383_v60  ;;  %v1342_v9 = vpop.f32.mrb[22].mxu0  ;;  %v1385_v5 = vpop.f32.mrb[22].mxu1  ;;  %2707 = vmatpush1.bf16.msra.mxu0 %v15840_v39  ;;  %2750 = vmatpush1.bf16.msra.mxu1 %v15843_v3  ;;  %v13594_v39 = vld [vmem:[%s19390_s0 + $0xc4] ss:$8 sps:$4 sm:$0xff]  }
 0x1b0   :  { %v1398_v8 = vmax.f32 %v1390_v17, %v1392_v19  ;;  %v1394_v10 = vmax.f32 %v15856_v29, %v1342_v9  ;;  %v1396_v6 = vmax.f32 %v15858_v37, %v1385_v5  ;;  %v1344_v7 = vpop.f32.mrb[23].mxu0  ;;  %v1387_v28 = vpop.f32.mrb[23].mxu1  ;;  %3051 = vmatprep.subr.bf16.mxu0 %v15467_v23  ;;  %3094 = vmatprep.subr.bf16.mxu1 %v15472_v24 }
 0x1b1   :  { %v1399_v40 = vmax.f32 %v1391_v38, %v1393_v61  ;;  %v1395_v0 = vmax.f32 %v15862_v13, %v1344_v7  ;;  %v1397_v16 = vmax.f32 %v15864_v4, %v1387_v28  ;;  %v2849_v38 = vld [vmem:[%s19389_s1 + $0x110] sm:$0x33]  ;;  %v2850_v61 = vld [vmem:[%s19389_s1 + $0x118] sm:$0x33] }
 0x1b2   :  { %v1414_v3 = vadd.f32 %v1407_v31, %v1398_v8  ;;  %v1400_v17 = vmax.f32 %v1394_v10, %v1396_v6  ;;  %2723 = vmatmul.mubr.bf16.vlgmr.msra.gmra.mrb[44].mxu0 %v13589_v63  ;;  %2766 = vmatmul.mubr.bf16.vlgmr.msra.gmra.mrb[44].mxu1 %v13589_v63  ;;  %v12234_v9 = vcombine.high %v15675_v30, %v2850_v61 }
 0x1b3   :  { %v1415_v29 = vadd.f32 %v1411_v62, %v1399_v40  ;;  %v1401_v37 = vmax.f32 %v1395_v0, %v1397_v16  ;;  %3052 = vmatpush1.bf16.msra.mxu0 %v15488_v32  ;;  %3095 = vmatpush1.bf16.msra.mxu1 %v15493_v34  ;;  %v12231_v5 = vcombine.low %v15667_v27, %v2849_v38  ;;  %v13596_v0 = vld [vmem:[%s19390_s0 + $0xc0] ss:$8 sps:$4 sm:$0xff]  }
 0x1b4   :  { %v1416_v19 = vadd.f32 %v1407_v31, %v1400_v17  ;;  %3053 = vmatprep.subr.bf16.mxu0 %v15502_v1  ;;  %3096 = vmatprep.subr.bf16.mxu1 %v15507_v2  ;;  %v1418_v13 = vmax.f32 %v1414_v3, 0.0  ;;  %v12233_v8 = vcombine.low %v15675_v30, %v2850_v61 }
 0x1b5   :  { %v1417_v28 = vadd.f32 %v1411_v62, %v1401_v37  ;;  %12236 = vmatprep.mubr.msk.bf16.mxu0 %vm262_vm0, %v13594_v39  ;;  %12238 = vmatprep.mubr.msk.bf16.mxu1 %vm262_vm0, %v13594_v39  ;;  %v1419_v35 = vmax.f32 %v1415_v29, 0.0  ;;  %v12232_v62 = vcombine.high %v15667_v27, %v2849_v38  ;;  %v15977_v10 = vsel %vm266_vm1, %v12231_v5, 0  ;;  %v13597_v29 = vld [vmem:[%s19390_s0 + $0xd4] ss:$8 sps:$4 sm:$0xff]   ;;  %v16126_v5 = vld [vmem:[%s19389_s1 + $0x40] ss:$16 sps:$4 sm:$0xff]  }
 0x1b6   :  { %v1420_v4 = vmax.f32 %v1416_v19, 0.0  ;;  %v15980_v6 = vsel %vm266_vm1, %v12233_v8, 0  ;;  %v16100_v19 = vld [vmem:[%s19389_s1 + $0x20] ss:$16 sps:$4 sm:$0xff]   ;;  %v16131_v8 = vld [vmem:[%s19389_s1 + $0x48] ss:$16 sps:$4 sm:$0xff]  }
 0x1b7   :  { %v1421_v60 = vmax.f32 %v1417_v28, 0.0  ;;  %3054 = vmatpush1.bf16.msra.mxu0 %v15519_v11  ;;  %3097 = vmatpush1.bf16.msra.mxu1 %v15524_v12  ;;  %v16105_v28 = vld [vmem:[%s19389_s1 + $0x28] ss:$16 sps:$4 sm:$0xff]  }
 0x1b8   :  { %v15936_v63 = vpack.c.bf16 %v1420_v4, %v1418_v13  ;;  %3055 = vmatprep.subr.bf16.mxu0 %v15531_v14  ;;  %3098 = vmatprep.subr.bf16.mxu1 %v15536_v15  ;;  %v16112_v4 = vld [vmem:[%s19389_s1 + $0x44] ss:$16 sps:$4 sm:$0xff]  }
 0x1b9   :  { %v15940_v31 = vpack.c.bf16 %v1421_v60, %v1419_v35  ;;  %v16117_v35 = vld [vmem:[%s19389_s1 + $0x4c] ss:$16 sps:$4 sm:$0xff]  }
 0x1ba   :  { %19413 = vst [vmem:[#allocation5_spill] sm:$0xff] %v15936_v63 }
 0x1bb   :  { %19414 = vst [vmem:[#allocation6_spill] sm:$0xff] %v15940_v31  ;;  %3056 = vmatpush1.bf16.msra.mxu0 %v15545_v33  ;;  %3099 = vmatpush1.bf16.msra.mxu1 %v15550_v41 }
 0x1bc   :  { %3057 = vmatprep.subr.bf16.mxu0 %v15559_v43  ;;  %3100 = vmatprep.subr.bf16.mxu1 %v15564_v44 }
 0x1bf   :  { %3058 = vmatpush1.bf16.msra.mxu0 %v15573_v46  ;;  %3101 = vmatpush1.bf16.msra.mxu1 %v15578_v47 }
 0x1c0   :  { %3059 = vmatprep.subr.bf16.mxu0 %v15585_v48  ;;  %3102 = vmatprep.subr.bf16.mxu1 %v15590_v49 }
 0x1c3   :  { %3060 = vmatpush1.bf16.msra.mxu0 %v15597_v50  ;;  %3103 = vmatpush1.bf16.msra.mxu1 %v15602_v51 }
 0x1c4   :  { %3061 = vmatprep.subr.bf16.mxu0 %v15609_v52  ;;  %3104 = vmatprep.subr.bf16.mxu1 %v15614_v53 }
 0x1c7   :  { %3062 = vmatpush1.bf16.msra.mxu0 %v15621_v54  ;;  %3105 = vmatpush1.bf16.msra.mxu1 %v15626_v55 }
 0x1c8   :  { %3063 = vmatprep.subr.bf16.mxu0 %v15633_v56  ;;  %3106 = vmatprep.subr.bf16.mxu1 %v15638_v57 }
 0x1cb   :  { %3064 = vmatpush1.bf16.msra.mxu0 %v15645_v58  ;;  %3107 = vmatpush1.bf16.msra.mxu1 %v15650_v21 }
 0x1cc   :  { %3065 = vmatprep.subr.bf16.mxu0 %v15655_v25  ;;  %3108 = vmatprep.subr.bf16.mxu1 %v15662_v26 }
 0x1cf   :  { %3066 = vmatpush1.bf16.msra.mxu0 %v15685_v36  ;;  %3109 = vmatpush1.bf16.msra.mxu1 %v15690_v59 }
 0x1d0   :  { %12235 = vmatprep.subr.msk.bf16.mxu0 %vm266_vm1, %v12232_v62  ;;  %12237 = vmatprep.subr.msk.bf16.mxu1 %vm266_vm1, %v12234_v9 }
 0x1d1   :  { %v15982_v7 = vpop.f32.mrb[24].mxu0  ;;  %v15984_v40 = vpop.f32.mrb[24].mxu1 }
 0x1d2   :  { %v15986_v27 = vpop.f32.mrb[25].mxu0  ;;  %v15988_v30 = vpop.f32.mrb[25].mxu1 }
 0x1d3   :  { %v15993_v16 = vpop.f32.mrb[26].mxu0  ;;  %v15995_v39 = vpop.f32.mrb[26].mxu1  ;;  %3068 = vmatpush1.bf16.msra.mxu0 %v15977_v10  ;;  %3111 = vmatpush1.bf16.msra.mxu1 %v15980_v6 }
 0x1d4   :  { %v15999_v3 = vpop.f32.mrb[27].mxu0  ;;  %v16001_v17 = vpop.f32.mrb[27].mxu1  ;;  %3152 = vmatprep.subr.bf16.mxu0 %v15467_v23  ;;  %3195 = vmatprep.subr.bf16.mxu1 %v15472_v24  ;;  %v1864_v23 = vld [vmem:[%s19391_s2] sm:$0x3]  ;;  %v16048_v24 = vld [vmem:[%s19389_s1 + $0x4] ss:$16 sps:$4 sm:$0xff]  }
 0x1d6   :  { %3084 = vmatmul.mubr.bf16.vlgmr.msra.gmra.mrb[48].mxu0 %v13596_v0  ;;  %3127 = vmatmul.mubr.bf16.vlgmr.msra.gmra.mrb[48].mxu1 %v13596_v0  ;;  %v16166_v0 = vld [vmem:[%s19389_s1 + $0x84] ss:$16 sps:$4 sm:$0xff]  }
 0x1d7   :  { %3153 = vmatpush1.bf16.msra.mxu0 %v15488_v32  ;;  %3196 = vmatpush1.bf16.msra.mxu1 %v15493_v34  ;;  %v16053_v32 = vld [vmem:[%s19389_s1 + $0xc] ss:$16 sps:$4 sm:$0xff]  }
 0x1d8   :  { %3154 = vmatprep.subr.bf16.mxu0 %v15502_v1  ;;  %3197 = vmatprep.subr.bf16.mxu1 %v15507_v2 }
 0x1d9   :  { %12244 = vmatprep.mubr.msk.bf16.mxu0 %vm262_vm0, %v13597_v29  ;;  %12246 = vmatprep.mubr.msk.bf16.mxu1 %vm262_vm0, %v13597_v29  ;;  %v16195_v29 = vld [vmem:[%s19389_s1 + $0xac] ss:$16 sps:$4 sm:$0xff]  }
 0x1db   :  { %3155 = vmatpush1.bf16.msra.mxu0 %v15519_v11  ;;  %3198 = vmatpush1.bf16.msra.mxu1 %v15524_v12  ;;  %v1869_v12 = vrot.slane %v1864_v23, %v15451_v20 }
 0x1dc   :  { %3156 = vmatprep.subr.bf16.mxu0 %v15531_v14  ;;  %3199 = vmatprep.subr.bf16.mxu1 %v15536_v15 }
 0x1df   :  { %3157 = vmatpush1.bf16.msra.mxu0 %v15545_v33  ;;  %3200 = vmatpush1.bf16.msra.mxu1 %v15550_v41  ;;  %v13599_v33 = vld [vmem:[%s19390_s0 + $0xd0] ss:$8 sps:$4 sm:$0xff]  }
 0x1e0   :  { %3158 = vmatprep.subr.bf16.mxu0 %v15559_v43  ;;  %3201 = vmatprep.subr.bf16.mxu1 %v15564_v44  ;;  %v1873_v44 = vrot.slane %v1864_v23, %v15458_v22  ;;  %v16202_v23 = vld [vmem:[%s19389_s1 + $0xa0] ss:$16 sps:$4 sm:$0xff]  }
 0x1e3   :  { %3159 = vmatpush1.bf16.msra.mxu0 %v15573_v46  ;;  %3202 = vmatpush1.bf16.msra.mxu1 %v15578_v47 }
 0x1e4   :  { %3160 = vmatprep.subr.bf16.mxu0 %v15585_v48  ;;  %3203 = vmatprep.subr.bf16.mxu1 %v15590_v49  ;;  %v16069_v48 = vld [vmem:[%s19389_s1] ss:$16 sps:$4 sm:$0xff]   ;;  %v16074_v49 = vld [vmem:[%s19389_s1 + $0x8] ss:$16 sps:$4 sm:$0xff]  }
 0x1e7   :  { %3161 = vmatpush1.bf16.msra.mxu0 %v15597_v50  ;;  %3204 = vmatpush1.bf16.msra.mxu1 %v15602_v51 }
 0x1e8   :  { %3162 = vmatprep.subr.bf16.mxu0 %v15609_v52  ;;  %3205 = vmatprep.subr.bf16.mxu1 %v15614_v53 }
 0x1eb   :  { %3163 = vmatpush1.bf16.msra.mxu0 %v15621_v54  ;;  %3206 = vmatpush1.bf16.msra.mxu1 %v15626_v55  ;;  %v16083_v55 = vld [vmem:[%s19389_s1 + $0x24] ss:$16 sps:$4 sm:$0xff]  }
 0x1ec   :  { %3164 = vmatprep.subr.bf16.mxu0 %v15633_v56  ;;  %3207 = vmatprep.subr.bf16.mxu1 %v15638_v57  ;;  %v16088_v56 = vld [vmem:[%s19389_s1 + $0x2c] ss:$16 sps:$4 sm:$0xff]  }
 0x1ef   :  { %3165 = vmatpush1.bf16.msra.mxu0 %v15645_v58  ;;  %3208 = vmatpush1.bf16.msra.mxu1 %v15650_v21 }
 0x1f0   :  { %3166 = vmatprep.subr.bf16.mxu0 %v15655_v25  ;;  %3209 = vmatprep.subr.bf16.mxu1 %v15662_v26  ;;  %v13652_v25 = vld [vmem:[%s19390_s0 + $0xe4] ss:$8 sps:$4 sm:$0xff]  }
 0x1f3   :  { %3167 = vmatpush1.bf16.msra.mxu0 %v15685_v36  ;;  %3210 = vmatpush1.bf16.msra.mxu1 %v15690_v59 }
 0x1f4   :  { %12243 = vmatprep.subr.msk.bf16.mxu0 %vm266_vm1, %v12232_v62  ;;  %12245 = vmatprep.subr.msk.bf16.mxu1 %vm266_vm1, %v12234_v9 }
 0x1f5   :  { %v1800_v34 = vpop.f32.mrb[28].mxu0  ;;  %v1843_v1 = vpop.f32.mrb[28].mxu1 }
 0x1f6   :  { %v1852_v2 = vmax.f32 %v15982_v7, %v1800_v34  ;;  %v1854_v11 = vmax.f32 %v15984_v40, %v1843_v1  ;;  %v1802_v14 = vpop.f32.mrb[29].mxu0  ;;  %v1845_v15 = vpop.f32.mrb[29].mxu1  ;;  %v16145_v7 = vld [vmem:[%s19389_s1 + $0x6c] ss:$16 sps:$4 sm:$0xff]   ;;  %v16207_v34 = vld [vmem:[%s19389_s1 + $0xa8] ss:$16 sps:$4 sm:$0xff]  }
 0x1f7   :  { %v1853_v41 = vmax.f32 %v15986_v27, %v1802_v14  ;;  %v1855_v43 = vmax.f32 %v15988_v30, %v1845_v15  ;;  %v1804_v46 = vpop.f32.mrb[30].mxu0  ;;  %v1847_v47 = vpop.f32.mrb[30].mxu1  ;;  %3169 = vmatpush1.bf16.msra.mxu0 %v15977_v10  ;;  %3212 = vmatpush1.bf16.msra.mxu1 %v15980_v6  ;;  %v16140_v6 = vld [vmem:[%s19389_s1 + $0x64] ss:$16 sps:$4 sm:$0xff]   ;;  %v16154_v27 = vld [vmem:[%s19389_s1 + $0x60] ss:$16 sps:$4 sm:$0xff]  }
 0x1f8   :  { %v1860_v50 = vmax.f32 %v1852_v2, %v1854_v11  ;;  %v1856_v51 = vmax.f32 %v15993_v16, %v1804_v46  ;;  %v1858_v52 = vmax.f32 %v15995_v39, %v1847_v47  ;;  %v1806_v53 = vpop.f32.mrb[31].mxu0  ;;  %v1849_v54 = vpop.f32.mrb[31].mxu1  ;;  %3513 = vmatprep.subr.bf16.mxu0 %v16048_v24  ;;  %3556 = vmatprep.subr.bf16.mxu1 %v16053_v32  ;;  %v16159_v30 = vld [vmem:[%s19389_s1 + $0x68] ss:$16 sps:$4 sm:$0xff]   ;;  %v16171_v16 = vld [vmem:[%s19389_s1 + $0x8c] ss:$16 sps:$4 sm:$0xff]  }
 0x1f9   :  { %v1861_v57 = vmax.f32 %v1853_v41, %v1855_v43  ;;  %v1857_v58 = vmax.f32 %v15999_v3, %v1806_v53  ;;  %v1859_v21 = vmax.f32 %v16001_v17, %v1849_v54  ;;  %v16178_v39 = vld [vmem:[%s19389_s1 + $0x80] ss:$16 sps:$4 sm:$0xff]   ;;  %v16183_v3 = vld [vmem:[%s19389_s1 + $0x88] ss:$16 sps:$4 sm:$0xff]   ;;  %v16190_v17 = vld [vmem:[%s19389_s1 + $0xa4] ss:$16 sps:$4 sm:$0xff]  }
 0x1fa   :  { %v1876_v26 = vadd.f32 %v1869_v12, %v1860_v50  ;;  %v1862_v36 = vmax.f32 %v1856_v51, %v1858_v52  ;;  %3185 = vmatmul.mubr.bf16.vlgmr.msra.gmra.mrb[52].mxu0 %v13599_v33  ;;  %3228 = vmatmul.mubr.bf16.vlgmr.msra.gmra.mrb[52].mxu1 %v13599_v33  ;;  %v16214_v1 = vld [vmem:[%s19389_s1 + $0xc4] ss:$16 sps:$4 sm:$0xff]   ;;  %v16219_v2 = vld [vmem:[%s19389_s1 + $0xcc] ss:$16 sps:$4 sm:$0xff]   ;;  %v16226_v11 = vld [vmem:[%s19389_s1 + $0xc0] ss:$16 sps:$4 sm:$0xff]  }
 0x1fb   :  { %v1877_v59 = vadd.f32 %v1873_v44, %v1861_v57  ;;  %v1863_v37 = vmax.f32 %v1857_v58, %v1859_v21  ;;  %3514 = vmatpush1.bf16.msra.mxu0 %v16069_v48  ;;  %3557 = vmatpush1.bf16.msra.mxu1 %v16074_v49  ;;  %v16236_v14 = vld [vmem:[%s19389_s1 + $0xe4] ss:$16 sps:$4 sm:$0xff]   ;;  %v16243_v15 = vld [vmem:[%s19389_s1 + $0xec] ss:$16 sps:$4 sm:$0xff]   ;;  %v16266_v46 = vld [vmem:[%s19389_s1 + $0xe0] ss:$16 sps:$4 sm:$0xff]  }
 0x1fc   :  { %v1878_v13 = vadd.f32 %v1869_v12, %v1862_v36  ;;  %3515 = vmatprep.subr.bf16.mxu0 %v16083_v55  ;;  %3558 = vmatprep.subr.bf16.mxu1 %v16088_v56  ;;  %v1880_v38 = vmax.f32 %v1876_v26, 0.0  ;;  %v16231_v12 = vld [vmem:[%s19389_s1 + $0xc8] ss:$16 sps:$4 sm:$0xff]   ;;  %v16248_v33 = vld [vmem:[%s19389_s1 + $0x100] sm:$0xff]  ;;  %v3311_v41 = vld [vmem:[%s19389_s1 + $0x110] sm:$0x33] }
 0x1fd   :  { %v1879_v60 = vadd.f32 %v1873_v44, %v1863_v37  ;;  %12288 = vmatprep.mubr.msk.bf16.mxu0 %vm262_vm0, %v13652_v25  ;;  %12290 = vmatprep.mubr.msk.bf16.mxu1 %vm262_vm0, %v13652_v25  ;;  %v1881_v62 = vmax.f32 %v1877_v59, 0.0  ;;  %v16256_v43 = vld [vmem:[%s19389_s1 + $0x108] sm:$0xff]  ;;  %v3312_v44 = vld [vmem:[%s19389_s1 + $0x118] sm:$0x33]  ;;  %v12284_v50 = vcombine.high %v16248_v33, %v3311_v41  ;;  %v12283_v52 = vcombine.low %v16248_v33, %v3311_v41 }
 0x1fe   :  { %v1882_v61 = vmax.f32 %v1878_v13, 0.0  ;;  %v16271_v47 = vld [vmem:[%s19389_s1 + $0xe8] ss:$16 sps:$4 sm:$0xff]   ;;  %v12286_v51 = vcombine.high %v16256_v43, %v3312_v44  ;;  %v12285_v53 = vcombine.low %v16256_v43, %v3312_v44 }
 0x1ff   :  { %v1883_v9 = vmax.f32 %v1879_v60, 0.0  ;;  %3516 = vmatpush1.bf16.msra.mxu0 %v16100_v19  ;;  %3559 = vmatpush1.bf16.msra.mxu1 %v16105_v28  ;;  %v16284_v54 = vsel %vm266_vm1, %v12283_v52, 0  ;;  %v13654_v36 = vld [vmem:[%s19390_s0 + $0xe0] ss:$8 sps:$4 sm:$0xff]  }
 0x200   :  { %v16133_v10 = vpack.c.bf16 %v1882_v61, %v1880_v38  ;;  %3517 = vmatprep.subr.bf16.mxu0 %v16112_v4  ;;  %3560 = vmatprep.subr.bf16.mxu1 %v16117_v35  ;;  %v16287_v57 = vsel %vm266_vm1, %v12285_v53, 0  ;;  %v13655_v38 = vld [vmem:[%s19390_s0 + $0xf4] ss:$8 sps:$4 sm:$0xff]   ;;  %v2326_v61 = vld [vmem:[%s19391_s2] sm:$0x3] }
 0x201   :  { %v16147_v40 = vpack.c.bf16 %v1883_v9, %v1881_v62  ;;  %v2331_v52 = vrot.slane %v2326_v61, %v15451_v20 }
 0x202   :  { %19415 = vst [vmem:[#allocation7_spill] sm:$0xff] %v16133_v10 }
 0x203   :  { %19416 = vst [vmem:[#allocation8_spill] sm:$0xff] %v16147_v40  ;;  %3518 = vmatpush1.bf16.msra.mxu0 %v16126_v5  ;;  %3561 = vmatpush1.bf16.msra.mxu1 %v16131_v8 }
 0x204   :  { %3519 = vmatprep.subr.bf16.mxu0 %v16140_v6  ;;  %3562 = vmatprep.subr.bf16.mxu1 %v16145_v7 }
 0x207   :  { %3520 = vmatpush1.bf16.msra.mxu0 %v16154_v27  ;;  %3563 = vmatpush1.bf16.msra.mxu1 %v16159_v30 }
 0x208   :  { %3521 = vmatprep.subr.bf16.mxu0 %v16166_v0  ;;  %3564 = vmatprep.subr.bf16.mxu1 %v16171_v16 }
 0x20b   :  { %3522 = vmatpush1.bf16.msra.mxu0 %v16178_v39  ;;  %3565 = vmatpush1.bf16.msra.mxu1 %v16183_v3 }
 0x20c   :  { %3523 = vmatprep.subr.bf16.mxu0 %v16190_v17  ;;  %3566 = vmatprep.subr.bf16.mxu1 %v16195_v29 }
 0x20f   :  { %3524 = vmatpush1.bf16.msra.mxu0 %v16202_v23  ;;  %3567 = vmatpush1.bf16.msra.mxu1 %v16207_v34 }
 0x210   :  { %3525 = vmatprep.subr.bf16.mxu0 %v16214_v1  ;;  %3568 = vmatprep.subr.bf16.mxu1 %v16219_v2 }
 0x213   :  { %3526 = vmatpush1.bf16.msra.mxu0 %v16226_v11  ;;  %3569 = vmatpush1.bf16.msra.mxu1 %v16231_v12 }
 0x214   :  { %3527 = vmatprep.subr.bf16.mxu0 %v16236_v14  ;;  %3570 = vmatprep.subr.bf16.mxu1 %v16243_v15 }
 0x217   :  { %3528 = vmatpush1.bf16.msra.mxu0 %v16266_v46  ;;  %3571 = vmatpush1.bf16.msra.mxu1 %v16271_v47 }
 0x218   :  { %12287 = vmatprep.subr.msk.bf16.mxu0 %vm266_vm1, %v12284_v50  ;;  %12289 = vmatprep.subr.msk.bf16.mxu1 %vm266_vm1, %v12286_v51 }
 0x219   :  { %v16289_v58 = vpop.f32.mrb[32].mxu0  ;;  %v16291_v21 = vpop.f32.mrb[32].mxu1 }
 0x21a   :  { %v16293_v25 = vpop.f32.mrb[33].mxu0  ;;  %v16295_v26 = vpop.f32.mrb[33].mxu1 }
 0x21b   :  { %v16300_v59 = vpop.f32.mrb[34].mxu0  ;;  %v16302_v37 = vpop.f32.mrb[34].mxu1  ;;  %3530 = vmatpush1.bf16.msra.mxu0 %v16284_v54  ;;  %3573 = vmatpush1.bf16.msra.mxu1 %v16287_v57 }
 0x21c   :  { %v16306_v13 = vpop.f32.mrb[35].mxu0  ;;  %v16308_v60 = vpop.f32.mrb[35].mxu1  ;;  %3614 = vmatprep.subr.bf16.mxu0 %v16048_v24  ;;  %3657 = vmatprep.subr.bf16.mxu1 %v16053_v32 }
 0x21e   :  { %3546 = vmatmul.mubr.bf16.vlgmr.msra.gmra.mrb[56].mxu0 %v13654_v36  ;;  %3589 = vmatmul.mubr.bf16.vlgmr.msra.gmra.mrb[56].mxu1 %v13654_v36 }
 0x21f   :  { %3615 = vmatpush1.bf16.msra.mxu0 %v16069_v48  ;;  %3658 = vmatpush1.bf16.msra.mxu1 %v16074_v49 }
 0x220   :  { %3616 = vmatprep.subr.bf16.mxu0 %v16083_v55  ;;  %3659 = vmatprep.subr.bf16.mxu1 %v16088_v56 }
 0x221   :  { %12296 = vmatprep.mubr.msk.bf16.mxu0 %vm262_vm0, %v13655_v38  ;;  %12298 = vmatprep.mubr.msk.bf16.mxu1 %vm262_vm0, %v13655_v38  ;;  %v13657_v38 = vld [vmem:[%s19390_s0 + $0xf0] ss:$8 sps:$4 sm:$0xff]  }
 0x223   :  { %3617 = vmatpush1.bf16.msra.mxu0 %v16100_v19  ;;  %3660 = vmatpush1.bf16.msra.mxu1 %v16105_v28 }
 0x224   :  { %3618 = vmatprep.subr.bf16.mxu0 %v16112_v4  ;;  %3661 = vmatprep.subr.bf16.mxu1 %v16117_v35 }
 0x227   :  { %3619 = vmatpush1.bf16.msra.mxu0 %v16126_v5  ;;  %3662 = vmatpush1.bf16.msra.mxu1 %v16131_v8 }
 0x228   :  { %3620 = vmatprep.subr.bf16.mxu0 %v16140_v6  ;;  %3663 = vmatprep.subr.bf16.mxu1 %v16145_v7 }
 0x22b   :  { %3621 = vmatpush1.bf16.msra.mxu0 %v16154_v27  ;;  %3664 = vmatpush1.bf16.msra.mxu1 %v16159_v30 }
 0x22c   :  { %3622 = vmatprep.subr.bf16.mxu0 %v16166_v0  ;;  %3665 = vmatprep.subr.bf16.mxu1 %v16171_v16 }
 0x22f   :  { %3623 = vmatpush1.bf16.msra.mxu0 %v16178_v39  ;;  %3666 = vmatpush1.bf16.msra.mxu1 %v16183_v3 }
 0x230   :  { %3624 = vmatprep.subr.bf16.mxu0 %v16190_v17  ;;  %3667 = vmatprep.subr.bf16.mxu1 %v16195_v29 }
 0x233   :  { %3625 = vmatpush1.bf16.msra.mxu0 %v16202_v23  ;;  %3668 = vmatpush1.bf16.msra.mxu1 %v16207_v34 }
 0x234   :  { %3626 = vmatprep.subr.bf16.mxu0 %v16214_v1  ;;  %3669 = vmatprep.subr.bf16.mxu1 %v16219_v2 }
 0x237   :  { %3627 = vmatpush1.bf16.msra.mxu0 %v16226_v11  ;;  %3670 = vmatpush1.bf16.msra.mxu1 %v16231_v12 }
 0x238   :  { %3628 = vmatprep.subr.bf16.mxu0 %v16236_v14  ;;  %3671 = vmatprep.subr.bf16.mxu1 %v16243_v15 }
 0x23b   :  { %3629 = vmatpush1.bf16.msra.mxu0 %v16266_v46  ;;  %3672 = vmatpush1.bf16.msra.mxu1 %v16271_v47 }
 0x23c   :  { %12295 = vmatprep.subr.msk.bf16.mxu0 %vm266_vm1, %v12284_v50  ;;  %12297 = vmatprep.subr.msk.bf16.mxu1 %vm266_vm1, %v12286_v51  ;;  %v2335_v51 = vrot.slane %v2326_v61, %v15458_v22 }
 0x23d   :  { %v2262_v62 = vpop.f32.mrb[36].mxu0  ;;  %v2305_v9 = vpop.f32.mrb[36].mxu1 }
 0x23e   :  { %v2314_v41 = vmax.f32 %v16289_v58, %v2262_v62  ;;  %v2316_v44 = vmax.f32 %v16291_v21, %v2305_v9  ;;  %v2264_v53 = vpop.f32.mrb[37].mxu0  ;;  %v2307_v36 = vpop.f32.mrb[37].mxu1 }
 0x23f   :  { %v2315_v10 = vmax.f32 %v16293_v25, %v2264_v53  ;;  %v2317_v50 = vmax.f32 %v16295_v26, %v2307_v36  ;;  %v2266_v40 = vpop.f32.mrb[38].mxu0  ;;  %v2309_v63 = vpop.f32.mrb[38].mxu1  ;;  %3631 = vmatpush1.bf16.msra.mxu0 %v16284_v54  ;;  %3674 = vmatpush1.bf16.msra.mxu1 %v16287_v57  ;;  %v13662_v54 = vld [vmem:[%s19390_s0 + $0x104] ss:$8 sps:$4 sm:$0xff]   ;;  %v3773_v53 = vld [vmem:[%s19389_s1 + $0x110] sm:$0x33] }
 0x240   :  { %v2322_v58 = vmax.f32 %v2314_v41, %v2316_v44  ;;  %v2318_v21 = vmax.f32 %v16300_v59, %v2266_v40  ;;  %v2320_v62 = vmax.f32 %v16302_v37, %v2309_v63  ;;  %v2268_v9 = vpop.f32.mrb[39].mxu0  ;;  %v2311_v31 = vpop.f32.mrb[39].mxu1  ;;  %3975 = vmatprep.subr.bf16.mxu0 %v16048_v24  ;;  %4018 = vmatprep.subr.bf16.mxu1 %v16053_v32  ;;  %v3774_v36 = vld [vmem:[%s19389_s1 + $0x118] sm:$0x33] }
 0x241   :  { %v2323_v25 = vmax.f32 %v2315_v10, %v2317_v50  ;;  %v2319_v26 = vmax.f32 %v16306_v13, %v2268_v9  ;;  %v2321_v61 = vmax.f32 %v16308_v60, %v2311_v31  ;;  %v12338_v50 = vcombine.high %v16256_v43, %v3774_v36 }
 0x242   :  { %v2338_v57 = vadd.f32 %v2331_v52, %v2322_v58  ;;  %v2324_v41 = vmax.f32 %v2318_v21, %v2320_v62  ;;  %3647 = vmatmul.mubr.bf16.vlgmr.msra.gmra.mrb[60].mxu0 %v13657_v38  ;;  %3690 = vmatmul.mubr.bf16.vlgmr.msra.gmra.mrb[60].mxu1 %v13657_v38  ;;  %v12336_v38 = vcombine.high %v16248_v33, %v3773_v53 }
 0x243   :  { %v2339_v63 = vadd.f32 %v2335_v51, %v2323_v25  ;;  %v2325_v40 = vmax.f32 %v2319_v26, %v2321_v61  ;;  %3976 = vmatpush1.bf16.msra.mxu0 %v16069_v48  ;;  %4019 = vmatpush1.bf16.msra.mxu1 %v16074_v49  ;;  %v12337_v58 = vcombine.low %v16256_v43, %v3774_v36 }
 0x244   :  { %v2340_v59 = vadd.f32 %v2331_v52, %v2324_v41  ;;  %3977 = vmatprep.subr.bf16.mxu0 %v16083_v55  ;;  %4020 = vmatprep.subr.bf16.mxu1 %v16088_v56  ;;  %v2342_v10 = vmax.f32 %v2338_v57, 0.0 }
 0x245   :  { %v2341_v31 = vadd.f32 %v2335_v51, %v2325_v40  ;;  %12340 = vmatprep.mubr.msk.bf16.mxu0 %vm262_vm0, %v13662_v54  ;;  %12342 = vmatprep.mubr.msk.bf16.mxu1 %vm262_vm0, %v13662_v54  ;;  %v2343_v13 = vmax.f32 %v2339_v63, 0.0  ;;  %v12335_v51 = vcombine.low %v16248_v33, %v3773_v53  ;;  %v16424_v62 = vsel %vm266_vm1, %v12337_v58, 0  ;;  %v13664_v54 = vld [vmem:[%s19390_s0 + $0x100] ss:$8 sps:$4 sm:$0xff]   ;;  %v13667_v58 = vld [vmem:[%s19390_s0 + $0x110] ss:$8 sps:$4 sm:$0xff]  }
 0x246   :  { %v2344_v37 = vmax.f32 %v2340_v59, 0.0  ;;  %v13665_v59 = vld [vmem:[%s19390_s0 + $0x114] ss:$8 sps:$4 sm:$0xff]  }
 0x247   :  { %v2345_v60 = vmax.f32 %v2341_v31, 0.0  ;;  %3978 = vmatpush1.bf16.msra.mxu0 %v16100_v19  ;;  %4021 = vmatpush1.bf16.msra.mxu1 %v16105_v28  ;;  %v16421_v21 = vsel %vm266_vm1, %v12335_v51, 0  ;;  %v2788_v31 = vld [vmem:[%s19391_s2] sm:$0x3] }
 0x248   :  { %v16380_v44 = vpack.c.bf16 %v2344_v37, %v2342_v10  ;;  %3979 = vmatprep.subr.bf16.mxu0 %v16112_v4  ;;  %4022 = vmatprep.subr.bf16.mxu1 %v16117_v35  ;;  %v2793_v53 = vrot.slane %v2788_v31, %v15451_v20 }
 0x249   :  { %v16384_v52 = vpack.c.bf16 %v2345_v60, %v2343_v13 }
 0x24a   :  { %19417 = vst [vmem:[#allocation9_spill] sm:$0xff] %v16380_v44 }
 0x24b   :  { %19418 = vst [vmem:[#allocation10_spill] sm:$0xff] %v16384_v52  ;;  %3980 = vmatpush1.bf16.msra.mxu0 %v16126_v5  ;;  %4023 = vmatpush1.bf16.msra.mxu1 %v16131_v8 }
 0x24c   :  { %3981 = vmatprep.subr.bf16.mxu0 %v16140_v6  ;;  %4024 = vmatprep.subr.bf16.mxu1 %v16145_v7 }
 0x24f   :  { %3982 = vmatpush1.bf16.msra.mxu0 %v16154_v27  ;;  %4025 = vmatpush1.bf16.msra.mxu1 %v16159_v30 }
 0x250   :  { %3983 = vmatprep.subr.bf16.mxu0 %v16166_v0  ;;  %4026 = vmatprep.subr.bf16.mxu1 %v16171_v16 }
 0x253   :  { %3984 = vmatpush1.bf16.msra.mxu0 %v16178_v39  ;;  %4027 = vmatpush1.bf16.msra.mxu1 %v16183_v3 }
 0x254   :  { %3985 = vmatprep.subr.bf16.mxu0 %v16190_v17  ;;  %4028 = vmatprep.subr.bf16.mxu1 %v16195_v29 }
 0x257   :  { %3986 = vmatpush1.bf16.msra.mxu0 %v16202_v23  ;;  %4029 = vmatpush1.bf16.msra.mxu1 %v16207_v34 }
 0x258   :  { %3987 = vmatprep.subr.bf16.mxu0 %v16214_v1  ;;  %4030 = vmatprep.subr.bf16.mxu1 %v16219_v2 }
 0x25b   :  { %3988 = vmatpush1.bf16.msra.mxu0 %v16226_v11  ;;  %4031 = vmatpush1.bf16.msra.mxu1 %v16231_v12 }
 0x25c   :  { %3989 = vmatprep.subr.bf16.mxu0 %v16236_v14  ;;  %4032 = vmatprep.subr.bf16.mxu1 %v16243_v15 }
 0x25f   :  { %3990 = vmatpush1.bf16.msra.mxu0 %v16266_v46  ;;  %4033 = vmatpush1.bf16.msra.mxu1 %v16271_v47 }
 0x260   :  { %12339 = vmatprep.subr.msk.bf16.mxu0 %vm266_vm1, %v12336_v38  ;;  %12341 = vmatprep.subr.msk.bf16.mxu1 %vm266_vm1, %v12338_v50 }
 0x261   :  { %v16426_v9 = vpop.f32.mrb[40].mxu0  ;;  %v16428_v25 = vpop.f32.mrb[40].mxu1 }
 0x262   :  { %v16430_v26 = vpop.f32.mrb[41].mxu0  ;;  %v16432_v61 = vpop.f32.mrb[41].mxu1 }
 0x263   :  { %v16437_v57 = vpop.f32.mrb[42].mxu0  ;;  %v16439_v41 = vpop.f32.mrb[42].mxu1  ;;  %3992 = vmatpush1.bf16.msra.mxu0 %v16421_v21  ;;  %4035 = vmatpush1.bf16.msra.mxu1 %v16424_v62 }
 0x264   :  { %v16443_v63 = vpop.f32.mrb[43].mxu0  ;;  %v16445_v40 = vpop.f32.mrb[43].mxu1  ;;  %4076 = vmatprep.subr.bf16.mxu0 %v16048_v24  ;;  %4119 = vmatprep.subr.bf16.mxu1 %v16053_v32 }
 0x266   :  { %4008 = vmatmul.mubr.bf16.vlgmr.msra.gmra.mrb[64].mxu0 %v13664_v54  ;;  %4051 = vmatmul.mubr.bf16.vlgmr.msra.gmra.mrb[64].mxu1 %v13664_v54 }
 0x267   :  { %4077 = vmatpush1.bf16.msra.mxu0 %v16069_v48  ;;  %4120 = vmatpush1.bf16.msra.mxu1 %v16074_v49 }
 0x268   :  { %4078 = vmatprep.subr.bf16.mxu0 %v16083_v55  ;;  %4121 = vmatprep.subr.bf16.mxu1 %v16088_v56 }
 0x269   :  { %12348 = vmatprep.mubr.msk.bf16.mxu0 %vm262_vm0, %v13665_v59  ;;  %12350 = vmatprep.mubr.msk.bf16.mxu1 %vm262_vm0, %v13665_v59 }
 0x26b   :  { %4079 = vmatpush1.bf16.msra.mxu0 %v16100_v19  ;;  %4122 = vmatpush1.bf16.msra.mxu1 %v16105_v28 }
 0x26c   :  { %4080 = vmatprep.subr.bf16.mxu0 %v16112_v4  ;;  %4123 = vmatprep.subr.bf16.mxu1 %v16117_v35 }
 0x26f   :  { %4081 = vmatpush1.bf16.msra.mxu0 %v16126_v5  ;;  %4124 = vmatpush1.bf16.msra.mxu1 %v16131_v8 }
 0x270   :  { %4082 = vmatprep.subr.bf16.mxu0 %v16140_v6  ;;  %4125 = vmatprep.subr.bf16.mxu1 %v16145_v7 }
 0x273   :  { %4083 = vmatpush1.bf16.msra.mxu0 %v16154_v27  ;;  %4126 = vmatpush1.bf16.msra.mxu1 %v16159_v30 }
 0x274   :  { %4084 = vmatprep.subr.bf16.mxu0 %v16166_v0  ;;  %4127 = vmatprep.subr.bf16.mxu1 %v16171_v16 }
 0x277   :  { %4085 = vmatpush1.bf16.msra.mxu0 %v16178_v39  ;;  %4128 = vmatpush1.bf16.msra.mxu1 %v16183_v3 }
 0x278   :  { %4086 = vmatprep.subr.bf16.mxu0 %v16190_v17  ;;  %4129 = vmatprep.subr.bf16.mxu1 %v16195_v29 }
 0x27b   :  { %4087 = vmatpush1.bf16.msra.mxu0 %v16202_v23  ;;  %4130 = vmatpush1.bf16.msra.mxu1 %v16207_v34 }
 0x27c   :  { %4088 = vmatprep.subr.bf16.mxu0 %v16214_v1  ;;  %4131 = vmatprep.subr.bf16.mxu1 %v16219_v2 }
 0x27f   :  { %4089 = vmatpush1.bf16.msra.mxu0 %v16226_v11  ;;  %4132 = vmatpush1.bf16.msra.mxu1 %v16231_v12 }
 0x280   :  { %4090 = vmatprep.subr.bf16.mxu0 %v16236_v14  ;;  %4133 = vmatprep.subr.bf16.mxu1 %v16243_v15 }
 0x283   :  { %4091 = vmatpush1.bf16.msra.mxu0 %v16266_v46  ;;  %4134 = vmatpush1.bf16.msra.mxu1 %v16271_v47 }
 0x284   :  { %12347 = vmatprep.subr.msk.bf16.mxu0 %vm266_vm1, %v12336_v38  ;;  %12349 = vmatprep.subr.msk.bf16.mxu1 %vm266_vm1, %v12338_v50  ;;  %v2797_v50 = vrot.slane %v2788_v31, %v15458_v22 }
 0x285   :  { %v2724_v10 = vpop.f32.mrb[44].mxu0  ;;  %v2767_v37 = vpop.f32.mrb[44].mxu1 }
 0x286   :  { %v2776_v13 = vmax.f32 %v16426_v9, %v2724_v10  ;;  %v2778_v60 = vmax.f32 %v16428_v25, %v2767_v37  ;;  %v2726_v36 = vpop.f32.mrb[45].mxu0  ;;  %v2769_v51 = vpop.f32.mrb[45].mxu1 }
 0x287   :  { %v2777_v54 = vmax.f32 %v16430_v26, %v2726_v36  ;;  %v2779_v38 = vmax.f32 %v16432_v61, %v2769_v51  ;;  %v2728_v59 = vpop.f32.mrb[46].mxu0  ;;  %v2771_v44 = vpop.f32.mrb[46].mxu1  ;;  %4093 = vmatpush1.bf16.msra.mxu0 %v16421_v21  ;;  %4136 = vmatpush1.bf16.msra.mxu1 %v16424_v62  ;;  %v13672_v21 = vld [vmem:[%s19390_s0 + $0x124] ss:$8 sps:$4 sm:$0xff]  }
 0x288   :  { %v2784_v9 = vmax.f32 %v2776_v13, %v2778_v60  ;;  %v2780_v25 = vmax.f32 %v16437_v57, %v2728_v59  ;;  %v2782_v10 = vmax.f32 %v16439_v41, %v2771_v44  ;;  %v2730_v37 = vpop.f32.mrb[47].mxu0  ;;  %v2773_v52 = vpop.f32.mrb[47].mxu1  ;;  %4437 = vmatprep.subr.bf16.mxu0 %v16048_v24  ;;  %4480 = vmatprep.subr.bf16.mxu1 %v16053_v32 }
 0x289   :  { %v2785_v26 = vmax.f32 %v2777_v54, %v2779_v38  ;;  %v2781_v61 = vmax.f32 %v16443_v63, %v2730_v37  ;;  %v2783_v31 = vmax.f32 %v16445_v40, %v2773_v52  ;;  %v4236_v54 = vld [vmem:[%s19389_s1 + $0x118] sm:$0x33] }
 0x28a   :  { %v2800_v62 = vadd.f32 %v2793_v53, %v2784_v9  ;;  %v2786_v13 = vmax.f32 %v2780_v25, %v2782_v10  ;;  %4109 = vmatmul.mubr.bf16.vlgmr.msra.gmra.mrb[68].mxu0 %v13667_v58  ;;  %4152 = vmatmul.mubr.bf16.vlgmr.msra.gmra.mrb[68].mxu1 %v13667_v58  ;;  %v4235_v58 = vld [vmem:[%s19389_s1 + $0x110] sm:$0x33]  ;;  %v12389_v9 = vcombine.low %v16256_v43, %v4236_v54 }
 0x28b   :  { %v2801_v44 = vadd.f32 %v2797_v50, %v2785_v26  ;;  %v2787_v57 = vmax.f32 %v2781_v61, %v2783_v31  ;;  %4438 = vmatpush1.bf16.msra.mxu0 %v16069_v48  ;;  %4481 = vmatpush1.bf16.msra.mxu1 %v16074_v49  ;;  %v12388_v38 = vcombine.high %v16248_v33, %v4235_v58  ;;  %v13674_v61 = vld [vmem:[%s19390_s0 + $0x120] ss:$8 sps:$4 sm:$0xff]  }
 0x28c   :  { %v2802_v41 = vadd.f32 %v2793_v53, %v2786_v13  ;;  %4439 = vmatprep.subr.bf16.mxu0 %v16083_v55  ;;  %4482 = vmatprep.subr.bf16.mxu1 %v16088_v56  ;;  %v2804_v63 = vmax.f32 %v2800_v62, 0.0  ;;  %v12387_v59 = vcombine.low %v16248_v33, %v4235_v58  ;;  %v16561_v10 = vsel %vm266_vm1, %v12389_v9, 0  ;;  %v16712_v9 = vld [vmem:[%s19389_s1 + $0x48] ss:$16 sps:$4 sm:$0xff]  }
 0x28d   :  { %v2803_v52 = vadd.f32 %v2797_v50, %v2787_v57  ;;  %12392 = vmatprep.mubr.msk.bf16.mxu0 %vm262_vm0, %v13672_v21  ;;  %12394 = vmatprep.mubr.msk.bf16.mxu1 %vm262_vm0, %v13672_v21  ;;  %v2805_v60 = vmax.f32 %v2801_v44, 0.0  ;;  %v12390_v50 = vcombine.high %v16256_v43, %v4236_v54  ;;  %v13675_v44 = vld [vmem:[%s19390_s0 + $0x134] ss:$8 sps:$4 sm:$0xff]  }
 0x28e   :  { %v2806_v40 = vmax.f32 %v2802_v41, 0.0  ;;  %v16558_v25 = vsel %vm266_vm1, %v12387_v59, 0  ;;  %v16681_v41 = vld [vmem:[%s19389_s1 + $0x20] ss:$16 sps:$4 sm:$0xff]  }
 0x28f   :  { %v2807_v36 = vmax.f32 %v2803_v52, 0.0  ;;  %4440 = vmatpush1.bf16.msra.mxu0 %v16100_v19  ;;  %4483 = vmatpush1.bf16.msra.mxu1 %v16105_v28  ;;  %v16686_v52 = vld [vmem:[%s19389_s1 + $0x28] ss:$16 sps:$4 sm:$0xff]   ;;  %v16707_v59 = vld [vmem:[%s19389_s1 + $0x40] ss:$16 sps:$4 sm:$0xff]  }
 0x290   :  { %v16517_v51 = vpack.c.bf16 %v2806_v40, %v2804_v63  ;;  %4441 = vmatprep.subr.bf16.mxu0 %v16112_v4  ;;  %4484 = vmatprep.subr.bf16.mxu1 %v16117_v35  ;;  %v16693_v40 = vld [vmem:[%s19389_s1 + $0x44] ss:$16 sps:$4 sm:$0xff]  }
 0x291   :  { %v16521_v53 = vpack.c.bf16 %v2807_v36, %v2805_v60  ;;  %v16698_v60 = vld [vmem:[%s19389_s1 + $0x4c] ss:$16 sps:$4 sm:$0xff]  }
 0x292   :  { %19419 = vst [vmem:[#allocation11_spill] sm:$0xff] %v16517_v51 }
 0x293   :  { %19420 = vst [vmem:[#allocation12_spill] sm:$0xff] %v16521_v53  ;;  %4442 = vmatpush1.bf16.msra.mxu0 %v16126_v5  ;;  %4485 = vmatpush1.bf16.msra.mxu1 %v16131_v8 }
 0x294   :  { %4443 = vmatprep.subr.bf16.mxu0 %v16140_v6  ;;  %4486 = vmatprep.subr.bf16.mxu1 %v16145_v7 }
 0x297   :  { %4444 = vmatpush1.bf16.msra.mxu0 %v16154_v27  ;;  %4487 = vmatpush1.bf16.msra.mxu1 %v16159_v30 }
 0x298   :  { %4445 = vmatprep.subr.bf16.mxu0 %v16166_v0  ;;  %4488 = vmatprep.subr.bf16.mxu1 %v16171_v16 }
 0x29b   :  { %4446 = vmatpush1.bf16.msra.mxu0 %v16178_v39  ;;  %4489 = vmatpush1.bf16.msra.mxu1 %v16183_v3 }
 0x29c   :  { %4447 = vmatprep.subr.bf16.mxu0 %v16190_v17  ;;  %4490 = vmatprep.subr.bf16.mxu1 %v16195_v29 }
 0x29f   :  { %4448 = vmatpush1.bf16.msra.mxu0 %v16202_v23  ;;  %4491 = vmatpush1.bf16.msra.mxu1 %v16207_v34 }
 0x2a0   :  { %4449 = vmatprep.subr.bf16.mxu0 %v16214_v1  ;;  %4492 = vmatprep.subr.bf16.mxu1 %v16219_v2 }
 0x2a3   :  { %4450 = vmatpush1.bf16.msra.mxu0 %v16226_v11  ;;  %4493 = vmatpush1.bf16.msra.mxu1 %v16231_v12 }
 0x2a4   :  { %4451 = vmatprep.subr.bf16.mxu0 %v16236_v14  ;;  %4494 = vmatprep.subr.bf16.mxu1 %v16243_v15 }
 0x2a7   :  { %4452 = vmatpush1.bf16.msra.mxu0 %v16266_v46  ;;  %4495 = vmatpush1.bf16.msra.mxu1 %v16271_v47 }
 0x2a8   :  { %12391 = vmatprep.subr.msk.bf16.mxu0 %vm266_vm1, %v12388_v38  ;;  %12393 = vmatprep.subr.msk.bf16.mxu1 %vm266_vm1, %v12390_v50 }
 0x2a9   :  { %v16563_v37 = vpop.f32.mrb[48].mxu0  ;;  %v16565_v26 = vpop.f32.mrb[48].mxu1 }
 0x2aa   :  { %v16567_v33 = vpop.f32.mrb[49].mxu0  ;;  %v16569_v43 = vpop.f32.mrb[49].mxu1 }
 0x2ab   :  { %v16574_v31 = vpop.f32.mrb[50].mxu0  ;;  %v16576_v21 = vpop.f32.mrb[50].mxu1  ;;  %4454 = vmatpush1.bf16.msra.mxu0 %v16558_v25  ;;  %4497 = vmatpush1.bf16.msra.mxu1 %v16561_v10 }
 0x2ac   :  { %v16580_v62 = vpop.f32.mrb[51].mxu0  ;;  %v16582_v13 = vpop.f32.mrb[51].mxu1  ;;  %4538 = vmatprep.subr.bf16.mxu0 %v16048_v24  ;;  %4581 = vmatprep.subr.bf16.mxu1 %v16053_v32  ;;  %v3250_v24 = vld [vmem:[%s19391_s2] sm:$0x3]  ;;  %v16629_v32 = vld [vmem:[%s19389_s1 + $0x4] ss:$16 sps:$4 sm:$0xff]  }
 0x2ae   :  { %4470 = vmatmul.mubr.bf16.vlgmr.msra.gmra.mrb[72].mxu0 %v13674_v61  ;;  %4513 = vmatmul.mubr.bf16.vlgmr.msra.gmra.mrb[72].mxu1 %v13674_v61  ;;  %v16747_v61 = vld [vmem:[%s19389_s1 + $0x84] ss:$16 sps:$4 sm:$0xff]  }
 0x2af   :  { %4539 = vmatpush1.bf16.msra.mxu0 %v16069_v48  ;;  %4582 = vmatpush1.bf16.msra.mxu1 %v16074_v49  ;;  %v16634_v48 = vld [vmem:[%s19389_s1 + $0xc] ss:$16 sps:$4 sm:$0xff]  }
 0x2b0   :  { %4540 = vmatprep.subr.bf16.mxu0 %v16083_v55  ;;  %4583 = vmatprep.subr.bf16.mxu1 %v16088_v56 }
 0x2b1   :  { %12400 = vmatprep.mubr.msk.bf16.mxu0 %vm262_vm0, %v13675_v44  ;;  %12402 = vmatprep.mubr.msk.bf16.mxu1 %vm262_vm0, %v13675_v44  ;;  %v16776_v44 = vld [vmem:[%s19389_s1 + $0xac] ss:$16 sps:$4 sm:$0xff]  }
 0x2b3   :  { %4541 = vmatpush1.bf16.msra.mxu0 %v16100_v19  ;;  %4584 = vmatpush1.bf16.msra.mxu1 %v16105_v28  ;;  %v3255_v28 = vrot.slane %v3250_v24, %v15451_v20 }
 0x2b4   :  { %4542 = vmatprep.subr.bf16.mxu0 %v16112_v4  ;;  %4585 = vmatprep.subr.bf16.mxu1 %v16117_v35 }
 0x2b7   :  { %4543 = vmatpush1.bf16.msra.mxu0 %v16126_v5  ;;  %4586 = vmatpush1.bf16.msra.mxu1 %v16131_v8  ;;  %v13677_v5 = vld [vmem:[%s19390_s0 + $0x130] ss:$8 sps:$4 sm:$0xff]  }
 0x2b8   :  { %4544 = vmatprep.subr.bf16.mxu0 %v16140_v6  ;;  %4587 = vmatprep.subr.bf16.mxu1 %v16145_v7  ;;  %v3259_v7 = vrot.slane %v3250_v24, %v15458_v22  ;;  %v16781_v24 = vld [vmem:[%s19389_s1 + $0xa0] ss:$16 sps:$4 sm:$0xff]  }
 0x2bb   :  { %4545 = vmatpush1.bf16.msra.mxu0 %v16154_v27  ;;  %4588 = vmatpush1.bf16.msra.mxu1 %v16159_v30 }
 0x2bc   :  { %4546 = vmatprep.subr.bf16.mxu0 %v16166_v0  ;;  %4589 = vmatprep.subr.bf16.mxu1 %v16171_v16  ;;  %v16650_v0 = vld [vmem:[%s19389_s1] ss:$16 sps:$4 sm:$0xff]   ;;  %v16655_v16 = vld [vmem:[%s19389_s1 + $0x8] ss:$16 sps:$4 sm:$0xff]  }
 0x2bf   :  { %4547 = vmatpush1.bf16.msra.mxu0 %v16178_v39  ;;  %4590 = vmatpush1.bf16.msra.mxu1 %v16183_v3 }
 0x2c0   :  { %4548 = vmatprep.subr.bf16.mxu0 %v16190_v17  ;;  %4591 = vmatprep.subr.bf16.mxu1 %v16195_v29 }
 0x2c3   :  { %4549 = vmatpush1.bf16.msra.mxu0 %v16202_v23  ;;  %4592 = vmatpush1.bf16.msra.mxu1 %v16207_v34  ;;  %v16664_v34 = vld [vmem:[%s19389_s1 + $0x24] ss:$16 sps:$4 sm:$0xff]  }
 0x2c4   :  { %4550 = vmatprep.subr.bf16.mxu0 %v16214_v1  ;;  %4593 = vmatprep.subr.bf16.mxu1 %v16219_v2  ;;  %v16669_v1 = vld [vmem:[%s19389_s1 + $0x2c] ss:$16 sps:$4 sm:$0xff]  }
 0x2c7   :  { %4551 = vmatpush1.bf16.msra.mxu0 %v16226_v11  ;;  %4594 = vmatpush1.bf16.msra.mxu1 %v16231_v12 }
 0x2c8   :  { %4552 = vmatprep.subr.bf16.mxu0 %v16236_v14  ;;  %4595 = vmatprep.subr.bf16.mxu1 %v16243_v15  ;;  %v13730_v14 = vld [vmem:[%s19390_s0 + $0x144] ss:$8 sps:$4 sm:$0xff]  }
 0x2cb   :  { %4553 = vmatpush1.bf16.msra.mxu0 %v16266_v46  ;;  %4596 = vmatpush1.bf16.msra.mxu1 %v16271_v47 }
 0x2cc   :  { %12399 = vmatprep.subr.msk.bf16.mxu0 %vm266_vm1, %v12388_v38  ;;  %12401 = vmatprep.subr.msk.bf16.mxu1 %vm266_vm1, %v12390_v50 }
 0x2cd   :  { %v3186_v49 = vpop.f32.mrb[52].mxu0  ;;  %v3229_v55 = vpop.f32.mrb[52].mxu1 }
 0x2ce   :  { %v3238_v56 = vmax.f32 %v16563_v37, %v3186_v49  ;;  %v3240_v19 = vmax.f32 %v16565_v26, %v3229_v55  ;;  %v3188_v4 = vpop.f32.mrb[53].mxu0  ;;  %v3231_v35 = vpop.f32.mrb[53].mxu1  ;;  %v16726_v37 = vld [vmem:[%s19389_s1 + $0x6c] ss:$16 sps:$4 sm:$0xff]   ;;  %v16786_v49 = vld [vmem:[%s19389_s1 + $0xa8] ss:$16 sps:$4 sm:$0xff]  }
 0x2cf   :  { %v3239_v8 = vmax.f32 %v16567_v33, %v3188_v4  ;;  %v3241_v6 = vmax.f32 %v16569_v43, %v3231_v35  ;;  %v3190_v27 = vpop.f32.mrb[54].mxu0  ;;  %v3233_v30 = vpop.f32.mrb[54].mxu1  ;;  %4555 = vmatpush1.bf16.msra.mxu0 %v16558_v25  ;;  %4598 = vmatpush1.bf16.msra.mxu1 %v16561_v10  ;;  %v16721_v10 = vld [vmem:[%s19389_s1 + $0x64] ss:$16 sps:$4 sm:$0xff]   ;;  %v16735_v33 = vld [vmem:[%s19389_s1 + $0x60] ss:$16 sps:$4 sm:$0xff]  }
 0x2d0   :  { %v3246_v39 = vmax.f32 %v3238_v56, %v3240_v19  ;;  %v3242_v3 = vmax.f32 %v16574_v31, %v3190_v27  ;;  %v3244_v17 = vmax.f32 %v16576_v21, %v3233_v30  ;;  %v3192_v29 = vpop.f32.mrb[55].mxu0  ;;  %v3235_v23 = vpop.f32.mrb[55].mxu1  ;;  %4899 = vmatprep.subr.bf16.mxu0 %v16629_v32  ;;  %4942 = vmatprep.subr.bf16.mxu1 %v16634_v48  ;;  %v16740_v43 = vld [vmem:[%s19389_s1 + $0x68] ss:$16 sps:$4 sm:$0xff]   ;;  %v16752_v31 = vld [vmem:[%s19389_s1 + $0x8c] ss:$16 sps:$4 sm:$0xff]  }
 0x2d1   :  { %v3247_v2 = vmax.f32 %v3239_v8, %v3241_v6  ;;  %v3243_v11 = vmax.f32 %v16580_v62, %v3192_v29  ;;  %v3245_v12 = vmax.f32 %v16582_v13, %v3235_v23  ;;  %v16759_v21 = vld [vmem:[%s19389_s1 + $0x80] ss:$16 sps:$4 sm:$0xff]   ;;  %v16764_v62 = vld [vmem:[%s19389_s1 + $0x88] ss:$16 sps:$4 sm:$0xff]   ;;  %v16769_v13 = vld [vmem:[%s19389_s1 + $0xa4] ss:$16 sps:$4 sm:$0xff]  }
 0x2d2   :  { %v3262_v15 = vadd.f32 %v3255_v28, %v3246_v39  ;;  %v3248_v46 = vmax.f32 %v3242_v3, %v3244_v17  ;;  %4571 = vmatmul.mubr.bf16.vlgmr.msra.gmra.mrb[76].mxu0 %v13677_v5  ;;  %4614 = vmatmul.mubr.bf16.vlgmr.msra.gmra.mrb[76].mxu1 %v13677_v5  ;;  %v16791_v55 = vld [vmem:[%s19389_s1 + $0xc4] ss:$16 sps:$4 sm:$0xff]   ;;  %v16796_v56 = vld [vmem:[%s19389_s1 + $0xcc] ss:$16 sps:$4 sm:$0xff]   ;;  %v16805_v19 = vld [vmem:[%s19389_s1 + $0xc0] ss:$16 sps:$4 sm:$0xff]  }
 0x2d3   :  { %v3263_v47 = vadd.f32 %v3259_v7, %v3247_v2  ;;  %v3249_v57 = vmax.f32 %v3243_v11, %v3245_v12  ;;  %4900 = vmatpush1.bf16.msra.mxu0 %v16650_v0  ;;  %4943 = vmatpush1.bf16.msra.mxu1 %v16655_v16  ;;  %v16815_v4 = vld [vmem:[%s19389_s1 + $0xe4] ss:$16 sps:$4 sm:$0xff]   ;;  %v16820_v35 = vld [vmem:[%s19389_s1 + $0xec] ss:$16 sps:$4 sm:$0xff]   ;;  %v16837_v6 = vld [vmem:[%s19389_s1 + $0xe0] ss:$16 sps:$4 sm:$0xff]  }
 0x2d4   :  { %v3264_v63 = vadd.f32 %v3255_v28, %v3248_v46  ;;  %4901 = vmatprep.subr.bf16.mxu0 %v16664_v34  ;;  %4944 = vmatprep.subr.bf16.mxu1 %v16669_v1  ;;  %v3266_v58 = vmax.f32 %v3262_v15, 0.0  ;;  %v16810_v28 = vld [vmem:[%s19389_s1 + $0xc8] ss:$16 sps:$4 sm:$0xff]   ;;  %v16825_v5 = vld [vmem:[%s19389_s1 + $0x100] sm:$0xff]  ;;  %v4697_v8 = vld [vmem:[%s19389_s1 + $0x110] sm:$0x33] }
 0x2d5   :  { %v3265_v36 = vadd.f32 %v3259_v7, %v3249_v57  ;;  %12444 = vmatprep.mubr.msk.bf16.mxu0 %vm262_vm0, %v13730_v14  ;;  %12446 = vmatprep.mubr.msk.bf16.mxu1 %vm262_vm0, %v13730_v14  ;;  %v3267_v38 = vmax.f32 %v3263_v47, 0.0  ;;  %v16842_v7 = vld [vmem:[%s19389_s1 + $0xe8] ss:$16 sps:$4 sm:$0xff]   ;;  %v12440_v39 = vcombine.high %v16825_v5, %v4697_v8  ;;  %v12439_v17 = vcombine.low %v16825_v5, %v4697_v8 }
 0x2d6   :  { %v3268_v54 = vmax.f32 %v3264_v63, 0.0  ;;  %v16847_v27 = vld [vmem:[%s19389_s1 + $0x108] sm:$0xff]  ;;  %v4698_v30 = vld [vmem:[%s19389_s1 + $0x118] sm:$0x33] }
 0x2d7   :  { %v3269_v50 = vmax.f32 %v3265_v36, 0.0  ;;  %4902 = vmatpush1.bf16.msra.mxu0 %v16681_v41  ;;  %4945 = vmatpush1.bf16.msra.mxu1 %v16686_v52  ;;  %v12442_v3 = vcombine.high %v16847_v27, %v4698_v30  ;;  %v12441_v29 = vcombine.low %v16847_v27, %v4698_v30  ;;  %v16865_v23 = vsel %vm266_vm1, %v12439_v17, 0  ;;  %v13732_v11 = vld [vmem:[%s19390_s0 + $0x140] ss:$8 sps:$4 sm:$0xff]  }
 0x2d8   :  { %v16714_v25 = vpack.c.bf16 %v3268_v54, %v3266_v58  ;;  %4903 = vmatprep.subr.bf16.mxu0 %v16693_v40  ;;  %4946 = vmatprep.subr.bf16.mxu1 %v16698_v60  ;;  %v13733_v58 = vld [vmem:[%s19390_s0 + $0x154] ss:$8 sps:$4 sm:$0xff]   ;;  %v3712_v54 = vld [vmem:[%s19391_s2] sm:$0x3] }
 0x2d9   :  { %v16728_v26 = vpack.c.bf16 %v3269_v50, %v3267_v38  ;;  %v16868_v2 = vsel %vm266_vm1, %v12441_v29, 0  ;;  %v13735_v38 = vld [vmem:[%s19390_s0 + $0x150] ss:$8 sps:$4 sm:$0xff]   ;;  %v3717_v29 = vrot.slane %v3712_v54, %v15451_v20 }
 0x2da   :  { %19421 = vst [vmem:[#allocation13_spill] sm:$0xff] %v16714_v25 }
 0x2db   :  { %19422 = vst [vmem:[#allocation14_spill] sm:$0xff] %v16728_v26  ;;  %4904 = vmatpush1.bf16.msra.mxu0 %v16707_v59  ;;  %4947 = vmatpush1.bf16.msra.mxu1 %v16712_v9 }
 0x2dc   :  { %4905 = vmatprep.subr.bf16.mxu0 %v16721_v10  ;;  %4948 = vmatprep.subr.bf16.mxu1 %v16726_v37 }
 0x2df   :  { %4906 = vmatpush1.bf16.msra.mxu0 %v16735_v33  ;;  %4949 = vmatpush1.bf16.msra.mxu1 %v16740_v43 }
 0x2e0   :  { %4907 = vmatprep.subr.bf16.mxu0 %v16747_v61  ;;  %4950 = vmatprep.subr.bf16.mxu1 %v16752_v31 }
 0x2e3   :  { %4908 = vmatpush1.bf16.msra.mxu0 %v16759_v21  ;;  %4951 = vmatpush1.bf16.msra.mxu1 %v16764_v62 }
 0x2e4   :  { %4909 = vmatprep.subr.bf16.mxu0 %v16769_v13  ;;  %4952 = vmatprep.subr.bf16.mxu1 %v16776_v44 }
 0x2e7   :  { %4910 = vmatpush1.bf16.msra.mxu0 %v16781_v24  ;;  %4953 = vmatpush1.bf16.msra.mxu1 %v16786_v49 }
 0x2e8   :  { %4911 = vmatprep.subr.bf16.mxu0 %v16791_v55  ;;  %4954 = vmatprep.subr.bf16.mxu1 %v16796_v56 }
 0x2eb   :  { %4912 = vmatpush1.bf16.msra.mxu0 %v16805_v19  ;;  %4955 = vmatpush1.bf16.msra.mxu1 %v16810_v28 }
 0x2ec   :  { %4913 = vmatprep.subr.bf16.mxu0 %v16815_v4  ;;  %4956 = vmatprep.subr.bf16.mxu1 %v16820_v35 }
 0x2ef   :  { %4914 = vmatpush1.bf16.msra.mxu0 %v16837_v6  ;;  %4957 = vmatpush1.bf16.msra.mxu1 %v16842_v7 }
 0x2f0   :  { %12443 = vmatprep.subr.msk.bf16.mxu0 %vm266_vm1, %v12440_v39  ;;  %12445 = vmatprep.subr.msk.bf16.mxu1 %vm266_vm1, %v12442_v3 }
 0x2f1   :  { %v16873_v12 = vpop.f32.mrb[56].mxu0  ;;  %v16875_v14 = vpop.f32.mrb[56].mxu1 }
 0x2f2   :  { %v16877_v15 = vpop.f32.mrb[57].mxu0  ;;  %v16879_v46 = vpop.f32.mrb[57].mxu1 }
 0x2f3   :  { %v16881_v47 = vpop.f32.mrb[58].mxu0  ;;  %v16883_v57 = vpop.f32.mrb[58].mxu1  ;;  %4916 = vmatpush1.bf16.msra.mxu0 %v16865_v23  ;;  %4959 = vmatpush1.bf16.msra.mxu1 %v16868_v2 }
 0x2f4   :  { %v16887_v63 = vpop.f32.mrb[59].mxu0  ;;  %v16889_v36 = vpop.f32.mrb[59].mxu1  ;;  %5000 = vmatprep.subr.bf16.mxu0 %v16629_v32  ;;  %5043 = vmatprep.subr.bf16.mxu1 %v16634_v48 }
 0x2f6   :  { %4932 = vmatmul.mubr.bf16.vlgmr.msra.gmra.mrb[80].mxu0 %v13732_v11  ;;  %4975 = vmatmul.mubr.bf16.vlgmr.msra.gmra.mrb[80].mxu1 %v13732_v11 }
 0x2f7   :  { %5001 = vmatpush1.bf16.msra.mxu0 %v16650_v0  ;;  %5044 = vmatpush1.bf16.msra.mxu1 %v16655_v16 }
 0x2f8   :  { %5002 = vmatprep.subr.bf16.mxu0 %v16664_v34  ;;  %5045 = vmatprep.subr.bf16.mxu1 %v16669_v1 }
 0x2f9   :  { %12452 = vmatprep.mubr.msk.bf16.mxu0 %vm262_vm0, %v13733_v58  ;;  %12454 = vmatprep.mubr.msk.bf16.mxu1 %vm262_vm0, %v13733_v58 }
 0x2fb   :  { %5003 = vmatpush1.bf16.msra.mxu0 %v16681_v41  ;;  %5046 = vmatpush1.bf16.msra.mxu1 %v16686_v52 }
 0x2fc   :  { %5004 = vmatprep.subr.bf16.mxu0 %v16693_v40  ;;  %5047 = vmatprep.subr.bf16.mxu1 %v16698_v60 }
 0x2ff   :  { %5005 = vmatpush1.bf16.msra.mxu0 %v16707_v59  ;;  %5048 = vmatpush1.bf16.msra.mxu1 %v16712_v9 }
 0x300   :  { %5006 = vmatprep.subr.bf16.mxu0 %v16721_v10  ;;  %5049 = vmatprep.subr.bf16.mxu1 %v16726_v37 }
 0x303   :  { %5007 = vmatpush1.bf16.msra.mxu0 %v16735_v33  ;;  %5050 = vmatpush1.bf16.msra.mxu1 %v16740_v43 }
 0x304   :  { %5008 = vmatprep.subr.bf16.mxu0 %v16747_v61  ;;  %5051 = vmatprep.subr.bf16.mxu1 %v16752_v31 }
 0x307   :  { %5009 = vmatpush1.bf16.msra.mxu0 %v16759_v21  ;;  %5052 = vmatpush1.bf16.msra.mxu1 %v16764_v62 }
 0x308   :  { %5010 = vmatprep.subr.bf16.mxu0 %v16769_v13  ;;  %5053 = vmatprep.subr.bf16.mxu1 %v16776_v44 }
 0x30b   :  { %5011 = vmatpush1.bf16.msra.mxu0 %v16781_v24  ;;  %5054 = vmatpush1.bf16.msra.mxu1 %v16786_v49 }
 0x30c   :  { %5012 = vmatprep.subr.bf16.mxu0 %v16791_v55  ;;  %5055 = vmatprep.subr.bf16.mxu1 %v16796_v56 }
 0x30f   :  { %5013 = vmatpush1.bf16.msra.mxu0 %v16805_v19  ;;  %5056 = vmatpush1.bf16.msra.mxu1 %v16810_v28 }
 0x310   :  { %5014 = vmatprep.subr.bf16.mxu0 %v16815_v4  ;;  %5057 = vmatprep.subr.bf16.mxu1 %v16820_v35 }
 0x313   :  { %5015 = vmatpush1.bf16.msra.mxu0 %v16837_v6  ;;  %5058 = vmatpush1.bf16.msra.mxu1 %v16842_v7 }
 0x314   :  { %12451 = vmatprep.subr.msk.bf16.mxu0 %vm266_vm1, %v12440_v39  ;;  %12453 = vmatprep.subr.msk.bf16.mxu1 %vm266_vm1, %v12442_v3  ;;  %v3721_v3 = vrot.slane %v3712_v54, %v15458_v22 }
 0x315   :  { %v3648_v50 = vpop.f32.mrb[60].mxu0  ;;  %v3691_v8 = vpop.f32.mrb[60].mxu1 }
 0x316   :  { %v3700_v30 = vmax.f32 %v16873_v12, %v3648_v50  ;;  %v3702_v17 = vmax.f32 %v16875_v14, %v3691_v8  ;;  %v3650_v11 = vpop.f32.mrb[61].mxu0  ;;  %v3693_v58 = vpop.f32.mrb[61].mxu1 }
 0x317   :  { %v3701_v25 = vmax.f32 %v16877_v15, %v3650_v11  ;;  %v3703_v39 = vmax.f32 %v16879_v46, %v3693_v58  ;;  %v3652_v26 = vpop.f32.mrb[62].mxu0  ;;  %v3695_v51 = vpop.f32.mrb[62].mxu1  ;;  %5017 = vmatpush1.bf16.msra.mxu0 %v16865_v23  ;;  %5060 = vmatpush1.bf16.msra.mxu1 %v16868_v2  ;;  %v13740_v15 = vld [vmem:[%s19390_s0 + $0x164] ss:$8 sps:$4 sm:$0xff]   ;;  %v5160_v11 = vld [vmem:[%s19389_s1 + $0x118] sm:$0x33] }
 0x318   :  { %v3708_v53 = vmax.f32 %v3700_v30, %v3702_v17  ;;  %v3704_v12 = vmax.f32 %v16881_v47, %v3652_v26  ;;  %v3706_v14 = vmax.f32 %v16883_v57, %v3695_v51  ;;  %v3654_v50 = vpop.f32.mrb[63].mxu0  ;;  %v3697_v8 = vpop.f32.mrb[63].mxu1  ;;  %5361 = vmatprep.subr.bf16.mxu0 %v16629_v32  ;;  %5404 = vmatprep.subr.bf16.mxu1 %v16634_v48 }
 0x319   :  { %v3709_v46 = vmax.f32 %v3701_v25, %v3703_v39  ;;  %v3705_v23 = vmax.f32 %v16887_v63, %v3654_v50  ;;  %v3707_v2 = vmax.f32 %v16889_v36, %v3697_v8  ;;  %v12494_v39 = vcombine.high %v16847_v27, %v5160_v11 }
 0x31a   :  { %v3724_v54 = vadd.f32 %v3717_v29, %v3708_v53  ;;  %v3710_v30 = vmax.f32 %v3704_v12, %v3706_v14  ;;  %5033 = vmatmul.mubr.bf16.vlgmr.msra.gmra.mrb[84].mxu0 %v13735_v38  ;;  %5076 = vmatmul.mubr.bf16.vlgmr.msra.gmra.mrb[84].mxu1 %v13735_v38  ;;  %v12493_v12 = vcombine.low %v16847_v27, %v5160_v11  ;;  %v13755_v11 = vld [vmem:[%s19392_s3 + $0x30] ss:$8 sps:$4 sm:$0xff]  }
 0x31b   :  { %v3725_v51 = vadd.f32 %v3721_v3, %v3709_v46  ;;  %v3711_v26 = vmax.f32 %v3705_v23, %v3707_v2  ;;  %5362 = vmatpush1.bf16.msra.mxu0 %v16650_v0  ;;  %5405 = vmatpush1.bf16.msra.mxu1 %v16655_v16 }
 0x31c   :  { %v3726_v47 = vadd.f32 %v3717_v29, %v3710_v30  ;;  %5363 = vmatprep.subr.bf16.mxu0 %v16664_v34  ;;  %5406 = vmatprep.subr.bf16.mxu1 %v16669_v1  ;;  %v3728_v53 = vmax.f32 %v3724_v54, 0.0  ;;  %v5159_v29 = vld [vmem:[%s19389_s1 + $0x110] sm:$0x33]  ;;  %v17005_v50 = vsel %vm266_vm1, %v12493_v12, 0 }
 0x31d   :  { %v3727_v25 = vadd.f32 %v3721_v3, %v3711_v26  ;;  %12496 = vmatprep.mubr.msk.bf16.mxu0 %vm262_vm0, %v13740_v15  ;;  %12498 = vmatprep.mubr.msk.bf16.mxu1 %vm262_vm0, %v13740_v15  ;;  %v3729_v63 = vmax.f32 %v3725_v51, 0.0  ;;  %v12492_v58 = vcombine.high %v16825_v5, %v5159_v29  ;;  %v12491_v3 = vcombine.low %v16825_v5, %v5159_v29  ;;  %v13742_v5 = vld [vmem:[%s19390_s0 + $0x160] ss:$8 sps:$4 sm:$0xff]   ;;  %v13743_v51 = vld [vmem:[%s19390_s0 + $0x174] ss:$8 sps:$4 sm:$0xff]  }
 0x31e   :  { %v3730_v57 = vmax.f32 %v3726_v47, 0.0  ;;  %v13752_v47 = vld [vmem:[%s19392_s3 + $0x20] ss:$8 sps:$4 sm:$0xff]   ;;  %v13761_v12 = vld [vmem:[%s19392_s3 + $0x50] ss:$8 sps:$4 sm:$0xff]  }
 0x31f   :  { %v3731_v36 = vmax.f32 %v3727_v25, 0.0  ;;  %5364 = vmatpush1.bf16.msra.mxu0 %v16681_v41  ;;  %5407 = vmatpush1.bf16.msra.mxu1 %v16686_v52  ;;  %v17002_v14 = vsel %vm266_vm1, %v12491_v3, 0  ;;  %v13763_v3 = vld [vmem:[%s19392_s3 + $0x54] ss:$8 sps:$4 sm:$0xff]  }
 0x320   :  { %v16961_v38 = vpack.c.bf16 %v3730_v57, %v3728_v53  ;;  %5365 = vmatprep.subr.bf16.mxu0 %v16693_v40  ;;  %5408 = vmatprep.subr.bf16.mxu1 %v16698_v60 }
 0x321   :  { %v16965_v17 = vpack.c.bf16 %v3731_v36, %v3729_v63 }
 0x323   :  { %5366 = vmatpush1.bf16.msra.mxu0 %v16707_v59  ;;  %5409 = vmatpush1.bf16.msra.mxu1 %v16712_v9 }
 0x324   :  { %5367 = vmatprep.subr.bf16.mxu0 %v16721_v10  ;;  %5410 = vmatprep.subr.bf16.mxu1 %v16726_v37 }
 0x327   :  { %5368 = vmatpush1.bf16.msra.mxu0 %v16735_v33  ;;  %5411 = vmatpush1.bf16.msra.mxu1 %v16740_v43 }
 0x328   :  { %5369 = vmatprep.subr.bf16.mxu0 %v16747_v61  ;;  %5412 = vmatprep.subr.bf16.mxu1 %v16752_v31 }
 0x32b   :  { %5370 = vmatpush1.bf16.msra.mxu0 %v16759_v21  ;;  %5413 = vmatpush1.bf16.msra.mxu1 %v16764_v62 }
 0x32c   :  { %5371 = vmatprep.subr.bf16.mxu0 %v16769_v13  ;;  %5414 = vmatprep.subr.bf16.mxu1 %v16776_v44 }
 0x32f   :  { %5372 = vmatpush1.bf16.msra.mxu0 %v16781_v24  ;;  %5415 = vmatpush1.bf16.msra.mxu1 %v16786_v49 }
 0x330   :  { %5373 = vmatprep.subr.bf16.mxu0 %v16791_v55  ;;  %5416 = vmatprep.subr.bf16.mxu1 %v16796_v56 }
 0x333   :  { %5374 = vmatpush1.bf16.msra.mxu0 %v16805_v19  ;;  %5417 = vmatpush1.bf16.msra.mxu1 %v16810_v28 }
 0x334   :  { %5375 = vmatprep.subr.bf16.mxu0 %v16815_v4  ;;  %5418 = vmatprep.subr.bf16.mxu1 %v16820_v35 }
 0x337   :  { %5376 = vmatpush1.bf16.msra.mxu0 %v16837_v6  ;;  %5419 = vmatpush1.bf16.msra.mxu1 %v16842_v7 }
 0x338   :  { %12495 = vmatprep.subr.msk.bf16.mxu0 %vm266_vm1, %v12492_v58  ;;  %12497 = vmatprep.subr.msk.bf16.mxu1 %vm266_vm1, %v12494_v39 }
 0x339   :  { %v17010_v8 = vpop.f32.mrb[64].mxu0  ;;  %v17012_v27 = vpop.f32.mrb[64].mxu1 }
 0x33a   :  { %v17014_v15 = vpop.f32.mrb[65].mxu0  ;;  %v17016_v46 = vpop.f32.mrb[65].mxu1 }
 0x33b   :  { %v17018_v23 = vpop.f32.mrb[66].mxu0  ;;  %v17020_v2 = vpop.f32.mrb[66].mxu1  ;;  %5378 = vmatpush1.bf16.msra.mxu0 %v17002_v14  ;;  %5421 = vmatpush1.bf16.msra.mxu1 %v17005_v50 }
 0x33c   :  { %v17024_v54 = vpop.f32.mrb[67].mxu0  ;;  %v17026_v30 = vpop.f32.mrb[67].mxu1  ;;  %5462 = vmatprep.subr.bf16.mxu0 %v16629_v32  ;;  %5505 = vmatprep.subr.bf16.mxu1 %v16634_v48  ;;  %v4174_v32 = vld [vmem:[%s19391_s2] sm:$0x3]  ;;  %v13745_v48 = vld [vmem:[%s19390_s0 + $0x170] ss:$8 sps:$4 sm:$0xff]  }
 0x33e   :  { %5394 = vmatmul.mubr.bf16.vlgmr.msra.gmra.mrb[88].mxu0 %v13742_v5  ;;  %5437 = vmatmul.mubr.bf16.vlgmr.msra.gmra.mrb[88].mxu1 %v13742_v5  ;;  %v13769_v5 = vld [vmem:[%s19392_s3 + $0x74] ss:$8 sps:$4 sm:$0xff]  }
 0x33f   :  { %5463 = vmatpush1.bf16.msra.mxu0 %v16650_v0  ;;  %5506 = vmatpush1.bf16.msra.mxu1 %v16655_v16  ;;  %v13748_v0 = vld [vmem:[%s19392_s3 + $0x4] ss:$8 sps:$4 sm:$0xff]  }
 0x340   :  { %5464 = vmatprep.subr.bf16.mxu0 %v16664_v34  ;;  %5507 = vmatprep.subr.bf16.mxu1 %v16669_v1  ;;  %v13746_v1 = vld [vmem:[%s19392_s3] ss:$8 sps:$4 sm:$0xff]  }
 0x341   :  { %12504 = vmatprep.mubr.msk.bf16.mxu0 %vm262_vm0, %v13743_v51  ;;  %12506 = vmatprep.mubr.msk.bf16.mxu1 %vm262_vm0, %v13743_v51 }
 0x343   :  { %5465 = vmatpush1.bf16.msra.mxu0 %v16681_v41  ;;  %5508 = vmatpush1.bf16.msra.mxu1 %v16686_v52 }
 0x344   :  { %5466 = vmatprep.subr.bf16.mxu0 %v16693_v40  ;;  %5509 = vmatprep.subr.bf16.mxu1 %v16698_v60  ;;  %v4179_v40 = vrot.slane %v4174_v32, %v15451_v20 }
 0x347   :  { %5467 = vmatpush1.bf16.msra.mxu0 %v16707_v59  ;;  %5510 = vmatpush1.bf16.msra.mxu1 %v16712_v9 }
 0x348   :  { %5468 = vmatprep.subr.bf16.mxu0 %v16721_v10  ;;  %5511 = vmatprep.subr.bf16.mxu1 %v16726_v37  ;;  %v4183_v37 = vrot.slane %v4174_v32, %v15458_v22 }
 0x34b   :  { %5469 = vmatpush1.bf16.msra.mxu0 %v16735_v33  ;;  %5512 = vmatpush1.bf16.msra.mxu1 %v16740_v43 }
 0x34c   :  { %5470 = vmatprep.subr.bf16.mxu0 %v16747_v61  ;;  %5513 = vmatprep.subr.bf16.mxu1 %v16752_v31  ;;  %v13751_v61 = vld [vmem:[%s19392_s3 + $0x14] ss:$8 sps:$4 sm:$0xff]  }
 0x34f   :  { %5471 = vmatpush1.bf16.msra.mxu0 %v16759_v21  ;;  %5514 = vmatpush1.bf16.msra.mxu1 %v16764_v62 }
 0x350   :  { %5472 = vmatprep.subr.bf16.mxu0 %v16769_v13  ;;  %5515 = vmatprep.subr.bf16.mxu1 %v16776_v44 }
 0x353   :  { %5473 = vmatpush1.bf16.msra.mxu0 %v16781_v24  ;;  %5516 = vmatpush1.bf16.msra.mxu1 %v16786_v49 }
 0x354   :  { %5474 = vmatprep.subr.bf16.mxu0 %v16791_v55  ;;  %5517 = vmatprep.subr.bf16.mxu1 %v16796_v56 }
 0x357   :  { %5475 = vmatpush1.bf16.msra.mxu0 %v16805_v19  ;;  %5518 = vmatpush1.bf16.msra.mxu1 %v16810_v28  ;;  %v13749_v28 = vld [vmem:[%s19392_s3 + $0x10] ss:$8 sps:$4 sm:$0xff]  }
 0x358   :  { %5476 = vmatprep.subr.bf16.mxu0 %v16815_v4  ;;  %5519 = vmatprep.subr.bf16.mxu1 %v16820_v35  ;;  %v13754_v4 = vld [vmem:[%s19392_s3 + $0x24] ss:$8 sps:$4 sm:$0xff]  }
 0x35b   :  { %5477 = vmatpush1.bf16.msra.mxu0 %v16837_v6  ;;  %5520 = vmatpush1.bf16.msra.mxu1 %v16842_v7 }
 0x35c   :  { %12503 = vmatprep.subr.msk.bf16.mxu0 %vm266_vm1, %v12492_v58  ;;  %12505 = vmatprep.subr.msk.bf16.mxu1 %vm266_vm1, %v12494_v39  ;;  %v13760_v58 = vld [vmem:[%s19392_s3 + $0x44] ss:$8 sps:$4 sm:$0xff]   ;;  %v13758_v39 = vld [vmem:[%s19392_s3 + $0x40] ss:$8 sps:$4 sm:$0xff]  }
 0x35d   :  { %v4110_v16 = vpop.f32.mrb[68].mxu0  ;;  %v4153_v34 = vpop.f32.mrb[68].mxu1 }
 0x35e   :  { %v4162_v41 = vmax.f32 %v17010_v8, %v4110_v16  ;;  %v4164_v52 = vmax.f32 %v17012_v27, %v4153_v34  ;;  %v4112_v60 = vpop.f32.mrb[69].mxu0  ;;  %v4155_v59 = vpop.f32.mrb[69].mxu1  ;;  %v13767_v8 = vld [vmem:[%s19392_s3 + $0x70] ss:$8 sps:$4 sm:$0xff]   ;;  %v13772_v27 = vld [vmem:[%s19392_s3 + $0x84] ss:$8 sps:$4 sm:$0xff]  }
 0x35f   :  { %v4163_v9 = vmax.f32 %v17014_v15, %v4112_v60  ;;  %v4165_v10 = vmax.f32 %v17016_v46, %v4155_v59  ;;  %v4114_v33 = vpop.f32.mrb[70].mxu0  ;;  %v4157_v43 = vpop.f32.mrb[70].mxu1  ;;  %5479 = vmatpush1.bf16.msra.mxu0 %v17002_v14  ;;  %5522 = vmatpush1.bf16.msra.mxu1 %v17005_v50  ;;  %v13766_v14 = vld [vmem:[%s19392_s3 + $0x64] ss:$8 sps:$4 sm:$0xff]   ;;  %v13764_v50 = vld [vmem:[%s19392_s3 + $0x60] ss:$8 sps:$4 sm:$0xff]  }
 0x360   :  { %v4170_v31 = vmax.f32 %v4162_v41, %v4164_v52  ;;  %v4166_v21 = vmax.f32 %v17018_v23, %v4114_v33  ;;  %v4168_v62 = vmax.f32 %v17020_v2, %v4157_v43  ;;  %v4116_v13 = vpop.f32.mrb[71].mxu0  ;;  %v4159_v44 = vpop.f32.mrb[71].mxu1  ;;  %6554 = vmatprep.subr.bf16.mxu0 %v13748_v0  ;;  %6779 = vmatprep.subr.bf16.mxu1 %v13748_v0  ;;  %v13770_v15 = vld [vmem:[%s19392_s3 + $0x80] ss:$8 sps:$4 sm:$0xff]   ;;  %v13775_v46 = vld [vmem:[%s19392_s3 + $0x94] ss:$8 sps:$4 sm:$0xff]  }
 0x361   :  { %v4171_v24 = vmax.f32 %v4163_v9, %v4165_v10  ;;  %v4167_v49 = vmax.f32 %v17024_v54, %v4116_v13  ;;  %v4169_v55 = vmax.f32 %v17026_v30, %v4159_v44  ;;  %v13773_v54 = vld [vmem:[%s19392_s3 + $0x90] ss:$8 sps:$4 sm:$0xff]   ;;  %v13778_v34 = vld [vmem:[%s19392_s3 + $0xa4] ss:$8 sps:$4 sm:$0xff]   ;;  %v13781_v41 = vld [vmem:[%s19392_s3 + $0xb4] ss:$8 sps:$4 sm:$0xff]  }
 0x362   :  { %v4186_v56 = vadd.f32 %v4179_v40, %v4170_v31  ;;  %v4172_v19 = vmax.f32 %v4166_v21, %v4168_v62  ;;  %5495 = vmatmul.mubr.bf16.vlgmr.msra.gmra.mrb[92].mxu0 %v13745_v48  ;;  %5538 = vmatmul.mubr.bf16.vlgmr.msra.gmra.mrb[92].mxu1 %v13745_v48  ;;  %v13779_v52 = vld [vmem:[%s19392_s3 + $0xb0] ss:$8 sps:$4 sm:$0xff]   ;;  %v13782_v60 = vld [vmem:[%s19392_s3 + $0xc0] ss:$8 sps:$4 sm:$0xff]   ;;  %v13787_v59 = vld [vmem:[%s19392_s3 + $0xd4] ss:$8 sps:$4 sm:$0xff]  }
 0x363   :  { %v4187_v35 = vadd.f32 %v4183_v37, %v4171_v24  ;;  %v4173_v6 = vmax.f32 %v4167_v49, %v4169_v55  ;;  %6555 = vmatpush1.bf16.msra.mxu0 %v13746_v1  ;;  %6586 = vmatprep.mubr.bf16.mxu0 %v15566_v45  ;;  %v13757_v45 = vld [vmem:[%s19392_s3 + $0x34] ss:$8 sps:$4 sm:$0xff]   ;;  %v13785_v9 = vld [vmem:[%s19392_s3 + $0xd0] ss:$8 sps:$4 sm:$0xff]   ;;  %v13790_v10 = vld [vmem:[%s19392_s3 + $0xe4] ss:$8 sps:$4 sm:$0xff]  }
 0x364   :  { %v4188_v7 = vadd.f32 %v4179_v40, %v4172_v19  ;;  %6780 = vmatpush1.bf16.msra.mxu1 %v13746_v1  ;;  %6811 = vmatprep.mubr.bf16.mxu1 %v15803_v18  ;;  %v4190_v25 = vmax.f32 %v4186_v56, 0.0  ;;  %v13776_v1 = vld [vmem:[%s19392_s3 + $0xa0] ss:$8 sps:$4 sm:$0xff]   ;;  %v13784_v40 = vld [vmem:[%s19392_s3 + $0xc4] ss:$8 sps:$4 sm:$0xff]   ;;  %v19424_v49 = vld [vmem:[#allocation6_spill] sm:$0xff] }
 0x365   :  { %v4189_v26 = vadd.f32 %v4183_v37, %v4173_v6  ;;  %6556 = vmatprep.subr.bf16.mxu0 %v13751_v61  ;;  %6781 = vmatprep.subr.bf16.mxu1 %v13751_v61  ;;  %v4191_v57 = vmax.f32 %v4187_v35, 0.0  ;;  %v13788_v37 = vld [vmem:[%s19392_s3 + $0xe0] ss:$8 sps:$4 sm:$0xff]   ;;  %v13793_v33 = vld [vmem:[%s19392_s3 + $0xf4] ss:$8 sps:$4 sm:$0xff]  }
 0x366   :  { %v4192_v53 = vmax.f32 %v4188_v7, 0.0  ;;  %v13791_v43 = vld [vmem:[%s19392_s3 + $0xf0] ss:$8 sps:$4 sm:$0xff]   ;;  %v13796_v61 = vld [vmem:[%s19392_s3 + $0x104] ss:$8 sps:$4 sm:$0xff]  }
 0x367   :  { %v4193_v63 = vmax.f32 %v4189_v26, 0.0  ;;  %6557 = vmatpush1.bf16.msra.mxu0 %v13749_v28  ;;  %v13794_v31 = vld [vmem:[%s19392_s3 + $0x100] ss:$8 sps:$4 sm:$0xff]   ;;  %v13799_v21 = vld [vmem:[%s19392_s3 + $0x114] ss:$8 sps:$4 sm:$0xff]  }
 0x368   :  { %v17105_v36 = vpack.c.bf16 %v4192_v53, %v4190_v25  ;;  %6782 = vmatpush1.bf16.msra.mxu1 %v13749_v28  ;;  %6558 = vmatprep.subr.bf16.mxu0 %v13754_v4  ;;  %v13797_v62 = vld [vmem:[%s19392_s3 + $0x110] ss:$8 sps:$4 sm:$0xff]   ;;  %v4636_v13 = vld [vmem:[%s19391_s2] sm:$0x3]  ;;  %v13802_v44 = vld [vmem:[%s19392_s3 + $0x124] ss:$8 sps:$4 sm:$0xff]  }
 0x369   :  { %v17110_v29 = vpack.c.bf16 %v4193_v63, %v4191_v57  ;;  %6783 = vmatprep.subr.bf16.mxu1 %v13754_v4  ;;  %v19423_v24 = vld [vmem:[#allocation4_spill] sm:$0xff]  ;;  %v4641_v4 = vrot.slane %v4636_v13, %v15451_v20  ;;  %v4645_v26 = vrot.slane %v4636_v13, %v15458_v22 }
 0x36b   :  { %6559 = vmatpush1.bf16.msra.mxu0 %v13752_v47 }
 0x36c   :  { %6784 = vmatpush1.bf16.msra.mxu1 %v13752_v47  ;;  %6560 = vmatprep.subr.bf16.mxu0 %v13757_v45 }
 0x36d   :  { %6785 = vmatprep.subr.bf16.mxu1 %v13757_v45 }
 0x36f   :  { %6561 = vmatpush1.bf16.msra.mxu0 %v13755_v11 }
 0x370   :  { %6786 = vmatpush1.bf16.msra.mxu1 %v13755_v11  ;;  %6562 = vmatprep.subr.bf16.mxu0 %v13760_v58 }
 0x371   :  { %6787 = vmatprep.subr.bf16.mxu1 %v13760_v58  ;;  %v13805_v58 = vld [vmem:[%s19392_s3 + $0x134] ss:$8 sps:$4 sm:$0xff]  }
 0x373   :  { %6563 = vmatpush1.bf16.msra.mxu0 %v13758_v39 }
 0x374   :  { %6788 = vmatpush1.bf16.msra.mxu1 %v13758_v39  ;;  %6564 = vmatprep.subr.bf16.mxu0 %v13763_v3 }
 0x375   :  { %6789 = vmatprep.subr.bf16.mxu1 %v13763_v3 }
 0x377   :  { %6565 = vmatpush1.bf16.msra.mxu0 %v13761_v12 }
 0x378   :  { %6790 = vmatpush1.bf16.msra.mxu1 %v13761_v12  ;;  %6566 = vmatprep.subr.bf16.mxu0 %v13766_v14 }
 0x379   :  { %6791 = vmatprep.subr.bf16.mxu1 %v13766_v14  ;;  %v13803_v14 = vld [vmem:[%s19392_s3 + $0x130] ss:$8 sps:$4 sm:$0xff]  }
 0x37b   :  { %6567 = vmatpush1.bf16.msra.mxu0 %v13764_v50 }
 0x37c   :  { %6792 = vmatpush1.bf16.msra.mxu1 %v13764_v50  ;;  %6568 = vmatprep.subr.bf16.mxu0 %v13769_v5 }
 0x37d   :  { %6793 = vmatprep.subr.bf16.mxu1 %v13769_v5 }
 0x37f   :  { %6569 = vmatpush1.bf16.msra.mxu0 %v13767_v8 }
 0x380   :  { %6794 = vmatpush1.bf16.msra.mxu1 %v13767_v8  ;;  %6570 = vmatprep.subr.bf16.mxu0 %v13772_v27 }
 0x381   :  { %v17148_v23 = vpop.f32.mrb[72].mxu0  ;;  %v17150_v2 = vpop.f32.mrb[72].mxu1  ;;  %6795 = vmatprep.subr.bf16.mxu1 %v13772_v27 }
 0x382   :  { %v17155_v30 = vpop.f32.mrb[73].mxu0  ;;  %v17157_v51 = vpop.f32.mrb[73].mxu1 }
 0x383   :  { %v17159_v32 = vpop.f32.mrb[74].mxu0  ;;  %v17161_v48 = vpop.f32.mrb[74].mxu1  ;;  %6571 = vmatpush1.bf16.msra.mxu0 %v13770_v15 }
 0x384   :  { %6796 = vmatpush1.bf16.msra.mxu1 %v13770_v15  ;;  %v17163_v0 = vpop.f32.mrb[75].mxu0  ;;  %v17165_v16 = vpop.f32.mrb[75].mxu1  ;;  %6572 = vmatprep.subr.bf16.mxu0 %v13775_v46 }
 0x385   :  { %6797 = vmatprep.subr.bf16.mxu1 %v13775_v46  ;;  %v13808_v46 = vld [vmem:[%s19392_s3 + $0x144] ss:$8 sps:$4 sm:$0xff]  }
 0x387   :  { %6573 = vmatpush1.bf16.msra.mxu0 %v13773_v54 }
 0x388   :  { %6798 = vmatpush1.bf16.msra.mxu1 %v13773_v54  ;;  %6574 = vmatprep.subr.bf16.mxu0 %v13778_v34 }
 0x389   :  { %6799 = vmatprep.subr.bf16.mxu1 %v13778_v34 }
 0x38b   :  { %6575 = vmatpush1.bf16.msra.mxu0 %v13776_v1 }
 0x38c   :  { %6800 = vmatpush1.bf16.msra.mxu1 %v13776_v1  ;;  %6576 = vmatprep.subr.bf16.mxu0 %v13781_v41  ;;  %v13814_v1 = vld [vmem:[%s19392_s3 + $0x164] ss:$8 sps:$4 sm:$0xff]  }
 0x38d   :  { %6801 = vmatprep.subr.bf16.mxu1 %v13781_v41  ;;  %v13812_v41 = vld [vmem:[%s19392_s3 + $0x160] ss:$8 sps:$4 sm:$0xff]  }
 0x38f   :  { %6577 = vmatpush1.bf16.msra.mxu0 %v13779_v52 }
 0x390   :  { %6802 = vmatpush1.bf16.msra.mxu1 %v13779_v52  ;;  %6578 = vmatprep.subr.bf16.mxu0 %v13784_v40  ;;  %v13817_v52 = vld [vmem:[%s19392_s3 + $0x174] ss:$8 sps:$4 sm:$0xff]  }
 0x391   :  { %6803 = vmatprep.subr.bf16.mxu1 %v13784_v40  ;;  %v13815_v40 = vld [vmem:[%s19392_s3 + $0x170] ss:$8 sps:$4 sm:$0xff]  }
 0x393   :  { %6579 = vmatpush1.bf16.msra.mxu0 %v13782_v60 }
 0x394   :  { %6804 = vmatpush1.bf16.msra.mxu1 %v13782_v60  ;;  %6580 = vmatprep.subr.bf16.mxu0 %v13787_v59  ;;  %v13820_v60 = vld [vmem:[%s19392_s3 + $0x184] ss:$8 sps:$4 sm:$0xff]  }
 0x395   :  { %6805 = vmatprep.subr.bf16.mxu1 %v13787_v59  ;;  %v13818_v59 = vld [vmem:[%s19392_s3 + $0x180] ss:$8 sps:$4 sm:$0xff]  }
 0x397   :  { %6581 = vmatpush1.bf16.msra.mxu0 %v13785_v9 }
 0x398   :  { %6806 = vmatpush1.bf16.msra.mxu1 %v13785_v9  ;;  %6582 = vmatprep.subr.bf16.mxu0 %v13790_v10  ;;  %v13823_v9 = vld [vmem:[%s19392_s3 + $0x194] ss:$8 sps:$4 sm:$0xff]  }
 0x399   :  { %6807 = vmatprep.subr.bf16.mxu1 %v13790_v10  ;;  %v13821_v10 = vld [vmem:[%s19392_s3 + $0x190] ss:$8 sps:$4 sm:$0xff]  }
 0x39b   :  { %6583 = vmatpush1.bf16.msra.mxu0 %v13788_v37 }
 0x39c   :  { %6808 = vmatpush1.bf16.msra.mxu1 %v13788_v37  ;;  %6584 = vmatprep.subr.bf16.mxu0 %v13793_v33  ;;  %v13826_v37 = vld [vmem:[%s19392_s3 + $0x1a4] ss:$8 sps:$4 sm:$0xff]  }
 0x39d   :  { %6809 = vmatprep.subr.bf16.mxu1 %v13793_v33  ;;  %v13824_v33 = vld [vmem:[%s19392_s3 + $0x1a0] ss:$8 sps:$4 sm:$0xff]  }
 0x39f   :  { %6585 = vmatpush1.bf16.msra.mxu0 %v13791_v43 }
 0x3a0   :  { %6810 = vmatpush1.bf16.msra.mxu1 %v13791_v43  ;;  %6597 = vmatprep.subr.bf16.mxu0 %v13796_v61  ;;  %v13829_v43 = vld [vmem:[%s19392_s3 + $0x1b4] ss:$8 sps:$4 sm:$0xff]  }
 0x3a1   :  { %6822 = vmatprep.subr.bf16.mxu1 %v13796_v61 }
 0x3a2   :  { %6587 = vmatmul.mubr.bf16.vlgmr.msra.gmra.mrb[96].mxu0 %v15552_v42  ;;  %v13800_v42 = vld [vmem:[%s19392_s3 + $0x120] ss:$8 sps:$4 sm:$0xff]  }
 0x3a3   :  { %6812 = vmatmul.mubr.bf16.vlgmr.msra.gmra.mrb[96].mxu1 %v19423_v24  ;;  %6598 = vmatpush1.bf16.msra.mxu0 %v13794_v31 }
 0x3a4   :  { %6629 = vmatprep.mubr.bf16.mxu0 %v15803_v18  ;;  %6823 = vmatpush1.bf16.msra.mxu1 %v13794_v31 }
 0x3a5   :  { %6854 = vmatprep.mubr.bf16.mxu1 %v19424_v49  ;;  %v4572_v55 = vpop.f32.mrb[76].mxu0  ;;  %v4615_v56 = vpop.f32.mrb[76].mxu1  ;;  %6599 = vmatprep.subr.bf16.mxu0 %v13799_v21 }
 0x3a6   :  { %v4624_v19 = vmax.f32 %v17148_v23, %v4572_v55  ;;  %v4626_v28 = vmax.f32 %v17150_v2, %v4615_v56  ;;  %v4574_v35 = vpop.f32.mrb[77].mxu0  ;;  %v4617_v6 = vpop.f32.mrb[77].mxu1  ;;  %6824 = vmatprep.subr.bf16.mxu1 %v13799_v21  ;;  %v13806_v2 = vld [vmem:[%s19392_s3 + $0x140] ss:$8 sps:$4 sm:$0xff]   ;;  %v13827_v21 = vld [vmem:[%s19392_s3 + $0x1b0] ss:$8 sps:$4 sm:$0xff]  }
 0x3a7   :  { %v4625_v18 = vmax.f32 %v17155_v30, %v4574_v35  ;;  %v4627_v7 = vmax.f32 %v17157_v51, %v4617_v6  ;;  %v4576_v47 = vpop.f32.mrb[78].mxu0  ;;  %v4619_v25 = vpop.f32.mrb[78].mxu1  ;;  %6600 = vmatpush1.bf16.msra.mxu0 %v13797_v62  ;;  %v13833_v35 = vld [vmem:[%s19392_s3 + $0x1d0] ss:$8 sps:$4 sm:$0xff]   ;;  %v13838_v6 = vld [vmem:[%s19392_s3 + $0x1e4] ss:$8 sps:$4 sm:$0xff]  }
 0x3a8   :  { %v4632_v53 = vmax.f32 %v4624_v19, %v4626_v28  ;;  %v4628_v57 = vmax.f32 %v17159_v32, %v4576_v47  ;;  %v4630_v63 = vmax.f32 %v17161_v48, %v4619_v25  ;;  %6825 = vmatpush1.bf16.msra.mxu1 %v13797_v62  ;;  %v4578_v45 = vpop.f32.mrb[79].mxu0  ;;  %v4621_v11 = vpop.f32.mrb[79].mxu1  ;;  %6601 = vmatprep.subr.bf16.mxu0 %v13802_v44  ;;  %v13832_v19 = vld [vmem:[%s19392_s3 + $0x1c4] ss:$8 sps:$4 sm:$0xff]   ;;  %v13830_v28 = vld [vmem:[%s19392_s3 + $0x1c0] ss:$8 sps:$4 sm:$0xff]  }
 0x3a9   :  { %v4633_v39 = vmax.f32 %v4625_v18, %v4627_v7  ;;  %v4629_v3 = vmax.f32 %v17163_v0, %v4578_v45  ;;  %v4631_v12 = vmax.f32 %v17165_v16, %v4621_v11  ;;  %6826 = vmatprep.subr.bf16.mxu1 %v13802_v44  ;;  %v13811_v0 = vld [vmem:[%s19392_s3 + $0x154] ss:$8 sps:$4 sm:$0xff]   ;;  %v13809_v16 = vld [vmem:[%s19392_s3 + $0x150] ss:$8 sps:$4 sm:$0xff]   ;;  %v13836_v18 = vld [vmem:[%s19392_s3 + $0x1e0] ss:$8 sps:$4 sm:$0xff]  }
 0x3aa   :  { %v4648_v50 = vadd.f32 %v4641_v4, %v4632_v53  ;;  %v4634_v5 = vmax.f32 %v4628_v57, %v4630_v63  ;;  %v13841_v7 = vld [vmem:[%s19392_s3 + $0x1f4] ss:$8 sps:$4 sm:$0xff]   ;;  %v13844_v47 = vld [vmem:[%s19392_s3 + $0x204] ss:$8 sps:$4 sm:$0xff]   ;;  %v13842_v25 = vld [vmem:[%s19392_s3 + $0x200] ss:$8 sps:$4 sm:$0xff]  }
 0x3ab   :  { %v4649_v8 = vadd.f32 %v4645_v26, %v4633_v39  ;;  %v4635_v27 = vmax.f32 %v4629_v3, %v4631_v12  ;;  %6602 = vmatpush1.bf16.msra.mxu0 %v13800_v42  ;;  %v13847_v53 = vld [vmem:[%s19392_s3 + $0x214] ss:$8 sps:$4 sm:$0xff]   ;;  %v13845_v57 = vld [vmem:[%s19392_s3 + $0x210] ss:$8 sps:$4 sm:$0xff]   ;;  %v19425_v63 = vld [vmem:[#allocation5_spill] sm:$0xff] }
 0x3ac   :  { %v4650_v15 = vadd.f32 %v4641_v4, %v4634_v5  ;;  %6827 = vmatpush1.bf16.msra.mxu1 %v13800_v42  ;;  %6603 = vmatprep.subr.bf16.mxu0 %v13805_v58  ;;  %v4652_v54 = vmax.f32 %v4648_v50, 0.0  ;;  %v13835_v4 = vld [vmem:[%s19392_s3 + $0x1d4] ss:$8 sps:$4 sm:$0xff]   ;;  %v13850_v45 = vld [vmem:[%s19392_s3 + $0x224] ss:$8 sps:$4 sm:$0xff]  }
 0x3ad   :  { %v4651_v23 = vadd.f32 %v4645_v26, %v4635_v27  ;;  %6828 = vmatprep.subr.bf16.mxu1 %v13805_v58  ;;  %v4653_v51 = vmax.f32 %v4649_v8, 0.0  ;;  %v13839_v26 = vld [vmem:[%s19392_s3 + $0x1f0] ss:$8 sps:$4 sm:$0xff]   ;;  %v19426_v11 = vld [vmem:[#allocation8_spill] sm:$0xff]  ;;  %v13853_v58 = vld [vmem:[%s19392_s3 + $0x234] ss:$8 sps:$4 sm:$0xff]  }
 0x3ae   :  { %v4654_v30 = vmax.f32 %v4650_v15, 0.0  ;;  %v5098_v39 = vld [vmem:[%s19391_s2] sm:$0x3]  ;;  %v13851_v3 = vld [vmem:[%s19392_s3 + $0x230] ss:$8 sps:$4 sm:$0xff]  }
 0x3af   :  { %v4655_v32 = vmax.f32 %v4651_v23, 0.0  ;;  %6604 = vmatpush1.bf16.msra.mxu0 %v13803_v14  ;;  %v13856_v12 = vld [vmem:[%s19392_s3 + $0x244] ss:$8 sps:$4 sm:$0xff]   ;;  %v5103_v27 = vrot.slane %v5098_v39, %v15451_v20 }
 0x3b0   :  { %v17250_v48 = vpack.c.bf16 %v4654_v30, %v4652_v54  ;;  %6829 = vmatpush1.bf16.msra.mxu1 %v13803_v14  ;;  %6605 = vmatprep.subr.bf16.mxu0 %v13808_v46  ;;  %v5107_v54 = vrot.slane %v5098_v39, %v15458_v22 }
 0x3b1   :  { %6830 = vmatprep.subr.bf16.mxu1 %v13808_v46  ;;  %v17258_v34 = vpack.c.bf16 %v4655_v32, %v4653_v51  ;;  %v13854_v32 = vld [vmem:[%s19392_s3 + $0x240] ss:$8 sps:$4 sm:$0xff]  }
 0x3b3   :  { %6606 = vmatpush1.bf16.msra.mxu0 %v13806_v2 }
 0x3b4   :  { %6831 = vmatpush1.bf16.msra.mxu1 %v13806_v2  ;;  %6607 = vmatprep.subr.bf16.mxu0 %v13811_v0 }
 0x3b5   :  { %6832 = vmatprep.subr.bf16.mxu1 %v13811_v0 }
 0x3b7   :  { %6608 = vmatpush1.bf16.msra.mxu0 %v13809_v16 }
 0x3b8   :  { %6833 = vmatpush1.bf16.msra.mxu1 %v13809_v16  ;;  %6609 = vmatprep.subr.bf16.mxu0 %v13814_v1 }
 0x3b9   :  { %6834 = vmatprep.subr.bf16.mxu1 %v13814_v1 }
 0x3bb   :  { %6610 = vmatpush1.bf16.msra.mxu0 %v13812_v41 }
 0x3bc   :  { %6835 = vmatpush1.bf16.msra.mxu1 %v13812_v41  ;;  %6611 = vmatprep.subr.bf16.mxu0 %v13817_v52 }
 0x3bd   :  { %6836 = vmatprep.subr.bf16.mxu1 %v13817_v52 }
 0x3bf   :  { %6612 = vmatpush1.bf16.msra.mxu0 %v13815_v40 }
 0x3c0   :  { %6837 = vmatpush1.bf16.msra.mxu1 %v13815_v40  ;;  %6613 = vmatprep.subr.bf16.mxu0 %v13820_v60  ;;  %v13859_v40 = vld [vmem:[%s19392_s3 + $0x254] ss:$8 sps:$4 sm:$0xff]  }
 0x3c1   :  { %6838 = vmatprep.subr.bf16.mxu1 %v13820_v60 }
 0x3c3   :  { %6614 = vmatpush1.bf16.msra.mxu0 %v13818_v59 }
 0x3c4   :  { %6839 = vmatpush1.bf16.msra.mxu1 %v13818_v59  ;;  %6615 = vmatprep.subr.bf16.mxu0 %v13823_v9 }
 0x3c5   :  { %6840 = vmatprep.subr.bf16.mxu1 %v13823_v9 }
 0x3c7   :  { %6616 = vmatpush1.bf16.msra.mxu0 %v13821_v10 }
 0x3c8   :  { %6841 = vmatpush1.bf16.msra.mxu1 %v13821_v10  ;;  %6617 = vmatprep.subr.bf16.mxu0 %v13826_v37 }
 0x3c9   :  { %v17293_v61 = vpop.f32.mrb[80].mxu0  ;;  %v17295_v31 = vpop.f32.mrb[80].mxu1  ;;  %6842 = vmatprep.subr.bf16.mxu1 %v13826_v37 }
 0x3ca   :  { %v17300_v62 = vpop.f32.mrb[81].mxu0  ;;  %v17302_v13 = vpop.f32.mrb[81].mxu1 }
 0x3cb   :  { %v17304_v44 = vpop.f32.mrb[82].mxu0  ;;  %v17306_v55 = vpop.f32.mrb[82].mxu1  ;;  %6618 = vmatpush1.bf16.msra.mxu0 %v13824_v33 }
 0x3cc   :  { %6843 = vmatpush1.bf16.msra.mxu1 %v13824_v33  ;;  %v17308_v56 = vpop.f32.mrb[83].mxu0  ;;  %v17310_v42 = vpop.f32.mrb[83].mxu1  ;;  %6619 = vmatprep.subr.bf16.mxu0 %v13829_v43 }
 0x3cd   :  { %6844 = vmatprep.subr.bf16.mxu1 %v13829_v43 }
 0x3cf   :  { %6620 = vmatpush1.bf16.msra.mxu0 %v13827_v21 }
 0x3d0   :  { %6845 = vmatpush1.bf16.msra.mxu1 %v13827_v21  ;;  %6621 = vmatprep.subr.bf16.mxu0 %v13832_v19  ;;  %v13862_v21 = vld [vmem:[%s19392_s3 + $0x264] ss:$8 sps:$4 sm:$0xff]  }
 0x3d1   :  { %6846 = vmatprep.subr.bf16.mxu1 %v13832_v19 }
 0x3d3   :  { %6622 = vmatpush1.bf16.msra.mxu0 %v13830_v28 }
 0x3d4   :  { %6847 = vmatpush1.bf16.msra.mxu1 %v13830_v28  ;;  %6623 = vmatprep.subr.bf16.mxu0 %v13835_v4  ;;  %v13865_v28 = vld [vmem:[%s19392_s3 + $0x274] ss:$8 sps:$4 sm:$0xff]  }
 0x3d5   :  { %6848 = vmatprep.subr.bf16.mxu1 %v13835_v4 }
 0x3d7   :  { %6624 = vmatpush1.bf16.msra.mxu0 %v13833_v35 }
 0x3d8   :  { %6849 = vmatpush1.bf16.msra.mxu1 %v13833_v35  ;;  %6625 = vmatprep.subr.bf16.mxu0 %v13838_v6  ;;  %v13863_v35 = vld [vmem:[%s19392_s3 + $0x270] ss:$8 sps:$4 sm:$0xff]  }
 0x3d9   :  { %6850 = vmatprep.subr.bf16.mxu1 %v13838_v6  ;;  %v13868_v6 = vld [vmem:[%s19392_s3 + $0x284] ss:$8 sps:$4 sm:$0xff]  }
 0x3db   :  { %6626 = vmatpush1.bf16.msra.mxu0 %v13836_v18 }
 0x3dc   :  { %6851 = vmatpush1.bf16.msra.mxu1 %v13836_v18  ;;  %6627 = vmatprep.subr.bf16.mxu0 %v13841_v7  ;;  %v13866_v18 = vld [vmem:[%s19392_s3 + $0x280] ss:$8 sps:$4 sm:$0xff]  }
 0x3dd   :  { %6852 = vmatprep.subr.bf16.mxu1 %v13841_v7  ;;  %v13871_v7 = vld [vmem:[%s19392_s3 + $0x294] ss:$8 sps:$4 sm:$0xff]  }
 0x3df   :  { %6628 = vmatpush1.bf16.msra.mxu0 %v13839_v26 }
 0x3e0   :  { %6853 = vmatpush1.bf16.msra.mxu1 %v13839_v26  ;;  %6640 = vmatprep.subr.bf16.mxu0 %v13844_v47  ;;  %v13869_v26 = vld [vmem:[%s19392_s3 + $0x290] ss:$8 sps:$4 sm:$0xff]  }
 0x3e1   :  { %6865 = vmatprep.subr.bf16.mxu1 %v13844_v47  ;;  %v13874_v47 = vld [vmem:[%s19392_s3 + $0x2a4] ss:$8 sps:$4 sm:$0xff]  }
 0x3e2   :  { %6630 = vmatmul.mubr.bf16.vlgmr.msra.gmra.mrb[96].mxu0 %v19423_v24  ;;  %v13848_v24 = vld [vmem:[%s19392_s3 + $0x220] ss:$8 sps:$4 sm:$0xff]  }
 0x3e3   :  { %6855 = vmatmul.mubr.bf16.vlgmr.msra.gmra.mrb[96].mxu1 %v19425_v63  ;;  %6641 = vmatpush1.bf16.msra.mxu0 %v13842_v25 }
 0x3e4   :  { %6672 = vmatprep.mubr.bf16.mxu0 %v19424_v49  ;;  %6866 = vmatpush1.bf16.msra.mxu1 %v13842_v25  ;;  %v13872_v25 = vld [vmem:[%s19392_s3 + $0x2a0] ss:$8 sps:$4 sm:$0xff]  }
 0x3e5   :  { %6897 = vmatprep.mubr.bf16.mxu1 %v19426_v11  ;;  %6642 = vmatprep.subr.bf16.mxu0 %v13847_v53 }
 0x3e6   :  { %6867 = vmatprep.subr.bf16.mxu1 %v13847_v53  ;;  %v13877_v53 = vld [vmem:[%s19392_s3 + $0x2b4] ss:$8 sps:$4 sm:$0xff]  }
 0x3e7   :  { %6643 = vmatpush1.bf16.msra.mxu0 %v13845_v57 }
 0x3e8   :  { %6868 = vmatpush1.bf16.msra.mxu1 %v13845_v57  ;;  %6644 = vmatprep.subr.bf16.mxu0 %v13850_v45  ;;  %v13875_v57 = vld [vmem:[%s19392_s3 + $0x2b0] ss:$8 sps:$4 sm:$0xff]  }
 0x3e9   :  { %6869 = vmatprep.subr.bf16.mxu1 %v13850_v45  ;;  %v13880_v45 = vld [vmem:[%s19392_s3 + $0x2c4] ss:$8 sps:$4 sm:$0xff]  }
 0x3eb   :  { %6645 = vmatpush1.bf16.msra.mxu0 %v13848_v24 }
 0x3ec   :  { %6870 = vmatpush1.bf16.msra.mxu1 %v13848_v24  ;;  %6646 = vmatprep.subr.bf16.mxu0 %v13853_v58  ;;  %v13878_v24 = vld [vmem:[%s19392_s3 + $0x2c0] ss:$8 sps:$4 sm:$0xff]  }
 0x3ed   :  { %v5034_v14 = vpop.f32.mrb[84].mxu0  ;;  %v5077_v50 = vpop.f32.mrb[84].mxu1  ;;  %6871 = vmatprep.subr.bf16.mxu1 %v13853_v58  ;;  %v13883_v58 = vld [vmem:[%s19392_s3 + $0x2d4] ss:$8 sps:$4 sm:$0xff]  }
 0x3ee   :  { %v5086_v5 = vmax.f32 %v17293_v61, %v5034_v14  ;;  %v5088_v8 = vmax.f32 %v17295_v31, %v5077_v50  ;;  %v5036_v15 = vpop.f32.mrb[85].mxu0  ;;  %v5079_v46 = vpop.f32.mrb[85].mxu1  ;;  %v13857_v61 = vld [vmem:[%s19392_s3 + $0x250] ss:$8 sps:$4 sm:$0xff]  }
 0x3ef   :  { %v5087_v23 = vmax.f32 %v17300_v62, %v5036_v15  ;;  %v5089_v2 = vmax.f32 %v17302_v13, %v5079_v46  ;;  %v5038_v30 = vpop.f32.mrb[86].mxu0  ;;  %v5081_v51 = vpop.f32.mrb[86].mxu1  ;;  %6647 = vmatpush1.bf16.msra.mxu0 %v13851_v3  ;;  %v13886_v46 = vld [vmem:[%s19392_s3 + $0x2e4] ss:$8 sps:$4 sm:$0xff]  }
 0x3f0   :  { %v5094_v0 = vmax.f32 %v5086_v5, %v5088_v8  ;;  %v5090_v16 = vmax.f32 %v17304_v44, %v5038_v30  ;;  %v5092_v1 = vmax.f32 %v17306_v55, %v5081_v51  ;;  %6872 = vmatpush1.bf16.msra.mxu1 %v13851_v3  ;;  %v5040_v41 = vpop.f32.mrb[87].mxu0  ;;  %v5083_v52 = vpop.f32.mrb[87].mxu1  ;;  %6648 = vmatprep.subr.bf16.mxu0 %v13856_v12  ;;  %v13881_v8 = vld [vmem:[%s19392_s3 + $0x2d0] ss:$8 sps:$4 sm:$0xff]   ;;  %v13892_v30 = vld [vmem:[%s19392_s3 + $0x304] ss:$8 sps:$4 sm:$0xff]  }
 0x3f1   :  { %v5095_v60 = vmax.f32 %v5087_v23, %v5089_v2  ;;  %v5091_v59 = vmax.f32 %v17308_v56, %v5040_v41  ;;  %v5093_v9 = vmax.f32 %v17310_v42, %v5083_v52  ;;  %6873 = vmatprep.subr.bf16.mxu1 %v13856_v12  ;;  %v13860_v42 = vld [vmem:[%s19392_s3 + $0x260] ss:$8 sps:$4 sm:$0xff]   ;;  %v13889_v2 = vld [vmem:[%s19392_s3 + $0x2f4] ss:$8 sps:$4 sm:$0xff]  }
 0x3f2   :  { %v5110_v10 = vadd.f32 %v5103_v27, %v5094_v0  ;;  %v5096_v37 = vmax.f32 %v5090_v16, %v5092_v1  ;;  %v13884_v23 = vld [vmem:[%s19392_s3 + $0x2e0] ss:$8 sps:$4 sm:$0xff]   ;;  %v19427_v0 = vld [vmem:[#allocation7_spill] sm:$0xff]  ;;  %v13898_v1 = vld [vmem:[%s19392_s3 + $0x324] ss:$8 sps:$4 sm:$0xff]  }
 0x3f3   :  { %v5111_v33 = vadd.f32 %v5107_v54, %v5095_v60  ;;  %v5097_v43 = vmax.f32 %v5091_v59, %v5093_v9  ;;  %6649 = vmatpush1.bf16.msra.mxu0 %v13854_v32  ;;  %v13890_v51 = vld [vmem:[%s19392_s3 + $0x300] ss:$8 sps:$4 sm:$0xff]   ;;  %v13893_v16 = vld [vmem:[%s19392_s3 + $0x310] ss:$8 sps:$4 sm:$0xff]   ;;  %v13904_v59 = vld [vmem:[%s19392_s3 + $0x344] ss:$8 sps:$4 sm:$0xff]  }
 0x3f4   :  { %v5112_v31 = vadd.f32 %v5103_v27, %v5096_v37  ;;  %6874 = vmatpush1.bf16.msra.mxu1 %v13854_v32  ;;  %6650 = vmatprep.subr.bf16.mxu0 %v13859_v40  ;;  %v5114_v13 = vmax.f32 %v5110_v10, 0.0  ;;  %v13895_v32 = vld [vmem:[%s19392_s3 + $0x314] ss:$8 sps:$4 sm:$0xff]   ;;  %v13896_v52 = vld [vmem:[%s19392_s3 + $0x320] ss:$8 sps:$4 sm:$0xff]  }
 0x3f5   :  { %v5113_v62 = vadd.f32 %v5107_v54, %v5097_v43  ;;  %6875 = vmatprep.subr.bf16.mxu1 %v13859_v40  ;;  %v5115_v55 = vmax.f32 %v5111_v33, 0.0  ;;  %v13887_v54 = vld [vmem:[%s19392_s3 + $0x2f0] ss:$8 sps:$4 sm:$0xff]   ;;  %v13901_v40 = vld [vmem:[%s19392_s3 + $0x334] ss:$8 sps:$4 sm:$0xff]  }
 0x3f6   :  { %v5116_v44 = vmax.f32 %v5112_v31, 0.0  ;;  %v19428_v41 = vld [vmem:[#allocation10_spill] sm:$0xff]  ;;  %v13902_v9 = vld [vmem:[%s19392_s3 + $0x340] ss:$8 sps:$4 sm:$0xff]   ;;  %v13910_v43 = vld [vmem:[%s19392_s3 + $0x364] ss:$8 sps:$4 sm:$0xff]  }
 0x3f7   :  { %v5117_v56 = vmax.f32 %v5113_v62, 0.0  ;;  %6651 = vmatpush1.bf16.msra.mxu0 %v13857_v61  ;;  %v13899_v60 = vld [vmem:[%s19392_s3 + $0x330] ss:$8 sps:$4 sm:$0xff]   ;;  %v13907_v10 = vld [vmem:[%s19392_s3 + $0x354] ss:$8 sps:$4 sm:$0xff]  }
 0x3f8   :  { %v17395_v19 = vpack.c.bf16 %v5116_v44, %v5114_v13  ;;  %6876 = vmatpush1.bf16.msra.mxu1 %v13857_v61  ;;  %6652 = vmatprep.subr.bf16.mxu0 %v13862_v21  ;;  %v5560_v37 = vld [vmem:[%s19391_s2] sm:$0x3]  ;;  %v13905_v33 = vld [vmem:[%s19392_s3 + $0x350] ss:$8 sps:$4 sm:$0xff]  }
 0x3f9   :  { %6877 = vmatprep.subr.bf16.mxu1 %v13862_v21  ;;  %v17400_v4 = vpack.c.bf16 %v5117_v56, %v5115_v55  ;;  %v5565_v13 = vrot.slane %v5560_v37, %v15451_v20 }
 0x3fb   :  { %6653 = vmatpush1.bf16.msra.mxu0 %v13860_v42 }
 0x3fc   :  { %6878 = vmatpush1.bf16.msra.mxu1 %v13860_v42  ;;  %6654 = vmatprep.subr.bf16.mxu0 %v13865_v28 }
 0x3fd   :  { %6879 = vmatprep.subr.bf16.mxu1 %v13865_v28  ;;  %v5569_v28 = vrot.slane %v5560_v37, %v15458_v22  ;;  %v13913_v22 = vld [vmem:[%s19392_s3 + $0x374] ss:$8 sps:$4 sm:$0xff]   ;;  %v13932_v37 = vld [vmem:[%s19392_s3 + $0x3e0] ss:$8 sps:$4 sm:$0xff]  }
 0x3ff   :  { %6655 = vmatpush1.bf16.msra.mxu0 %v13863_v35 }
 0x400   :  { %6880 = vmatpush1.bf16.msra.mxu1 %v13863_v35  ;;  %6656 = vmatprep.subr.bf16.mxu0 %v13868_v6 }
 0x401   :  { %6881 = vmatprep.subr.bf16.mxu1 %v13868_v6 }
 0x403   :  { %6657 = vmatpush1.bf16.msra.mxu0 %v13866_v18 }
 0x404   :  { %6882 = vmatpush1.bf16.msra.mxu1 %v13866_v18  ;;  %6658 = vmatprep.subr.bf16.mxu0 %v13871_v7  ;;  %v13908_v18 = vld [vmem:[%s19392_s3 + $0x360] ss:$8 sps:$4 sm:$0xff]  }
 0x405   :  { %6883 = vmatprep.subr.bf16.mxu1 %v13871_v7 }
 0x407   :  { %6659 = vmatpush1.bf16.msra.mxu0 %v13869_v26 }
 0x408   :  { %6884 = vmatpush1.bf16.msra.mxu1 %v13869_v26  ;;  %6660 = vmatprep.subr.bf16.mxu0 %v13874_v47 }
 0x409   :  { %6885 = vmatprep.subr.bf16.mxu1 %v13874_v47 }
 0x40b   :  { %6661 = vmatpush1.bf16.msra.mxu0 %v13872_v25 }
 0x40c   :  { %6886 = vmatpush1.bf16.msra.mxu1 %v13872_v25  ;;  %6662 = vmatprep.subr.bf16.mxu0 %v13877_v53 }
 0x40d   :  { %6887 = vmatprep.subr.bf16.mxu1 %v13877_v53 }
 0x40f   :  { %6663 = vmatpush1.bf16.msra.mxu0 %v13875_v57 }
 0x410   :  { %6888 = vmatpush1.bf16.msra.mxu1 %v13875_v57  ;;  %6664 = vmatprep.subr.bf16.mxu0 %v13880_v45 }
 0x411   :  { %v17438_v39 = vpop.f32.mrb[88].mxu0  ;;  %v17440_v3 = vpop.f32.mrb[88].mxu1  ;;  %6889 = vmatprep.subr.bf16.mxu1 %v13880_v45 }
 0x412   :  { %v17442_v12 = vpop.f32.mrb[89].mxu0  ;;  %v17444_v14 = vpop.f32.mrb[89].mxu1 }
 0x413   :  { %v17446_v50 = vpop.f32.mrb[90].mxu0  ;;  %v17448_v5 = vpop.f32.mrb[90].mxu1  ;;  %6665 = vmatpush1.bf16.msra.mxu0 %v13878_v24 }
 0x414   :  { %6890 = vmatpush1.bf16.msra.mxu1 %v13878_v24  ;;  %v17453_v27 = vpop.f32.mrb[91].mxu0  ;;  %v17455_v15 = vpop.f32.mrb[91].mxu1  ;;  %6666 = vmatprep.subr.bf16.mxu0 %v13883_v58 }
 0x415   :  { %6891 = vmatprep.subr.bf16.mxu1 %v13883_v58 }
 0x417   :  { %6667 = vmatpush1.bf16.msra.mxu0 %v13881_v8 }
 0x418   :  { %6892 = vmatpush1.bf16.msra.mxu1 %v13881_v8  ;;  %6668 = vmatprep.subr.bf16.mxu0 %v13886_v46 }
 0x419   :  { %6893 = vmatprep.subr.bf16.mxu1 %v13886_v46 }
 0x41b   :  { %6669 = vmatpush1.bf16.msra.mxu0 %v13884_v23 }
 0x41c   :  { %6894 = vmatpush1.bf16.msra.mxu1 %v13884_v23  ;;  %6670 = vmatprep.subr.bf16.mxu0 %v13889_v2  ;;  %v13914_v23 = vld [vmem:[%s19392_s3 + $0x380] ss:$8 sps:$4 sm:$0xff]  }
 0x41d   :  { %6895 = vmatprep.subr.bf16.mxu1 %v13889_v2 }
 0x41f   :  { %6671 = vmatpush1.bf16.msra.mxu0 %v13887_v54 }
 0x420   :  { %6896 = vmatpush1.bf16.msra.mxu1 %v13887_v54  ;;  %6683 = vmatprep.subr.bf16.mxu0 %v13892_v30  ;;  %v13919_v54 = vld [vmem:[%s19392_s3 + $0x394] ss:$8 sps:$4 sm:$0xff]  }
 0x421   :  { %6908 = vmatprep.subr.bf16.mxu1 %v13892_v30 }
 0x422   :  { %6673 = vmatmul.mubr.bf16.vlgmr.msra.gmra.mrb[96].mxu0 %v19425_v63 }
 0x423   :  { %6898 = vmatmul.mubr.bf16.vlgmr.msra.gmra.mrb[96].mxu1 %v19427_v0  ;;  %6684 = vmatpush1.bf16.msra.mxu0 %v13890_v51 }
 0x424   :  { %6715 = vmatprep.mubr.bf16.mxu0 %v19426_v11  ;;  %6909 = vmatpush1.bf16.msra.mxu1 %v13890_v51  ;;  %v13917_v51 = vld [vmem:[%s19392_s3 + $0x390] ss:$8 sps:$4 sm:$0xff]  }
 0x425   :  { %6940 = vmatprep.mubr.bf16.mxu1 %v19428_v41  ;;  %6685 = vmatprep.subr.bf16.mxu0 %v13895_v32 }
 0x426   :  { %6910 = vmatprep.subr.bf16.mxu1 %v13895_v32  ;;  %v13922_v32 = vld [vmem:[%s19392_s3 + $0x3a4] ss:$8 sps:$4 sm:$0xff]  }
 0x427   :  { %6686 = vmatpush1.bf16.msra.mxu0 %v13893_v16 }
 0x428   :  { %6911 = vmatpush1.bf16.msra.mxu1 %v13893_v16  ;;  %6687 = vmatprep.subr.bf16.mxu0 %v13898_v1  ;;  %v13920_v16 = vld [vmem:[%s19392_s3 + $0x3a0] ss:$8 sps:$4 sm:$0xff]  }
 0x429   :  { %6912 = vmatprep.subr.bf16.mxu1 %v13898_v1  ;;  %v13925_v1 = vld [vmem:[%s19392_s3 + $0x3b4] ss:$8 sps:$4 sm:$0xff]  }
 0x42b   :  { %6688 = vmatpush1.bf16.msra.mxu0 %v13896_v52 }
 0x42c   :  { %6913 = vmatpush1.bf16.msra.mxu1 %v13896_v52  ;;  %6689 = vmatprep.subr.bf16.mxu0 %v13901_v40  ;;  %v13923_v52 = vld [vmem:[%s19392_s3 + $0x3b0] ss:$8 sps:$4 sm:$0xff]  }
 0x42d   :  { %6914 = vmatprep.subr.bf16.mxu1 %v13901_v40  ;;  %v13928_v40 = vld [vmem:[%s19392_s3 + $0x3c4] ss:$8 sps:$4 sm:$0xff]  }
 0x42f   :  { %6690 = vmatpush1.bf16.msra.mxu0 %v13899_v60 }
 0x430   :  { %6915 = vmatpush1.bf16.msra.mxu1 %v13899_v60  ;;  %6691 = vmatprep.subr.bf16.mxu0 %v13904_v59  ;;  %v13926_v60 = vld [vmem:[%s19392_s3 + $0x3c0] ss:$8 sps:$4 sm:$0xff]  }
 0x431   :  { %6916 = vmatprep.subr.bf16.mxu1 %v13904_v59  ;;  %v13931_v59 = vld [vmem:[%s19392_s3 + $0x3d4] ss:$8 sps:$4 sm:$0xff]  }
 0x433   :  { %6692 = vmatpush1.bf16.msra.mxu0 %v13902_v9 }
 0x434   :  { %6917 = vmatpush1.bf16.msra.mxu1 %v13902_v9  ;;  %6693 = vmatprep.subr.bf16.mxu0 %v13907_v10  ;;  %v13929_v9 = vld [vmem:[%s19392_s3 + $0x3d0] ss:$8 sps:$4 sm:$0xff]  }
 0x435   :  { %v5496_v61 = vpop.f32.mrb[92].mxu0  ;;  %v5539_v31 = vpop.f32.mrb[92].mxu1  ;;  %6918 = vmatprep.subr.bf16.mxu1 %v13907_v10  ;;  %v13934_v10 = vld [vmem:[%s19392_s3 + $0x3e4] ss:$8 sps:$4 sm:$0xff]  }
 0x436   :  { %v5548_v21 = vmax.f32 %v17438_v39, %v5496_v61  ;;  %v5550_v62 = vmax.f32 %v17440_v3, %v5539_v31  ;;  %v5498_v44 = vpop.f32.mrb[93].mxu0  ;;  %v5541_v55 = vpop.f32.mrb[93].mxu1  ;;  %v13940_v61 = vld [vmem:[%s19392_s3 + $0x404] ss:$8 sps:$4 sm:$0xff]   ;;  %v13938_v31 = vld [vmem:[%s19392_s3 + $0x400] ss:$8 sps:$4 sm:$0xff]  }
 0x437   :  { %v5549_v56 = vmax.f32 %v17442_v12, %v5498_v44  ;;  %v5551_v42 = vmax.f32 %v17444_v14, %v5541_v55  ;;  %v5500_v35 = vpop.f32.mrb[94].mxu0  ;;  %v5543_v6 = vpop.f32.mrb[94].mxu1  ;;  %6694 = vmatpush1.bf16.msra.mxu0 %v13905_v33  ;;  %v13911_v12 = vld [vmem:[%s19392_s3 + $0x370] ss:$8 sps:$4 sm:$0xff]   ;;  %v13946_v44 = vld [vmem:[%s19392_s3 + $0x424] ss:$8 sps:$4 sm:$0xff]  }
 0x438   :  { %v5556_v7 = vmax.f32 %v5548_v21, %v5550_v62  ;;  %v5552_v26 = vmax.f32 %v17446_v50, %v5500_v35  ;;  %v5554_v20 = vmax.f32 %v17448_v5, %v5543_v6  ;;  %6919 = vmatpush1.bf16.msra.mxu1 %v13905_v33  ;;  %v5502_v47 = vpop.f32.mrb[95].mxu0  ;;  %v5545_v25 = vpop.f32.mrb[95].mxu1  ;;  %6695 = vmatprep.subr.bf16.mxu0 %v13910_v43  ;;  %v13916_v50 = vld [vmem:[%s19392_s3 + $0x384] ss:$8 sps:$4 sm:$0xff]   ;;  %v13937_v33 = vld [vmem:[%s19392_s3 + $0x3f4] ss:$8 sps:$4 sm:$0xff]  }
 0x439   :  { %v5557_v53 = vmax.f32 %v5549_v56, %v5551_v42  ;;  %v5553_v57 = vmax.f32 %v17453_v27, %v5502_v47  ;;  %v5555_v45 = vmax.f32 %v17455_v15, %v5545_v25  ;;  %6920 = vmatprep.subr.bf16.mxu1 %v13910_v43  ;;  %v13935_v43 = vld [vmem:[%s19392_s3 + $0x3f0] ss:$8 sps:$4 sm:$0xff]   ;;  %v13943_v21 = vld [vmem:[%s19392_s3 + $0x414] ss:$8 sps:$4 sm:$0xff]   ;;  %v19429_v62 = vld [vmem:[#allocation9_spill] sm:$0xff] }
 0x43a   :  { %v5572_v24 = vadd.f32 %v5565_v13, %v5556_v7  ;;  %v5558_v58 = vmax.f32 %v5552_v26, %v5554_v20  ;;  %v19430_v55 = vld [vmem:[#allocation12_spill] sm:$0xff]  ;;  %v13949_v42 = vld [vmem:[%s19392_s3 + $0x434] ss:$8 sps:$4 sm:$0xff]   ;;  %v13953_v7 = vld [vmem:[%s19392_s3 + $0x450] ss:$8 sps:$4 sm:$0xff]  }
 0x43b   :  { %v5573_v39 = vadd.f32 %v5569_v28, %v5557_v53  ;;  %v5559_v3 = vmax.f32 %v5553_v57, %v5555_v45  ;;  %6696 = vmatpush1.bf16.msra.mxu0 %v13908_v18  ;;  %v13944_v56 = vld [vmem:[%s19392_s3 + $0x420] ss:$8 sps:$4 sm:$0xff]   ;;  %v13952_v35 = vld [vmem:[%s19392_s3 + $0x444] ss:$8 sps:$4 sm:$0xff]   ;;  %v13961_v47 = vld [vmem:[%s19392_s3 + $0x474] ss:$8 sps:$4 sm:$0xff]  }
 0x43c   :  { %v5574_v14 = vadd.f32 %v5565_v13, %v5558_v58  ;;  %6921 = vmatpush1.bf16.msra.mxu1 %v13908_v18  ;;  %6697 = vmatprep.subr.bf16.mxu0 %v13913_v22  ;;  %v5576_v8 = vmax.f32 %v5572_v24, 0.0  ;;  %v13941_v13 = vld [vmem:[%s19392_s3 + $0x410] ss:$8 sps:$4 sm:$0xff]   ;;  %v13950_v6 = vld [vmem:[%s19392_s3 + $0x440] ss:$8 sps:$4 sm:$0xff]  }
 0x43d   :  { %v5575_v5 = vadd.f32 %v5569_v28, %v5559_v3  ;;  %6922 = vmatprep.subr.bf16.mxu1 %v13913_v22  ;;  %v5577_v15 = vmax.f32 %v5573_v39, 0.0  ;;  %v13947_v28 = vld [vmem:[%s19392_s3 + $0x430] ss:$8 sps:$4 sm:$0xff]   ;;  %v13955_v18 = vld [vmem:[%s19392_s3 + $0x454] ss:$8 sps:$4 sm:$0xff]  }
 0x43e   :  { %v5578_v27 = vmax.f32 %v5574_v14, 0.0  ;;  %v13958_v26 = vld [vmem:[%s19392_s3 + $0x464] ss:$8 sps:$4 sm:$0xff]   ;;  %v13956_v20 = vld [vmem:[%s19392_s3 + $0x460] ss:$8 sps:$4 sm:$0xff]  }
 0x43f   :  { %v5579_v46 = vmax.f32 %v5575_v5, 0.0  ;;  %6698 = vmatpush1.bf16.msra.mxu0 %v13911_v12  ;;  %v13959_v25 = vld [vmem:[%s19392_s3 + $0x470] ss:$8 sps:$4 sm:$0xff]   ;;  %v13964_v22 = vld [vmem:[%s19392_s3 + $0x484] ss:$8 sps:$4 sm:$0xff]  }
 0x440   :  { %v17540_v2 = vpack.c.bf16 %v5578_v27, %v5576_v8  ;;  %6923 = vmatpush1.bf16.msra.mxu1 %v13911_v12  ;;  %6699 = vmatprep.subr.bf16.mxu0 %v13916_v50  ;;  %v13962_v53 = vld [vmem:[%s19392_s3 + $0x480] ss:$8 sps:$4 sm:$0xff]   ;;  %v13967_v57 = vld [vmem:[%s19392_s3 + $0x494] ss:$8 sps:$4 sm:$0xff]   ;;  %v13965_v45 = vld [vmem:[%s19392_s3 + $0x490] ss:$8 sps:$4 sm:$0xff]  }
 0x441   :  { %6924 = vmatprep.subr.bf16.mxu1 %v13916_v50  ;;  %v17545_v30 = vpack.c.bf16 %v5579_v46, %v5577_v15  ;;  %v13970_v24 = vld [vmem:[%s19392_s3 + $0x4a4] ss:$8 sps:$4 sm:$0xff]   ;;  %v13968_v58 = vld [vmem:[%s19392_s3 + $0x4a0] ss:$8 sps:$4 sm:$0xff]   ;;  %v13973_v39 = vld [vmem:[%s19392_s3 + $0x4b4] ss:$8 sps:$4 sm:$0xff]  }
 0x442   :  { %v13971_v3 = vld [vmem:[%s19392_s3 + $0x4b0] ss:$8 sps:$4 sm:$0xff]   ;;  %v13976_v12 = vld [vmem:[%s19392_s3 + $0x4c4] ss:$8 sps:$4 sm:$0xff]   ;;  %v13974_v14 = vld [vmem:[%s19392_s3 + $0x4c0] ss:$8 sps:$4 sm:$0xff]  }
 0x443   :  { %6700 = vmatpush1.bf16.msra.mxu0 %v13914_v23  ;;  %v13979_v50 = vld [vmem:[%s19392_s3 + $0x4d4] ss:$8 sps:$4 sm:$0xff]   ;;  %v13977_v5 = vld [vmem:[%s19392_s3 + $0x4d0] ss:$8 sps:$4 sm:$0xff]   ;;  %v13982_v8 = vld [vmem:[%s19392_s3 + $0x4e4] ss:$8 sps:$4 sm:$0xff]  }
 0x444   :  { %6925 = vmatpush1.bf16.msra.mxu1 %v13914_v23  ;;  %6701 = vmatprep.subr.bf16.mxu0 %v13919_v54  ;;  %v13980_v27 = vld [vmem:[%s19392_s3 + $0x4e0] ss:$8 sps:$4 sm:$0xff]   ;;  %v13985_v15 = vld [vmem:[%s19392_s3 + $0x4f4] ss:$8 sps:$4 sm:$0xff]   ;;  %v13983_v46 = vld [vmem:[%s19392_s3 + $0x4f0] ss:$8 sps:$4 sm:$0xff]  }
 0x445   :  { %6926 = vmatprep.subr.bf16.mxu1 %v13919_v54  ;;  %v13988_v23 = vld [vmem:[%s19392_s3 + $0x4] ss:$8 sps:$4 sm:$0xff]   ;;  %v13986_v54 = vld [vmem:[%s19392_s3] ss:$8 sps:$4 sm:$0xff]  }
 0x447   :  { %6702 = vmatpush1.bf16.msra.mxu0 %v13917_v51 }
 0x448   :  { %6927 = vmatpush1.bf16.msra.mxu1 %v13917_v51  ;;  %6703 = vmatprep.subr.bf16.mxu0 %v13922_v32  ;;  %v13991_v51 = vld [vmem:[%s19392_s3 + $0x14] ss:$8 sps:$4 sm:$0xff]  }
 0x449   :  { %6928 = vmatprep.subr.bf16.mxu1 %v13922_v32  ;;  %v19431_v32 = vld [vmem:[#allocation11_spill] sm:$0xff] }
 0x44b   :  { %6704 = vmatpush1.bf16.msra.mxu0 %v13920_v16 }
 0x44c   :  { %6929 = vmatpush1.bf16.msra.mxu1 %v13920_v16  ;;  %6705 = vmatprep.subr.bf16.mxu0 %v13925_v1  ;;  %v13989_v16 = vld [vmem:[%s19392_s3 + $0x10] ss:$8 sps:$4 sm:$0xff]  }
 0x44d   :  { %6930 = vmatprep.subr.bf16.mxu1 %v13925_v1  ;;  %v13994_v1 = vld [vmem:[%s19392_s3 + $0x24] ss:$8 sps:$4 sm:$0xff]  }
 0x44f   :  { %6706 = vmatpush1.bf16.msra.mxu0 %v13923_v52 }
 0x450   :  { %6931 = vmatpush1.bf16.msra.mxu1 %v13923_v52  ;;  %6707 = vmatprep.subr.bf16.mxu0 %v13928_v40  ;;  %v13992_v52 = vld [vmem:[%s19392_s3 + $0x20] ss:$8 sps:$4 sm:$0xff]  }
 0x451   :  { %6932 = vmatprep.subr.bf16.mxu1 %v13928_v40  ;;  %v13995_v40 = vld [vmem:[%s19392_s3 + $0x30] ss:$8 sps:$4 sm:$0xff]  }
 0x453   :  { %6708 = vmatpush1.bf16.msra.mxu0 %v13926_v60 }
 0x454   :  { %6933 = vmatpush1.bf16.msra.mxu1 %v13926_v60  ;;  %6709 = vmatprep.subr.bf16.mxu0 %v13931_v59  ;;  %v14000_v60 = vld [vmem:[%s19392_s3 + $0x44] ss:$8 sps:$4 sm:$0xff]  }
 0x455   :  { %6934 = vmatprep.subr.bf16.mxu1 %v13931_v59  ;;  %v13998_v59 = vld [vmem:[%s19392_s3 + $0x40] ss:$8 sps:$4 sm:$0xff]  }
 0x457   :  { %6710 = vmatpush1.bf16.msra.mxu0 %v13929_v9 }
 0x458   :  { %6935 = vmatpush1.bf16.msra.mxu1 %v13929_v9  ;;  %6711 = vmatprep.subr.bf16.mxu0 %v13934_v10  ;;  %v14003_v9 = vld [vmem:[%s19392_s3 + $0x54] ss:$8 sps:$4 sm:$0xff]  }
 0x459   :  { %6936 = vmatprep.subr.bf16.mxu1 %v13934_v10  ;;  %v14001_v10 = vld [vmem:[%s19392_s3 + $0x50] ss:$8 sps:$4 sm:$0xff]  }
 0x45b   :  { %6712 = vmatpush1.bf16.msra.mxu0 %v13932_v37 }
 0x45c   :  { %6937 = vmatpush1.bf16.msra.mxu1 %v13932_v37  ;;  %6713 = vmatprep.subr.bf16.mxu0 %v13937_v33  ;;  %v14006_v37 = vld [vmem:[%s19392_s3 + $0x64] ss:$8 sps:$4 sm:$0xff]  }
 0x45d   :  { %6938 = vmatprep.subr.bf16.mxu1 %v13937_v33  ;;  %v14004_v33 = vld [vmem:[%s19392_s3 + $0x60] ss:$8 sps:$4 sm:$0xff]  }
 0x45f   :  { %6714 = vmatpush1.bf16.msra.mxu0 %v13935_v43 }
 0x460   :  { %6939 = vmatpush1.bf16.msra.mxu1 %v13935_v43  ;;  %6726 = vmatprep.subr.bf16.mxu0 %v13940_v61  ;;  %v14009_v43 = vld [vmem:[%s19392_s3 + $0x74] ss:$8 sps:$4 sm:$0xff]  }
 0x461   :  { %6951 = vmatprep.subr.bf16.mxu1 %v13940_v61  ;;  %v14007_v61 = vld [vmem:[%s19392_s3 + $0x70] ss:$8 sps:$4 sm:$0xff]  }
 0x462   :  { %6716 = vmatmul.mubr.bf16.vlgmr.msra.gmra.mrb[96].mxu0 %v19427_v0 }
 0x463   :  { %6941 = vmatmul.mubr.bf16.vlgmr.msra.gmra.mrb[96].mxu1 %v19429_v62  ;;  %6727 = vmatpush1.bf16.msra.mxu0 %v13938_v31 }
 0x464   :  { %6758 = vmatprep.mubr.bf16.mxu0 %v19428_v41  ;;  %6952 = vmatpush1.bf16.msra.mxu1 %v13938_v31  ;;  %v14012_v31 = vld [vmem:[%s19392_s3 + $0x84] ss:$8 sps:$4 sm:$0xff]  }
 0x465   :  { %6983 = vmatprep.mubr.bf16.mxu1 %v19430_v55  ;;  %6728 = vmatprep.subr.bf16.mxu0 %v13943_v21 }
 0x466   :  { %6953 = vmatprep.subr.bf16.mxu1 %v13943_v21  ;;  %v14010_v21 = vld [vmem:[%s19392_s3 + $0x80] ss:$8 sps:$4 sm:$0xff]  }
 0x467   :  { %6729 = vmatpush1.bf16.msra.mxu0 %v13941_v13 }
 0x468   :  { %6954 = vmatpush1.bf16.msra.mxu1 %v13941_v13  ;;  %6730 = vmatprep.subr.bf16.mxu0 %v13946_v44  ;;  %v14015_v13 = vld [vmem:[%s19392_s3 + $0x94] ss:$8 sps:$4 sm:$0xff]  }
 0x469   :  { %6955 = vmatprep.subr.bf16.mxu1 %v13946_v44  ;;  %v14013_v44 = vld [vmem:[%s19392_s3 + $0x90] ss:$8 sps:$4 sm:$0xff]  }
 0x46b   :  { %6731 = vmatpush1.bf16.msra.mxu0 %v13944_v56 }
 0x46c   :  { %6956 = vmatpush1.bf16.msra.mxu1 %v13944_v56  ;;  %6732 = vmatprep.subr.bf16.mxu0 %v13949_v42  ;;  %v14018_v56 = vld [vmem:[%s19392_s3 + $0xa4] ss:$8 sps:$4 sm:$0xff]  }
 0x46d   :  { %6957 = vmatprep.subr.bf16.mxu1 %v13949_v42  ;;  %v14016_v42 = vld [vmem:[%s19392_s3 + $0xa0] ss:$8 sps:$4 sm:$0xff]  }
 0x46f   :  { %6733 = vmatpush1.bf16.msra.mxu0 %v13947_v28 }
 0x470   :  { %6958 = vmatpush1.bf16.msra.mxu1 %v13947_v28  ;;  %6734 = vmatprep.subr.bf16.mxu0 %v13952_v35  ;;  %v14021_v28 = vld [vmem:[%s19392_s3 + $0xb4] ss:$8 sps:$4 sm:$0xff]  }
 0x471   :  { %6959 = vmatprep.subr.bf16.mxu1 %v13952_v35  ;;  %v14019_v35 = vld [vmem:[%s19392_s3 + $0xb0] ss:$8 sps:$4 sm:$0xff]  }
 0x473   :  { %6735 = vmatpush1.bf16.msra.mxu0 %v13950_v6 }
 0x474   :  { %6960 = vmatpush1.bf16.msra.mxu1 %v13950_v6  ;;  %6736 = vmatprep.subr.bf16.mxu0 %v13955_v18  ;;  %v14024_v6 = vld [vmem:[%s19392_s3 + $0xc4] ss:$8 sps:$4 sm:$0xff]  }
 0x475   :  { %6961 = vmatprep.subr.bf16.mxu1 %v13955_v18  ;;  %v14022_v18 = vld [vmem:[%s19392_s3 + $0xc0] ss:$8 sps:$4 sm:$0xff]  }
 0x477   :  { %6737 = vmatpush1.bf16.msra.mxu0 %v13953_v7 }
 0x478   :  { %6962 = vmatpush1.bf16.msra.mxu1 %v13953_v7  ;;  %6738 = vmatprep.subr.bf16.mxu0 %v13958_v26  ;;  %v14027_v7 = vld [vmem:[%s19392_s3 + $0xd4] ss:$8 sps:$4 sm:$0xff]  }
 0x479   :  { %6963 = vmatprep.subr.bf16.mxu1 %v13958_v26  ;;  %v14025_v26 = vld [vmem:[%s19392_s3 + $0xd0] ss:$8 sps:$4 sm:$0xff]  }
 0x47b   :  { %6739 = vmatpush1.bf16.msra.mxu0 %v13956_v20 }
 0x47c   :  { %6964 = vmatpush1.bf16.msra.mxu1 %v13956_v20  ;;  %6740 = vmatprep.subr.bf16.mxu0 %v13961_v47  ;;  %v14030_v20 = vld [vmem:[%s19392_s3 + $0xe4] ss:$8 sps:$4 sm:$0xff]  }
 0x47d   :  { %6965 = vmatprep.subr.bf16.mxu1 %v13961_v47  ;;  %v14028_v47 = vld [vmem:[%s19392_s3 + $0xe0] ss:$8 sps:$4 sm:$0xff]  }
 0x47f   :  { %6741 = vmatpush1.bf16.msra.mxu0 %v13959_v25 }
 0x480   :  { %6966 = vmatpush1.bf16.msra.mxu1 %v13959_v25  ;;  %6742 = vmatprep.subr.bf16.mxu0 %v13964_v22  ;;  %v14033_v25 = vld [vmem:[%s19392_s3 + $0xf4] ss:$8 sps:$4 sm:$0xff]  }
 0x481   :  { %6967 = vmatprep.subr.bf16.mxu1 %v13964_v22  ;;  %v14031_v22 = vld [vmem:[%s19392_s3 + $0xf0] ss:$8 sps:$4 sm:$0xff]  }
 0x483   :  { %6743 = vmatpush1.bf16.msra.mxu0 %v13962_v53 }
 0x484   :  { %6968 = vmatpush1.bf16.msra.mxu1 %v13962_v53  ;;  %6744 = vmatprep.subr.bf16.mxu0 %v13967_v57  ;;  %v14036_v53 = vld [vmem:[%s19392_s3 + $0x104] ss:$8 sps:$4 sm:$0xff]  }
 0x485   :  { %6969 = vmatprep.subr.bf16.mxu1 %v13967_v57  ;;  %v14034_v57 = vld [vmem:[%s19392_s3 + $0x100] ss:$8 sps:$4 sm:$0xff]  }
 0x487   :  { %6745 = vmatpush1.bf16.msra.mxu0 %v13965_v45 }
 0x488   :  { %6970 = vmatpush1.bf16.msra.mxu1 %v13965_v45  ;;  %6746 = vmatprep.subr.bf16.mxu0 %v13970_v24  ;;  %v14039_v45 = vld [vmem:[%s19392_s3 + $0x114] ss:$8 sps:$4 sm:$0xff]  }
 0x489   :  { %6971 = vmatprep.subr.bf16.mxu1 %v13970_v24  ;;  %v14037_v24 = vld [vmem:[%s19392_s3 + $0x110] ss:$8 sps:$4 sm:$0xff]  }
 0x48b   :  { %6747 = vmatpush1.bf16.msra.mxu0 %v13968_v58 }
 0x48c   :  { %6972 = vmatpush1.bf16.msra.mxu1 %v13968_v58  ;;  %6748 = vmatprep.subr.bf16.mxu0 %v13973_v39  ;;  %v14042_v58 = vld [vmem:[%s19392_s3 + $0x124] ss:$8 sps:$4 sm:$0xff]  }
 0x48d   :  { %6973 = vmatprep.subr.bf16.mxu1 %v13973_v39  ;;  %v14043_v39 = vld [vmem:[%s19392_s3 + $0x130] ss:$8 sps:$4 sm:$0xff]  }
 0x48f   :  { %6749 = vmatpush1.bf16.msra.mxu0 %v13971_v3 }
 0x490   :  { %6974 = vmatpush1.bf16.msra.mxu1 %v13971_v3  ;;  %6750 = vmatprep.subr.bf16.mxu0 %v13976_v12  ;;  %v14048_v3 = vld [vmem:[%s19392_s3 + $0x144] ss:$8 sps:$4 sm:$0xff]  }
 0x491   :  { %6975 = vmatprep.subr.bf16.mxu1 %v13976_v12  ;;  %v14046_v12 = vld [vmem:[%s19392_s3 + $0x140] ss:$8 sps:$4 sm:$0xff]  }
 0x493   :  { %6751 = vmatpush1.bf16.msra.mxu0 %v13974_v14 }
 0x494   :  { %6976 = vmatpush1.bf16.msra.mxu1 %v13974_v14  ;;  %6752 = vmatprep.subr.bf16.mxu0 %v13979_v50  ;;  %v14051_v14 = vld [vmem:[%s19392_s3 + $0x154] ss:$8 sps:$4 sm:$0xff]  }
 0x495   :  { %6977 = vmatprep.subr.bf16.mxu1 %v13979_v50  ;;  %v14049_v50 = vld [vmem:[%s19392_s3 + $0x150] ss:$8 sps:$4 sm:$0xff]  }
 0x497   :  { %6753 = vmatpush1.bf16.msra.mxu0 %v13977_v5 }
 0x498   :  { %6978 = vmatpush1.bf16.msra.mxu1 %v13977_v5  ;;  %6754 = vmatprep.subr.bf16.mxu0 %v13982_v8  ;;  %v14054_v5 = vld [vmem:[%s19392_s3 + $0x164] ss:$8 sps:$4 sm:$0xff]  }
 0x499   :  { %6979 = vmatprep.subr.bf16.mxu1 %v13982_v8  ;;  %v14052_v8 = vld [vmem:[%s19392_s3 + $0x160] ss:$8 sps:$4 sm:$0xff]  }
 0x49b   :  { %6755 = vmatpush1.bf16.msra.mxu0 %v13980_v27 }
 0x49c   :  { %6980 = vmatpush1.bf16.msra.mxu1 %v13980_v27  ;;  %6756 = vmatprep.subr.bf16.mxu0 %v13985_v15  ;;  %v14057_v27 = vld [vmem:[%s19392_s3 + $0x174] ss:$8 sps:$4 sm:$0xff]  }
 0x49d   :  { %6981 = vmatprep.subr.bf16.mxu1 %v13985_v15  ;;  %v14055_v15 = vld [vmem:[%s19392_s3 + $0x170] ss:$8 sps:$4 sm:$0xff]  }
 0x49f   :  { %6757 = vmatpush1.bf16.msra.mxu0 %v13983_v46 }
 0x4a0   :  { %6982 = vmatpush1.bf16.msra.mxu1 %v13983_v46  ;;  %7983 = vmatprep.subr.bf16.mxu0 %v13988_v23  ;;  %v14060_v46 = vld [vmem:[%s19392_s3 + $0x184] ss:$8 sps:$4 sm:$0xff]  }
 0x4a1   :  { %8208 = vmatprep.subr.bf16.mxu1 %v13988_v23  ;;  %v14058_v23 = vld [vmem:[%s19392_s3 + $0x180] ss:$8 sps:$4 sm:$0xff]  }
 0x4a2   :  { %6759 = vmatmul.mubr.bf16.vlgmr.msra.gmra.mrb[96].mxu0 %v19429_v62 }
 0x4a3   :  { %6984 = vmatmul.mubr.bf16.vlgmr.msra.gmra.mrb[96].mxu1 %v19431_v32  ;;  %7984 = vmatpush1.bf16.msra.mxu0 %v13986_v54 }
 0x4a4   :  { %8015 = vmatprep.mubr.bf16.mxu0 %v19424_v49  ;;  %8209 = vmatpush1.bf16.msra.mxu1 %v13986_v54  ;;  %v13997_v49 = vld [vmem:[%s19392_s3 + $0x34] ss:$8 sps:$4 sm:$0xff]  }
 0x4a5   :  { %8240 = vmatprep.mubr.bf16.mxu1 %v19426_v11  ;;  %7985 = vmatprep.subr.bf16.mxu0 %v13991_v51  ;;  %v14063_v54 = vld [vmem:[%s19392_s3 + $0x194] ss:$8 sps:$4 sm:$0xff]  }
 0x4a6   :  { %8210 = vmatprep.subr.bf16.mxu1 %v13991_v51  ;;  %v14061_v51 = vld [vmem:[%s19392_s3 + $0x190] ss:$8 sps:$4 sm:$0xff]  }
 0x4a7   :  { %7986 = vmatpush1.bf16.msra.mxu0 %v13989_v16 }
 0x4a8   :  { %8211 = vmatpush1.bf16.msra.mxu1 %v13989_v16  ;;  %7987 = vmatprep.subr.bf16.mxu0 %v13994_v1  ;;  %v14066_v16 = vld [vmem:[%s19392_s3 + $0x1a4] ss:$8 sps:$4 sm:$0xff]  }
 0x4a9   :  { %8212 = vmatprep.subr.bf16.mxu1 %v13994_v1  ;;  %v14064_v1 = vld [vmem:[%s19392_s3 + $0x1a0] ss:$8 sps:$4 sm:$0xff]  }
 0x4ab   :  { %7988 = vmatpush1.bf16.msra.mxu0 %v13992_v52 }
 0x4ac   :  { %8213 = vmatpush1.bf16.msra.mxu1 %v13992_v52  ;;  %7989 = vmatprep.subr.bf16.mxu0 %v13997_v49  ;;  %v14069_v52 = vld [vmem:[%s19392_s3 + $0x1b4] ss:$8 sps:$4 sm:$0xff]  }
 0x4ad   :  { %8214 = vmatprep.subr.bf16.mxu1 %v13997_v49  ;;  %v14067_v49 = vld [vmem:[%s19392_s3 + $0x1b0] ss:$8 sps:$4 sm:$0xff]  }
 0x4af   :  { %7990 = vmatpush1.bf16.msra.mxu0 %v13995_v40 }
 0x4b0   :  { %8215 = vmatpush1.bf16.msra.mxu1 %v13995_v40  ;;  %7991 = vmatprep.subr.bf16.mxu0 %v14000_v60  ;;  %v14072_v40 = vld [vmem:[%s19392_s3 + $0x1c4] ss:$8 sps:$4 sm:$0xff]  }
 0x4b1   :  { %8216 = vmatprep.subr.bf16.mxu1 %v14000_v60  ;;  %v14070_v60 = vld [vmem:[%s19392_s3 + $0x1c0] ss:$8 sps:$4 sm:$0xff]  }
 0x4b3   :  { %7992 = vmatpush1.bf16.msra.mxu0 %v13998_v59 }
 0x4b4   :  { %8217 = vmatpush1.bf16.msra.mxu1 %v13998_v59  ;;  %7993 = vmatprep.subr.bf16.mxu0 %v14003_v9  ;;  %v14075_v59 = vld [vmem:[%s19392_s3 + $0x1d4] ss:$8 sps:$4 sm:$0xff]  }
 0x4b5   :  { %8218 = vmatprep.subr.bf16.mxu1 %v14003_v9  ;;  %v14073_v9 = vld [vmem:[%s19392_s3 + $0x1d0] ss:$8 sps:$4 sm:$0xff]  }
 0x4b7   :  { %7994 = vmatpush1.bf16.msra.mxu0 %v14001_v10 }
 0x4b8   :  { %8219 = vmatpush1.bf16.msra.mxu1 %v14001_v10  ;;  %7995 = vmatprep.subr.bf16.mxu0 %v14006_v37  ;;  %v14078_v10 = vld [vmem:[%s19392_s3 + $0x1e4] ss:$8 sps:$4 sm:$0xff]  }
 0x4b9   :  { %8220 = vmatprep.subr.bf16.mxu1 %v14006_v37  ;;  %v14076_v37 = vld [vmem:[%s19392_s3 + $0x1e0] ss:$8 sps:$4 sm:$0xff]  }
 0x4bb   :  { %7996 = vmatpush1.bf16.msra.mxu0 %v14004_v33 }
 0x4bc   :  { %8221 = vmatpush1.bf16.msra.mxu1 %v14004_v33  ;;  %7997 = vmatprep.subr.bf16.mxu0 %v14009_v43  ;;  %v14081_v33 = vld [vmem:[%s19392_s3 + $0x1f4] ss:$8 sps:$4 sm:$0xff]  }
 0x4bd   :  { %8222 = vmatprep.subr.bf16.mxu1 %v14009_v43  ;;  %v14079_v43 = vld [vmem:[%s19392_s3 + $0x1f0] ss:$8 sps:$4 sm:$0xff]  }
 0x4bf   :  { %7998 = vmatpush1.bf16.msra.mxu0 %v14007_v61 }
 0x4c0   :  { %8223 = vmatpush1.bf16.msra.mxu1 %v14007_v61  ;;  %7999 = vmatprep.subr.bf16.mxu0 %v14012_v31  ;;  %v14084_v61 = vld [vmem:[%s19392_s3 + $0x204] ss:$8 sps:$4 sm:$0xff]  }
 0x4c1   :  { %8224 = vmatprep.subr.bf16.mxu1 %v14012_v31  ;;  %v14082_v31 = vld [vmem:[%s19392_s3 + $0x200] ss:$8 sps:$4 sm:$0xff]  }
 0x4c3   :  { %8000 = vmatpush1.bf16.msra.mxu0 %v14010_v21 }
 0x4c4   :  { %8225 = vmatpush1.bf16.msra.mxu1 %v14010_v21  ;;  %8001 = vmatprep.subr.bf16.mxu0 %v14015_v13  ;;  %v14087_v21 = vld [vmem:[%s19392_s3 + $0x214] ss:$8 sps:$4 sm:$0xff]  }
 0x4c5   :  { %8226 = vmatprep.subr.bf16.mxu1 %v14015_v13  ;;  %v14085_v13 = vld [vmem:[%s19392_s3 + $0x210] ss:$8 sps:$4 sm:$0xff]  }
 0x4c7   :  { %8002 = vmatpush1.bf16.msra.mxu0 %v14013_v44 }
 0x4c8   :  { %8227 = vmatpush1.bf16.msra.mxu1 %v14013_v44  ;;  %8003 = vmatprep.subr.bf16.mxu0 %v14018_v56  ;;  %v14090_v44 = vld [vmem:[%s19392_s3 + $0x224] ss:$8 sps:$4 sm:$0xff]  }
 0x4c9   :  { %8228 = vmatprep.subr.bf16.mxu1 %v14018_v56  ;;  %v14093_v56 = vld [vmem:[%s19392_s3 + $0x234] ss:$8 sps:$4 sm:$0xff]  }
 0x4cb   :  { %8004 = vmatpush1.bf16.msra.mxu0 %v14016_v42 }
 0x4cc   :  { %8229 = vmatpush1.bf16.msra.mxu1 %v14016_v42  ;;  %8005 = vmatprep.subr.bf16.mxu0 %v14021_v28  ;;  %v14091_v42 = vld [vmem:[%s19392_s3 + $0x230] ss:$8 sps:$4 sm:$0xff]  }
 0x4cd   :  { %8230 = vmatprep.subr.bf16.mxu1 %v14021_v28  ;;  %v14096_v28 = vld [vmem:[%s19392_s3 + $0x244] ss:$8 sps:$4 sm:$0xff]  }
 0x4cf   :  { %8006 = vmatpush1.bf16.msra.mxu0 %v14019_v35 }
 0x4d0   :  { %8231 = vmatpush1.bf16.msra.mxu1 %v14019_v35  ;;  %8007 = vmatprep.subr.bf16.mxu0 %v14024_v6  ;;  %v14094_v35 = vld [vmem:[%s19392_s3 + $0x240] ss:$8 sps:$4 sm:$0xff]  }
 0x4d1   :  { %8232 = vmatprep.subr.bf16.mxu1 %v14024_v6  ;;  %v14099_v6 = vld [vmem:[%s19392_s3 + $0x254] ss:$8 sps:$4 sm:$0xff]  }
 0x4d3   :  { %8008 = vmatpush1.bf16.msra.mxu0 %v14022_v18 }
 0x4d4   :  { %8233 = vmatpush1.bf16.msra.mxu1 %v14022_v18  ;;  %8009 = vmatprep.subr.bf16.mxu0 %v14027_v7  ;;  %v14097_v18 = vld [vmem:[%s19392_s3 + $0x250] ss:$8 sps:$4 sm:$0xff]  }
 0x4d5   :  { %8234 = vmatprep.subr.bf16.mxu1 %v14027_v7  ;;  %v14102_v7 = vld [vmem:[%s19392_s3 + $0x264] ss:$8 sps:$4 sm:$0xff]  }
 0x4d7   :  { %8010 = vmatpush1.bf16.msra.mxu0 %v14025_v26 }
 0x4d8   :  { %8235 = vmatpush1.bf16.msra.mxu1 %v14025_v26  ;;  %8011 = vmatprep.subr.bf16.mxu0 %v14030_v20  ;;  %v14100_v26 = vld [vmem:[%s19392_s3 + $0x260] ss:$8 sps:$4 sm:$0xff]  }
 0x4d9   :  { %8236 = vmatprep.subr.bf16.mxu1 %v14030_v20  ;;  %v14105_v20 = vld [vmem:[%s19392_s3 + $0x274] ss:$8 sps:$4 sm:$0xff]  }
 0x4db   :  { %8012 = vmatpush1.bf16.msra.mxu0 %v14028_v47 }
 0x4dc   :  { %8237 = vmatpush1.bf16.msra.mxu1 %v14028_v47  ;;  %8013 = vmatprep.subr.bf16.mxu0 %v14033_v25  ;;  %v14103_v47 = vld [vmem:[%s19392_s3 + $0x270] ss:$8 sps:$4 sm:$0xff]  }
 0x4dd   :  { %8238 = vmatprep.subr.bf16.mxu1 %v14033_v25  ;;  %v14108_v25 = vld [vmem:[%s19392_s3 + $0x284] ss:$8 sps:$4 sm:$0xff]  }
 0x4df   :  { %8014 = vmatpush1.bf16.msra.mxu0 %v14031_v22 }
 0x4e0   :  { %8239 = vmatpush1.bf16.msra.mxu1 %v14031_v22  ;;  %8026 = vmatprep.subr.bf16.mxu0 %v14036_v53  ;;  %v14106_v22 = vld [vmem:[%s19392_s3 + $0x280] ss:$8 sps:$4 sm:$0xff]  }
 0x4e1   :  { %8251 = vmatprep.subr.bf16.mxu1 %v14036_v53  ;;  %v14111_v53 = vld [vmem:[%s19392_s3 + $0x294] ss:$8 sps:$4 sm:$0xff]  }
 0x4e2   :  { %8016 = vmatmul.mubr.bf16.vlgmr.msra.gmra.mrb[100].mxu0 %v19425_v63  ;;  %v14040_v63 = vld [vmem:[%s19392_s3 + $0x120] ss:$8 sps:$4 sm:$0xff]  }
 0x4e3   :  { %8241 = vmatmul.mubr.bf16.vlgmr.msra.gmra.mrb[100].mxu1 %v19427_v0  ;;  %8027 = vmatpush1.bf16.msra.mxu0 %v14034_v57 }
 0x4e4   :  { %8058 = vmatprep.mubr.bf16.mxu0 %v19426_v11  ;;  %8252 = vmatpush1.bf16.msra.mxu1 %v14034_v57  ;;  %v14045_v11 = vld [vmem:[%s19392_s3 + $0x134] ss:$8 sps:$4 sm:$0xff]   ;;  %v14109_v57 = vld [vmem:[%s19392_s3 + $0x290] ss:$8 sps:$4 sm:$0xff]  }
 0x4e5   :  { %8283 = vmatprep.mubr.bf16.mxu1 %v19428_v41  ;;  %8028 = vmatprep.subr.bf16.mxu0 %v14039_v45 }
 0x4e6   :  { %8253 = vmatprep.subr.bf16.mxu1 %v14039_v45  ;;  %v14114_v45 = vld [vmem:[%s19392_s3 + $0x2a4] ss:$8 sps:$4 sm:$0xff]  }
 0x4e7   :  { %8029 = vmatpush1.bf16.msra.mxu0 %v14037_v24 }
 0x4e8   :  { %8254 = vmatpush1.bf16.msra.mxu1 %v14037_v24  ;;  %8030 = vmatprep.subr.bf16.mxu0 %v14042_v58  ;;  %v14112_v24 = vld [vmem:[%s19392_s3 + $0x2a0] ss:$8 sps:$4 sm:$0xff]  }
 0x4e9   :  { %8255 = vmatprep.subr.bf16.mxu1 %v14042_v58  ;;  %v14117_v58 = vld [vmem:[%s19392_s3 + $0x2b4] ss:$8 sps:$4 sm:$0xff]  }
 0x4eb   :  { %8031 = vmatpush1.bf16.msra.mxu0 %v14040_v63 }
 0x4ec   :  { %8256 = vmatpush1.bf16.msra.mxu1 %v14040_v63  ;;  %8032 = vmatprep.subr.bf16.mxu0 %v14045_v11  ;;  %v14115_v63 = vld [vmem:[%s19392_s3 + $0x2b0] ss:$8 sps:$4 sm:$0xff]  }
 0x4ed   :  { %8257 = vmatprep.subr.bf16.mxu1 %v14045_v11  ;;  %v14120_v11 = vld [vmem:[%s19392_s3 + $0x2c4] ss:$8 sps:$4 sm:$0xff]  }
 0x4ef   :  { %8033 = vmatpush1.bf16.msra.mxu0 %v14043_v39 }
 0x4f0   :  { %8258 = vmatpush1.bf16.msra.mxu1 %v14043_v39  ;;  %8034 = vmatprep.subr.bf16.mxu0 %v14048_v3  ;;  %v14118_v39 = vld [vmem:[%s19392_s3 + $0x2c0] ss:$8 sps:$4 sm:$0xff]  }
 0x4f1   :  { %8259 = vmatprep.subr.bf16.mxu1 %v14048_v3  ;;  %v14123_v3 = vld [vmem:[%s19392_s3 + $0x2d4] ss:$8 sps:$4 sm:$0xff]  }
 0x4f3   :  { %8035 = vmatpush1.bf16.msra.mxu0 %v14046_v12 }
 0x4f4   :  { %8260 = vmatpush1.bf16.msra.mxu1 %v14046_v12  ;;  %8036 = vmatprep.subr.bf16.mxu0 %v14051_v14  ;;  %v14121_v12 = vld [vmem:[%s19392_s3 + $0x2d0] ss:$8 sps:$4 sm:$0xff]  }
 0x4f5   :  { %8261 = vmatprep.subr.bf16.mxu1 %v14051_v14  ;;  %v14126_v14 = vld [vmem:[%s19392_s3 + $0x2e4] ss:$8 sps:$4 sm:$0xff]  }
 0x4f7   :  { %8037 = vmatpush1.bf16.msra.mxu0 %v14049_v50 }
 0x4f8   :  { %8262 = vmatpush1.bf16.msra.mxu1 %v14049_v50  ;;  %8038 = vmatprep.subr.bf16.mxu0 %v14054_v5  ;;  %v14124_v50 = vld [vmem:[%s19392_s3 + $0x2e0] ss:$8 sps:$4 sm:$0xff]  }
 0x4f9   :  { %8263 = vmatprep.subr.bf16.mxu1 %v14054_v5  ;;  %v14129_v5 = vld [vmem:[%s19392_s3 + $0x2f4] ss:$8 sps:$4 sm:$0xff]  }
 0x4fb   :  { %8039 = vmatpush1.bf16.msra.mxu0 %v14052_v8 }
 0x4fc   :  { %8264 = vmatpush1.bf16.msra.mxu1 %v14052_v8  ;;  %8040 = vmatprep.subr.bf16.mxu0 %v14057_v27  ;;  %v14127_v8 = vld [vmem:[%s19392_s3 + $0x2f0] ss:$8 sps:$4 sm:$0xff]  }
 0x4fd   :  { %8265 = vmatprep.subr.bf16.mxu1 %v14057_v27  ;;  %v14132_v27 = vld [vmem:[%s19392_s3 + $0x304] ss:$8 sps:$4 sm:$0xff]  }
 0x4ff   :  { %8041 = vmatpush1.bf16.msra.mxu0 %v14055_v15 }
 0x500   :  { %8266 = vmatpush1.bf16.msra.mxu1 %v14055_v15  ;;  %8042 = vmatprep.subr.bf16.mxu0 %v14060_v46  ;;  %v14130_v15 = vld [vmem:[%s19392_s3 + $0x300] ss:$8 sps:$4 sm:$0xff]  }
 0x501   :  { %8267 = vmatprep.subr.bf16.mxu1 %v14060_v46  ;;  %v14135_v46 = vld [vmem:[%s19392_s3 + $0x314] ss:$8 sps:$4 sm:$0xff]  }
 0x503   :  { %8043 = vmatpush1.bf16.msra.mxu0 %v14058_v23 }
 0x504   :  { %8268 = vmatpush1.bf16.msra.mxu1 %v14058_v23  ;;  %8044 = vmatprep.subr.bf16.mxu0 %v14063_v54  ;;  %v14133_v23 = vld [vmem:[%s19392_s3 + $0x310] ss:$8 sps:$4 sm:$0xff]  }
 0x505   :  { %8269 = vmatprep.subr.bf16.mxu1 %v14063_v54  ;;  %v14138_v54 = vld [vmem:[%s19392_s3 + $0x324] ss:$8 sps:$4 sm:$0xff]  }
 0x507   :  { %8045 = vmatpush1.bf16.msra.mxu0 %v14061_v51 }
 0x508   :  { %8270 = vmatpush1.bf16.msra.mxu1 %v14061_v51  ;;  %8046 = vmatprep.subr.bf16.mxu0 %v14066_v16  ;;  %v19432_v51 = vld [vmem:[#allocation14_spill] sm:$0xff] }
 0x509   :  { %8271 = vmatprep.subr.bf16.mxu1 %v14066_v16  ;;  %v14136_v16 = vld [vmem:[%s19392_s3 + $0x320] ss:$8 sps:$4 sm:$0xff]  }
 0x50b   :  { %8047 = vmatpush1.bf16.msra.mxu0 %v14064_v1 }
 0x50c   :  { %8272 = vmatpush1.bf16.msra.mxu1 %v14064_v1  ;;  %8048 = vmatprep.subr.bf16.mxu0 %v14069_v52  ;;  %v14141_v1 = vld [vmem:[%s19392_s3 + $0x334] ss:$8 sps:$4 sm:$0xff]  }
 0x50d   :  { %8273 = vmatprep.subr.bf16.mxu1 %v14069_v52  ;;  %v14139_v52 = vld [vmem:[%s19392_s3 + $0x330] ss:$8 sps:$4 sm:$0xff]  }
 0x50f   :  { %8049 = vmatpush1.bf16.msra.mxu0 %v14067_v49 }
 0x510   :  { %8274 = vmatpush1.bf16.msra.mxu1 %v14067_v49  ;;  %8050 = vmatprep.subr.bf16.mxu0 %v14072_v40  ;;  %v14144_v49 = vld [vmem:[%s19392_s3 + $0x344] ss:$8 sps:$4 sm:$0xff]  }
 0x511   :  { %8275 = vmatprep.subr.bf16.mxu1 %v14072_v40  ;;  %v14142_v40 = vld [vmem:[%s19392_s3 + $0x340] ss:$8 sps:$4 sm:$0xff]  }
 0x513   :  { %8051 = vmatpush1.bf16.msra.mxu0 %v14070_v60 }
 0x514   :  { %8276 = vmatpush1.bf16.msra.mxu1 %v14070_v60  ;;  %8052 = vmatprep.subr.bf16.mxu0 %v14075_v59  ;;  %v14147_v60 = vld [vmem:[%s19392_s3 + $0x354] ss:$8 sps:$4 sm:$0xff]  }
 0x515   :  { %8277 = vmatprep.subr.bf16.mxu1 %v14075_v59  ;;  %v14145_v59 = vld [vmem:[%s19392_s3 + $0x350] ss:$8 sps:$4 sm:$0xff]  }
 0x517   :  { %8053 = vmatpush1.bf16.msra.mxu0 %v14073_v9 }
 0x518   :  { %8278 = vmatpush1.bf16.msra.mxu1 %v14073_v9  ;;  %8054 = vmatprep.subr.bf16.mxu0 %v14078_v10  ;;  %v14150_v9 = vld [vmem:[%s19392_s3 + $0x364] ss:$8 sps:$4 sm:$0xff]  }
 0x519   :  { %8279 = vmatprep.subr.bf16.mxu1 %v14078_v10 }
 0x51b   :  { %8055 = vmatpush1.bf16.msra.mxu0 %v14076_v37 }
 0x51c   :  { %8280 = vmatpush1.bf16.msra.mxu1 %v14076_v37  ;;  %8056 = vmatprep.subr.bf16.mxu0 %v14081_v33 }
 0x51d   :  { %8281 = vmatprep.subr.bf16.mxu1 %v14081_v33 }
 0x51f   :  { %8057 = vmatpush1.bf16.msra.mxu0 %v14079_v43 }
 0x520   :  { %8282 = vmatpush1.bf16.msra.mxu1 %v14079_v43  ;;  %8069 = vmatprep.subr.bf16.mxu0 %v14084_v61 }
 0x521   :  { %8294 = vmatprep.subr.bf16.mxu1 %v14084_v61 }
 0x522   :  { %8059 = vmatmul.mubr.bf16.vlgmr.msra.gmra.mrb[100].mxu0 %v19427_v0  ;;  %v14088_v0 = vld [vmem:[%s19392_s3 + $0x220] ss:$8 sps:$4 sm:$0xff]  }
 0x523   :  { %8284 = vmatmul.mubr.bf16.vlgmr.msra.gmra.mrb[100].mxu1 %v19429_v62  ;;  %8070 = vmatpush1.bf16.msra.mxu0 %v14082_v31 }
 0x524   :  { %8101 = vmatprep.mubr.bf16.mxu0 %v19428_v41  ;;  %8295 = vmatpush1.bf16.msra.mxu1 %v14082_v31 }
 0x525   :  { %8326 = vmatprep.mubr.bf16.mxu1 %v19430_v55  ;;  %8071 = vmatprep.subr.bf16.mxu0 %v14087_v21 }
 0x526   :  { %8296 = vmatprep.subr.bf16.mxu1 %v14087_v21  ;;  %v14148_v21 = vld [vmem:[%s19392_s3 + $0x360] ss:$8 sps:$4 sm:$0xff]  }
 0x527   :  { %8072 = vmatpush1.bf16.msra.mxu0 %v14085_v13 }
 0x528   :  { %8297 = vmatpush1.bf16.msra.mxu1 %v14085_v13  ;;  %8073 = vmatprep.subr.bf16.mxu0 %v14090_v44 }
 0x529   :  { %8298 = vmatprep.subr.bf16.mxu1 %v14090_v44 }
 0x52b   :  { %8074 = vmatpush1.bf16.msra.mxu0 %v14088_v0 }
 0x52c   :  { %8299 = vmatpush1.bf16.msra.mxu1 %v14088_v0  ;;  %8075 = vmatprep.subr.bf16.mxu0 %v14093_v56 }
 0x52d   :  { %8300 = vmatprep.subr.bf16.mxu1 %v14093_v56  ;;  %v14153_v56 = vld [vmem:[%s19392_s3 + $0x374] ss:$8 sps:$4 sm:$0xff]  }
 0x52f   :  { %8076 = vmatpush1.bf16.msra.mxu0 %v14091_v42 }
 0x530   :  { %8301 = vmatpush1.bf16.msra.mxu1 %v14091_v42  ;;  %8077 = vmatprep.subr.bf16.mxu0 %v14096_v28  ;;  %v12667_v42 = vld [vmem:[%s19393_s4] ss:$0 sm:$0xff] }
 0x531   :  { %8302 = vmatprep.subr.bf16.mxu1 %v14096_v28 }
 0x533   :  { %8078 = vmatpush1.bf16.msra.mxu0 %v14094_v35 }
 0x534   :  { %8303 = vmatpush1.bf16.msra.mxu1 %v14094_v35  ;;  %8079 = vmatprep.subr.bf16.mxu0 %v14099_v6 }
 0x535   :  { %8304 = vmatprep.subr.bf16.mxu1 %v14099_v6 }
 0x537   :  { %8080 = vmatpush1.bf16.msra.mxu0 %v14097_v18 }
 0x538   :  { %8305 = vmatpush1.bf16.msra.mxu1 %v14097_v18  ;;  %8081 = vmatprep.subr.bf16.mxu0 %v14102_v7 }
 0x539   :  { %8306 = vmatprep.subr.bf16.mxu1 %v14102_v7  ;;  %v14151_v7 = vld [vmem:[%s19392_s3 + $0x370] ss:$8 sps:$4 sm:$0xff]  }
 0x53b   :  { %8082 = vmatpush1.bf16.msra.mxu0 %v14100_v26 }
 0x53c   :  { %8307 = vmatpush1.bf16.msra.mxu1 %v14100_v26  ;;  %8083 = vmatprep.subr.bf16.mxu0 %v14105_v20 }
 0x53d   :  { %8308 = vmatprep.subr.bf16.mxu1 %v14105_v20 }
 0x53f   :  { %8084 = vmatpush1.bf16.msra.mxu0 %v14103_v47 }
 0x540   :  { %8309 = vmatpush1.bf16.msra.mxu1 %v14103_v47  ;;  %8085 = vmatprep.subr.bf16.mxu0 %v14108_v25  ;;  %v14156_v47 = vld [vmem:[%s19392_s3 + $0x384] ss:$8 sps:$4 sm:$0xff]  }
 0x541   :  { %8310 = vmatprep.subr.bf16.mxu1 %v14108_v25 }
 0x543   :  { %8086 = vmatpush1.bf16.msra.mxu0 %v14106_v22 }
 0x544   :  { %8311 = vmatpush1.bf16.msra.mxu1 %v14106_v22  ;;  %8087 = vmatprep.subr.bf16.mxu0 %v14111_v53  ;;  %v14154_v22 = vld [vmem:[%s19392_s3 + $0x380] ss:$8 sps:$4 sm:$0xff]  }
 0x545   :  { %8312 = vmatprep.subr.bf16.mxu1 %v14111_v53 }
 0x547   :  { %8088 = vmatpush1.bf16.msra.mxu0 %v14109_v57 }
 0x548   :  { %8313 = vmatpush1.bf16.msra.mxu1 %v14109_v57  ;;  %8089 = vmatprep.subr.bf16.mxu0 %v14114_v45 }
 0x549   :  { %8314 = vmatprep.subr.bf16.mxu1 %v14114_v45  ;;  %v14159_v45 = vld [vmem:[%s19392_s3 + $0x394] ss:$8 sps:$4 sm:$0xff]  }
 0x54b   :  { %8090 = vmatpush1.bf16.msra.mxu0 %v14112_v24 }
 0x54c   :  { %8315 = vmatpush1.bf16.msra.mxu1 %v14112_v24  ;;  %8091 = vmatprep.subr.bf16.mxu0 %v14117_v58 }
 0x54d   :  { %8316 = vmatprep.subr.bf16.mxu1 %v14117_v58  ;;  %v14157_v58 = vld [vmem:[%s19392_s3 + $0x390] ss:$8 sps:$4 sm:$0xff]  }
 0x54f   :  { %8092 = vmatpush1.bf16.msra.mxu0 %v14115_v63 }
 0x550   :  { %8317 = vmatpush1.bf16.msra.mxu1 %v14115_v63  ;;  %8093 = vmatprep.subr.bf16.mxu0 %v14120_v11  ;;  %v14162_v63 = vld [vmem:[%s19392_s3 + $0x3a4] ss:$8 sps:$4 sm:$0xff]  }
 0x551   :  { %8318 = vmatprep.subr.bf16.mxu1 %v14120_v11  ;;  %v14160_v11 = vld [vmem:[%s19392_s3 + $0x3a0] ss:$8 sps:$4 sm:$0xff]  }
 0x553   :  { %8094 = vmatpush1.bf16.msra.mxu0 %v14118_v39 }
 0x554   :  { %8319 = vmatpush1.bf16.msra.mxu1 %v14118_v39  ;;  %8095 = vmatprep.subr.bf16.mxu0 %v14123_v3  ;;  %v14165_v39 = vld [vmem:[%s19392_s3 + $0x3b4] ss:$8 sps:$4 sm:$0xff]  }
 0x555   :  { %8320 = vmatprep.subr.bf16.mxu1 %v14123_v3  ;;  %v14163_v3 = vld [vmem:[%s19392_s3 + $0x3b0] ss:$8 sps:$4 sm:$0xff]  }
 0x557   :  { %8096 = vmatpush1.bf16.msra.mxu0 %v14121_v12 }
 0x558   :  { %8321 = vmatpush1.bf16.msra.mxu1 %v14121_v12  ;;  %8097 = vmatprep.subr.bf16.mxu0 %v14126_v14  ;;  %v14168_v12 = vld [vmem:[%s19392_s3 + $0x3c4] ss:$8 sps:$4 sm:$0xff]  }
 0x559   :  { %8322 = vmatprep.subr.bf16.mxu1 %v14126_v14  ;;  %v14166_v14 = vld [vmem:[%s19392_s3 + $0x3c0] ss:$8 sps:$4 sm:$0xff]  }
 0x55b   :  { %8098 = vmatpush1.bf16.msra.mxu0 %v14124_v50 }
 0x55c   :  { %8323 = vmatpush1.bf16.msra.mxu1 %v14124_v50  ;;  %8099 = vmatprep.subr.bf16.mxu0 %v14129_v5  ;;  %v14171_v50 = vld [vmem:[%s19392_s3 + $0x3d4] ss:$8 sps:$4 sm:$0xff]  }
 0x55d   :  { %8324 = vmatprep.subr.bf16.mxu1 %v14129_v5  ;;  %v14169_v5 = vld [vmem:[%s19392_s3 + $0x3d0] ss:$8 sps:$4 sm:$0xff]  }
 0x55f   :  { %8100 = vmatpush1.bf16.msra.mxu0 %v14127_v8 }
 0x560   :  { %8325 = vmatpush1.bf16.msra.mxu1 %v14127_v8  ;;  %8112 = vmatprep.subr.bf16.mxu0 %v14132_v27  ;;  %v14174_v8 = vld [vmem:[%s19392_s3 + $0x3e4] ss:$8 sps:$4 sm:$0xff]  }
 0x561   :  { %8337 = vmatprep.subr.bf16.mxu1 %v14132_v27  ;;  %v14172_v27 = vld [vmem:[%s19392_s3 + $0x3e0] ss:$8 sps:$4 sm:$0xff]  }
 0x562   :  { %8102 = vmatmul.mubr.bf16.vlgmr.msra.gmra.mrb[100].mxu0 %v19429_v62 }
 0x563   :  { %8327 = vmatmul.mubr.bf16.vlgmr.msra.gmra.mrb[100].mxu1 %v19431_v32  ;;  %8113 = vmatpush1.bf16.msra.mxu0 %v14130_v15 }
 0x564   :  { %8144 = vmatprep.mubr.bf16.mxu0 %v19430_v55  ;;  %8338 = vmatpush1.bf16.msra.mxu1 %v14130_v15  ;;  %v14177_v15 = vld [vmem:[%s19392_s3 + $0x3f4] ss:$8 sps:$4 sm:$0xff]  }
 0x565   :  { %8369 = vmatprep.mubr.bf16.mxu1 %v19432_v51  ;;  %8114 = vmatprep.subr.bf16.mxu0 %v14135_v46 }
 0x566   :  { %8339 = vmatprep.subr.bf16.mxu1 %v14135_v46  ;;  %v14175_v46 = vld [vmem:[%s19392_s3 + $0x3f0] ss:$8 sps:$4 sm:$0xff]  }
 0x567   :  { %8115 = vmatpush1.bf16.msra.mxu0 %v14133_v23 }
 0x568   :  { %8340 = vmatpush1.bf16.msra.mxu1 %v14133_v23  ;;  %8116 = vmatprep.subr.bf16.mxu0 %v14138_v54  ;;  %v14180_v23 = vld [vmem:[%s19392_s3 + $0x404] ss:$8 sps:$4 sm:$0xff]  }
 0x569   :  { %8341 = vmatprep.subr.bf16.mxu1 %v14138_v54  ;;  %v14178_v54 = vld [vmem:[%s19392_s3 + $0x400] ss:$8 sps:$4 sm:$0xff]  }
 0x56b   :  { %8117 = vmatpush1.bf16.msra.mxu0 %v14136_v16 }
 0x56c   :  { %8342 = vmatpush1.bf16.msra.mxu1 %v14136_v16  ;;  %8118 = vmatprep.subr.bf16.mxu0 %v14141_v1  ;;  %v14183_v16 = vld [vmem:[%s19392_s3 + $0x414] ss:$8 sps:$4 sm:$0xff]  }
 0x56d   :  { %8343 = vmatprep.subr.bf16.mxu1 %v14141_v1  ;;  %v19433_v1 = vld [vmem:[#allocation13_spill] sm:$0xff] }
 0x56f   :  { %8119 = vmatpush1.bf16.msra.mxu0 %v14139_v52 }
 0x570   :  { %8344 = vmatpush1.bf16.msra.mxu1 %v14139_v52  ;;  %8120 = vmatprep.subr.bf16.mxu0 %v14144_v49  ;;  %v14181_v52 = vld [vmem:[%s19392_s3 + $0x410] ss:$8 sps:$4 sm:$0xff]  }
 0x571   :  { %8345 = vmatprep.subr.bf16.mxu1 %v14144_v49  ;;  %v14186_v49 = vld [vmem:[%s19392_s3 + $0x424] ss:$8 sps:$4 sm:$0xff]  }
 0x573   :  { %8121 = vmatpush1.bf16.msra.mxu0 %v14142_v40 }
 0x574   :  { %8346 = vmatpush1.bf16.msra.mxu1 %v14142_v40  ;;  %8122 = vmatprep.subr.bf16.mxu0 %v14147_v60  ;;  %v14184_v40 = vld [vmem:[%s19392_s3 + $0x420] ss:$8 sps:$4 sm:$0xff]  }
 0x575   :  { %v6760_v10 = vpop.f32.mrb[96].mxu0  ;;  %8347 = vmatprep.subr.bf16.mxu1 %v14147_v60  ;;  %v14189_v60 = vld [vmem:[%s19392_s3 + $0x434] ss:$8 sps:$4 sm:$0xff]  }
 0x576   :  { %v6985_v37 = vpop.f32.mrb[96].mxu1  ;;  %v6762_v33 = vpop.f32.mrb[97].mxu0 }
 0x577   :  { %v6994_v43 = vmax.f32 %v6760_v10, %v6985_v37  ;;  %v6987_v61 = vpop.f32.mrb[97].mxu1  ;;  %v6764_v31 = vpop.f32.mrb[98].mxu0  ;;  %8123 = vmatpush1.bf16.msra.mxu0 %v14145_v59  ;;  %v14190_v10 = vld [vmem:[%s19392_s3 + $0x440] ss:$8 sps:$4 sm:$0xff]   ;;  %v14195_v37 = vld [vmem:[%s19392_s3 + $0x454] ss:$8 sps:$4 sm:$0xff]  }
 0x578   :  { %v6995_v13 = vmax.f32 %v6762_v33, %v6987_v61  ;;  %v6989_v44 = vpop.f32.mrb[98].mxu1  ;;  %8348 = vmatpush1.bf16.msra.mxu1 %v14145_v59  ;;  %v6766_v0 = vpop.f32.mrb[99].mxu0  ;;  %8124 = vmatprep.subr.bf16.mxu0 %v14150_v9  ;;  %v14187_v59 = vld [vmem:[%s19392_s3 + $0x430] ss:$8 sps:$4 sm:$0xff]   ;;  %v14196_v61 = vld [vmem:[%s19392_s3 + $0x460] ss:$8 sps:$4 sm:$0xff]  }
 0x579   :  { %v6996_v28 = vmax.f32 %v6764_v31, %v6989_v44  ;;  %v6991_v35 = vpop.f32.mrb[99].mxu1  ;;  %8349 = vmatprep.subr.bf16.mxu1 %v14150_v9  ;;  %v14192_v9 = vld [vmem:[%s19392_s3 + $0x444] ss:$8 sps:$4 sm:$0xff]   ;;  %v14193_v33 = vld [vmem:[%s19392_s3 + $0x450] ss:$8 sps:$4 sm:$0xff]  }
 0x57a   :  { %v6998_v6 = vmax.f32 %v6994_v43, %v6995_v13  ;;  %v6997_v18 = vmax.f32 %v6766_v0, %v6991_v35  ;;  %v14198_v43 = vld [vmem:[%s19392_s3 + $0x464] ss:$8 sps:$4 sm:$0xff]   ;;  %v14201_v31 = vld [vmem:[%s19392_s3 + $0x474] ss:$8 sps:$4 sm:$0xff]   ;;  %v14202_v44 = vld [vmem:[%s19392_s3 + $0x480] ss:$8 sps:$4 sm:$0xff]  }
 0x57b   :  { %8125 = vmatpush1.bf16.msra.mxu0 %v14148_v21  ;;  %v14204_v13 = vld [vmem:[%s19392_s3 + $0x484] ss:$8 sps:$4 sm:$0xff]   ;;  %v14207_v0 = vld [vmem:[%s19392_s3 + $0x494] ss:$8 sps:$4 sm:$0xff]  }
 0x57c   :  { %v7007_v26 = vadd.f32 %v12667_v42, %v6998_v6  ;;  %v6999_v20 = vmax.f32 %v6996_v28, %v6997_v18  ;;  %8350 = vmatpush1.bf16.msra.mxu1 %v14148_v21  ;;  %8126 = vmatprep.subr.bf16.mxu0 %v14153_v56  ;;  %v14199_v21 = vld [vmem:[%s19392_s3 + $0x470] ss:$8 sps:$4 sm:$0xff]   ;;  %v14208_v28 = vld [vmem:[%s19392_s3 + $0x4a0] ss:$8 sps:$4 sm:$0xff]   ;;  %v14213_v35 = vld [vmem:[%s19392_s3 + $0x4b4] ss:$8 sps:$4 sm:$0xff]  }
 0x57d   :  { %8351 = vmatprep.subr.bf16.mxu1 %v14153_v56  ;;  %v14205_v56 = vld [vmem:[%s19392_s3 + $0x490] ss:$8 sps:$4 sm:$0xff]   ;;  %v14216_v18 = vld [vmem:[%s19392_s3 + $0x4c4] ss:$8 sps:$4 sm:$0xff]  }
 0x57e   :  { %v7008_v25 = vadd.f32 %v12667_v42, %v6999_v20  ;;  %v7009_v53 = vmax.f32 %v7007_v26, 0.0  ;;  %v14210_v42 = vld [vmem:[%s19392_s3 + $0x4a4] ss:$8 sps:$4 sm:$0xff]   ;;  %v14211_v6 = vld [vmem:[%s19392_s3 + $0x4b0] ss:$8 sps:$4 sm:$0xff]  }
 0x57f   :  { %8127 = vmatpush1.bf16.msra.mxu0 %v14151_v7  ;;  %v14219_v26 = vld [vmem:[%s19392_s3 + $0x4d4] ss:$8 sps:$4 sm:$0xff]   ;;  %v14217_v20 = vld [vmem:[%s19392_s3 + $0x4d0] ss:$8 sps:$4 sm:$0xff]  }
 0x580   :  { %v7010_v57 = vmax.f32 %v7008_v25, 0.0  ;;  %8352 = vmatpush1.bf16.msra.mxu1 %v14151_v7  ;;  %8128 = vmatprep.subr.bf16.mxu0 %v14156_v47  ;;  %v14214_v7 = vld [vmem:[%s19392_s3 + $0x4c0] ss:$8 sps:$4 sm:$0xff]  }
 0x581   :  { %8353 = vmatprep.subr.bf16.mxu1 %v14156_v47  ;;  %v14222_v47 = vld [vmem:[%s19392_s3 + $0x4e4] ss:$8 sps:$4 sm:$0xff]   ;;  %v14220_v25 = vld [vmem:[%s19392_s3 + $0x4e0] ss:$8 sps:$4 sm:$0xff]  }
 0x582   :  { %v18050_v24 = vpack.c.bf16 %v7010_v57, %v7009_v53  ;;  %v14223_v53 = vld [vmem:[%s19392_s3 + $0x4f0] ss:$8 sps:$4 sm:$0xff]   ;;  %v14228_v57 = vld [vmem:[%s19392_s3 + $0x4] ss:$8 sps:$4 sm:$0xff]  }
 0x583   :  { %8129 = vmatpush1.bf16.msra.mxu0 %v14154_v22 }
 0x584   :  { %8354 = vmatpush1.bf16.msra.mxu1 %v14154_v22  ;;  %8130 = vmatprep.subr.bf16.mxu0 %v14159_v45  ;;  %v14225_v22 = vld [vmem:[%s19392_s3 + $0x4f4] ss:$8 sps:$4 sm:$0xff]  }
 0x585   :  { %8355 = vmatprep.subr.bf16.mxu1 %v14159_v45  ;;  %v14226_v45 = vld [vmem:[%s19392_s3] ss:$8 sps:$4 sm:$0xff]  }
 0x587   :  { %8131 = vmatpush1.bf16.msra.mxu0 %v14157_v58 }
 0x588   :  { %8356 = vmatpush1.bf16.msra.mxu1 %v14157_v58  ;;  %8132 = vmatprep.subr.bf16.mxu0 %v14162_v63  ;;  %v14231_v58 = vld [vmem:[%s19392_s3 + $0x14] ss:$8 sps:$4 sm:$0xff]  }
 0x589   :  { %8357 = vmatprep.subr.bf16.mxu1 %v14162_v63  ;;  %v14229_v63 = vld [vmem:[%s19392_s3 + $0x10] ss:$8 sps:$4 sm:$0xff]  }
 0x58b   :  { %8133 = vmatpush1.bf16.msra.mxu0 %v14160_v11 }
 0x58c   :  { %8358 = vmatpush1.bf16.msra.mxu1 %v14160_v11  ;;  %8134 = vmatprep.subr.bf16.mxu0 %v14165_v39  ;;  %v14234_v11 = vld [vmem:[%s19392_s3 + $0x24] ss:$8 sps:$4 sm:$0xff]  }
 0x58d   :  { %8359 = vmatprep.subr.bf16.mxu1 %v14165_v39  ;;  %v14232_v39 = vld [vmem:[%s19392_s3 + $0x20] ss:$8 sps:$4 sm:$0xff]  }
 0x58f   :  { %8135 = vmatpush1.bf16.msra.mxu0 %v14163_v3 }
 0x590   :  { %8360 = vmatpush1.bf16.msra.mxu1 %v14163_v3  ;;  %8136 = vmatprep.subr.bf16.mxu0 %v14168_v12  ;;  %v14235_v3 = vld [vmem:[%s19392_s3 + $0x30] ss:$8 sps:$4 sm:$0xff]  }
 0x591   :  { %8361 = vmatprep.subr.bf16.mxu1 %v14168_v12  ;;  %v14240_v12 = vld [vmem:[%s19392_s3 + $0x44] ss:$8 sps:$4 sm:$0xff]  }
 0x593   :  { %8137 = vmatpush1.bf16.msra.mxu0 %v14166_v14 }
 0x594   :  { %8362 = vmatpush1.bf16.msra.mxu1 %v14166_v14  ;;  %8138 = vmatprep.subr.bf16.mxu0 %v14171_v50  ;;  %v14238_v14 = vld [vmem:[%s19392_s3 + $0x40] ss:$8 sps:$4 sm:$0xff]  }
 0x595   :  { %8363 = vmatprep.subr.bf16.mxu1 %v14171_v50  ;;  %v14243_v50 = vld [vmem:[%s19392_s3 + $0x54] ss:$8 sps:$4 sm:$0xff]  }
 0x597   :  { %8139 = vmatpush1.bf16.msra.mxu0 %v14169_v5 }
 0x598   :  { %8364 = vmatpush1.bf16.msra.mxu1 %v14169_v5  ;;  %8140 = vmatprep.subr.bf16.mxu0 %v14174_v8  ;;  %v14241_v5 = vld [vmem:[%s19392_s3 + $0x50] ss:$8 sps:$4 sm:$0xff]  }
 0x599   :  { %8365 = vmatprep.subr.bf16.mxu1 %v14174_v8  ;;  %v14246_v8 = vld [vmem:[%s19392_s3 + $0x64] ss:$8 sps:$4 sm:$0xff]  }
 0x59b   :  { %8141 = vmatpush1.bf16.msra.mxu0 %v14172_v27 }
 0x59c   :  { %8366 = vmatpush1.bf16.msra.mxu1 %v14172_v27  ;;  %8142 = vmatprep.subr.bf16.mxu0 %v14177_v15  ;;  %v14244_v27 = vld [vmem:[%s19392_s3 + $0x60] ss:$8 sps:$4 sm:$0xff]  }
 0x59d   :  { %8367 = vmatprep.subr.bf16.mxu1 %v14177_v15  ;;  %v14249_v15 = vld [vmem:[%s19392_s3 + $0x74] ss:$8 sps:$4 sm:$0xff]  }
 0x59f   :  { %8143 = vmatpush1.bf16.msra.mxu0 %v14175_v46 }
 0x5a0   :  { %8368 = vmatpush1.bf16.msra.mxu1 %v14175_v46  ;;  %8155 = vmatprep.subr.bf16.mxu0 %v14180_v23  ;;  %v14247_v46 = vld [vmem:[%s19392_s3 + $0x70] ss:$8 sps:$4 sm:$0xff]  }
 0x5a1   :  { %8380 = vmatprep.subr.bf16.mxu1 %v14180_v23  ;;  %v14252_v23 = vld [vmem:[%s19392_s3 + $0x84] ss:$8 sps:$4 sm:$0xff]  }
 0x5a2   :  { %8145 = vmatmul.mubr.bf16.vlgmr.msra.gmra.mrb[100].mxu0 %v19431_v32 }
 0x5a3   :  { %8370 = vmatmul.mubr.bf16.vlgmr.msra.gmra.mrb[100].mxu1 %v19433_v1  ;;  %8156 = vmatpush1.bf16.msra.mxu0 %v14178_v54 }
 0x5a4   :  { %8187 = vmatprep.mubr.bf16.mxu0 %v19432_v51  ;;  %8381 = vmatpush1.bf16.msra.mxu1 %v14178_v54  ;;  %v14250_v54 = vld [vmem:[%s19392_s3 + $0x80] ss:$8 sps:$4 sm:$0xff]  }
 0x5a5   :  { %8412 = vmatprep.mubr.bf16.mxu1 %v16965_v17  ;;  %8157 = vmatprep.subr.bf16.mxu0 %v14183_v16 }
 0x5a6   :  { %8382 = vmatprep.subr.bf16.mxu1 %v14183_v16  ;;  %v14255_v16 = vld [vmem:[%s19392_s3 + $0x94] ss:$8 sps:$4 sm:$0xff]  }
 0x5a7   :  { %8158 = vmatpush1.bf16.msra.mxu0 %v14181_v52 }
 0x5a8   :  { %8383 = vmatpush1.bf16.msra.mxu1 %v14181_v52  ;;  %8159 = vmatprep.subr.bf16.mxu0 %v14186_v49  ;;  %v14253_v52 = vld [vmem:[%s19392_s3 + $0x90] ss:$8 sps:$4 sm:$0xff]  }
 0x5a9   :  { %8384 = vmatprep.subr.bf16.mxu1 %v14186_v49  ;;  %v14258_v49 = vld [vmem:[%s19392_s3 + $0xa4] ss:$8 sps:$4 sm:$0xff]  }
 0x5ab   :  { %8160 = vmatpush1.bf16.msra.mxu0 %v14184_v40 }
 0x5ac   :  { %8385 = vmatpush1.bf16.msra.mxu1 %v14184_v40  ;;  %8161 = vmatprep.subr.bf16.mxu0 %v14189_v60  ;;  %v14256_v40 = vld [vmem:[%s19392_s3 + $0xa0] ss:$8 sps:$4 sm:$0xff]  }
 0x5ad   :  { %8386 = vmatprep.subr.bf16.mxu1 %v14189_v60  ;;  %v14261_v60 = vld [vmem:[%s19392_s3 + $0xb4] ss:$8 sps:$4 sm:$0xff]  }
 0x5af   :  { %8162 = vmatpush1.bf16.msra.mxu0 %v14187_v59 }
 0x5b0   :  { %8387 = vmatpush1.bf16.msra.mxu1 %v14187_v59  ;;  %8163 = vmatprep.subr.bf16.mxu0 %v14192_v9  ;;  %v14259_v59 = vld [vmem:[%s19392_s3 + $0xb0] ss:$8 sps:$4 sm:$0xff]  }
 0x5b1   :  { %8388 = vmatprep.subr.bf16.mxu1 %v14192_v9  ;;  %v14264_v9 = vld [vmem:[%s19392_s3 + $0xc4] ss:$8 sps:$4 sm:$0xff]  }
 0x5b3   :  { %8164 = vmatpush1.bf16.msra.mxu0 %v14190_v10 }
 0x5b4   :  { %8389 = vmatpush1.bf16.msra.mxu1 %v14190_v10  ;;  %8165 = vmatprep.subr.bf16.mxu0 %v14195_v37  ;;  %v14262_v10 = vld [vmem:[%s19392_s3 + $0xc0] ss:$8 sps:$4 sm:$0xff]  }
 0x5b5   :  { %8390 = vmatprep.subr.bf16.mxu1 %v14195_v37  ;;  %v14267_v37 = vld [vmem:[%s19392_s3 + $0xd4] ss:$8 sps:$4 sm:$0xff]  }
 0x5b7   :  { %8166 = vmatpush1.bf16.msra.mxu0 %v14193_v33 }
 0x5b8   :  { %8391 = vmatpush1.bf16.msra.mxu1 %v14193_v33  ;;  %8167 = vmatprep.subr.bf16.mxu0 %v14198_v43  ;;  %v14265_v33 = vld [vmem:[%s19392_s3 + $0xd0] ss:$8 sps:$4 sm:$0xff]  }
 0x5b9   :  { %8392 = vmatprep.subr.bf16.mxu1 %v14198_v43  ;;  %v14270_v43 = vld [vmem:[%s19392_s3 + $0xe4] ss:$8 sps:$4 sm:$0xff]  }
 0x5bb   :  { %8168 = vmatpush1.bf16.msra.mxu0 %v14196_v61 }
 0x5bc   :  { %8393 = vmatpush1.bf16.msra.mxu1 %v14196_v61  ;;  %8169 = vmatprep.subr.bf16.mxu0 %v14201_v31  ;;  %v14268_v61 = vld [vmem:[%s19392_s3 + $0xe0] ss:$8 sps:$4 sm:$0xff]  }
 0x5bd   :  { %8394 = vmatprep.subr.bf16.mxu1 %v14201_v31  ;;  %v14273_v31 = vld [vmem:[%s19392_s3 + $0xf4] ss:$8 sps:$4 sm:$0xff]  }
 0x5bf   :  { %8170 = vmatpush1.bf16.msra.mxu0 %v14199_v21 }
 0x5c0   :  { %8395 = vmatpush1.bf16.msra.mxu1 %v14199_v21  ;;  %8171 = vmatprep.subr.bf16.mxu0 %v14204_v13  ;;  %v14271_v21 = vld [vmem:[%s19392_s3 + $0xf0] ss:$8 sps:$4 sm:$0xff]  }
 0x5c1   :  { %8396 = vmatprep.subr.bf16.mxu1 %v14204_v13  ;;  %v14276_v13 = vld [vmem:[%s19392_s3 + $0x104] ss:$8 sps:$4 sm:$0xff]  }
 0x5c3   :  { %8172 = vmatpush1.bf16.msra.mxu0 %v14202_v44 }
 0x5c4   :  { %8397 = vmatpush1.bf16.msra.mxu1 %v14202_v44  ;;  %8173 = vmatprep.subr.bf16.mxu0 %v14207_v0  ;;  %v14274_v44 = vld [vmem:[%s19392_s3 + $0x100] ss:$8 sps:$4 sm:$0xff]  }
 0x5c5   :  { %8398 = vmatprep.subr.bf16.mxu1 %v14207_v0  ;;  %v14279_v0 = vld [vmem:[%s19392_s3 + $0x114] ss:$8 sps:$4 sm:$0xff]  }
 0x5c7   :  { %8174 = vmatpush1.bf16.msra.mxu0 %v14205_v56 }
 0x5c8   :  { %8399 = vmatpush1.bf16.msra.mxu1 %v14205_v56  ;;  %8175 = vmatprep.subr.bf16.mxu0 %v14210_v42  ;;  %v14277_v56 = vld [vmem:[%s19392_s3 + $0x110] ss:$8 sps:$4 sm:$0xff]  }
 0x5c9   :  { %8400 = vmatprep.subr.bf16.mxu1 %v14210_v42  ;;  %v14282_v42 = vld [vmem:[%s19392_s3 + $0x124] ss:$8 sps:$4 sm:$0xff]  }
 0x5cb   :  { %8176 = vmatpush1.bf16.msra.mxu0 %v14208_v28 }
 0x5cc   :  { %8401 = vmatpush1.bf16.msra.mxu1 %v14208_v28  ;;  %8177 = vmatprep.subr.bf16.mxu0 %v14213_v35  ;;  %v14283_v28 = vld [vmem:[%s19392_s3 + $0x130] ss:$8 sps:$4 sm:$0xff]  }
 0x5cd   :  { %8402 = vmatprep.subr.bf16.mxu1 %v14213_v35  ;;  %v14288_v35 = vld [vmem:[%s19392_s3 + $0x144] ss:$8 sps:$4 sm:$0xff]  }
 0x5cf   :  { %8178 = vmatpush1.bf16.msra.mxu0 %v14211_v6 }
 0x5d0   :  { %8403 = vmatpush1.bf16.msra.mxu1 %v14211_v6  ;;  %8179 = vmatprep.subr.bf16.mxu0 %v14216_v18  ;;  %v14286_v6 = vld [vmem:[%s19392_s3 + $0x140] ss:$8 sps:$4 sm:$0xff]  }
 0x5d1   :  { %8404 = vmatprep.subr.bf16.mxu1 %v14216_v18  ;;  %v14291_v18 = vld [vmem:[%s19392_s3 + $0x154] ss:$8 sps:$4 sm:$0xff]  }
 0x5d3   :  { %8180 = vmatpush1.bf16.msra.mxu0 %v14214_v7 }
 0x5d4   :  { %8405 = vmatpush1.bf16.msra.mxu1 %v14214_v7  ;;  %8181 = vmatprep.subr.bf16.mxu0 %v14219_v26  ;;  %v14289_v7 = vld [vmem:[%s19392_s3 + $0x150] ss:$8 sps:$4 sm:$0xff]  }
 0x5d5   :  { %8406 = vmatprep.subr.bf16.mxu1 %v14219_v26  ;;  %v14294_v26 = vld [vmem:[%s19392_s3 + $0x164] ss:$8 sps:$4 sm:$0xff]  }
 0x5d7   :  { %8182 = vmatpush1.bf16.msra.mxu0 %v14217_v20 }
 0x5d8   :  { %8407 = vmatpush1.bf16.msra.mxu1 %v14217_v20  ;;  %8183 = vmatprep.subr.bf16.mxu0 %v14222_v47  ;;  %v14292_v20 = vld [vmem:[%s19392_s3 + $0x160] ss:$8 sps:$4 sm:$0xff]  }
 0x5d9   :  { %8408 = vmatprep.subr.bf16.mxu1 %v14222_v47  ;;  %v14297_v47 = vld [vmem:[%s19392_s3 + $0x174] ss:$8 sps:$4 sm:$0xff]  }
 0x5db   :  { %8184 = vmatpush1.bf16.msra.mxu0 %v14220_v25 }
 0x5dc   :  { %8409 = vmatpush1.bf16.msra.mxu1 %v14220_v25  ;;  %8185 = vmatprep.subr.bf16.mxu0 %v14225_v22  ;;  %v14295_v25 = vld [vmem:[%s19392_s3 + $0x170] ss:$8 sps:$4 sm:$0xff]  }
 0x5dd   :  { %8410 = vmatprep.subr.bf16.mxu1 %v14225_v22  ;;  %v14300_v22 = vld [vmem:[%s19392_s3 + $0x184] ss:$8 sps:$4 sm:$0xff]  }
 0x5df   :  { %8186 = vmatpush1.bf16.msra.mxu0 %v14223_v53 }
 0x5e0   :  { %8411 = vmatpush1.bf16.msra.mxu1 %v14223_v53  ;;  %9412 = vmatprep.subr.bf16.mxu0 %v14228_v57  ;;  %v14298_v53 = vld [vmem:[%s19392_s3 + $0x180] ss:$8 sps:$4 sm:$0xff]  }
 0x5e1   :  { %9637 = vmatprep.subr.bf16.mxu1 %v14228_v57  ;;  %v14303_v57 = vld [vmem:[%s19392_s3 + $0x194] ss:$8 sps:$4 sm:$0xff]  }
 0x5e2   :  { %8188 = vmatmul.mubr.bf16.vlgmr.msra.gmra.mrb[100].mxu0 %v19433_v1 }
 0x5e3   :  { %8413 = vmatmul.mubr.bf16.vlgmr.msra.gmra.mrb[100].mxu1 %v16961_v38  ;;  %9413 = vmatpush1.bf16.msra.mxu0 %v14226_v45 }
 0x5e4   :  { %9444 = vmatprep.mubr.bf16.mxu0 %v19428_v41  ;;  %9638 = vmatpush1.bf16.msra.mxu1 %v14226_v45  ;;  %v14237_v41 = vld [vmem:[%s19392_s3 + $0x34] ss:$8 sps:$4 sm:$0xff]   ;;  %v14301_v45 = vld [vmem:[%s19392_s3 + $0x190] ss:$8 sps:$4 sm:$0xff]  }
 0x5e5   :  { %9669 = vmatprep.mubr.bf16.mxu1 %v19430_v55  ;;  %9414 = vmatprep.subr.bf16.mxu0 %v14231_v58 }
 0x5e6   :  { %9639 = vmatprep.subr.bf16.mxu1 %v14231_v58  ;;  %v14306_v58 = vld [vmem:[%s19392_s3 + $0x1a4] ss:$8 sps:$4 sm:$0xff]  }
 0x5e7   :  { %9415 = vmatpush1.bf16.msra.mxu0 %v14229_v63 }
 0x5e8   :  { %9640 = vmatpush1.bf16.msra.mxu1 %v14229_v63  ;;  %9416 = vmatprep.subr.bf16.mxu0 %v14234_v11  ;;  %v14304_v63 = vld [vmem:[%s19392_s3 + $0x1a0] ss:$8 sps:$4 sm:$0xff]  }
 0x5e9   :  { %9641 = vmatprep.subr.bf16.mxu1 %v14234_v11  ;;  %v14309_v11 = vld [vmem:[%s19392_s3 + $0x1b4] ss:$8 sps:$4 sm:$0xff]  }
 0x5eb   :  { %9417 = vmatpush1.bf16.msra.mxu0 %v14232_v39 }
 0x5ec   :  { %9642 = vmatpush1.bf16.msra.mxu1 %v14232_v39  ;;  %9418 = vmatprep.subr.bf16.mxu0 %v14237_v41  ;;  %v14307_v39 = vld [vmem:[%s19392_s3 + $0x1b0] ss:$8 sps:$4 sm:$0xff]  }
 0x5ed   :  { %9643 = vmatprep.subr.bf16.mxu1 %v14237_v41  ;;  %v14312_v41 = vld [vmem:[%s19392_s3 + $0x1c4] ss:$8 sps:$4 sm:$0xff]  }
 0x5ef   :  { %9419 = vmatpush1.bf16.msra.mxu0 %v14235_v3 }
 0x5f0   :  { %9644 = vmatpush1.bf16.msra.mxu1 %v14235_v3  ;;  %9420 = vmatprep.subr.bf16.mxu0 %v14240_v12  ;;  %v14310_v3 = vld [vmem:[%s19392_s3 + $0x1c0] ss:$8 sps:$4 sm:$0xff]  }
 0x5f1   :  { %9645 = vmatprep.subr.bf16.mxu1 %v14240_v12  ;;  %v14315_v12 = vld [vmem:[%s19392_s3 + $0x1d4] ss:$8 sps:$4 sm:$0xff]  }
 0x5f3   :  { %9421 = vmatpush1.bf16.msra.mxu0 %v14238_v14 }
 0x5f4   :  { %9646 = vmatpush1.bf16.msra.mxu1 %v14238_v14  ;;  %9422 = vmatprep.subr.bf16.mxu0 %v14243_v50  ;;  %v14313_v14 = vld [vmem:[%s19392_s3 + $0x1d0] ss:$8 sps:$4 sm:$0xff]  }
 0x5f5   :  { %9647 = vmatprep.subr.bf16.mxu1 %v14243_v50  ;;  %v14318_v50 = vld [vmem:[%s19392_s3 + $0x1e4] ss:$8 sps:$4 sm:$0xff]  }
 0x5f7   :  { %9423 = vmatpush1.bf16.msra.mxu0 %v14241_v5 }
 0x5f8   :  { %9648 = vmatpush1.bf16.msra.mxu1 %v14241_v5  ;;  %9424 = vmatprep.subr.bf16.mxu0 %v14246_v8  ;;  %v14316_v5 = vld [vmem:[%s19392_s3 + $0x1e0] ss:$8 sps:$4 sm:$0xff]  }
 0x5f9   :  { %9649 = vmatprep.subr.bf16.mxu1 %v14246_v8  ;;  %v14321_v8 = vld [vmem:[%s19392_s3 + $0x1f4] ss:$8 sps:$4 sm:$0xff]  }
 0x5fb   :  { %9425 = vmatpush1.bf16.msra.mxu0 %v14244_v27 }
 0x5fc   :  { %9650 = vmatpush1.bf16.msra.mxu1 %v14244_v27  ;;  %9426 = vmatprep.subr.bf16.mxu0 %v14249_v15  ;;  %v14319_v27 = vld [vmem:[%s19392_s3 + $0x1f0] ss:$8 sps:$4 sm:$0xff]  }
 0x5fd   :  { %9651 = vmatprep.subr.bf16.mxu1 %v14249_v15  ;;  %v14324_v15 = vld [vmem:[%s19392_s3 + $0x204] ss:$8 sps:$4 sm:$0xff]  }
 0x5ff   :  { %9427 = vmatpush1.bf16.msra.mxu0 %v14247_v46 }
 0x600   :  { %9652 = vmatpush1.bf16.msra.mxu1 %v14247_v46  ;;  %9428 = vmatprep.subr.bf16.mxu0 %v14252_v23  ;;  %v14322_v46 = vld [vmem:[%s19392_s3 + $0x200] ss:$8 sps:$4 sm:$0xff]  }
 0x601   :  { %9653 = vmatprep.subr.bf16.mxu1 %v14252_v23  ;;  %v14327_v23 = vld [vmem:[%s19392_s3 + $0x214] ss:$8 sps:$4 sm:$0xff]  }
 0x603   :  { %9429 = vmatpush1.bf16.msra.mxu0 %v14250_v54 }
 0x604   :  { %9654 = vmatpush1.bf16.msra.mxu1 %v14250_v54  ;;  %9430 = vmatprep.subr.bf16.mxu0 %v14255_v16  ;;  %v14325_v54 = vld [vmem:[%s19392_s3 + $0x210] ss:$8 sps:$4 sm:$0xff]  }
 0x605   :  { %9655 = vmatprep.subr.bf16.mxu1 %v14255_v16  ;;  %v14330_v16 = vld [vmem:[%s19392_s3 + $0x224] ss:$8 sps:$4 sm:$0xff]  }
 0x607   :  { %9431 = vmatpush1.bf16.msra.mxu0 %v14253_v52 }
 0x608   :  { %9656 = vmatpush1.bf16.msra.mxu1 %v14253_v52  ;;  %9432 = vmatprep.subr.bf16.mxu0 %v14258_v49  ;;  %v14333_v52 = vld [vmem:[%s19392_s3 + $0x234] ss:$8 sps:$4 sm:$0xff]  }
 0x609   :  { %9657 = vmatprep.subr.bf16.mxu1 %v14258_v49  ;;  %v14331_v49 = vld [vmem:[%s19392_s3 + $0x230] ss:$8 sps:$4 sm:$0xff]  }
 0x60b   :  { %9433 = vmatpush1.bf16.msra.mxu0 %v14256_v40 }
 0x60c   :  { %9658 = vmatpush1.bf16.msra.mxu1 %v14256_v40  ;;  %9434 = vmatprep.subr.bf16.mxu0 %v14261_v60  ;;  %v14336_v40 = vld [vmem:[%s19392_s3 + $0x244] ss:$8 sps:$4 sm:$0xff]  }
 0x60d   :  { %9659 = vmatprep.subr.bf16.mxu1 %v14261_v60  ;;  %v14334_v60 = vld [vmem:[%s19392_s3 + $0x240] ss:$8 sps:$4 sm:$0xff]  }
 0x60f   :  { %9435 = vmatpush1.bf16.msra.mxu0 %v14259_v59 }
 0x610   :  { %9660 = vmatpush1.bf16.msra.mxu1 %v14259_v59  ;;  %9436 = vmatprep.subr.bf16.mxu0 %v14264_v9  ;;  %v14339_v59 = vld [vmem:[%s19392_s3 + $0x254] ss:$8 sps:$4 sm:$0xff]  }
 0x611   :  { %9661 = vmatprep.subr.bf16.mxu1 %v14264_v9  ;;  %v14337_v9 = vld [vmem:[%s19392_s3 + $0x250] ss:$8 sps:$4 sm:$0xff]  }
 0x613   :  { %9437 = vmatpush1.bf16.msra.mxu0 %v14262_v10 }
 0x614   :  { %9662 = vmatpush1.bf16.msra.mxu1 %v14262_v10  ;;  %9438 = vmatprep.subr.bf16.mxu0 %v14267_v37  ;;  %v14342_v10 = vld [vmem:[%s19392_s3 + $0x264] ss:$8 sps:$4 sm:$0xff]  }
 0x615   :  { %9663 = vmatprep.subr.bf16.mxu1 %v14267_v37  ;;  %v14340_v37 = vld [vmem:[%s19392_s3 + $0x260] ss:$8 sps:$4 sm:$0xff]  }
 0x617   :  { %9439 = vmatpush1.bf16.msra.mxu0 %v14265_v33 }
 0x618   :  { %9664 = vmatpush1.bf16.msra.mxu1 %v14265_v33  ;;  %9440 = vmatprep.subr.bf16.mxu0 %v14270_v43  ;;  %v14345_v33 = vld [vmem:[%s19392_s3 + $0x274] ss:$8 sps:$4 sm:$0xff]  }
 0x619   :  { %9665 = vmatprep.subr.bf16.mxu1 %v14270_v43  ;;  %v14343_v43 = vld [vmem:[%s19392_s3 + $0x270] ss:$8 sps:$4 sm:$0xff]  }
 0x61b   :  { %9441 = vmatpush1.bf16.msra.mxu0 %v14268_v61 }
 0x61c   :  { %9666 = vmatpush1.bf16.msra.mxu1 %v14268_v61  ;;  %9442 = vmatprep.subr.bf16.mxu0 %v14273_v31  ;;  %v14348_v61 = vld [vmem:[%s19392_s3 + $0x284] ss:$8 sps:$4 sm:$0xff]  }
 0x61d   :  { %9667 = vmatprep.subr.bf16.mxu1 %v14273_v31  ;;  %v14346_v31 = vld [vmem:[%s19392_s3 + $0x280] ss:$8 sps:$4 sm:$0xff]  }
 0x61f   :  { %9443 = vmatpush1.bf16.msra.mxu0 %v14271_v21 }
 0x620   :  { %9668 = vmatpush1.bf16.msra.mxu1 %v14271_v21  ;;  %9455 = vmatprep.subr.bf16.mxu0 %v14276_v13  ;;  %v14351_v21 = vld [vmem:[%s19392_s3 + $0x294] ss:$8 sps:$4 sm:$0xff]  }
 0x621   :  { %9680 = vmatprep.subr.bf16.mxu1 %v14276_v13  ;;  %v14349_v13 = vld [vmem:[%s19392_s3 + $0x290] ss:$8 sps:$4 sm:$0xff]  }
 0x622   :  { %9445 = vmatmul.mubr.bf16.vlgmr.msra.gmra.mrb[104].mxu0 %v19429_v62  ;;  %v14280_v62 = vld [vmem:[%s19392_s3 + $0x120] ss:$8 sps:$4 sm:$0xff]  }
 0x623   :  { %9670 = vmatmul.mubr.bf16.vlgmr.msra.gmra.mrb[104].mxu1 %v19431_v32  ;;  %9456 = vmatpush1.bf16.msra.mxu0 %v14274_v44 }
 0x624   :  { %9487 = vmatprep.mubr.bf16.mxu0 %v19430_v55  ;;  %9681 = vmatpush1.bf16.msra.mxu1 %v14274_v44  ;;  %v14285_v55 = vld [vmem:[%s19392_s3 + $0x134] ss:$8 sps:$4 sm:$0xff]   ;;  %v14354_v44 = vld [vmem:[%s19392_s3 + $0x2a4] ss:$8 sps:$4 sm:$0xff]  }
 0x625   :  { %9712 = vmatprep.mubr.bf16.mxu1 %v19432_v51  ;;  %9457 = vmatprep.subr.bf16.mxu0 %v14279_v0 }
 0x626   :  { %9682 = vmatprep.subr.bf16.mxu1 %v14279_v0  ;;  %v14352_v0 = vld [vmem:[%s19392_s3 + $0x2a0] ss:$8 sps:$4 sm:$0xff]  }
 0x627   :  { %9458 = vmatpush1.bf16.msra.mxu0 %v14277_v56 }
 0x628   :  { %9683 = vmatpush1.bf16.msra.mxu1 %v14277_v56  ;;  %9459 = vmatprep.subr.bf16.mxu0 %v14282_v42  ;;  %v14357_v56 = vld [vmem:[%s19392_s3 + $0x2b4] ss:$8 sps:$4 sm:$0xff]  }
 0x629   :  { %9684 = vmatprep.subr.bf16.mxu1 %v14282_v42  ;;  %v14355_v42 = vld [vmem:[%s19392_s3 + $0x2b0] ss:$8 sps:$4 sm:$0xff]  }
 0x62b   :  { %9460 = vmatpush1.bf16.msra.mxu0 %v14280_v62 }
 0x62c   :  { %9685 = vmatpush1.bf16.msra.mxu1 %v14280_v62  ;;  %9461 = vmatprep.subr.bf16.mxu0 %v14285_v55  ;;  %v14360_v62 = vld [vmem:[%s19392_s3 + $0x2c4] ss:$8 sps:$4 sm:$0xff]  }
 0x62d   :  { %9686 = vmatprep.subr.bf16.mxu1 %v14285_v55  ;;  %v14358_v55 = vld [vmem:[%s19392_s3 + $0x2c0] ss:$8 sps:$4 sm:$0xff]  }
 0x62f   :  { %9462 = vmatpush1.bf16.msra.mxu0 %v14283_v28 }
 0x630   :  { %9687 = vmatpush1.bf16.msra.mxu1 %v14283_v28  ;;  %9463 = vmatprep.subr.bf16.mxu0 %v14288_v35  ;;  %v14363_v28 = vld [vmem:[%s19392_s3 + $0x2d4] ss:$8 sps:$4 sm:$0xff]  }
 0x631   :  { %9688 = vmatprep.subr.bf16.mxu1 %v14288_v35  ;;  %v14361_v35 = vld [vmem:[%s19392_s3 + $0x2d0] ss:$8 sps:$4 sm:$0xff]  }
 0x633   :  { %9464 = vmatpush1.bf16.msra.mxu0 %v14286_v6 }
 0x634   :  { %9689 = vmatpush1.bf16.msra.mxu1 %v14286_v6  ;;  %9465 = vmatprep.subr.bf16.mxu0 %v14291_v18  ;;  %v14366_v6 = vld [vmem:[%s19392_s3 + $0x2e4] ss:$8 sps:$4 sm:$0xff]  }
 0x635   :  { %9690 = vmatprep.subr.bf16.mxu1 %v14291_v18  ;;  %v14364_v18 = vld [vmem:[%s19392_s3 + $0x2e0] ss:$8 sps:$4 sm:$0xff]  }
 0x637   :  { %9466 = vmatpush1.bf16.msra.mxu0 %v14289_v7 }
 0x638   :  { %9691 = vmatpush1.bf16.msra.mxu1 %v14289_v7  ;;  %9467 = vmatprep.subr.bf16.mxu0 %v14294_v26  ;;  %v14369_v7 = vld [vmem:[%s19392_s3 + $0x2f4] ss:$8 sps:$4 sm:$0xff]  }
 0x639   :  { %9692 = vmatprep.subr.bf16.mxu1 %v14294_v26  ;;  %v14367_v26 = vld [vmem:[%s19392_s3 + $0x2f0] ss:$8 sps:$4 sm:$0xff]  }
 0x63b   :  { %9468 = vmatpush1.bf16.msra.mxu0 %v14292_v20 }
 0x63c   :  { %9693 = vmatpush1.bf16.msra.mxu1 %v14292_v20  ;;  %9469 = vmatprep.subr.bf16.mxu0 %v14297_v47  ;;  %v14372_v20 = vld [vmem:[%s19392_s3 + $0x304] ss:$8 sps:$4 sm:$0xff]  }
 0x63d   :  { %9694 = vmatprep.subr.bf16.mxu1 %v14297_v47  ;;  %v14370_v47 = vld [vmem:[%s19392_s3 + $0x300] ss:$8 sps:$4 sm:$0xff]  }
 0x63f   :  { %9470 = vmatpush1.bf16.msra.mxu0 %v14295_v25 }
 0x640   :  { %9695 = vmatpush1.bf16.msra.mxu1 %v14295_v25  ;;  %9471 = vmatprep.subr.bf16.mxu0 %v14300_v22  ;;  %v14375_v25 = vld [vmem:[%s19392_s3 + $0x314] ss:$8 sps:$4 sm:$0xff]  }
 0x641   :  { %9696 = vmatprep.subr.bf16.mxu1 %v14300_v22  ;;  %v14373_v22 = vld [vmem:[%s19392_s3 + $0x310] ss:$8 sps:$4 sm:$0xff]  }
 0x643   :  { %9472 = vmatpush1.bf16.msra.mxu0 %v14298_v53 }
 0x644   :  { %9697 = vmatpush1.bf16.msra.mxu1 %v14298_v53  ;;  %9473 = vmatprep.subr.bf16.mxu0 %v14303_v57  ;;  %v14378_v53 = vld [vmem:[%s19392_s3 + $0x324] ss:$8 sps:$4 sm:$0xff]  }
 0x645   :  { %9698 = vmatprep.subr.bf16.mxu1 %v14303_v57  ;;  %v14376_v57 = vld [vmem:[%s19392_s3 + $0x320] ss:$8 sps:$4 sm:$0xff]  }
 0x647   :  { %9474 = vmatpush1.bf16.msra.mxu0 %v14301_v45 }
 0x648   :  { %9699 = vmatpush1.bf16.msra.mxu1 %v14301_v45  ;;  %9475 = vmatprep.subr.bf16.mxu0 %v14306_v58  ;;  %v14381_v45 = vld [vmem:[%s19392_s3 + $0x334] ss:$8 sps:$4 sm:$0xff]  }
 0x649   :  { %9700 = vmatprep.subr.bf16.mxu1 %v14306_v58  ;;  %v14379_v58 = vld [vmem:[%s19392_s3 + $0x330] ss:$8 sps:$4 sm:$0xff]  }
 0x64b   :  { %9476 = vmatpush1.bf16.msra.mxu0 %v14304_v63 }
 0x64c   :  { %9701 = vmatpush1.bf16.msra.mxu1 %v14304_v63  ;;  %9477 = vmatprep.subr.bf16.mxu0 %v14309_v11  ;;  %v14384_v63 = vld [vmem:[%s19392_s3 + $0x344] ss:$8 sps:$4 sm:$0xff]  }
 0x64d   :  { %9702 = vmatprep.subr.bf16.mxu1 %v14309_v11  ;;  %v14382_v11 = vld [vmem:[%s19392_s3 + $0x340] ss:$8 sps:$4 sm:$0xff]  }
 0x64f   :  { %9478 = vmatpush1.bf16.msra.mxu0 %v14307_v39 }
 0x650   :  { %9703 = vmatpush1.bf16.msra.mxu1 %v14307_v39  ;;  %9479 = vmatprep.subr.bf16.mxu0 %v14312_v41  ;;  %v14387_v39 = vld [vmem:[%s19392_s3 + $0x354] ss:$8 sps:$4 sm:$0xff]  }
 0x651   :  { %9704 = vmatprep.subr.bf16.mxu1 %v14312_v41  ;;  %v14385_v41 = vld [vmem:[%s19392_s3 + $0x350] ss:$8 sps:$4 sm:$0xff]  }
 0x653   :  { %9480 = vmatpush1.bf16.msra.mxu0 %v14310_v3 }
 0x654   :  { %9705 = vmatpush1.bf16.msra.mxu1 %v14310_v3  ;;  %9481 = vmatprep.subr.bf16.mxu0 %v14315_v12  ;;  %v14390_v3 = vld [vmem:[%s19392_s3 + $0x364] ss:$8 sps:$4 sm:$0xff]  }
 0x655   :  { %9706 = vmatprep.subr.bf16.mxu1 %v14315_v12 }
 0x657   :  { %9482 = vmatpush1.bf16.msra.mxu0 %v14313_v14 }
 0x658   :  { %9707 = vmatpush1.bf16.msra.mxu1 %v14313_v14  ;;  %9483 = vmatprep.subr.bf16.mxu0 %v14318_v50 }
 0x659   :  { %9708 = vmatprep.subr.bf16.mxu1 %v14318_v50 }
 0x65b   :  { %9484 = vmatpush1.bf16.msra.mxu0 %v14316_v5 }
 0x65c   :  { %9709 = vmatpush1.bf16.msra.mxu1 %v14316_v5  ;;  %9485 = vmatprep.subr.bf16.mxu0 %v14321_v8 }
 0x65d   :  { %9710 = vmatprep.subr.bf16.mxu1 %v14321_v8 }
 0x65f   :  { %9486 = vmatpush1.bf16.msra.mxu0 %v14319_v27 }
 0x660   :  { %9711 = vmatpush1.bf16.msra.mxu1 %v14319_v27  ;;  %9498 = vmatprep.subr.bf16.mxu0 %v14324_v15 }
 0x661   :  { %9723 = vmatprep.subr.bf16.mxu1 %v14324_v15  ;;  %v14388_v15 = vld [vmem:[%s19392_s3 + $0x360] ss:$8 sps:$4 sm:$0xff]  }
 0x662   :  { %9488 = vmatmul.mubr.bf16.vlgmr.msra.gmra.mrb[104].mxu0 %v19431_v32  ;;  %v14328_v32 = vld [vmem:[%s19392_s3 + $0x220] ss:$8 sps:$4 sm:$0xff]  }
 0x663   :  { %9713 = vmatmul.mubr.bf16.vlgmr.msra.gmra.mrb[104].mxu1 %v19433_v1  ;;  %9499 = vmatpush1.bf16.msra.mxu0 %v14322_v46 }
 0x664   :  { %9530 = vmatprep.mubr.bf16.mxu0 %v19432_v51  ;;  %9724 = vmatpush1.bf16.msra.mxu1 %v14322_v46 }
 0x665   :  { %9755 = vmatprep.mubr.bf16.mxu1 %v16965_v17  ;;  %9500 = vmatprep.subr.bf16.mxu0 %v14327_v23 }
 0x666   :  { %9725 = vmatprep.subr.bf16.mxu1 %v14327_v23 }
 0x667   :  { %9501 = vmatpush1.bf16.msra.mxu0 %v14325_v54 }
 0x668   :  { %9726 = vmatpush1.bf16.msra.mxu1 %v14325_v54  ;;  %9502 = vmatprep.subr.bf16.mxu0 %v14330_v16 }
 0x669   :  { %9727 = vmatprep.subr.bf16.mxu1 %v14330_v16  ;;  %v14393_v16 = vld [vmem:[%s19392_s3 + $0x374] ss:$8 sps:$4 sm:$0xff]  }
 0x66b   :  { %9503 = vmatpush1.bf16.msra.mxu0 %v14328_v32 }
 0x66c   :  { %9728 = vmatpush1.bf16.msra.mxu1 %v14328_v32  ;;  %9504 = vmatprep.subr.bf16.mxu0 %v14333_v52  ;;  %v12828_v32 = vld [vmem:[%s19393_s4] ss:$0 sm:$0xff] }
 0x66d   :  { %9729 = vmatprep.subr.bf16.mxu1 %v14333_v52 }
 0x66f   :  { %9505 = vmatpush1.bf16.msra.mxu0 %v14331_v49 }
 0x670   :  { %9730 = vmatpush1.bf16.msra.mxu1 %v14331_v49  ;;  %9506 = vmatprep.subr.bf16.mxu0 %v14336_v40 }
 0x671   :  { %9731 = vmatprep.subr.bf16.mxu1 %v14336_v40 }
 0x673   :  { %9507 = vmatpush1.bf16.msra.mxu0 %v14334_v60 }
 0x674   :  { %9732 = vmatpush1.bf16.msra.mxu1 %v14334_v60  ;;  %9508 = vmatprep.subr.bf16.mxu0 %v14339_v59 }
 0x675   :  { %9733 = vmatprep.subr.bf16.mxu1 %v14339_v59  ;;  %v14391_v59 = vld [vmem:[%s19392_s3 + $0x370] ss:$8 sps:$4 sm:$0xff]  }
 0x677   :  { %9509 = vmatpush1.bf16.msra.mxu0 %v14337_v9 }
 0x678   :  { %9734 = vmatpush1.bf16.msra.mxu1 %v14337_v9  ;;  %9510 = vmatprep.subr.bf16.mxu0 %v14342_v10 }
 0x679   :  { %9735 = vmatprep.subr.bf16.mxu1 %v14342_v10 }
 0x67b   :  { %9511 = vmatpush1.bf16.msra.mxu0 %v14340_v37 }
 0x67c   :  { %9736 = vmatpush1.bf16.msra.mxu1 %v14340_v37  ;;  %9512 = vmatprep.subr.bf16.mxu0 %v14345_v33  ;;  %v14396_v37 = vld [vmem:[%s19392_s3 + $0x384] ss:$8 sps:$4 sm:$0xff]  }
 0x67d   :  { %9737 = vmatprep.subr.bf16.mxu1 %v14345_v33 }
 0x67f   :  { %9513 = vmatpush1.bf16.msra.mxu0 %v14343_v43 }
 0x680   :  { %9738 = vmatpush1.bf16.msra.mxu1 %v14343_v43  ;;  %9514 = vmatprep.subr.bf16.mxu0 %v14348_v61  ;;  %v14394_v43 = vld [vmem:[%s19392_s3 + $0x380] ss:$8 sps:$4 sm:$0xff]  }
 0x681   :  { %9739 = vmatprep.subr.bf16.mxu1 %v14348_v61 }
 0x683   :  { %9515 = vmatpush1.bf16.msra.mxu0 %v14346_v31 }
 0x684   :  { %9740 = vmatpush1.bf16.msra.mxu1 %v14346_v31  ;;  %9516 = vmatprep.subr.bf16.mxu0 %v14351_v21 }
 0x685   :  { %9741 = vmatprep.subr.bf16.mxu1 %v14351_v21  ;;  %v14399_v21 = vld [vmem:[%s19392_s3 + $0x394] ss:$8 sps:$4 sm:$0xff]  }
 0x687   :  { %9517 = vmatpush1.bf16.msra.mxu0 %v14349_v13 }
 0x688   :  { %9742 = vmatpush1.bf16.msra.mxu1 %v14349_v13  ;;  %9518 = vmatprep.subr.bf16.mxu0 %v14354_v44 }
 0x689   :  { %9743 = vmatprep.subr.bf16.mxu1 %v14354_v44  ;;  %v14397_v44 = vld [vmem:[%s19392_s3 + $0x390] ss:$8 sps:$4 sm:$0xff]  }
 0x68b   :  { %9519 = vmatpush1.bf16.msra.mxu0 %v14352_v0 }
 0x68c   :  { %9744 = vmatpush1.bf16.msra.mxu1 %v14352_v0  ;;  %9520 = vmatprep.subr.bf16.mxu0 %v14357_v56  ;;  %v14402_v0 = vld [vmem:[%s19392_s3 + $0x3a4] ss:$8 sps:$4 sm:$0xff]  }
 0x68d   :  { %9745 = vmatprep.subr.bf16.mxu1 %v14357_v56  ;;  %v14400_v56 = vld [vmem:[%s19392_s3 + $0x3a0] ss:$8 sps:$4 sm:$0xff]  }
 0x68f   :  { %9521 = vmatpush1.bf16.msra.mxu0 %v14355_v42 }
 0x690   :  { %9746 = vmatpush1.bf16.msra.mxu1 %v14355_v42  ;;  %9522 = vmatprep.subr.bf16.mxu0 %v14360_v62  ;;  %v14405_v42 = vld [vmem:[%s19392_s3 + $0x3b4] ss:$8 sps:$4 sm:$0xff]  }
 0x691   :  { %9747 = vmatprep.subr.bf16.mxu1 %v14360_v62  ;;  %v14403_v62 = vld [vmem:[%s19392_s3 + $0x3b0] ss:$8 sps:$4 sm:$0xff]  }
 0x693   :  { %9523 = vmatpush1.bf16.msra.mxu0 %v14358_v55 }
 0x694   :  { %9748 = vmatpush1.bf16.msra.mxu1 %v14358_v55  ;;  %9524 = vmatprep.subr.bf16.mxu0 %v14363_v28  ;;  %v14408_v55 = vld [vmem:[%s19392_s3 + $0x3c4] ss:$8 sps:$4 sm:$0xff]  }
 0x695   :  { %9749 = vmatprep.subr.bf16.mxu1 %v14363_v28  ;;  %v14406_v28 = vld [vmem:[%s19392_s3 + $0x3c0] ss:$8 sps:$4 sm:$0xff]  }
 0x697   :  { %9525 = vmatpush1.bf16.msra.mxu0 %v14361_v35 }
 0x698   :  { %9750 = vmatpush1.bf16.msra.mxu1 %v14361_v35  ;;  %9526 = vmatprep.subr.bf16.mxu0 %v14366_v6  ;;  %v14411_v35 = vld [vmem:[%s19392_s3 + $0x3d4] ss:$8 sps:$4 sm:$0xff]  }
 0x699   :  { %9751 = vmatprep.subr.bf16.mxu1 %v14366_v6  ;;  %v14409_v6 = vld [vmem:[%s19392_s3 + $0x3d0] ss:$8 sps:$4 sm:$0xff]  }
 0x69b   :  { %9527 = vmatpush1.bf16.msra.mxu0 %v14364_v18 }
 0x69c   :  { %9752 = vmatpush1.bf16.msra.mxu1 %v14364_v18  ;;  %9528 = vmatprep.subr.bf16.mxu0 %v14369_v7  ;;  %v14414_v18 = vld [vmem:[%s19392_s3 + $0x3e4] ss:$8 sps:$4 sm:$0xff]  }
 0x69d   :  { %9753 = vmatprep.subr.bf16.mxu1 %v14369_v7  ;;  %v14412_v7 = vld [vmem:[%s19392_s3 + $0x3e0] ss:$8 sps:$4 sm:$0xff]  }
 0x69f   :  { %9529 = vmatpush1.bf16.msra.mxu0 %v14367_v26 }
 0x6a0   :  { %9754 = vmatpush1.bf16.msra.mxu1 %v14367_v26  ;;  %9541 = vmatprep.subr.bf16.mxu0 %v14372_v20  ;;  %v14417_v26 = vld [vmem:[%s19392_s3 + $0x3f4] ss:$8 sps:$4 sm:$0xff]  }
 0x6a1   :  { %9766 = vmatprep.subr.bf16.mxu1 %v14372_v20  ;;  %v14415_v20 = vld [vmem:[%s19392_s3 + $0x3f0] ss:$8 sps:$4 sm:$0xff]  }
 0x6a2   :  { %9531 = vmatmul.mubr.bf16.vlgmr.msra.gmra.mrb[104].mxu0 %v19433_v1 }
 0x6a3   :  { %9756 = vmatmul.mubr.bf16.vlgmr.msra.gmra.mrb[104].mxu1 %v16961_v38  ;;  %9542 = vmatpush1.bf16.msra.mxu0 %v14370_v47 }
 0x6a4   :  { %9573 = vmatprep.mubr.bf16.mxu0 %v16965_v17  ;;  %9767 = vmatpush1.bf16.msra.mxu1 %v14370_v47  ;;  %v14420_v47 = vld [vmem:[%s19392_s3 + $0x404] ss:$8 sps:$4 sm:$0xff]  }
 0x6a5   :  { %9798 = vmatprep.mubr.bf16.mxu1 %v17110_v29  ;;  %9543 = vmatprep.subr.bf16.mxu0 %v14375_v25 }
 0x6a6   :  { %9768 = vmatprep.subr.bf16.mxu1 %v14375_v25  ;;  %v14418_v25 = vld [vmem:[%s19392_s3 + $0x400] ss:$8 sps:$4 sm:$0xff]  }
 0x6a7   :  { %9544 = vmatpush1.bf16.msra.mxu0 %v14373_v22 }
 0x6a8   :  { %9769 = vmatpush1.bf16.msra.mxu1 %v14373_v22  ;;  %9545 = vmatprep.subr.bf16.mxu0 %v14378_v53  ;;  %v14423_v22 = vld [vmem:[%s19392_s3 + $0x414] ss:$8 sps:$4 sm:$0xff]  }
 0x6a9   :  { %9770 = vmatprep.subr.bf16.mxu1 %v14378_v53  ;;  %v14421_v53 = vld [vmem:[%s19392_s3 + $0x410] ss:$8 sps:$4 sm:$0xff]  }
 0x6ab   :  { %9546 = vmatpush1.bf16.msra.mxu0 %v14376_v57 }
 0x6ac   :  { %9771 = vmatpush1.bf16.msra.mxu1 %v14376_v57  ;;  %9547 = vmatprep.subr.bf16.mxu0 %v14381_v45  ;;  %v14426_v57 = vld [vmem:[%s19392_s3 + $0x424] ss:$8 sps:$4 sm:$0xff]  }
 0x6ad   :  { %9772 = vmatprep.subr.bf16.mxu1 %v14381_v45  ;;  %v14424_v45 = vld [vmem:[%s19392_s3 + $0x420] ss:$8 sps:$4 sm:$0xff]  }
 0x6af   :  { %9548 = vmatpush1.bf16.msra.mxu0 %v14379_v58 }
 0x6b0   :  { %9773 = vmatpush1.bf16.msra.mxu1 %v14379_v58  ;;  %9549 = vmatprep.subr.bf16.mxu0 %v14384_v63  ;;  %v14429_v58 = vld [vmem:[%s19392_s3 + $0x434] ss:$8 sps:$4 sm:$0xff]  }
 0x6b1   :  { %9774 = vmatprep.subr.bf16.mxu1 %v14384_v63  ;;  %v14427_v63 = vld [vmem:[%s19392_s3 + $0x430] ss:$8 sps:$4 sm:$0xff]  }
 0x6b3   :  { %9550 = vmatpush1.bf16.msra.mxu0 %v14382_v11 }
 0x6b4   :  { %9775 = vmatpush1.bf16.msra.mxu1 %v14382_v11  ;;  %9551 = vmatprep.subr.bf16.mxu0 %v14387_v39  ;;  %v14432_v11 = vld [vmem:[%s19392_s3 + $0x444] ss:$8 sps:$4 sm:$0xff]  }
 0x6b5   :  { %v8189_v12 = vpop.f32.mrb[100].mxu0  ;;  %9776 = vmatprep.subr.bf16.mxu1 %v14387_v39  ;;  %v14430_v39 = vld [vmem:[%s19392_s3 + $0x440] ss:$8 sps:$4 sm:$0xff]  }
 0x6b6   :  { %v8414_v14 = vpop.f32.mrb[100].mxu1  ;;  %v8191_v50 = vpop.f32.mrb[101].mxu0 }
 0x6b7   :  { %v8423_v5 = vmax.f32 %v8189_v12, %v8414_v14  ;;  %v8416_v8 = vpop.f32.mrb[101].mxu1  ;;  %v8193_v27 = vpop.f32.mrb[102].mxu0  ;;  %9552 = vmatpush1.bf16.msra.mxu0 %v14385_v41  ;;  %v14438_v12 = vld [vmem:[%s19392_s3 + $0x464] ss:$8 sps:$4 sm:$0xff]   ;;  %v14436_v14 = vld [vmem:[%s19392_s3 + $0x460] ss:$8 sps:$4 sm:$0xff]  }
 0x6b8   :  { %v8424_v46 = vmax.f32 %v8191_v50, %v8416_v8  ;;  %v8418_v23 = vpop.f32.mrb[102].mxu1  ;;  %9777 = vmatpush1.bf16.msra.mxu1 %v14385_v41  ;;  %v8195_v54 = vpop.f32.mrb[103].mxu0  ;;  %9553 = vmatprep.subr.bf16.mxu0 %v14390_v3  ;;  %v14435_v41 = vld [vmem:[%s19392_s3 + $0x454] ss:$8 sps:$4 sm:$0xff]   ;;  %v14444_v8 = vld [vmem:[%s19392_s3 + $0x484] ss:$8 sps:$4 sm:$0xff]  }
 0x6b9   :  { %v8425_v52 = vmax.f32 %v8193_v27, %v8418_v23  ;;  %v8420_v49 = vpop.f32.mrb[103].mxu1  ;;  %9778 = vmatprep.subr.bf16.mxu1 %v14390_v3  ;;  %v14433_v3 = vld [vmem:[%s19392_s3 + $0x450] ss:$8 sps:$4 sm:$0xff]   ;;  %v14441_v50 = vld [vmem:[%s19392_s3 + $0x474] ss:$8 sps:$4 sm:$0xff]  }
 0x6ba   :  { %v8427_v40 = vmax.f32 %v8423_v5, %v8424_v46  ;;  %v8426_v60 = vmax.f32 %v8195_v54, %v8420_v49  ;;  %v14439_v5 = vld [vmem:[%s19392_s3 + $0x470] ss:$8 sps:$4 sm:$0xff]   ;;  %v14442_v27 = vld [vmem:[%s19392_s3 + $0x480] ss:$8 sps:$4 sm:$0xff]   ;;  %v14450_v23 = vld [vmem:[%s19392_s3 + $0x4a4] ss:$8 sps:$4 sm:$0xff]  }
 0x6bb   :  { %9554 = vmatpush1.bf16.msra.mxu0 %v14388_v15  ;;  %v14445_v46 = vld [vmem:[%s19392_s3 + $0x490] ss:$8 sps:$4 sm:$0xff]   ;;  %v14448_v54 = vld [vmem:[%s19392_s3 + $0x4a0] ss:$8 sps:$4 sm:$0xff]  }
 0x6bc   :  { %v8436_v9 = vadd.f32 %v12828_v32, %v8427_v40  ;;  %v8428_v10 = vmax.f32 %v8425_v52, %v8426_v60  ;;  %9779 = vmatpush1.bf16.msra.mxu1 %v14388_v15  ;;  %9555 = vmatprep.subr.bf16.mxu0 %v14393_v16  ;;  %v14447_v15 = vld [vmem:[%s19392_s3 + $0x494] ss:$8 sps:$4 sm:$0xff]   ;;  %v14456_v52 = vld [vmem:[%s19392_s3 + $0x4c4] ss:$8 sps:$4 sm:$0xff]   ;;  %v14454_v49 = vld [vmem:[%s19392_s3 + $0x4c0] ss:$8 sps:$4 sm:$0xff]  }
 0x6bd   :  { %9780 = vmatprep.subr.bf16.mxu1 %v14393_v16  ;;  %v14453_v16 = vld [vmem:[%s19392_s3 + $0x4b4] ss:$8 sps:$4 sm:$0xff]   ;;  %v14457_v60 = vld [vmem:[%s19392_s3 + $0x4d0] ss:$8 sps:$4 sm:$0xff]  }
 0x6be   :  { %v8437_v33 = vadd.f32 %v12828_v32, %v8428_v10  ;;  %v8438_v61 = vmax.f32 %v8436_v9, 0.0  ;;  %v14451_v32 = vld [vmem:[%s19392_s3 + $0x4b0] ss:$8 sps:$4 sm:$0xff]   ;;  %v14459_v40 = vld [vmem:[%s19392_s3 + $0x4d4] ss:$8 sps:$4 sm:$0xff]  }
 0x6bf   :  { %9556 = vmatpush1.bf16.msra.mxu0 %v14391_v59  ;;  %v14460_v9 = vld [vmem:[%s19392_s3 + $0x4e0] ss:$8 sps:$4 sm:$0xff]   ;;  %v14465_v10 = vld [vmem:[%s19392_s3 + $0x4f4] ss:$8 sps:$4 sm:$0xff]  }
 0x6c0   :  { %v8439_v31 = vmax.f32 %v8437_v33, 0.0  ;;  %9781 = vmatpush1.bf16.msra.mxu1 %v14391_v59  ;;  %9557 = vmatprep.subr.bf16.mxu0 %v14396_v37  ;;  %v14462_v59 = vld [vmem:[%s19392_s3 + $0x4e4] ss:$8 sps:$4 sm:$0xff]  }
 0x6c1   :  { %9782 = vmatprep.subr.bf16.mxu1 %v14396_v37  ;;  %v14463_v37 = vld [vmem:[%s19392_s3 + $0x4f0] ss:$8 sps:$4 sm:$0xff]   ;;  %v14468_v33 = vld [vmem:[%s19392_s3 + $0x4] ss:$8 sps:$4 sm:$0xff]  }
 0x6c2   :  { %v18555_v13 = vpack.c.bf16 %v8439_v31, %v8438_v61  ;;  %v14471_v61 = vld [vmem:[%s19392_s3 + $0x14] ss:$8 sps:$4 sm:$0xff]   ;;  %v14469_v31 = vld [vmem:[%s19392_s3 + $0x10] ss:$8 sps:$4 sm:$0xff]  }
 0x6c3   :  { %9558 = vmatpush1.bf16.msra.mxu0 %v14394_v43 }
 0x6c4   :  { %9783 = vmatpush1.bf16.msra.mxu1 %v14394_v43  ;;  %9559 = vmatprep.subr.bf16.mxu0 %v14399_v21  ;;  %v14466_v43 = vld [vmem:[%s19392_s3] ss:$8 sps:$4 sm:$0xff]  }
 0x6c5   :  { %9784 = vmatprep.subr.bf16.mxu1 %v14399_v21  ;;  %v14474_v21 = vld [vmem:[%s19392_s3 + $0x24] ss:$8 sps:$4 sm:$0xff]  }
 0x6c7   :  { %9560 = vmatpush1.bf16.msra.mxu0 %v14397_v44 }
 0x6c8   :  { %9785 = vmatpush1.bf16.msra.mxu1 %v14397_v44  ;;  %9561 = vmatprep.subr.bf16.mxu0 %v14402_v0  ;;  %v14472_v44 = vld [vmem:[%s19392_s3 + $0x20] ss:$8 sps:$4 sm:$0xff]  }
 0x6c9   :  { %9786 = vmatprep.subr.bf16.mxu1 %v14402_v0  ;;  %v14475_v0 = vld [vmem:[%s19392_s3 + $0x30] ss:$8 sps:$4 sm:$0xff]  }
 0x6cb   :  { %9562 = vmatpush1.bf16.msra.mxu0 %v14400_v56 }
 0x6cc   :  { %9787 = vmatpush1.bf16.msra.mxu1 %v14400_v56  ;;  %9563 = vmatprep.subr.bf16.mxu0 %v14405_v42  ;;  %v14480_v56 = vld [vmem:[%s19392_s3 + $0x44] ss:$8 sps:$4 sm:$0xff]  }
 0x6cd   :  { %9788 = vmatprep.subr.bf16.mxu1 %v14405_v42  ;;  %v14478_v42 = vld [vmem:[%s19392_s3 + $0x40] ss:$8 sps:$4 sm:$0xff]  }
 0x6cf   :  { %9564 = vmatpush1.bf16.msra.mxu0 %v14403_v62 }
 0x6d0   :  { %9789 = vmatpush1.bf16.msra.mxu1 %v14403_v62  ;;  %9565 = vmatprep.subr.bf16.mxu0 %v14408_v55  ;;  %v14483_v62 = vld [vmem:[%s19392_s3 + $0x54] ss:$8 sps:$4 sm:$0xff]  }
 0x6d1   :  { %9790 = vmatprep.subr.bf16.mxu1 %v14408_v55  ;;  %v14481_v55 = vld [vmem:[%s19392_s3 + $0x50] ss:$8 sps:$4 sm:$0xff]  }
 0x6d3   :  { %9566 = vmatpush1.bf16.msra.mxu0 %v14406_v28 }
 0x6d4   :  { %9791 = vmatpush1.bf16.msra.mxu1 %v14406_v28  ;;  %9567 = vmatprep.subr.bf16.mxu0 %v14411_v35  ;;  %v14486_v28 = vld [vmem:[%s19392_s3 + $0x64] ss:$8 sps:$4 sm:$0xff]  }
 0x6d5   :  { %9792 = vmatprep.subr.bf16.mxu1 %v14411_v35  ;;  %v14484_v35 = vld [vmem:[%s19392_s3 + $0x60] ss:$8 sps:$4 sm:$0xff]  }
 0x6d7   :  { %9568 = vmatpush1.bf16.msra.mxu0 %v14409_v6 }
 0x6d8   :  { %9793 = vmatpush1.bf16.msra.mxu1 %v14409_v6  ;;  %9569 = vmatprep.subr.bf16.mxu0 %v14414_v18  ;;  %v14489_v6 = vld [vmem:[%s19392_s3 + $0x74] ss:$8 sps:$4 sm:$0xff]  }
 0x6d9   :  { %9794 = vmatprep.subr.bf16.mxu1 %v14414_v18  ;;  %v14487_v18 = vld [vmem:[%s19392_s3 + $0x70] ss:$8 sps:$4 sm:$0xff]  }
 0x6db   :  { %9570 = vmatpush1.bf16.msra.mxu0 %v14412_v7 }
 0x6dc   :  { %9795 = vmatpush1.bf16.msra.mxu1 %v14412_v7  ;;  %9571 = vmatprep.subr.bf16.mxu0 %v14417_v26  ;;  %v14492_v7 = vld [vmem:[%s19392_s3 + $0x84] ss:$8 sps:$4 sm:$0xff]  }
 0x6dd   :  { %9796 = vmatprep.subr.bf16.mxu1 %v14417_v26  ;;  %v14490_v26 = vld [vmem:[%s19392_s3 + $0x80] ss:$8 sps:$4 sm:$0xff]  }
 0x6df   :  { %9572 = vmatpush1.bf16.msra.mxu0 %v14415_v20 }
 0x6e0   :  { %9797 = vmatpush1.bf16.msra.mxu1 %v14415_v20  ;;  %9584 = vmatprep.subr.bf16.mxu0 %v14420_v47  ;;  %v14495_v20 = vld [vmem:[%s19392_s3 + $0x94] ss:$8 sps:$4 sm:$0xff]  }
 0x6e1   :  { %9809 = vmatprep.subr.bf16.mxu1 %v14420_v47  ;;  %v14493_v47 = vld [vmem:[%s19392_s3 + $0x90] ss:$8 sps:$4 sm:$0xff]  }
 0x6e2   :  { %9574 = vmatmul.mubr.bf16.vlgmr.msra.gmra.mrb[104].mxu0 %v16961_v38 }
 0x6e3   :  { %9799 = vmatmul.mubr.bf16.vlgmr.msra.gmra.mrb[104].mxu1 %v17105_v36  ;;  %9585 = vmatpush1.bf16.msra.mxu0 %v14418_v25 }
 0x6e4   :  { %9616 = vmatprep.mubr.bf16.mxu0 %v17110_v29  ;;  %9810 = vmatpush1.bf16.msra.mxu1 %v14418_v25  ;;  %v14498_v25 = vld [vmem:[%s19392_s3 + $0xa4] ss:$8 sps:$4 sm:$0xff]  }
 0x6e5   :  { %9841 = vmatprep.mubr.bf16.mxu1 %v17258_v34  ;;  %9586 = vmatprep.subr.bf16.mxu0 %v14423_v22 }
 0x6e6   :  { %9811 = vmatprep.subr.bf16.mxu1 %v14423_v22  ;;  %v14496_v22 = vld [vmem:[%s19392_s3 + $0xa0] ss:$8 sps:$4 sm:$0xff]  }
 0x6e7   :  { %9587 = vmatpush1.bf16.msra.mxu0 %v14421_v53 }
 0x6e8   :  { %9812 = vmatpush1.bf16.msra.mxu1 %v14421_v53  ;;  %9588 = vmatprep.subr.bf16.mxu0 %v14426_v57  ;;  %v14501_v53 = vld [vmem:[%s19392_s3 + $0xb4] ss:$8 sps:$4 sm:$0xff]  }
 0x6e9   :  { %9813 = vmatprep.subr.bf16.mxu1 %v14426_v57  ;;  %v14499_v57 = vld [vmem:[%s19392_s3 + $0xb0] ss:$8 sps:$4 sm:$0xff]  }
 0x6eb   :  { %9589 = vmatpush1.bf16.msra.mxu0 %v14424_v45 }
 0x6ec   :  { %9814 = vmatpush1.bf16.msra.mxu1 %v14424_v45  ;;  %9590 = vmatprep.subr.bf16.mxu0 %v14429_v58  ;;  %v14504_v45 = vld [vmem:[%s19392_s3 + $0xc4] ss:$8 sps:$4 sm:$0xff]  }
 0x6ed   :  { %9815 = vmatprep.subr.bf16.mxu1 %v14429_v58  ;;  %v14502_v58 = vld [vmem:[%s19392_s3 + $0xc0] ss:$8 sps:$4 sm:$0xff]  }
 0x6ef   :  { %9591 = vmatpush1.bf16.msra.mxu0 %v14427_v63 }
 0x6f0   :  { %9816 = vmatpush1.bf16.msra.mxu1 %v14427_v63  ;;  %9592 = vmatprep.subr.bf16.mxu0 %v14432_v11  ;;  %v14507_v63 = vld [vmem:[%s19392_s3 + $0xd4] ss:$8 sps:$4 sm:$0xff]  }
 0x6f1   :  { %9817 = vmatprep.subr.bf16.mxu1 %v14432_v11  ;;  %v14505_v11 = vld [vmem:[%s19392_s3 + $0xd0] ss:$8 sps:$4 sm:$0xff]  }
 0x6f3   :  { %9593 = vmatpush1.bf16.msra.mxu0 %v14430_v39 }
 0x6f4   :  { %9818 = vmatpush1.bf16.msra.mxu1 %v14430_v39  ;;  %9594 = vmatprep.subr.bf16.mxu0 %v14435_v41  ;;  %v14510_v39 = vld [vmem:[%s19392_s3 + $0xe4] ss:$8 sps:$4 sm:$0xff]  }
 0x6f5   :  { %9819 = vmatprep.subr.bf16.mxu1 %v14435_v41  ;;  %v14508_v41 = vld [vmem:[%s19392_s3 + $0xe0] ss:$8 sps:$4 sm:$0xff]  }
 0x6f7   :  { %9595 = vmatpush1.bf16.msra.mxu0 %v14433_v3 }
 0x6f8   :  { %9820 = vmatpush1.bf16.msra.mxu1 %v14433_v3  ;;  %9596 = vmatprep.subr.bf16.mxu0 %v14438_v12  ;;  %v14513_v3 = vld [vmem:[%s19392_s3 + $0xf4] ss:$8 sps:$4 sm:$0xff]  }
 0x6f9   :  { %9821 = vmatprep.subr.bf16.mxu1 %v14438_v12  ;;  %v14511_v12 = vld [vmem:[%s19392_s3 + $0xf0] ss:$8 sps:$4 sm:$0xff]  }
 0x6fb   :  { %9597 = vmatpush1.bf16.msra.mxu0 %v14436_v14 }
 0x6fc   :  { %9822 = vmatpush1.bf16.msra.mxu1 %v14436_v14  ;;  %9598 = vmatprep.subr.bf16.mxu0 %v14441_v50  ;;  %v14516_v14 = vld [vmem:[%s19392_s3 + $0x104] ss:$8 sps:$4 sm:$0xff]  }
 0x6fd   :  { %9823 = vmatprep.subr.bf16.mxu1 %v14441_v50  ;;  %v14514_v50 = vld [vmem:[%s19392_s3 + $0x100] ss:$8 sps:$4 sm:$0xff]  }
 0x6ff   :  { %9599 = vmatpush1.bf16.msra.mxu0 %v14439_v5 }
 0x700   :  { %9824 = vmatpush1.bf16.msra.mxu1 %v14439_v5  ;;  %9600 = vmatprep.subr.bf16.mxu0 %v14444_v8  ;;  %v14519_v5 = vld [vmem:[%s19392_s3 + $0x114] ss:$8 sps:$4 sm:$0xff]  }
 0x701   :  { %9825 = vmatprep.subr.bf16.mxu1 %v14444_v8  ;;  %v14517_v8 = vld [vmem:[%s19392_s3 + $0x110] ss:$8 sps:$4 sm:$0xff]  }
 0x703   :  { %9601 = vmatpush1.bf16.msra.mxu0 %v14442_v27 }
 0x704   :  { %9826 = vmatpush1.bf16.msra.mxu1 %v14442_v27  ;;  %9602 = vmatprep.subr.bf16.mxu0 %v14447_v15  ;;  %v14522_v27 = vld [vmem:[%s19392_s3 + $0x124] ss:$8 sps:$4 sm:$0xff]  }
 0x705   :  { %9827 = vmatprep.subr.bf16.mxu1 %v14447_v15  ;;  %v14523_v15 = vld [vmem:[%s19392_s3 + $0x130] ss:$8 sps:$4 sm:$0xff]  }
 0x707   :  { %9603 = vmatpush1.bf16.msra.mxu0 %v14445_v46 }
 0x708   :  { %9828 = vmatpush1.bf16.msra.mxu1 %v14445_v46  ;;  %9604 = vmatprep.subr.bf16.mxu0 %v14450_v23  ;;  %v14528_v46 = vld [vmem:[%s19392_s3 + $0x144] ss:$8 sps:$4 sm:$0xff]  }
 0x709   :  { %9829 = vmatprep.subr.bf16.mxu1 %v14450_v23  ;;  %v14526_v23 = vld [vmem:[%s19392_s3 + $0x140] ss:$8 sps:$4 sm:$0xff]  }
 0x70b   :  { %9605 = vmatpush1.bf16.msra.mxu0 %v14448_v54 }
 0x70c   :  { %9830 = vmatpush1.bf16.msra.mxu1 %v14448_v54  ;;  %9606 = vmatprep.subr.bf16.mxu0 %v14453_v16  ;;  %v14531_v54 = vld [vmem:[%s19392_s3 + $0x154] ss:$8 sps:$4 sm:$0xff]  }
 0x70d   :  { %9831 = vmatprep.subr.bf16.mxu1 %v14453_v16  ;;  %v14529_v16 = vld [vmem:[%s19392_s3 + $0x150] ss:$8 sps:$4 sm:$0xff]  }
 0x70f   :  { %9607 = vmatpush1.bf16.msra.mxu0 %v14451_v32 }
 0x710   :  { %9832 = vmatpush1.bf16.msra.mxu1 %v14451_v32  ;;  %9608 = vmatprep.subr.bf16.mxu0 %v14456_v52  ;;  %v14534_v32 = vld [vmem:[%s19392_s3 + $0x164] ss:$8 sps:$4 sm:$0xff]  }
 0x711   :  { %9833 = vmatprep.subr.bf16.mxu1 %v14456_v52  ;;  %v14532_v52 = vld [vmem:[%s19392_s3 + $0x160] ss:$8 sps:$4 sm:$0xff]  }
 0x713   :  { %9609 = vmatpush1.bf16.msra.mxu0 %v14454_v49 }
 0x714   :  { %9834 = vmatpush1.bf16.msra.mxu1 %v14454_v49  ;;  %9610 = vmatprep.subr.bf16.mxu0 %v14459_v40  ;;  %v14537_v49 = vld [vmem:[%s19392_s3 + $0x174] ss:$8 sps:$4 sm:$0xff]  }
 0x715   :  { %9835 = vmatprep.subr.bf16.mxu1 %v14459_v40  ;;  %v14535_v40 = vld [vmem:[%s19392_s3 + $0x170] ss:$8 sps:$4 sm:$0xff]  }
 0x717   :  { %9611 = vmatpush1.bf16.msra.mxu0 %v14457_v60 }
 0x718   :  { %9836 = vmatpush1.bf16.msra.mxu1 %v14457_v60  ;;  %9612 = vmatprep.subr.bf16.mxu0 %v14462_v59  ;;  %v14540_v60 = vld [vmem:[%s19392_s3 + $0x184] ss:$8 sps:$4 sm:$0xff]  }
 0x719   :  { %9837 = vmatprep.subr.bf16.mxu1 %v14462_v59  ;;  %v14538_v59 = vld [vmem:[%s19392_s3 + $0x180] ss:$8 sps:$4 sm:$0xff]  }
 0x71b   :  { %9613 = vmatpush1.bf16.msra.mxu0 %v14460_v9 }
 0x71c   :  { %9838 = vmatpush1.bf16.msra.mxu1 %v14460_v9  ;;  %9614 = vmatprep.subr.bf16.mxu0 %v14465_v10  ;;  %v14543_v9 = vld [vmem:[%s19392_s3 + $0x194] ss:$8 sps:$4 sm:$0xff]  }
 0x71d   :  { %9839 = vmatprep.subr.bf16.mxu1 %v14465_v10  ;;  %v14541_v10 = vld [vmem:[%s19392_s3 + $0x190] ss:$8 sps:$4 sm:$0xff]  }
 0x71f   :  { %9615 = vmatpush1.bf16.msra.mxu0 %v14463_v37 }
 0x720   :  { %9840 = vmatpush1.bf16.msra.mxu1 %v14463_v37  ;;  %10841 = vmatprep.subr.bf16.mxu0 %v14468_v33  ;;  %v14546_v37 = vld [vmem:[%s19392_s3 + $0x1a4] ss:$8 sps:$4 sm:$0xff]  }
 0x721   :  { %11066 = vmatprep.subr.bf16.mxu1 %v14468_v33  ;;  %v14544_v33 = vld [vmem:[%s19392_s3 + $0x1a0] ss:$8 sps:$4 sm:$0xff]  }
 0x722   :  { %9617 = vmatmul.mubr.bf16.vlgmr.msra.gmra.mrb[104].mxu0 %v17105_v36 }
 0x723   :  { %9842 = vmatmul.mubr.bf16.vlgmr.msra.gmra.mrb[104].mxu1 %v17250_v48  ;;  %10842 = vmatpush1.bf16.msra.mxu0 %v14466_v43 }
 0x724   :  { %10873 = vmatprep.mubr.bf16.mxu0 %v19432_v51  ;;  %11067 = vmatpush1.bf16.msra.mxu1 %v14466_v43  ;;  %v14477_v51 = vld [vmem:[%s19392_s3 + $0x34] ss:$8 sps:$4 sm:$0xff]  }
 0x725   :  { %11098 = vmatprep.mubr.bf16.mxu1 %v16965_v17  ;;  %10843 = vmatprep.subr.bf16.mxu0 %v14471_v61  ;;  %v14549_v43 = vld [vmem:[%s19392_s3 + $0x1b4] ss:$8 sps:$4 sm:$0xff]  }
 0x726   :  { %11068 = vmatprep.subr.bf16.mxu1 %v14471_v61  ;;  %v14547_v61 = vld [vmem:[%s19392_s3 + $0x1b0] ss:$8 sps:$4 sm:$0xff]  }
 0x727   :  { %10844 = vmatpush1.bf16.msra.mxu0 %v14469_v31 }
 0x728   :  { %11069 = vmatpush1.bf16.msra.mxu1 %v14469_v31  ;;  %10845 = vmatprep.subr.bf16.mxu0 %v14474_v21  ;;  %v14552_v31 = vld [vmem:[%s19392_s3 + $0x1c4] ss:$8 sps:$4 sm:$0xff]  }
 0x729   :  { %11070 = vmatprep.subr.bf16.mxu1 %v14474_v21  ;;  %v14550_v21 = vld [vmem:[%s19392_s3 + $0x1c0] ss:$8 sps:$4 sm:$0xff]  }
 0x72b   :  { %10846 = vmatpush1.bf16.msra.mxu0 %v14472_v44 }
 0x72c   :  { %11071 = vmatpush1.bf16.msra.mxu1 %v14472_v44  ;;  %10847 = vmatprep.subr.bf16.mxu0 %v14477_v51  ;;  %v14555_v44 = vld [vmem:[%s19392_s3 + $0x1d4] ss:$8 sps:$4 sm:$0xff]  }
 0x72d   :  { %11072 = vmatprep.subr.bf16.mxu1 %v14477_v51  ;;  %v14553_v51 = vld [vmem:[%s19392_s3 + $0x1d0] ss:$8 sps:$4 sm:$0xff]  }
 0x72f   :  { %10848 = vmatpush1.bf16.msra.mxu0 %v14475_v0 }
 0x730   :  { %11073 = vmatpush1.bf16.msra.mxu1 %v14475_v0  ;;  %10849 = vmatprep.subr.bf16.mxu0 %v14480_v56  ;;  %v14558_v0 = vld [vmem:[%s19392_s3 + $0x1e4] ss:$8 sps:$4 sm:$0xff]  }
 0x731   :  { %11074 = vmatprep.subr.bf16.mxu1 %v14480_v56  ;;  %v14556_v56 = vld [vmem:[%s19392_s3 + $0x1e0] ss:$8 sps:$4 sm:$0xff]  }
 0x733   :  { %10850 = vmatpush1.bf16.msra.mxu0 %v14478_v42 }
 0x734   :  { %11075 = vmatpush1.bf16.msra.mxu1 %v14478_v42  ;;  %10851 = vmatprep.subr.bf16.mxu0 %v14483_v62  ;;  %v14561_v42 = vld [vmem:[%s19392_s3 + $0x1f4] ss:$8 sps:$4 sm:$0xff]  }
 0x735   :  { %11076 = vmatprep.subr.bf16.mxu1 %v14483_v62  ;;  %v14559_v62 = vld [vmem:[%s19392_s3 + $0x1f0] ss:$8 sps:$4 sm:$0xff]  }
 0x737   :  { %10852 = vmatpush1.bf16.msra.mxu0 %v14481_v55 }
 0x738   :  { %11077 = vmatpush1.bf16.msra.mxu1 %v14481_v55  ;;  %10853 = vmatprep.subr.bf16.mxu0 %v14486_v28  ;;  %v14564_v55 = vld [vmem:[%s19392_s3 + $0x204] ss:$8 sps:$4 sm:$0xff]  }
 0x739   :  { %11078 = vmatprep.subr.bf16.mxu1 %v14486_v28  ;;  %v14562_v28 = vld [vmem:[%s19392_s3 + $0x200] ss:$8 sps:$4 sm:$0xff]  }
 0x73b   :  { %10854 = vmatpush1.bf16.msra.mxu0 %v14484_v35 }
 0x73c   :  { %11079 = vmatpush1.bf16.msra.mxu1 %v14484_v35  ;;  %10855 = vmatprep.subr.bf16.mxu0 %v14489_v6  ;;  %v14567_v35 = vld [vmem:[%s19392_s3 + $0x214] ss:$8 sps:$4 sm:$0xff]  }
 0x73d   :  { %11080 = vmatprep.subr.bf16.mxu1 %v14489_v6  ;;  %v14565_v6 = vld [vmem:[%s19392_s3 + $0x210] ss:$8 sps:$4 sm:$0xff]  }
 0x73f   :  { %10856 = vmatpush1.bf16.msra.mxu0 %v14487_v18 }
 0x740   :  { %11081 = vmatpush1.bf16.msra.mxu1 %v14487_v18  ;;  %10857 = vmatprep.subr.bf16.mxu0 %v14492_v7  ;;  %v14570_v18 = vld [vmem:[%s19392_s3 + $0x224] ss:$8 sps:$4 sm:$0xff]  }
 0x741   :  { %11082 = vmatprep.subr.bf16.mxu1 %v14492_v7  ;;  %v14571_v7 = vld [vmem:[%s19392_s3 + $0x230] ss:$8 sps:$4 sm:$0xff]  }
 0x743   :  { %10858 = vmatpush1.bf16.msra.mxu0 %v14490_v26 }
 0x744   :  { %11083 = vmatpush1.bf16.msra.mxu1 %v14490_v26  ;;  %10859 = vmatprep.subr.bf16.mxu0 %v14495_v20  ;;  %v14576_v26 = vld [vmem:[%s19392_s3 + $0x244] ss:$8 sps:$4 sm:$0xff]  }
 0x745   :  { %11084 = vmatprep.subr.bf16.mxu1 %v14495_v20  ;;  %v14574_v20 = vld [vmem:[%s19392_s3 + $0x240] ss:$8 sps:$4 sm:$0xff]  }
 0x747   :  { %10860 = vmatpush1.bf16.msra.mxu0 %v14493_v47 }
 0x748   :  { %11085 = vmatpush1.bf16.msra.mxu1 %v14493_v47  ;;  %10861 = vmatprep.subr.bf16.mxu0 %v14498_v25  ;;  %v14579_v47 = vld [vmem:[%s19392_s3 + $0x254] ss:$8 sps:$4 sm:$0xff]  }
 0x749   :  { %11086 = vmatprep.subr.bf16.mxu1 %v14498_v25  ;;  %v14577_v25 = vld [vmem:[%s19392_s3 + $0x250] ss:$8 sps:$4 sm:$0xff]  }
 0x74b   :  { %10862 = vmatpush1.bf16.msra.mxu0 %v14496_v22 }
 0x74c   :  { %11087 = vmatpush1.bf16.msra.mxu1 %v14496_v22  ;;  %10863 = vmatprep.subr.bf16.mxu0 %v14501_v53  ;;  %v14582_v22 = vld [vmem:[%s19392_s3 + $0x264] ss:$8 sps:$4 sm:$0xff]  }
 0x74d   :  { %11088 = vmatprep.subr.bf16.mxu1 %v14501_v53  ;;  %v14580_v53 = vld [vmem:[%s19392_s3 + $0x260] ss:$8 sps:$4 sm:$0xff]  }
 0x74f   :  { %10864 = vmatpush1.bf16.msra.mxu0 %v14499_v57 }
 0x750   :  { %11089 = vmatpush1.bf16.msra.mxu1 %v14499_v57  ;;  %10865 = vmatprep.subr.bf16.mxu0 %v14504_v45  ;;  %v14585_v57 = vld [vmem:[%s19392_s3 + $0x274] ss:$8 sps:$4 sm:$0xff]  }
 0x751   :  { %11090 = vmatprep.subr.bf16.mxu1 %v14504_v45  ;;  %v14583_v45 = vld [vmem:[%s19392_s3 + $0x270] ss:$8 sps:$4 sm:$0xff]  }
 0x753   :  { %10866 = vmatpush1.bf16.msra.mxu0 %v14502_v58 }
 0x754   :  { %11091 = vmatpush1.bf16.msra.mxu1 %v14502_v58  ;;  %10867 = vmatprep.subr.bf16.mxu0 %v14507_v63  ;;  %v14588_v58 = vld [vmem:[%s19392_s3 + $0x284] ss:$8 sps:$4 sm:$0xff]  }
 0x755   :  { %11092 = vmatprep.subr.bf16.mxu1 %v14507_v63  ;;  %v14586_v63 = vld [vmem:[%s19392_s3 + $0x280] ss:$8 sps:$4 sm:$0xff]  }
 0x757   :  { %10868 = vmatpush1.bf16.msra.mxu0 %v14505_v11 }
 0x758   :  { %11093 = vmatpush1.bf16.msra.mxu1 %v14505_v11  ;;  %10869 = vmatprep.subr.bf16.mxu0 %v14510_v39  ;;  %v14591_v11 = vld [vmem:[%s19392_s3 + $0x294] ss:$8 sps:$4 sm:$0xff]  }
 0x759   :  { %11094 = vmatprep.subr.bf16.mxu1 %v14510_v39  ;;  %v14589_v39 = vld [vmem:[%s19392_s3 + $0x290] ss:$8 sps:$4 sm:$0xff]  }
 0x75b   :  { %10870 = vmatpush1.bf16.msra.mxu0 %v14508_v41 }
 0x75c   :  { %11095 = vmatpush1.bf16.msra.mxu1 %v14508_v41  ;;  %10871 = vmatprep.subr.bf16.mxu0 %v14513_v3  ;;  %v14594_v41 = vld [vmem:[%s19392_s3 + $0x2a4] ss:$8 sps:$4 sm:$0xff]  }
 0x75d   :  { %11096 = vmatprep.subr.bf16.mxu1 %v14513_v3  ;;  %v14592_v3 = vld [vmem:[%s19392_s3 + $0x2a0] ss:$8 sps:$4 sm:$0xff]  }
 0x75f   :  { %10872 = vmatpush1.bf16.msra.mxu0 %v14511_v12 }
 0x760   :  { %11097 = vmatpush1.bf16.msra.mxu1 %v14511_v12  ;;  %10884 = vmatprep.subr.bf16.mxu0 %v14516_v14  ;;  %v14597_v12 = vld [vmem:[%s19392_s3 + $0x2b4] ss:$8 sps:$4 sm:$0xff]  }
 0x761   :  { %11109 = vmatprep.subr.bf16.mxu1 %v14516_v14  ;;  %v14595_v14 = vld [vmem:[%s19392_s3 + $0x2b0] ss:$8 sps:$4 sm:$0xff]  }
 0x762   :  { %10874 = vmatmul.mubr.bf16.vlgmr.msra.gmra.mrb[108].mxu0 %v19433_v1  ;;  %v14520_v1 = vld [vmem:[%s19392_s3 + $0x120] ss:$8 sps:$4 sm:$0xff]  }
 0x763   :  { %11099 = vmatmul.mubr.bf16.vlgmr.msra.gmra.mrb[108].mxu1 %v16961_v38  ;;  %10885 = vmatpush1.bf16.msra.mxu0 %v14514_v50 }
 0x764   :  { %10916 = vmatprep.mubr.bf16.mxu0 %v16965_v17  ;;  %11110 = vmatpush1.bf16.msra.mxu1 %v14514_v50  ;;  %v14525_v17 = vld [vmem:[%s19392_s3 + $0x134] ss:$8 sps:$4 sm:$0xff]   ;;  %v14600_v50 = vld [vmem:[%s19392_s3 + $0x2c4] ss:$8 sps:$4 sm:$0xff]  }
 0x765   :  { %11141 = vmatprep.mubr.bf16.mxu1 %v17110_v29  ;;  %10886 = vmatprep.subr.bf16.mxu0 %v14519_v5 }
 0x766   :  { %11111 = vmatprep.subr.bf16.mxu1 %v14519_v5  ;;  %v14598_v5 = vld [vmem:[%s19392_s3 + $0x2c0] ss:$8 sps:$4 sm:$0xff]  }
 0x767   :  { %10887 = vmatpush1.bf16.msra.mxu0 %v14517_v8 }
 0x768   :  { %11112 = vmatpush1.bf16.msra.mxu1 %v14517_v8  ;;  %10888 = vmatprep.subr.bf16.mxu0 %v14522_v27  ;;  %v14603_v8 = vld [vmem:[%s19392_s3 + $0x2d4] ss:$8 sps:$4 sm:$0xff]  }
 0x769   :  { %11113 = vmatprep.subr.bf16.mxu1 %v14522_v27  ;;  %v14601_v27 = vld [vmem:[%s19392_s3 + $0x2d0] ss:$8 sps:$4 sm:$0xff]  }
 0x76b   :  { %10889 = vmatpush1.bf16.msra.mxu0 %v14520_v1 }
 0x76c   :  { %11114 = vmatpush1.bf16.msra.mxu1 %v14520_v1  ;;  %10890 = vmatprep.subr.bf16.mxu0 %v14525_v17  ;;  %v14606_v1 = vld [vmem:[%s19392_s3 + $0x2e4] ss:$8 sps:$4 sm:$0xff]  }
 0x76d   :  { %11115 = vmatprep.subr.bf16.mxu1 %v14525_v17  ;;  %v14604_v17 = vld [vmem:[%s19392_s3 + $0x2e0] ss:$8 sps:$4 sm:$0xff]  }
 0x76f   :  { %10891 = vmatpush1.bf16.msra.mxu0 %v14523_v15 }
 0x770   :  { %11116 = vmatpush1.bf16.msra.mxu1 %v14523_v15  ;;  %10892 = vmatprep.subr.bf16.mxu0 %v14528_v46  ;;  %v14609_v15 = vld [vmem:[%s19392_s3 + $0x2f4] ss:$8 sps:$4 sm:$0xff]  }
 0x771   :  { %11117 = vmatprep.subr.bf16.mxu1 %v14528_v46  ;;  %v14607_v46 = vld [vmem:[%s19392_s3 + $0x2f0] ss:$8 sps:$4 sm:$0xff]  }
 0x773   :  { %10893 = vmatpush1.bf16.msra.mxu0 %v14526_v23 }
 0x774   :  { %11118 = vmatpush1.bf16.msra.mxu1 %v14526_v23  ;;  %10894 = vmatprep.subr.bf16.mxu0 %v14531_v54  ;;  %v14612_v23 = vld [vmem:[%s19392_s3 + $0x304] ss:$8 sps:$4 sm:$0xff]  }
 0x775   :  { %11119 = vmatprep.subr.bf16.mxu1 %v14531_v54  ;;  %v14610_v54 = vld [vmem:[%s19392_s3 + $0x300] ss:$8 sps:$4 sm:$0xff]  }
 0x777   :  { %10895 = vmatpush1.bf16.msra.mxu0 %v14529_v16 }
 0x778   :  { %11120 = vmatpush1.bf16.msra.mxu1 %v14529_v16  ;;  %10896 = vmatprep.subr.bf16.mxu0 %v14534_v32  ;;  %v14615_v16 = vld [vmem:[%s19392_s3 + $0x314] ss:$8 sps:$4 sm:$0xff]  }
 0x779   :  { %11121 = vmatprep.subr.bf16.mxu1 %v14534_v32  ;;  %v14613_v32 = vld [vmem:[%s19392_s3 + $0x310] ss:$8 sps:$4 sm:$0xff]  }
 0x77b   :  { %10897 = vmatpush1.bf16.msra.mxu0 %v14532_v52 }
 0x77c   :  { %11122 = vmatpush1.bf16.msra.mxu1 %v14532_v52  ;;  %10898 = vmatprep.subr.bf16.mxu0 %v14537_v49  ;;  %v14618_v52 = vld [vmem:[%s19392_s3 + $0x324] ss:$8 sps:$4 sm:$0xff]  }
 0x77d   :  { %11123 = vmatprep.subr.bf16.mxu1 %v14537_v49  ;;  %v14619_v49 = vld [vmem:[%s19392_s3 + $0x330] ss:$8 sps:$4 sm:$0xff]  }
 0x77f   :  { %10899 = vmatpush1.bf16.msra.mxu0 %v14535_v40 }
 0x780   :  { %11124 = vmatpush1.bf16.msra.mxu1 %v14535_v40  ;;  %10900 = vmatprep.subr.bf16.mxu0 %v14540_v60  ;;  %v14624_v40 = vld [vmem:[%s19392_s3 + $0x344] ss:$8 sps:$4 sm:$0xff]  }
 0x781   :  { %11125 = vmatprep.subr.bf16.mxu1 %v14540_v60  ;;  %v14622_v60 = vld [vmem:[%s19392_s3 + $0x340] ss:$8 sps:$4 sm:$0xff]  }
 0x783   :  { %10901 = vmatpush1.bf16.msra.mxu0 %v14538_v59 }
 0x784   :  { %11126 = vmatpush1.bf16.msra.mxu1 %v14538_v59  ;;  %10902 = vmatprep.subr.bf16.mxu0 %v14543_v9  ;;  %v14627_v59 = vld [vmem:[%s19392_s3 + $0x354] ss:$8 sps:$4 sm:$0xff]  }
 0x785   :  { %11127 = vmatprep.subr.bf16.mxu1 %v14543_v9  ;;  %v14625_v9 = vld [vmem:[%s19392_s3 + $0x350] ss:$8 sps:$4 sm:$0xff]  }
 0x787   :  { %10903 = vmatpush1.bf16.msra.mxu0 %v14541_v10 }
 0x788   :  { %11128 = vmatpush1.bf16.msra.mxu1 %v14541_v10  ;;  %10904 = vmatprep.subr.bf16.mxu0 %v14546_v37  ;;  %v14630_v10 = vld [vmem:[%s19392_s3 + $0x364] ss:$8 sps:$4 sm:$0xff]  }
 0x789   :  { %11129 = vmatprep.subr.bf16.mxu1 %v14546_v37 }
 0x78b   :  { %10905 = vmatpush1.bf16.msra.mxu0 %v14544_v33 }
 0x78c   :  { %11130 = vmatpush1.bf16.msra.mxu1 %v14544_v33  ;;  %10906 = vmatprep.subr.bf16.mxu0 %v14549_v43 }
 0x78d   :  { %11131 = vmatprep.subr.bf16.mxu1 %v14549_v43 }
 0x78f   :  { %10907 = vmatpush1.bf16.msra.mxu0 %v14547_v61 }
 0x790   :  { %11132 = vmatpush1.bf16.msra.mxu1 %v14547_v61  ;;  %10908 = vmatprep.subr.bf16.mxu0 %v14552_v31 }
 0x791   :  { %11133 = vmatprep.subr.bf16.mxu1 %v14552_v31 }
 0x793   :  { %10909 = vmatpush1.bf16.msra.mxu0 %v14550_v21 }
 0x794   :  { %11134 = vmatpush1.bf16.msra.mxu1 %v14550_v21  ;;  %10910 = vmatprep.subr.bf16.mxu0 %v14555_v44  ;;  %v19042_v21 = vld [vmem:[%s19393_s4] ss:$0 sm:$0xff] }
 0x795   :  { %11135 = vmatprep.subr.bf16.mxu1 %v14555_v44 }
 0x797   :  { %10911 = vmatpush1.bf16.msra.mxu0 %v14553_v51 }
 0x798   :  { %11136 = vmatpush1.bf16.msra.mxu1 %v14553_v51  ;;  %10912 = vmatprep.subr.bf16.mxu0 %v14558_v0  ;;  %v14628_v51 = vld [vmem:[%s19392_s3 + $0x360] ss:$8 sps:$4 sm:$0xff]  }
 0x799   :  { %11137 = vmatprep.subr.bf16.mxu1 %v14558_v0 }
 0x79b   :  { %10913 = vmatpush1.bf16.msra.mxu0 %v14556_v56 }
 0x79c   :  { %11138 = vmatpush1.bf16.msra.mxu1 %v14556_v56  ;;  %10914 = vmatprep.subr.bf16.mxu0 %v14561_v42 }
 0x79d   :  { %11139 = vmatprep.subr.bf16.mxu1 %v14561_v42 }
 0x79f   :  { %10915 = vmatpush1.bf16.msra.mxu0 %v14559_v62 }
 0x7a0   :  { %11140 = vmatpush1.bf16.msra.mxu1 %v14559_v62  ;;  %10927 = vmatprep.subr.bf16.mxu0 %v14564_v55  ;;  %v14633_v62 = vld [vmem:[%s19392_s3 + $0x374] ss:$8 sps:$4 sm:$0xff]  }
 0x7a1   :  { %11152 = vmatprep.subr.bf16.mxu1 %v14564_v55 }
 0x7a2   :  { %10917 = vmatmul.mubr.bf16.vlgmr.msra.gmra.mrb[108].mxu0 %v16961_v38  ;;  %v14568_v38 = vld [vmem:[%s19392_s3 + $0x220] ss:$8 sps:$4 sm:$0xff]  }
 0x7a3   :  { %11142 = vmatmul.mubr.bf16.vlgmr.msra.gmra.mrb[108].mxu1 %v17105_v36  ;;  %10928 = vmatpush1.bf16.msra.mxu0 %v14562_v28 }
 0x7a4   :  { %10959 = vmatprep.mubr.bf16.mxu0 %v17110_v29  ;;  %11153 = vmatpush1.bf16.msra.mxu1 %v14562_v28  ;;  %v14573_v29 = vld [vmem:[%s19392_s3 + $0x234] ss:$8 sps:$4 sm:$0xff]  }
 0x7a5   :  { %11184 = vmatprep.mubr.bf16.mxu1 %v17258_v34  ;;  %10929 = vmatprep.subr.bf16.mxu0 %v14567_v35 }
 0x7a6   :  { %11154 = vmatprep.subr.bf16.mxu1 %v14567_v35 }
 0x7a7   :  { %10930 = vmatpush1.bf16.msra.mxu0 %v14565_v6 }
 0x7a8   :  { %11155 = vmatpush1.bf16.msra.mxu1 %v14565_v6  ;;  %10931 = vmatprep.subr.bf16.mxu0 %v14570_v18 }
 0x7a9   :  { %11156 = vmatprep.subr.bf16.mxu1 %v14570_v18  ;;  %v14631_v18 = vld [vmem:[%s19392_s3 + $0x370] ss:$8 sps:$4 sm:$0xff]  }
 0x7ab   :  { %10932 = vmatpush1.bf16.msra.mxu0 %v14568_v38 }
 0x7ac   :  { %11157 = vmatpush1.bf16.msra.mxu1 %v14568_v38  ;;  %10933 = vmatprep.subr.bf16.mxu0 %v14573_v29 }
 0x7ad   :  { %11158 = vmatprep.subr.bf16.mxu1 %v14573_v29 }
 0x7af   :  { %10934 = vmatpush1.bf16.msra.mxu0 %v14571_v7 }
 0x7b0   :  { %11159 = vmatpush1.bf16.msra.mxu1 %v14571_v7  ;;  %10935 = vmatprep.subr.bf16.mxu0 %v14576_v26  ;;  %v14636_v7 = vld [vmem:[%s19392_s3 + $0x384] ss:$8 sps:$4 sm:$0xff]  }
 0x7b1   :  { %11160 = vmatprep.subr.bf16.mxu1 %v14576_v26 }
 0x7b3   :  { %10936 = vmatpush1.bf16.msra.mxu0 %v14574_v20 }
 0x7b4   :  { %11161 = vmatpush1.bf16.msra.mxu1 %v14574_v20  ;;  %10937 = vmatprep.subr.bf16.mxu0 %v14579_v47  ;;  %v14634_v20 = vld [vmem:[%s19392_s3 + $0x380] ss:$8 sps:$4 sm:$0xff]  }
 0x7b5   :  { %11162 = vmatprep.subr.bf16.mxu1 %v14579_v47 }
 0x7b7   :  { %10938 = vmatpush1.bf16.msra.mxu0 %v14577_v25 }
 0x7b8   :  { %11163 = vmatpush1.bf16.msra.mxu1 %v14577_v25  ;;  %10939 = vmatprep.subr.bf16.mxu0 %v14582_v22 }
 0x7b9   :  { %11164 = vmatprep.subr.bf16.mxu1 %v14582_v22  ;;  %v14639_v22 = vld [vmem:[%s19392_s3 + $0x394] ss:$8 sps:$4 sm:$0xff]  }
 0x7bb   :  { %10940 = vmatpush1.bf16.msra.mxu0 %v14580_v53 }
 0x7bc   :  { %11165 = vmatpush1.bf16.msra.mxu1 %v14580_v53  ;;  %10941 = vmatprep.subr.bf16.mxu0 %v14585_v57 }
 0x7bd   :  { %11166 = vmatprep.subr.bf16.mxu1 %v14585_v57  ;;  %v14637_v57 = vld [vmem:[%s19392_s3 + $0x390] ss:$8 sps:$4 sm:$0xff]  }
 0x7bf   :  { %10942 = vmatpush1.bf16.msra.mxu0 %v14583_v45 }
 0x7c0   :  { %11167 = vmatpush1.bf16.msra.mxu1 %v14583_v45  ;;  %10943 = vmatprep.subr.bf16.mxu0 %v14588_v58  ;;  %v14642_v45 = vld [vmem:[%s19392_s3 + $0x3a4] ss:$8 sps:$4 sm:$0xff]  }
 0x7c1   :  { %11168 = vmatprep.subr.bf16.mxu1 %v14588_v58  ;;  %v14640_v58 = vld [vmem:[%s19392_s3 + $0x3a0] ss:$8 sps:$4 sm:$0xff]  }
 0x7c3   :  { %10944 = vmatpush1.bf16.msra.mxu0 %v14586_v63 }
 0x7c4   :  { %11169 = vmatpush1.bf16.msra.mxu1 %v14586_v63  ;;  %10945 = vmatprep.subr.bf16.mxu0 %v14591_v11  ;;  %v14645_v63 = vld [vmem:[%s19392_s3 + $0x3b4] ss:$8 sps:$4 sm:$0xff]  }
 0x7c5   :  { %11170 = vmatprep.subr.bf16.mxu1 %v14591_v11  ;;  %v14643_v11 = vld [vmem:[%s19392_s3 + $0x3b0] ss:$8 sps:$4 sm:$0xff]  }
 0x7c7   :  { %10946 = vmatpush1.bf16.msra.mxu0 %v14589_v39 }
 0x7c8   :  { %11171 = vmatpush1.bf16.msra.mxu1 %v14589_v39  ;;  %10947 = vmatprep.subr.bf16.mxu0 %v14594_v41  ;;  %v14648_v39 = vld [vmem:[%s19392_s3 + $0x3c4] ss:$8 sps:$4 sm:$0xff]  }
 0x7c9   :  { %11172 = vmatprep.subr.bf16.mxu1 %v14594_v41  ;;  %v14646_v41 = vld [vmem:[%s19392_s3 + $0x3c0] ss:$8 sps:$4 sm:$0xff]  }
 0x7cb   :  { %10948 = vmatpush1.bf16.msra.mxu0 %v14592_v3 }
 0x7cc   :  { %11173 = vmatpush1.bf16.msra.mxu1 %v14592_v3  ;;  %10949 = vmatprep.subr.bf16.mxu0 %v14597_v12  ;;  %v14651_v3 = vld [vmem:[%s19392_s3 + $0x3d4] ss:$8 sps:$4 sm:$0xff]  }
 0x7cd   :  { %11174 = vmatprep.subr.bf16.mxu1 %v14597_v12  ;;  %v14649_v12 = vld [vmem:[%s19392_s3 + $0x3d0] ss:$8 sps:$4 sm:$0xff]  }
 0x7cf   :  { %10950 = vmatpush1.bf16.msra.mxu0 %v14595_v14 }
 0x7d0   :  { %11175 = vmatpush1.bf16.msra.mxu1 %v14595_v14  ;;  %10951 = vmatprep.subr.bf16.mxu0 %v14600_v50  ;;  %v14654_v14 = vld [vmem:[%s19392_s3 + $0x3e4] ss:$8 sps:$4 sm:$0xff]  }
 0x7d1   :  { %11176 = vmatprep.subr.bf16.mxu1 %v14600_v50  ;;  %v14652_v50 = vld [vmem:[%s19392_s3 + $0x3e0] ss:$8 sps:$4 sm:$0xff]  }
 0x7d3   :  { %10952 = vmatpush1.bf16.msra.mxu0 %v14598_v5 }
 0x7d4   :  { %11177 = vmatpush1.bf16.msra.mxu1 %v14598_v5  ;;  %10953 = vmatprep.subr.bf16.mxu0 %v14603_v8  ;;  %v14657_v5 = vld [vmem:[%s19392_s3 + $0x3f4] ss:$8 sps:$4 sm:$0xff]  }
 0x7d5   :  { %11178 = vmatprep.subr.bf16.mxu1 %v14603_v8  ;;  %v14655_v8 = vld [vmem:[%s19392_s3 + $0x3f0] ss:$8 sps:$4 sm:$0xff]  }
 0x7d7   :  { %10954 = vmatpush1.bf16.msra.mxu0 %v14601_v27 }
 0x7d8   :  { %11179 = vmatpush1.bf16.msra.mxu1 %v14601_v27  ;;  %10955 = vmatprep.subr.bf16.mxu0 %v14606_v1  ;;  %v14660_v27 = vld [vmem:[%s19392_s3 + $0x404] ss:$8 sps:$4 sm:$0xff]  }
 0x7d9   :  { %11180 = vmatprep.subr.bf16.mxu1 %v14606_v1  ;;  %v14658_v1 = vld [vmem:[%s19392_s3 + $0x400] ss:$8 sps:$4 sm:$0xff]  }
 0x7db   :  { %10956 = vmatpush1.bf16.msra.mxu0 %v14604_v17 }
 0x7dc   :  { %11181 = vmatpush1.bf16.msra.mxu1 %v14604_v17  ;;  %10957 = vmatprep.subr.bf16.mxu0 %v14609_v15  ;;  %v14663_v17 = vld [vmem:[%s19392_s3 + $0x414] ss:$8 sps:$4 sm:$0xff]  }
 0x7dd   :  { %11182 = vmatprep.subr.bf16.mxu1 %v14609_v15  ;;  %v14661_v15 = vld [vmem:[%s19392_s3 + $0x410] ss:$8 sps:$4 sm:$0xff]  }
 0x7df   :  { %10958 = vmatpush1.bf16.msra.mxu0 %v14607_v46 }
 0x7e0   :  { %11183 = vmatpush1.bf16.msra.mxu1 %v14607_v46  ;;  %10970 = vmatprep.subr.bf16.mxu0 %v14612_v23  ;;  %v14666_v46 = vld [vmem:[%s19392_s3 + $0x424] ss:$8 sps:$4 sm:$0xff]  }
 0x7e1   :  { %11195 = vmatprep.subr.bf16.mxu1 %v14612_v23  ;;  %v14667_v23 = vld [vmem:[%s19392_s3 + $0x430] ss:$8 sps:$4 sm:$0xff]  }
 0x7e2   :  { %10960 = vmatmul.mubr.bf16.vlgmr.msra.gmra.mrb[108].mxu0 %v17105_v36  ;;  %v14616_v36 = vld [vmem:[%s19392_s3 + $0x320] ss:$8 sps:$4 sm:$0xff]  }
 0x7e3   :  { %11185 = vmatmul.mubr.bf16.vlgmr.msra.gmra.mrb[108].mxu1 %v17250_v48  ;;  %10971 = vmatpush1.bf16.msra.mxu0 %v14610_v54 }
 0x7e4   :  { %11002 = vmatprep.mubr.bf16.mxu0 %v17258_v34  ;;  %11196 = vmatpush1.bf16.msra.mxu1 %v14610_v54  ;;  %v14621_v34 = vld [vmem:[%s19392_s3 + $0x334] ss:$8 sps:$4 sm:$0xff]   ;;  %v14670_v54 = vld [vmem:[%s19392_s3 + $0x440] ss:$8 sps:$4 sm:$0xff]  }
 0x7e5   :  { %11227 = vmatprep.mubr.bf16.mxu1 %v17400_v4  ;;  %10972 = vmatprep.subr.bf16.mxu0 %v14615_v16 }
 0x7e6   :  { %11197 = vmatprep.subr.bf16.mxu1 %v14615_v16  ;;  %v14675_v16 = vld [vmem:[%s19392_s3 + $0x454] ss:$8 sps:$4 sm:$0xff]  }
 0x7e7   :  { %10973 = vmatpush1.bf16.msra.mxu0 %v14613_v32 }
 0x7e8   :  { %11198 = vmatpush1.bf16.msra.mxu1 %v14613_v32  ;;  %10974 = vmatprep.subr.bf16.mxu0 %v14618_v52  ;;  %v14673_v32 = vld [vmem:[%s19392_s3 + $0x450] ss:$8 sps:$4 sm:$0xff]  }
 0x7e9   :  { %11199 = vmatprep.subr.bf16.mxu1 %v14618_v52  ;;  %v14678_v52 = vld [vmem:[%s19392_s3 + $0x464] ss:$8 sps:$4 sm:$0xff]  }
 0x7eb   :  { %10975 = vmatpush1.bf16.msra.mxu0 %v14616_v36 }
 0x7ec   :  { %11200 = vmatpush1.bf16.msra.mxu1 %v14616_v36  ;;  %10976 = vmatprep.subr.bf16.mxu0 %v14621_v34  ;;  %v14676_v36 = vld [vmem:[%s19392_s3 + $0x460] ss:$8 sps:$4 sm:$0xff]  }
 0x7ed   :  { %11201 = vmatprep.subr.bf16.mxu1 %v14621_v34  ;;  %v14681_v34 = vld [vmem:[%s19392_s3 + $0x474] ss:$8 sps:$4 sm:$0xff]  }
 0x7ef   :  { %10977 = vmatpush1.bf16.msra.mxu0 %v14619_v49 }
 0x7f0   :  { %11202 = vmatpush1.bf16.msra.mxu1 %v14619_v49  ;;  %10978 = vmatprep.subr.bf16.mxu0 %v14624_v40  ;;  %v14679_v49 = vld [vmem:[%s19392_s3 + $0x470] ss:$8 sps:$4 sm:$0xff]  }
 0x7f1   :  { %11203 = vmatprep.subr.bf16.mxu1 %v14624_v40  ;;  %v14684_v40 = vld [vmem:[%s19392_s3 + $0x484] ss:$8 sps:$4 sm:$0xff]  }
 0x7f3   :  { %10979 = vmatpush1.bf16.msra.mxu0 %v14622_v60 }
 0x7f4   :  { %11204 = vmatpush1.bf16.msra.mxu1 %v14622_v60  ;;  %10980 = vmatprep.subr.bf16.mxu0 %v14627_v59  ;;  %v14682_v60 = vld [vmem:[%s19392_s3 + $0x480] ss:$8 sps:$4 sm:$0xff]  }
 0x7f5   :  { %v9618_v37 = vpop.f32.mrb[104].mxu0  ;;  %11205 = vmatprep.subr.bf16.mxu1 %v14627_v59  ;;  %v14687_v59 = vld [vmem:[%s19392_s3 + $0x494] ss:$8 sps:$4 sm:$0xff]  }
 0x7f6   :  { %v9843_v33 = vpop.f32.mrb[104].mxu1  ;;  %v9620_v43 = vpop.f32.mrb[105].mxu0 }
 0x7f7   :  { %v9852_v61 = vmax.f32 %v9618_v37, %v9843_v33  ;;  %v9845_v31 = vpop.f32.mrb[105].mxu1  ;;  %v9622_v44 = vpop.f32.mrb[106].mxu0  ;;  %10981 = vmatpush1.bf16.msra.mxu0 %v14625_v9  ;;  %v14688_v37 = vld [vmem:[%s19392_s3 + $0x4a0] ss:$8 sps:$4 sm:$0xff]   ;;  %v14693_v33 = vld [vmem:[%s19392_s3 + $0x4b4] ss:$8 sps:$4 sm:$0xff]  }
 0x7f8   :  { %v9853_v0 = vmax.f32 %v9620_v43, %v9845_v31  ;;  %v9847_v56 = vpop.f32.mrb[106].mxu1  ;;  %11206 = vmatpush1.bf16.msra.mxu1 %v14625_v9  ;;  %v9624_v42 = vpop.f32.mrb[107].mxu0  ;;  %10982 = vmatprep.subr.bf16.mxu0 %v14630_v10  ;;  %v14685_v9 = vld [vmem:[%s19392_s3 + $0x490] ss:$8 sps:$4 sm:$0xff]   ;;  %v14694_v31 = vld [vmem:[%s19392_s3 + $0x4c0] ss:$8 sps:$4 sm:$0xff]  }
 0x7f9   :  { %v9854_v55 = vmax.f32 %v9622_v44, %v9847_v56  ;;  %v9849_v28 = vpop.f32.mrb[107].mxu1  ;;  %11207 = vmatprep.subr.bf16.mxu1 %v14630_v10  ;;  %v14690_v10 = vld [vmem:[%s19392_s3 + $0x4a4] ss:$8 sps:$4 sm:$0xff]   ;;  %v14691_v43 = vld [vmem:[%s19392_s3 + $0x4b0] ss:$8 sps:$4 sm:$0xff]  }
 0x7fa   :  { %v9856_v35 = vmax.f32 %v9852_v61, %v9853_v0  ;;  %v9855_v6 = vmax.f32 %v9624_v42, %v9849_v28  ;;  %v14696_v61 = vld [vmem:[%s19392_s3 + $0x4c4] ss:$8 sps:$4 sm:$0xff]   ;;  %v14699_v44 = vld [vmem:[%s19392_s3 + $0x4d4] ss:$8 sps:$4 sm:$0xff]   ;;  %v14700_v56 = vld [vmem:[%s19392_s3 + $0x4e0] ss:$8 sps:$4 sm:$0xff]  }
 0x7fb   :  { %10983 = vmatpush1.bf16.msra.mxu0 %v14628_v51  ;;  %v14702_v0 = vld [vmem:[%s19392_s3 + $0x4e4] ss:$8 sps:$4 sm:$0xff]   ;;  %v14705_v42 = vld [vmem:[%s19392_s3 + $0x4f4] ss:$8 sps:$4 sm:$0xff]  }
 0x7fc   :  { %v9865_v38 = vadd.f32 %v19042_v21, %v9856_v35  ;;  %v9857_v29 = vmax.f32 %v9854_v55, %v9855_v6  ;;  %11208 = vmatpush1.bf16.msra.mxu1 %v14628_v51  ;;  %10984 = vmatprep.subr.bf16.mxu0 %v14633_v62  ;;  %v14697_v51 = vld [vmem:[%s19392_s3 + $0x4d0] ss:$8 sps:$4 sm:$0xff]   ;;  %v14706_v55 = vld [vmem:[%s19394_s5 + $0x40] sm:$0xff]   ;;  %v14708_v6 = vld [vmem:[%s19394_s5 + $0x48] sm:$0xff]  }
 0x7fd   :  { %11209 = vmatprep.subr.bf16.mxu1 %v14633_v62  ;;  %v14703_v62 = vld [vmem:[%s19392_s3 + $0x4f0] ss:$8 sps:$4 sm:$0xff]   ;;  %v14722_v28 = vld [vmem:[%s19394_s5 + $0xc0] sm:$0xff]  }
 0x7fe   :  { %v9866_v26 = vadd.f32 %v19042_v21, %v9857_v29  ;;  %v9867_v47 = vmax.f32 %v9865_v38, 0.0  ;;  %v14707_v35 = vld [vmem:[%s19394_s5] sm:$0xff]   ;;  %v14724_v38 = vld [vmem:[%s19394_s5 + $0xc8] sm:$0xff]  }
 0x7ff   :  { %10985 = vmatpush1.bf16.msra.mxu0 %v14631_v18  ;;  %v14709_v29 = vld [vmem:[%s19394_s5 + $0x8] sm:$0xff]  }
 0x800   :  { %v9868_v25 = vmax.f32 %v9866_v26, 0.0  ;;  %11210 = vmatpush1.bf16.msra.mxu1 %v14631_v18  ;;  %10986 = vmatprep.subr.bf16.mxu0 %v14636_v7  ;;  %v14723_v18 = vld [vmem:[%s19394_s5 + $0x80] sm:$0xff]   ;;  %v14712_v26 = vld [vmem:[%s19394_s5 + $0x58] sm:$0xff]  }
 0x801   :  { %11211 = vmatprep.subr.bf16.mxu1 %v14636_v7  ;;  %v14710_v7 = vld [vmem:[%s19394_s5 + $0x50] sm:$0xff]  }
 0x802   :  { %v19064_v53 = vpack.c.bf16 %v9868_v25, %v9867_v47  ;;  %v14728_v47 = vld [vmem:[%s19394_s5 + $0xd8] sm:$0xff]  }
 0x803   :  { %10987 = vmatpush1.bf16.msra.mxu0 %v14634_v20  ;;  %v14713_v25 = vld [vmem:[%s19394_s5 + $0x18] sm:$0xff]  }
 0x804   :  { %11212 = vmatpush1.bf16.msra.mxu1 %v14634_v20  ;;  %10988 = vmatprep.subr.bf16.mxu0 %v14639_v22  ;;  %v14727_v20 = vld [vmem:[%s19394_s5 + $0x90] sm:$0xff]  }
 0x805   :  { %11213 = vmatprep.subr.bf16.mxu1 %v14639_v22  ;;  %v14714_v22 = vld [vmem:[%s19394_s5 + $0x60] sm:$0xff]  }
 0x807   :  { %10989 = vmatpush1.bf16.msra.mxu0 %v14637_v57 }
 0x808   :  { %11214 = vmatpush1.bf16.msra.mxu1 %v14637_v57  ;;  %10990 = vmatprep.subr.bf16.mxu0 %v14642_v45  ;;  %v14729_v57 = vld [vmem:[%s19394_s5 + $0x98] sm:$0xff]  }
 0x809   :  { %11215 = vmatprep.subr.bf16.mxu1 %v14642_v45  ;;  %v14730_v45 = vld [vmem:[%s19394_s5 + $0xe0] sm:$0xff]  }
 0x80b   :  { %10991 = vmatpush1.bf16.msra.mxu0 %v14640_v58 }
 0x80c   :  { %11216 = vmatpush1.bf16.msra.mxu1 %v14640_v58  ;;  %10992 = vmatprep.subr.bf16.mxu0 %v14645_v63  ;;  %v14715_v58 = vld [vmem:[%s19394_s5 + $0x20] sm:$0xff]  }
 0x80d   :  { %11217 = vmatprep.subr.bf16.mxu1 %v14645_v63  ;;  %v14716_v63 = vld [vmem:[%s19394_s5 + $0x68] sm:$0xff]  }
 0x80f   :  { %10993 = vmatpush1.bf16.msra.mxu0 %v14643_v11 }
 0x810   :  { %11218 = vmatpush1.bf16.msra.mxu1 %v14643_v11  ;;  %10994 = vmatprep.subr.bf16.mxu0 %v14648_v39  ;;  %v14717_v11 = vld [vmem:[%s19394_s5 + $0x28] sm:$0xff]  }
 0x811   :  { %11219 = vmatprep.subr.bf16.mxu1 %v14648_v39  ;;  %v14718_v39 = vld [vmem:[%s19394_s5 + $0x70] sm:$0xff]  }
 0x813   :  { %10995 = vmatpush1.bf16.msra.mxu0 %v14646_v41 }
 0x814   :  { %11220 = vmatpush1.bf16.msra.mxu1 %v14646_v41  ;;  %10996 = vmatprep.subr.bf16.mxu0 %v14651_v3  ;;  %v14719_v41 = vld [vmem:[%s19394_s5 + $0x30] sm:$0xff]  }
 0x815   :  { %11221 = vmatprep.subr.bf16.mxu1 %v14651_v3  ;;  %v14720_v3 = vld [vmem:[%s19394_s5 + $0x78] sm:$0xff]  }
 0x817   :  { %10997 = vmatpush1.bf16.msra.mxu0 %v14649_v12 }
 0x818   :  { %11222 = vmatpush1.bf16.msra.mxu1 %v14649_v12  ;;  %10998 = vmatprep.subr.bf16.mxu0 %v14654_v14  ;;  %v14721_v12 = vld [vmem:[%s19394_s5 + $0x38] sm:$0xff]  }
 0x819   :  { %11223 = vmatprep.subr.bf16.mxu1 %v14654_v14  ;;  %v14731_v14 = vld [vmem:[%s19394_s5 + $0xa0] sm:$0xff]  }
 0x81b   :  { %10999 = vmatpush1.bf16.msra.mxu0 %v14652_v50 }
 0x81c   :  { %11224 = vmatpush1.bf16.msra.mxu1 %v14652_v50  ;;  %11000 = vmatprep.subr.bf16.mxu0 %v14657_v5  ;;  %v14732_v50 = vld [vmem:[%s19394_s5 + $0xe8] sm:$0xff]  }
 0x81d   :  { %11225 = vmatprep.subr.bf16.mxu1 %v14657_v5  ;;  %v14733_v5 = vld [vmem:[%s19394_s5 + $0xa8] sm:$0xff]  }
 0x81f   :  { %11001 = vmatpush1.bf16.msra.mxu0 %v14655_v8 }
 0x820   :  { %11226 = vmatpush1.bf16.msra.mxu1 %v14655_v8  ;;  %11013 = vmatprep.subr.bf16.mxu0 %v14660_v27  ;;  %v14734_v8 = vld [vmem:[%s19394_s5 + $0xf0] sm:$0xff]  }
 0x821   :  { %11238 = vmatprep.subr.bf16.mxu1 %v14660_v27  ;;  %v14736_v27 = vld [vmem:[%s19394_s5 + $0xf8] sm:$0xff]  }
 0x822   :  { %11003 = vmatmul.mubr.bf16.vlgmr.msra.gmra.mrb[108].mxu0 %v17250_v48  ;;  %v14664_v48 = vld [vmem:[%s19392_s3 + $0x420] ss:$8 sps:$4 sm:$0xff]  }
 0x823   :  { %11228 = vmatmul.mubr.bf16.vlgmr.msra.gmra.mrb[108].mxu1 %v17395_v19  ;;  %11014 = vmatpush1.bf16.msra.mxu0 %v14658_v1 }
 0x824   :  { %11045 = vmatprep.mubr.bf16.mxu0 %v17400_v4  ;;  %11239 = vmatpush1.bf16.msra.mxu1 %v14658_v1  ;;  %v14669_v4 = vld [vmem:[%s19392_s3 + $0x434] ss:$8 sps:$4 sm:$0xff]  }
 0x825   :  { %11270 = vmatprep.mubr.bf16.mxu1 %v17545_v30  ;;  %11015 = vmatprep.subr.bf16.mxu0 %v14663_v17  ;;  %v14672_v30 = vld [vmem:[%s19392_s3 + $0x444] ss:$8 sps:$4 sm:$0xff]   ;;  %v14737_v1 = vld [vmem:[%s19394_s5 + $0xb8] sm:$0xff]  }
 0x826   :  { %11240 = vmatprep.subr.bf16.mxu1 %v14663_v17  ;;  %v14774_v17 = vmov 0.0  }
 0x827   :  { %11016 = vmatpush1.bf16.msra.mxu0 %v14661_v15 }
 0x828   :  { %11241 = vmatpush1.bf16.msra.mxu1 %v14661_v15  ;;  %11017 = vmatprep.subr.bf16.mxu0 %v14666_v46  ;;  %v14738_v15 = vld [vmem:[%s19395_s7] sm:$0xff]  }
 0x829   :  { %11242 = vmatprep.subr.bf16.mxu1 %v14666_v46  ;;  %v14739_v46 = vld [vmem:[%s19395_s7 + $0x8] sm:$0xff]  }
 0x82b   :  { %11018 = vmatpush1.bf16.msra.mxu0 %v14664_v48 }
 0x82c   :  { %11243 = vmatpush1.bf16.msra.mxu1 %v14664_v48  ;;  %11019 = vmatprep.subr.bf16.mxu0 %v14669_v4  ;;  %v14740_v48 = vld [vmem:[%s19395_s7 + $0x10] sm:$0xff]  }
 0x82d   :  { %11244 = vmatprep.subr.bf16.mxu1 %v14669_v4  ;;  %v14741_v4 = vld [vmem:[%s19395_s7 + $0x18] sm:$0xff]  }
 0x82f   :  { %11020 = vmatpush1.bf16.msra.mxu0 %v14667_v23 }
 0x830   :  { %11245 = vmatpush1.bf16.msra.mxu1 %v14667_v23  ;;  %11021 = vmatprep.subr.bf16.mxu0 %v14672_v30  ;;  %v14742_v23 = vld [vmem:[%s19395_s7 + $0x20] sm:$0xff]  }
 0x831   :  { %11246 = vmatprep.subr.bf16.mxu1 %v14672_v30 }
 0x833   :  { %11022 = vmatpush1.bf16.msra.mxu0 %v14670_v54 }
 0x834   :  { %11247 = vmatpush1.bf16.msra.mxu1 %v14670_v54  ;;  %11023 = vmatprep.subr.bf16.mxu0 %v14675_v16 }
 0x835   :  { %11248 = vmatprep.subr.bf16.mxu1 %v14675_v16 }
 0x837   :  { %11024 = vmatpush1.bf16.msra.mxu0 %v14673_v32 }
 0x838   :  { %11249 = vmatpush1.bf16.msra.mxu1 %v14673_v32  ;;  %11025 = vmatprep.subr.bf16.mxu0 %v14678_v52 }
 0x839   :  { %11250 = vmatprep.subr.bf16.mxu1 %v14678_v52 }
 0x83b   :  { %11026 = vmatpush1.bf16.msra.mxu0 %v14676_v36 }
 0x83c   :  { %11251 = vmatpush1.bf16.msra.mxu1 %v14676_v36  ;;  %11027 = vmatprep.subr.bf16.mxu0 %v14681_v34 }
 0x83d   :  { %11252 = vmatprep.subr.bf16.mxu1 %v14681_v34 }
 0x83f   :  { %11028 = vmatpush1.bf16.msra.mxu0 %v14679_v49 }
 0x840   :  { %11253 = vmatpush1.bf16.msra.mxu1 %v14679_v49  ;;  %11029 = vmatprep.subr.bf16.mxu0 %v14684_v40 }
 0x841   :  { %11254 = vmatprep.subr.bf16.mxu1 %v14684_v40 }
 0x843   :  { %11030 = vmatpush1.bf16.msra.mxu0 %v14682_v60 }
 0x844   :  { %11255 = vmatpush1.bf16.msra.mxu1 %v14682_v60  ;;  %11031 = vmatprep.subr.bf16.mxu0 %v14687_v59 }
 0x845   :  { %11256 = vmatprep.subr.bf16.mxu1 %v14687_v59 }
 0x847   :  { %11032 = vmatpush1.bf16.msra.mxu0 %v14685_v9 }
 0x848   :  { %11257 = vmatpush1.bf16.msra.mxu1 %v14685_v9  ;;  %11033 = vmatprep.subr.bf16.mxu0 %v14690_v10 }
 0x849   :  { %11258 = vmatprep.subr.bf16.mxu1 %v14690_v10 }
 0x84b   :  { %11034 = vmatpush1.bf16.msra.mxu0 %v14688_v37 }
 0x84c   :  { %11259 = vmatpush1.bf16.msra.mxu1 %v14688_v37  ;;  %11035 = vmatprep.subr.bf16.mxu0 %v14693_v33 }
 0x84d   :  { %11260 = vmatprep.subr.bf16.mxu1 %v14693_v33 }
 0x84f   :  { %11036 = vmatpush1.bf16.msra.mxu0 %v14691_v43 }
 0x850   :  { %11261 = vmatpush1.bf16.msra.mxu1 %v14691_v43  ;;  %11037 = vmatprep.subr.bf16.mxu0 %v14696_v61 }
 0x851   :  { %11262 = vmatprep.subr.bf16.mxu1 %v14696_v61 }
 0x853   :  { %11038 = vmatpush1.bf16.msra.mxu0 %v14694_v31 }
 0x854   :  { %11263 = vmatpush1.bf16.msra.mxu1 %v14694_v31  ;;  %11039 = vmatprep.subr.bf16.mxu0 %v14699_v44 }
 0x855   :  { %11264 = vmatprep.subr.bf16.mxu1 %v14699_v44 }
 0x857   :  { %11040 = vmatpush1.bf16.msra.mxu0 %v14697_v51 }
 0x858   :  { %11265 = vmatpush1.bf16.msra.mxu1 %v14697_v51  ;;  %11041 = vmatprep.subr.bf16.mxu0 %v14702_v0 }
 0x859   :  { %11266 = vmatprep.subr.bf16.mxu1 %v14702_v0 }
 0x85b   :  { %11042 = vmatpush1.bf16.msra.mxu0 %v14700_v56 }
 0x85c   :  { %11267 = vmatpush1.bf16.msra.mxu1 %v14700_v56  ;;  %11043 = vmatprep.subr.bf16.mxu0 %v14705_v42 }
 0x85d   :  { %11268 = vmatprep.subr.bf16.mxu1 %v14705_v42 }
 0x85f   :  { %11044 = vmatpush1.bf16.msra.mxu0 %v14703_v62 }
 0x860   :  { %11269 = vmatpush1.bf16.msra.mxu1 %v14703_v62  ;;  %13202 = vmatprep.subr.bf16.mxu0 %v14706_v55 }
 0x861   :  { %13224 = vmatprep.subr.bf16.mxu1 %v14722_v28  ;;  %v14743_v28 = vld [vmem:[%s19395_s7 + $0x28] sm:$0xff]  }
 0x862   :  { %11046 = vmatmul.mubr.bf16.vlgmr.msra.gmra.mrb[108].mxu0 %v17395_v19  ;;  %v14725_v19 = vld [vmem:[%s19394_s5 + $0x88] sm:$0xff]  }
 0x863   :  { %11271 = vmatmul.mubr.bf16.vlgmr.msra.gmra.mrb[108].mxu1 %v17540_v2  ;;  %13203 = vmatpush3.bf16.msra.mxu0 %v14707_v35  ;;  %v14726_v2 = vld [vmem:[%s19394_s5 + $0xd0] sm:$0xff]   ;;  %v14746_v35 = vld [vmem:[%s19396_s9] sm:$0xff]  }
 0x864   :  { %11599 = vmatprep.mubr.bf16.mxu0 %v18555_v13  ;;  %13204 = vmatprep.subr.bf16.mxu0 %v14708_v6  ;;  %v14711_v13 = vld [vmem:[%s19394_s5 + $0x10] sm:$0xff]   ;;  %v14747_v6 = vld [vmem:[%s19396_s9 + $0x8] sm:$0xff]  }
 0x865   :  { %13225 = vmatpush3.bf16.msra.mxu1 %v14723_v18  ;;  %v14748_v18 = vld [vmem:[%s19396_s9 + $0x10] sm:$0xff]  }
 0x866   :  { %13226 = vmatprep.subr.bf16.mxu1 %v14724_v38  ;;  %v14749_v38 = vld [vmem:[%s19396_s9 + $0x18] sm:$0xff]  }
 0x867   :  { %13205 = vmatpush3.bf16.msra.mxu0 %v14709_v29  ;;  %v14750_v29 = vld [vmem:[%s19396_s9 + $0x20] sm:$0xff]  }
 0x868   :  { %13206 = vmatprep.subr.bf16.mxu0 %v14710_v7  ;;  %v14751_v7 = vld [vmem:[%s19396_s9 + $0x28] sm:$0xff]  }
 0x869   :  { %13227 = vmatpush3.bf16.msra.mxu1 %v14725_v19  ;;  %v13151_v19 = vld [vmem:[%s19397_s6] ss:$0 sm:$0xff] }
 0x86a   :  { %13228 = vmatprep.subr.bf16.mxu1 %v14726_v2 }
 0x86b   :  { %13207 = vmatpush3.bf16.msra.mxu0 %v14711_v13 }
 0x86c   :  { %13208 = vmatprep.subr.bf16.mxu0 %v14712_v26 }
 0x86d   :  { %13229 = vmatpush3.bf16.msra.mxu1 %v14727_v20 }
 0x86e   :  { %13230 = vmatprep.subr.bf16.mxu1 %v14728_v47 }
 0x86f   :  { %13209 = vmatpush3.bf16.msra.mxu0 %v14713_v25 }
 0x870   :  { %13210 = vmatprep.subr.bf16.mxu0 %v14714_v22 }
 0x871   :  { %13231 = vmatpush3.bf16.msra.mxu1 %v14729_v57 }
 0x872   :  { %13232 = vmatprep.subr.bf16.mxu1 %v14730_v45 }
 0x873   :  { %13211 = vmatpush3.bf16.msra.mxu0 %v14715_v58 }
 0x874   :  { %13212 = vmatprep.subr.bf16.mxu0 %v14716_v63 }
 0x875   :  { %13233 = vmatpush3.bf16.msra.mxu1 %v14731_v14 }
 0x876   :  { %13234 = vmatprep.subr.bf16.mxu1 %v14732_v50 }
 0x877   :  { %13213 = vmatpush3.bf16.msra.mxu0 %v14717_v11 }
 0x878   :  { %13214 = vmatprep.subr.bf16.mxu0 %v14718_v39 }
 0x879   :  { %13235 = vmatpush3.bf16.msra.mxu1 %v14733_v5 }
 0x87a   :  { %13236 = vmatprep.subr.bf16.mxu1 %v14734_v8 }
 0x87b   :  { %13215 = vmatpush3.bf16.msra.mxu0 %v14719_v41  ;;  %v14752_v41 = vld [vmem:[%s19396_s9 + $0x30] sm:$0xff]  }
 0x87c   :  { %13216 = vmatprep.subr.bf16.mxu0 %v14720_v3  ;;  %v14753_v3 = vld [vmem:[%s19396_s9 + $0x38] sm:$0xff]  }
 0x87f   :  { %13217 = vmatpush3.bf16.msra.mxu0 %v14721_v12  ;;  %v13184_v12 = vld [vmem:[%s19398_s8] ss:$0 sm:$0xff] }
 0x880   :  { %13264 = vmatprep.subr.bf16.mxu0 %v14774_v17 }
 0x882   :  { %11600 = vmatmul.mubr.bf16.vlgmr.msra.gmra.mrb[112].mxu0 %v18050_v24  ;;  %v14735_v24 = vld [vmem:[%s19394_s5 + $0xb0] sm:$0xff]  }
 0x883   :  { %13237 = vmatpush3.bf16.msra.mxu1 %v14735_v24  ;;  %13265 = vmatpush3.bf16.msra.mxu0 %v14738_v15 }
 0x884   :  { %13238 = vmatprep.subr.bf16.mxu1 %v14736_v27  ;;  %13266 = vmatprep.subr.bf16.mxu0 %v14774_v17 }
 0x885   :  { %13280 = vmatprep.mubr.msk.bf16.mxu0 %vm14775_vm2, %v14774_v17 }
 0x887   :  { %13239 = vmatpush3.bf16.msra.mxu1 %v14737_v1  ;;  %13267 = vmatpush3.bf16.msra.mxu0 %v14739_v46 }
 0x888   :  { %13284 = vmatprep.subr.bf16.mxu1 %v14774_v17  ;;  %13268 = vmatprep.subr.bf16.mxu0 %v14774_v17 }
 0x88b   :  { %13269 = vmatpush3.bf16.msra.mxu0 %v14740_v48 }
 0x88c   :  { %13270 = vmatprep.subr.bf16.mxu0 %v14774_v17 }
 0x88f   :  { %13271 = vmatpush3.bf16.msra.mxu0 %v14741_v4 }
 0x890   :  { %13272 = vmatprep.subr.bf16.mxu0 %v14774_v17 }
 0x893   :  { %13273 = vmatpush3.bf16.msra.mxu0 %v14742_v23 }
 0x894   :  { %13274 = vmatprep.subr.bf16.mxu0 %v14774_v17 }
 0x897   :  { %13275 = vmatpush3.bf16.msra.mxu0 %v14743_v28 }
 0x898   :  { %13276 = vmatprep.subr.bf16.mxu0 %v14774_v17 }
 0x935   :  { %v11047_v30 = vpop.f32.mrb[108].mxu0 }
 0x936   :  { %v11272_v54 = vpop.f32.mrb[108].mxu1  ;;  %v11049_v16 = vpop.f32.mrb[109].mxu0 }
 0x937   :  { %v11281_v32 = vmax.f32 %v11047_v30, %v11272_v54  ;;  %v11274_v52 = vpop.f32.mrb[109].mxu1  ;;  %v11051_v36 = vpop.f32.mrb[110].mxu0 }
 0x938   :  { %v11282_v34 = vmax.f32 %v11049_v16, %v11274_v52  ;;  %v11276_v49 = vpop.f32.mrb[110].mxu1  ;;  %v11053_v40 = vpop.f32.mrb[111].mxu0 }
 0x939   :  { %v11283_v60 = vmax.f32 %v11051_v36, %v11276_v49  ;;  %v11278_v59 = vpop.f32.mrb[111].mxu1 }
 0x93a   :  { %v11285_v9 = vmax.f32 %v11281_v32, %v11282_v34  ;;  %v11284_v10 = vmax.f32 %v11053_v40, %v11278_v59 }
 0x93c   :  { %v11294_v37 = vadd.f32 %v19042_v21, %v11285_v9  ;;  %v11286_v33 = vmax.f32 %v11283_v60, %v11284_v10 }
 0x93e   :  { %v11295_v43 = vadd.f32 %v19042_v21, %v11286_v33  ;;  %v11296_v61 = vmax.f32 %v11294_v37, 0.0  ;;  %v14744_v21 = vld [vmem:[%s19395_s7 + $0x30] sm:$0xff]  }
 0x93f   :  { %13277 = vmatpush3.bf16.msra.mxu0 %v14744_v21 }
 0x940   :  { %v11297_v31 = vmax.f32 %v11295_v43, 0.0  ;;  %13278 = vmatprep.subr.bf16.mxu0 %v14774_v17 }
 0x942   :  { %v11298_v44 = vpack.c.bf16 %v11297_v31, %v11296_v61 }
 0x944   :  { %11640 = vmatprep.mubr.bf16.mxu1 %v11298_v44 }
 0x945   :  { %11641 = vmatmul.mubr.bf16.vlgmr.msra.gmra.mrb[112].mxu1 %v19064_v53  ;;  %v14745_v53 = vld [vmem:[%s19395_s7 + $0x38] sm:$0xff]  }
 0x946   :  { %13279 = vmatpush3.bf16.msra.mxu0 %v14745_v53  ;;  %13300 = vmatprep.mubr.msk.bf16.mxu1 %vm14775_vm2, %v14774_v17 }
 0x947   :  { %13285 = vmatpush3.bf16.msra.mxu1 %v14746_v35 }
 0x948   :  { %13286 = vmatprep.subr.bf16.mxu1 %v14774_v17 }
 0x94b   :  { %13287 = vmatpush3.bf16.msra.mxu1 %v14747_v6 }
 0x94c   :  { %13288 = vmatprep.subr.bf16.mxu1 %v14774_v17 }
 0x94f   :  { %13289 = vmatpush3.bf16.msra.mxu1 %v14748_v18 }
 0x950   :  { %13290 = vmatprep.subr.bf16.mxu1 %v14774_v17 }
 0x953   :  { %13291 = vmatpush3.bf16.msra.mxu1 %v14749_v38 }
 0x954   :  { %13292 = vmatprep.subr.bf16.mxu1 %v14774_v17 }
 0x955   :  { %v13218_v51 = vpop.f32.mrb[112].mxu0 }
 0x956   :  { %v13219_v0 = vpop.f32.mrb[113].mxu0 }
 0x957   :  { %v13220_v56 = vadd.f32 %v13219_v0, %v13218_v51  ;;  %v13221_v42 = vpop.f32.mrb[114].mxu0  ;;  %13293 = vmatpush3.bf16.msra.mxu1 %v14750_v29 }
 0x958   :  { %v13222_v62 = vpop.f32.mrb[115].mxu0  ;;  %13294 = vmatprep.subr.bf16.mxu1 %v14774_v17 }
 0x959   :  { %v13223_v55 = vadd.f32 %v13222_v62, %v13221_v42  ;;  %v11602_v26 = vadd.f32 %v13220_v56, %v13151_v19 }
 0x95b   :  { %13295 = vmatpush3.bf16.msra.mxu1 %v14751_v7  ;;  %v11605_v22 = vadd.f32 %v13223_v55, %v13151_v19 }
 0x95c   :  { %13296 = vmatprep.subr.bf16.mxu1 %v14774_v17 }
 0x95f   :  { %13297 = vmatpush3.bf16.msra.mxu1 %v14752_v41 }
 0x960   :  { %13298 = vmatprep.subr.bf16.mxu1 %v14774_v17  ;;  %v13193_v17 = vld [vmem:[%s19399_s10] ss:$0 sm:$0xff] }
 0x963   :  { %13299 = vmatpush3.bf16.msra.mxu1 %v14753_v3 }
 0xa18   :  { %v13240_v2 = vpop.f32.mrb[112].mxu1 }
 0xa19   :  { %v13241_v13 = vpop.f32.mrb[113].mxu1 }
 0xa1a   :  { %v13242_v20 = vadd.f32 %v13241_v13, %v13240_v2  ;;  %v13243_v47 = vpop.f32.mrb[114].mxu1 }
 0xa1b   :  { %v13244_v25 = vpop.f32.mrb[115].mxu1 }
 0xa1c   :  { %v11643_v57 = vadd.f32 %v13242_v20, %v11602_v26  ;;  %v13245_v45 = vadd.f32 %v13244_v25, %v13243_v47 }
 0xa1e   :  { %v11646_v58 = vadd.f32 %v13245_v45, %v11605_v22  ;;  %v11649_v63 = vmax.f32 %v11643_v57, 0.0 }
 0xa20   :  { %v11650_v11 = vmax.f32 %v11646_v58, 0.0 }
 0xa22   :  { %v11651_v39 = vpack.c.bf16 %v11650_v11, %v11649_v63 }
 0xa24   :  { %13281 = vmatmul.mubr.bf16.vlgmr.msra.gmra.mrb[116].mxu0 %v11651_v39 }
 0xaf7   :  { %v11757_v14 = vpop.f32.mrb[116].mxu0 }
 0xaf8   :  { %v11758_v50 = vadd.f32 %v13184_v12, %v11757_v14  ;;  %v13282_v5 = vpop.f32.mrb[117].mxu0 }
 0xaf9   :  { %v11760_v8 = vpop.f32.mrb[118].mxu0 }
 0xafa   :  { %v11761_v24 = vadd.f32 %v13184_v12, %v11760_v8  ;;  %v13283_v27 = vpop.f32.mrb[119].mxu0  ;;  %v11764_v1 = vmax.f32 %v11758_v50, 0.0 }
 0xafc   :  { %v11765_v15 = vmax.f32 %v11761_v24, 0.0 }
 0xafe   :  { %v11766_v46 = vpack.c.bf16 %v11765_v15, %v11764_v1 }
 0xb00   :  { %13301 = vmatmul.mubr.bf16.vlgmr.msra.gmra.mrb[116].mxu1 %v11766_v46 }
 0xbd3   :  { %v11872_v48 = vpop.f32.mrb[116].mxu1 }
 0xbd4   :  { %v11873_v4 = vadd.f32 %v13193_v17, %v11872_v48  ;;  %v13302_v23 = vpop.f32.mrb[117].mxu1 }
 0xbd5   :  { %v11875_v30 = vpop.f32.mrb[118].mxu1 }
 0xbd6   :  { %11879 = vst [vmem:[%s19400_s11] sm:$0xff] %v11873_v4  ;;  %v11876_v54 = vadd.f32 %v13193_v17, %v11875_v30  ;;  %v13303_v16 = vpop.f32.mrb[119].mxu1 }
 0xbd8   :  { %11880 = vst [vmem:[%s19400_s11 + $0x8] sm:$0xff] %v11876_v54 }

</bundles_post_ra>
